<compile_context>
chip_gen: v6e
topology: v6e:2x2x1
jax: 0.10.0
libtpu: 0.0.40
codegen_flags: <defaults>
</compile_context>

<pallas_src>
import functools

import jax
import jax.numpy as jnp
from jax.experimental import pallas as pl
from jax.experimental.pallas import tpu as pltpu

IMG_CHANNELS = 3
IMG_SIZE = 64          # feature_map == IMG_SIZE in the reference module


def _round_up(x, m):
    return (x + m - 1) // m * m


# ---------------------------------------------------------------------------
# Pallas kernel 1: tiled matmul, bf16 operands, f32 accumulation directly in
# the resident output block, fused activation epilogue.
# ---------------------------------------------------------------------------
def _matmul_fused_kernel(a_ref, b_ref, o_ref, *, mode, negative_slope):
    k = pl.program_id(2)

    @pl.when(k == 0)
    def _():
        o_ref[...] = jnp.zeros_like(o_ref)

    o_ref[...] += jnp.dot(a_ref[...], b_ref[...],
                          preferred_element_type=jnp.float32)

    if mode != "none":
        @pl.when(k == pl.num_programs(2) - 1)
        def _():
            acc = o_ref[...]
            if mode == "leaky":
                o_ref[...] = jnp.where(acc >= 0, acc, negative_slope * acc)
            elif mode == "sigmoid":
                o_ref[...] = jax.nn.sigmoid(acc)


def fused_matmul(a, b_pad, n_valid, *, mode="none", negative_slope=0.2):
    """(M,K) @ pre-padded bf16 (Kp,Np) with fused activation -> (M, n_valid) f32."""
    M, K = a.shape
    Kp, Np = b_pad.shape
    assert K <= Kp and Kp % 128 == 0 and Np % 128 == 0

    # Tile selection: aligned divisors, biggest useful sizes.
    tm = 256 if M >= 256 else _round_up(M, 16)
    Mp = _round_up(M, tm)
    tn = 256 if Np % 256 == 0 else 128
    tk = 512 if Kp % 512 == 0 else (256 if Kp % 256 == 0 else 128)

    a = a.astype(jnp.bfloat16)
    if (Mp, Kp) != (M, K):
        a = jnp.pad(a, ((0, Mp - M), (0, Kp - K)))

    grid = (Mp // tm, Np // tn, Kp // tk)

    out = pl.pallas_call(
        functools.partial(_matmul_fused_kernel, mode=mode,
                          negative_slope=negative_slope),
        out_shape=jax.ShapeDtypeStruct((Mp, Np), jnp.float32),
        grid_spec=pltpu.PrefetchScalarGridSpec(
            num_scalar_prefetch=0,
            grid=grid,
            in_specs=[pl.BlockSpec((tm, tk), lambda i, j, k: (i, k)),
                      pl.BlockSpec((tk, tn), lambda i, j, k: (k, j))],
            out_specs=pl.BlockSpec((tm, tn), lambda i, j, k: (i, j))),
        compiler_params=pltpu.CompilerParams(
            dimension_semantics=("parallel", "parallel", "arbitrary")),
    )(a, b_pad)
    return out[:M, :n_valid]


# ---------------------------------------------------------------------------
# Pallas kernels 2+3: BatchNorm (batch statistics) + LeakyReLU, tiled over M.
#   Pass 1: per-channel sum / sum-of-squares with resident (1,C) accumulators.
#   Pass 2: (x - mean) * scale + shift, LeakyReLU.
# ---------------------------------------------------------------------------
def _bn_stats_kernel(x_ref, sum_ref, sq_ref):
    @pl.when(pl.program_id(0) == 0)
    def _():
        sum_ref[...] = jnp.zeros_like(sum_ref)
        sq_ref[...] = jnp.zeros_like(sq_ref)

    x = x_ref[...]
    sum_ref[...] += jnp.sum(x, axis=0, keepdims=True)
    sq_ref[...] += jnp.sum(x * x, axis=0, keepdims=True)


def _bn_apply_kernel(x_ref, scale_ref, shift_ref, o_ref, *, negative_slope):
    y = x_ref[...] * scale_ref[...] + shift_ref[...]
    o_ref[...] = jnp.where(y >= 0, y, negative_slope * y)


def bn_leaky_relu(x_nhwc, gamma, beta, *, eps=1e-5, negative_slope=0.2):
    N, H, W, C = x_nhwc.shape
    M = N * H * W
    assert M % 8 == 0 and C % 128 == 0
    x2 = x_nhwc.reshape(M, C)

    tm = M
    for cand in (512, 256, 128, 64, 32, 16, 8):
        if M % cand == 0:
            tm = cand
            break
    grid = (M // tm,)

    s, sq = pl.pallas_call(
        _bn_stats_kernel,
        out_shape=(jax.ShapeDtypeStruct((1, C), jnp.float32),
                   jax.ShapeDtypeStruct((1, C), jnp.float32)),
        grid_spec=pltpu.PrefetchScalarGridSpec(
            num_scalar_prefetch=0,
            grid=grid,
            in_specs=[pl.BlockSpec((tm, C), lambda i: (i, 0))],
            out_specs=(pl.BlockSpec((1, C), lambda i: (0, 0)),
                       pl.BlockSpec((1, C), lambda i: (0, 0)))),
        compiler_params=pltpu.CompilerParams(
            dimension_semantics=("arbitrary",)),
    )(x2)

    mean = s / M
    var = jnp.maximum(sq / M - mean * mean, 0.0)  # biased var, as in PyTorch norm step
    scale = gamma.reshape(1, C).astype(jnp.float32) * jax.lax.rsqrt(var + eps)
    shift = beta.reshape(1, C).astype(jnp.float32) - mean * scale

    out = pl.pallas_call(
        functools.partial(_bn_apply_kernel, negative_slope=negative_slope),
        out_shape=jax.ShapeDtypeStruct((M, C), jnp.float32),
        grid_spec=pltpu.PrefetchScalarGridSpec(
            num_scalar_prefetch=0,
            grid=grid,
            in_specs=[pl.BlockSpec((tm, C), lambda i: (i, 0)),
                      pl.BlockSpec((1, C), lambda i: (0, 0)),
                      pl.BlockSpec((1, C), lambda i: (0, 0))],
            out_specs=pl.BlockSpec((tm, C), lambda i: (i, 0))),
        compiler_params=pltpu.CompilerParams(
            dimension_semantics=("parallel",)),
    )(x2, scale, shift)
    return out.reshape(N, H, W, C)


# ---------------------------------------------------------------------------
# Conv2d (no bias) via im2col (JAX layout glue, bf16) + Pallas fused matmul
# ---------------------------------------------------------------------------
def conv2d_fused(x_nhwc, w_mat_pad, cout, *, kh=4, kw=4, stride=2, pad=1,
                 mode="none"):
    N, H, W, Cin = x_nhwc.shape
    OH = (H + 2 * pad - kh) // stride + 1
    OW = (W + 2 * pad - kw) // stride + 1

    x = x_nhwc.astype(jnp.bfloat16)
    if pad:
        x = jnp.pad(x, ((0, 0), (pad, pad), (pad, pad), (0, 0)))
    cols = []
    for i in range(kh):
        for j in range(kw):
            cols.append(x[:, i:i + stride * OH:stride,
                          j:j + stride * OW:stride, :])
    a = jnp.concatenate(cols, axis=-1).reshape(N * OH * OW, kh * kw * Cin)

    y = fused_matmul(a, w_mat_pad, cout, mode=mode)
    return y.reshape(N, OH, OW, cout)


# ---------------------------------------------------------------------------
# Parameters
# ---------------------------------------------------------------------------
def init_params(key):
    fm = IMG_SIZE
    keys = jax.random.split(key, 5)
    std = 0.02  # DCGAN-style weight init, deterministic from PRNGKey
    params = {
        "w1": std * jax.random.normal(keys[0], (fm, IMG_CHANNELS, 4, 4), jnp.float32),
        "w2": std * jax.random.normal(keys[1], (fm * 2, fm, 4, 4), jnp.float32),
        "w3": std * jax.random.normal(keys[2], (fm * 4, fm * 2, 4, 4), jnp.float32),
        "w4": std * jax.random.normal(keys[3], (fm * 8, fm * 4, 4, 4), jnp.float32),
        "w5": std * jax.random.normal(keys[4], (1, fm * 8, 4, 4), jnp.float32),
        # BatchNorm affine params: PyTorch default init (gamma=1, beta=0)
        "g2": jnp.ones((fm * 2,), jnp.float32), "b2": jnp.zeros((fm * 2,), jnp.float32),
        "g3": jnp.ones((fm * 4,), jnp.float32), "b3": jnp.zeros((fm * 4,), jnp.float32),
        "g4": jnp.ones((fm * 8,), jnp.float32), "b4": jnp.zeros((fm * 8,), jnp.float32),
    }
    return params


def prepare_params(params):
    """One-time weight re-layout: OIHW -> (kh*kw*Cin, Cout) bf16, padded to
    multiples of 128 so the matmul kernel never re-pads the weight."""
    def to_mat(w):
        cout, cin, kh, kw = w.shape
        k = kh * kw * cin
        # (Cout,Cin,kh,kw) -> (kh,kw,Cin,Cout) -> (K, Cout), matching im2col order.
        b = jnp.transpose(w, (2, 3, 1, 0)).reshape(k, cout).astype(jnp.bfloat16)
        kp, np_ = _round_up(k, 128), _round_up(cout, 128)
        if (kp, np_) != (k, cout):
            b = jnp.pad(b, ((0, kp - k), (0, np_ - cout)))
        return b

    prepared = {"m%d" % i: to_mat(params["w%d" % i]) for i in range(1, 6)}
    for name in ("g2", "b2", "g3", "b3", "g4", "b4"):
        prepared[name] = params[name]
    return prepared


# ---------------------------------------------------------------------------
# Discriminator forward (NCHW in, NCHW out)
# ---------------------------------------------------------------------------
def discriminator_forward(x_nchw, p):
    fm = IMG_SIZE
    # PyTorch NCHW -> internal NHWC
    x = jnp.transpose(x_nchw, (0, 2, 3, 1)).astype(jnp.float32)

    # block 1: conv + LeakyReLU (fused into matmul epilogue)
    x = conv2d_fused(x, p["m1"], fm, stride=2, pad=1, mode="leaky")
    # block 2: conv -> BN(batch stats) + LeakyReLU
    x = conv2d_fused(x, p["m2"], fm * 2, stride=2, pad=1, mode="none")
    x = bn_leaky_relu(x, p["g2"], p["b2"])
    # block 3
    x = conv2d_fused(x, p["m3"], fm * 4, stride=2, pad=1, mode="none")
    x = bn_leaky_relu(x, p["g3"], p["b3"])
    # block 4
    x = conv2d_fused(x, p["m4"], fm * 8, stride=2, pad=1, mode="none")
    x = bn_leaky_relu(x, p["g4"], p["b4"])
    # block 5: conv (k4, s1, p0) + Sigmoid (fused)
    x = conv2d_fused(x, p["m5"], 1, stride=1, pad=0, mode="sigmoid")

    # back to NCHW: (N, 1, 1, 1)
    return jnp.transpose(x, (0, 3, 1, 2))


if __name__ == "__main__":
    key = jax.random.PRNGKey(0)
    pkey, xkey = jax.random.split(key)
    params = init_params(pkey)
    prepared = prepare_params(params)

    batch = 2
    x = jax.random.normal(xkey, (batch, IMG_CHANNELS, IMG_SIZE, IMG_SIZE),
                          jnp.float32)

    fwd = jax.jit(discriminator_forward)
    out = fwd(x, prepared)
    out = jax.block_until_ready(out)

    assert out.shape == (batch, 1, 1, 1), out.shape
    assert bool(jnp.all(jnp.isfinite(out)))
    assert bool(jnp.all((out >= 0.0) & (out <= 1.0)))  # sigmoid range
    print("KERNEL_OK")
</pallas_src>

<mosaic_0001>
module attributes {stable_mosaic.version = 11 : i64} {
  func.func @_matmul_fused_kernel(%arg0: i32, %arg1: i32, %arg2: i32, %arg3: memref<256x128xbf16, #tpu.memory_space<vmem>>, %arg4: memref<128x128xbf16, #tpu.memory_space<vmem>>, %arg5: memref<256x128xf32, #tpu.memory_space<vmem>>) attributes {dimension_semantics = [#tpu.dimension_semantics<parallel>, #tpu.dimension_semantics<parallel>, #tpu.dimension_semantics<arbitrary>], iteration_bounds = array<i64: 8, 1, 1>, scalar_prefetch = 0 : i64, scratch_operands = 0 : i64, tpu.core_type = #tpu.core_type<tc>, window_params = [{transform_indices = @transform_0, window_bounds = array<i64: 256, 128>}, {transform_indices = @transform_1, window_bounds = array<i64: 128, 128>}, {transform_indices = @transform_2, window_bounds = array<i64: 256, 128>}]} {
    %c0_i32 = arith.constant 0 : i32
    %0 = arith.cmpi eq, %arg2, %c0_i32 : i32
    %1 = arith.extui %0 : i1 to i32
    %c0_i32_0 = arith.constant 0 : i32
    %2 = arith.cmpi ne, %1, %c0_i32_0 : i32
    scf.if %2 {
      %cst_10 = arith.constant 0.000000e+00 : f32
      %12 = vector.broadcast %cst_10 : f32 to vector<256x128xf32>
      %c0_11 = arith.constant 0 : index
      %c0_12 = arith.constant 0 : index
      %13 = vector.load %arg5[%c0_11, %c0_12] : memref<256x128xf32, #tpu.memory_space<vmem>>, vector<256x128xf32>
      tpu.vector_store %arg5[%c0_11, %c0_12], %12 {strides = array<i32>} : memref<256x128xf32, #tpu.memory_space<vmem>>, vector<256x128xf32>,
    } else {
    }
    %c0 = arith.constant 0 : index
    %c0_1 = arith.constant 0 : index
    %3 = vector.load %arg5[%c0, %c0_1] : memref<256x128xf32, #tpu.memory_space<vmem>>, vector<256x128xf32>
    %c0_2 = arith.constant 0 : index
    %c0_3 = arith.constant 0 : index
    %4 = vector.load %arg3[%c0_2, %c0_3] : memref<256x128xbf16, #tpu.memory_space<vmem>>, vector<256x128xbf16>
    %c0_4 = arith.constant 0 : index
    %c0_5 = arith.constant 0 : index
    %5 = vector.load %arg4[%c0_4, %c0_5] : memref<128x128xbf16, #tpu.memory_space<vmem>>, vector<128x128xbf16>
    %cst = arith.constant dense<0.000000e+00> : vector<256x128xf32>
    %6 = tpu.matmul %4, %5, %cst {dimension_numbers = #tpu.dot_dimension_numbers<[1], [0], [0], [1], [0, 0, 1, 1], [], []>} : vector<256x128xbf16>, vector<128x128xbf16>, vector<256x128xf32> -> vector<256x128xf32>
    %7 = arith.addf %3, %6 : vector<256x128xf32>
    %c0_6 = arith.constant 0 : index
    %c0_7 = arith.constant 0 : index
    %8 = vector.load %arg5[%c0_6, %c0_7] : memref<256x128xf32, #tpu.memory_space<vmem>>, vector<256x128xf32>
    tpu.vector_store %arg5[%c0_6, %c0_7], %7 {strides = array<i32>} : memref<256x128xf32, #tpu.memory_space<vmem>>, vector<256x128xf32>,
    %c0_i32_8 = arith.constant 0 : i32
    %9 = arith.cmpi eq, %arg2, %c0_i32_8 : i32
    %10 = arith.extui %9 : i1 to i32
    %c0_i32_9 = arith.constant 0 : i32
    %11 = arith.cmpi ne, %10, %c0_i32_9 : i32
    scf.if %11 {
      %c0_10 = arith.constant 0 : index
      %c0_11 = arith.constant 0 : index
      %12 = vector.load %arg5[%c0_10, %c0_11] : memref<256x128xf32, #tpu.memory_space<vmem>>, vector<256x128xf32>
      %cst_12 = arith.constant 0.000000e+00 : f32
      %13 = vector.broadcast %cst_12 : f32 to vector<256x128xf32>
      %14 = arith.cmpf oge, %12, %13 : vector<256x128xf32>
      %cst_13 = arith.constant 2.000000e-01 : f32
      %15 = vector.broadcast %cst_13 : f32 to vector<256x128xf32>
      %16 = arith.mulf %15, %12 : vector<256x128xf32>
      %17 = arith.select %14, %12, %16 : vector<256x128xi1>, vector<256x128xf32>
      %c0_14 = arith.constant 0 : index
      %c0_15 = arith.constant 0 : index
      %18 = vector.load %arg5[%c0_14, %c0_15] : memref<256x128xf32, #tpu.memory_space<vmem>>, vector<256x128xf32>
      tpu.vector_store %arg5[%c0_14, %c0_15], %17 {strides = array<i32>} : memref<256x128xf32, #tpu.memory_space<vmem>>, vector<256x128xf32>,
    } else {
    }
    return
  }
  func.func @transform_0(%arg0: i32, %arg1: i32, %arg2: i32) -> (i32, i32) {
    %c0_i32 = arith.constant 0 : i32
    return %arg0, %arg2 : i32, i32
  }
  func.func @transform_1(%arg0: i32, %arg1: i32, %arg2: i32) -> (i32, i32) {
    %c0_i32 = arith.constant 0 : i32
    return %arg2, %arg1 : i32, i32
  }
  func.func @transform_2(%arg0: i32, %arg1: i32, %arg2: i32) -> (i32, i32) {
    %c0_i32 = arith.constant 0 : i32
    return %arg0, %arg1 : i32, i32
  }
}

module attributes {stable_mosaic.version = 11 : i64} {
  func.func @_matmul_fused_kernel(%arg0: i32, %arg1: i32, %arg2: i32, %arg3: memref<256x512xbf16, #tpu.memory_space<vmem>>, %arg4: memref<512x128xbf16, #tpu.memory_space<vmem>>, %arg5: memref<256x128xf32, #tpu.memory_space<vmem>>) attributes {dimension_semantics = [#tpu.dimension_semantics<parallel>, #tpu.dimension_semantics<parallel>, #tpu.dimension_semantics<arbitrary>], iteration_bounds = array<i64: 2, 1, 2>, scalar_prefetch = 0 : i64, scratch_operands = 0 : i64, tpu.core_type = #tpu.core_type<tc>, window_params = [{transform_indices = @transform_0, window_bounds = array<i64: 256, 512>}, {transform_indices = @transform_1, window_bounds = array<i64: 512, 128>}, {transform_indices = @transform_2, window_bounds = array<i64: 256, 128>}]} {
    %c0_i32 = arith.constant 0 : i32
    %0 = arith.cmpi eq, %arg2, %c0_i32 : i32
    %1 = arith.extui %0 : i1 to i32
    %c0_i32_0 = arith.constant 0 : i32
    %2 = arith.cmpi ne, %1, %c0_i32_0 : i32
    scf.if %2 {
      %cst_8 = arith.constant 0.000000e+00 : f32
      %9 = vector.broadcast %cst_8 : f32 to vector<256x128xf32>
      %c0_9 = arith.constant 0 : index
      %c0_10 = arith.constant 0 : index
      %10 = vector.load %arg5[%c0_9, %c0_10] : memref<256x128xf32, #tpu.memory_space<vmem>>, vector<256x128xf32>
      tpu.vector_store %arg5[%c0_9, %c0_10], %9 {strides = array<i32>} : memref<256x128xf32, #tpu.memory_space<vmem>>, vector<256x128xf32>,
    } else {
    }
    %c0 = arith.constant 0 : index
    %c0_1 = arith.constant 0 : index
    %3 = vector.load %arg5[%c0, %c0_1] : memref<256x128xf32, #tpu.memory_space<vmem>>, vector<256x128xf32>
    %c0_2 = arith.constant 0 : index
    %c0_3 = arith.constant 0 : index
    %4 = vector.load %arg3[%c0_2, %c0_3] : memref<256x512xbf16, #tpu.memory_space<vmem>>, vector<256x512xbf16>
    %c0_4 = arith.constant 0 : index
    %c0_5 = arith.constant 0 : index
    %5 = vector.load %arg4[%c0_4, %c0_5] : memref<512x128xbf16, #tpu.memory_space<vmem>>, vector<512x128xbf16>
    %cst = arith.constant dense<0.000000e+00> : vector<256x128xf32>
    %6 = tpu.matmul %4, %5, %cst {dimension_numbers = #tpu.dot_dimension_numbers<[1], [0], [0], [1], [0, 0, 1, 1], [], []>} : vector<256x512xbf16>, vector<512x128xbf16>, vector<256x128xf32> -> vector<256x128xf32>
    %7 = arith.addf %3, %6 : vector<256x128xf32>
    %c0_6 = arith.constant 0 : index
    %c0_7 = arith.constant 0 : index
    %8 = vector.load %arg5[%c0_6, %c0_7] : memref<256x128xf32, #tpu.memory_space<vmem>>, vector<256x128xf32>
    tpu.vector_store %arg5[%c0_6, %c0_7], %7 {strides = array<i32>} : memref<256x128xf32, #tpu.memory_space<vmem>>, vector<256x128xf32>,
    return
  }
  func.func @transform_0(%arg0: i32, %arg1: i32, %arg2: i32) -> (i32, i32) {
    %c0_i32 = arith.constant 0 : i32
    return %arg0, %arg2 : i32, i32
  }
  func.func @transform_1(%arg0: i32, %arg1: i32, %arg2: i32) -> (i32, i32) {
    %c0_i32 = arith.constant 0 : i32
    return %arg2, %arg1 : i32, i32
  }
  func.func @transform_2(%arg0: i32, %arg1: i32, %arg2: i32) -> (i32, i32) {
    %c0_i32 = arith.constant 0 : i32
    return %arg0, %arg1 : i32, i32
  }
}

module attributes {stable_mosaic.version = 11 : i64} {
  func.func @_bn_stats_kernel(%arg0: i32, %arg1: memref<512x128xf32, #tpu.memory_space<vmem>>, %arg2: memref<1x128xf32, #tpu.memory_space<vmem>>, %arg3: memref<1x128xf32, #tpu.memory_space<vmem>>) attributes {dimension_semantics = [#tpu.dimension_semantics<arbitrary>], iteration_bounds = array<i64: 1>, scalar_prefetch = 0 : i64, scratch_operands = 0 : i64, tpu.core_type = #tpu.core_type<tc>, window_params = [{transform_indices = @transform_0, window_bounds = array<i64: 512, 128>}, {pipeline_mode = #tpu.pipeline_mode<synchronous>, transform_indices = @transform_1, window_bounds = array<i64: 1, 128>}, {pipeline_mode = #tpu.pipeline_mode<synchronous>, transform_indices = @transform_2, window_bounds = array<i64: 1, 128>}]} {
    %c0_i32 = arith.constant 0 : i32
    %0 = arith.cmpi eq, %arg0, %c0_i32 : i32
    %1 = arith.extui %0 : i1 to i32
    %c0_i32_0 = arith.constant 0 : i32
    %2 = arith.cmpi ne, %1, %c0_i32_0 : i32
    scf.if %2 {
      %cst_11 = arith.constant 0.000000e+00 : f32
      %15 = vector.broadcast %cst_11 : f32 to vector<1x128xf32>
      %c0_12 = arith.constant 0 : index
      %c0_13 = arith.constant 0 : index
      %16 = vector.load %arg2[%c0_12, %c0_13] : memref<1x128xf32, #tpu.memory_space<vmem>>, vector<1x128xf32>
      tpu.vector_store %arg2[%c0_12, %c0_13], %15 {strides = array<i32>} : memref<1x128xf32, #tpu.memory_space<vmem>>, vector<1x128xf32>,
      %cst_14 = arith.constant 0.000000e+00 : f32
      %17 = vector.broadcast %cst_14 : f32 to vector<1x128xf32>
      %c0_15 = arith.constant 0 : index
      %c0_16 = arith.constant 0 : index
      %18 = vector.load %arg3[%c0_15, %c0_16] : memref<1x128xf32, #tpu.memory_space<vmem>>, vector<1x128xf32>
      tpu.vector_store %arg3[%c0_15, %c0_16], %17 {strides = array<i32>} : memref<1x128xf32, #tpu.memory_space<vmem>>, vector<1x128xf32>,
    } else {
    }
    %c0 = arith.constant 0 : index
    %c0_1 = arith.constant 0 : index
    %3 = vector.load %arg1[%c0, %c0_1] : memref<512x128xf32, #tpu.memory_space<vmem>>, vector<512x128xf32>
    %c0_2 = arith.constant 0 : index
    %c0_3 = arith.constant 0 : index
    %4 = vector.load %arg2[%c0_2, %c0_3] : memref<1x128xf32, #tpu.memory_space<vmem>>, vector<1x128xf32>
    %cst = arith.constant dense<0.000000e+00> : vector<128xf32>
    %5 = vector.multi_reduction <add>, %3, %cst [0] : vector<512x128xf32> to vector<128xf32>
    %6 = vector.shape_cast %5 : vector<128xf32> to vector<1x128xf32>
    %7 = arith.addf %4, %6 : vector<1x128xf32>
    %c0_4 = arith.constant 0 : index
    %c0_5 = arith.constant 0 : index
    %8 = vector.load %arg2[%c0_4, %c0_5] : memref<1x128xf32, #tpu.memory_space<vmem>>, vector<1x128xf32>
    tpu.vector_store %arg2[%c0_4, %c0_5], %7 {strides = array<i32>} : memref<1x128xf32, #tpu.memory_space<vmem>>, vector<1x128xf32>,
    %c0_6 = arith.constant 0 : index
    %c0_7 = arith.constant 0 : index
    %9 = vector.load %arg3[%c0_6, %c0_7] : memref<1x128xf32, #tpu.memory_space<vmem>>, vector<1x128xf32>
    %10 = arith.mulf %3, %3 : vector<512x128xf32>
    %cst_8 = arith.constant dense<0.000000e+00> : vector<128xf32>
    %11 = vector.multi_reduction <add>, %10, %cst_8 [0] : vector<512x128xf32> to vector<128xf32>
    %12 = vector.shape_cast %11 : vector<128xf32> to vector<1x128xf32>
    %13 = arith.addf %9, %12 : vector<1x128xf32>
    %c0_9 = arith.constant 0 : index
    %c0_10 = arith.constant 0 : index
    %14 = vector.load %arg3[%c0_9, %c0_10] : memref<1x128xf32, #tpu.memory_space<vmem>>, vector<1x128xf32>
    tpu.vector_store %arg3[%c0_9, %c0_10], %13 {strides = array<i32>} : memref<1x128xf32, #tpu.memory_space<vmem>>, vector<1x128xf32>,
    return
  }
  func.func @transform_0(%arg0: i32) -> (i32, i32) {
    %c0_i32 = arith.constant 0 : i32
    %c0_i32_0 = arith.constant 0 : i32
    return %arg0, %c0_i32 : i32, i32
  }
  func.func @transform_1(%arg0: i32) -> (i32, i32) {
    %c0_i32 = arith.constant 0 : i32
    %c0_i32_0 = arith.constant 0 : i32
    %c0_i32_1 = arith.constant 0 : i32
    return %c0_i32, %c0_i32_0 : i32, i32
  }
  func.func @transform_2(%arg0: i32) -> (i32, i32) {
    %c0_i32 = arith.constant 0 : i32
    %c0_i32_0 = arith.constant 0 : i32
    %c0_i32_1 = arith.constant 0 : i32
    return %c0_i32, %c0_i32_0 : i32, i32
  }
}

module attributes {stable_mosaic.version = 11 : i64} {
  func.func @_bn_apply_kernel(%arg0: i32, %arg1: memref<512x128xf32, #tpu.memory_space<vmem>>, %arg2: memref<1x128xf32, #tpu.memory_space<vmem>>, %arg3: memref<1x128xf32, #tpu.memory_space<vmem>>, %arg4: memref<512x128xf32, #tpu.memory_space<vmem>>) attributes {dimension_semantics = [#tpu.dimension_semantics<parallel>], iteration_bounds = array<i64: 1>, scalar_prefetch = 0 : i64, scratch_operands = 0 : i64, tpu.core_type = #tpu.core_type<tc>, window_params = [{transform_indices = @transform_0, window_bounds = array<i64: 512, 128>}, {pipeline_mode = #tpu.pipeline_mode<synchronous>, transform_indices = @transform_1, window_bounds = array<i64: 1, 128>}, {pipeline_mode = #tpu.pipeline_mode<synchronous>, transform_indices = @transform_2, window_bounds = array<i64: 1, 128>}, {transform_indices = @transform_3, window_bounds = array<i64: 512, 128>}]} {
    %c0 = arith.constant 0 : index
    %c0_0 = arith.constant 0 : index
    %0 = vector.load %arg1[%c0, %c0_0] : memref<512x128xf32, #tpu.memory_space<vmem>>, vector<512x128xf32>
    %c0_1 = arith.constant 0 : index
    %c0_2 = arith.constant 0 : index
    %1 = vector.load %arg2[%c0_1, %c0_2] : memref<1x128xf32, #tpu.memory_space<vmem>>, vector<1x128xf32>
    %2 = vector.broadcast %1 : vector<1x128xf32> to vector<512x128xf32>
    %3 = arith.mulf %0, %2 : vector<512x128xf32>
    %c0_3 = arith.constant 0 : index
    %c0_4 = arith.constant 0 : index
    %4 = vector.load %arg3[%c0_3, %c0_4] : memref<1x128xf32, #tpu.memory_space<vmem>>, vector<1x128xf32>
    %5 = vector.broadcast %4 : vector<1x128xf32> to vector<512x128xf32>
    %6 = arith.addf %3, %5 : vector<512x128xf32>
    %cst = arith.constant 0.000000e+00 : f32
    %7 = vector.broadcast %cst : f32 to vector<512x128xf32>
    %8 = arith.cmpf oge, %6, %7 : vector<512x128xf32>
    %cst_5 = arith.constant 2.000000e-01 : f32
    %9 = vector.broadcast %cst_5 : f32 to vector<512x128xf32>
    %10 = arith.mulf %9, %6 : vector<512x128xf32>
    %11 = arith.select %8, %6, %10 : vector<512x128xi1>, vector<512x128xf32>
    %c0_6 = arith.constant 0 : index
    %c0_7 = arith.constant 0 : index
    %12 = vector.load %arg4[%c0_6, %c0_7] : memref<512x128xf32, #tpu.memory_space<vmem>>, vector<512x128xf32>
    tpu.vector_store %arg4[%c0_6, %c0_7], %11 {strides = array<i32>} : memref<512x128xf32, #tpu.memory_space<vmem>>, vector<512x128xf32>,
    return
  }
  func.func @transform_0(%arg0: i32) -> (i32, i32) {
    %c0_i32 = arith.constant 0 : i32
    %c0_i32_0 = arith.constant 0 : i32
    return %arg0, %c0_i32 : i32, i32
  }
  func.func @transform_1(%arg0: i32) -> (i32, i32) {
    %c0_i32 = arith.constant 0 : i32
    %c0_i32_0 = arith.constant 0 : i32
    %c0_i32_1 = arith.constant 0 : i32
    return %c0_i32, %c0_i32_0 : i32, i32
  }
  func.func @transform_2(%arg0: i32) -> (i32, i32) {
    %c0_i32 = arith.constant 0 : i32
    %c0_i32_0 = arith.constant 0 : i32
    %c0_i32_1 = arith.constant 0 : i32
    return %c0_i32, %c0_i32_0 : i32, i32
  }
  func.func @transform_3(%arg0: i32) -> (i32, i32) {
    %c0_i32 = arith.constant 0 : i32
    %c0_i32_0 = arith.constant 0 : i32
    return %arg0, %c0_i32 : i32, i32
  }
}

module attributes {stable_mosaic.version = 11 : i64} {
  func.func @_matmul_fused_kernel(%arg0: i32, %arg1: i32, %arg2: i32, %arg3: memref<128x512xbf16, #tpu.memory_space<vmem>>, %arg4: memref<512x256xbf16, #tpu.memory_space<vmem>>, %arg5: memref<128x256xf32, #tpu.memory_space<vmem>>) attributes {dimension_semantics = [#tpu.dimension_semantics<parallel>, #tpu.dimension_semantics<parallel>, #tpu.dimension_semantics<arbitrary>], iteration_bounds = array<i64: 1, 1, 4>, scalar_prefetch = 0 : i64, scratch_operands = 0 : i64, tpu.core_type = #tpu.core_type<tc>, window_params = [{transform_indices = @transform_0, window_bounds = array<i64: 128, 512>}, {transform_indices = @transform_1, window_bounds = array<i64: 512, 256>}, {transform_indices = @transform_2, window_bounds = array<i64: 128, 256>}]} {
    %c0_i32 = arith.constant 0 : i32
    %0 = arith.cmpi eq, %arg2, %c0_i32 : i32
    %1 = arith.extui %0 : i1 to i32
    %c0_i32_0 = arith.constant 0 : i32
    %2 = arith.cmpi ne, %1, %c0_i32_0 : i32
    scf.if %2 {
      %cst_8 = arith.constant 0.000000e+00 : f32
      %9 = vector.broadcast %cst_8 : f32 to vector<128x256xf32>
      %c0_9 = arith.constant 0 : index
      %c0_10 = arith.constant 0 : index
      %10 = vector.load %arg5[%c0_9, %c0_10] : memref<128x256xf32, #tpu.memory_space<vmem>>, vector<128x256xf32>
      tpu.vector_store %arg5[%c0_9, %c0_10], %9 {strides = array<i32>} : memref<128x256xf32, #tpu.memory_space<vmem>>, vector<128x256xf32>,
    } else {
    }
    %c0 = arith.constant 0 : index
    %c0_1 = arith.constant 0 : index
    %3 = vector.load %arg5[%c0, %c0_1] : memref<128x256xf32, #tpu.memory_space<vmem>>, vector<128x256xf32>
    %c0_2 = arith.constant 0 : index
    %c0_3 = arith.constant 0 : index
    %4 = vector.load %arg3[%c0_2, %c0_3] : memref<128x512xbf16, #tpu.memory_space<vmem>>, vector<128x512xbf16>
    %c0_4 = arith.constant 0 : index
    %c0_5 = arith.constant 0 : index
    %5 = vector.load %arg4[%c0_4, %c0_5] : memref<512x256xbf16, #tpu.memory_space<vmem>>, vector<512x256xbf16>
    %cst = arith.constant dense<0.000000e+00> : vector<128x256xf32>
    %6 = tpu.matmul %4, %5, %cst {dimension_numbers = #tpu.dot_dimension_numbers<[1], [0], [0], [1], [0, 0, 1, 1], [], []>} : vector<128x512xbf16>, vector<512x256xbf16>, vector<128x256xf32> -> vector<128x256xf32>
    %7 = arith.addf %3, %6 : vector<128x256xf32>
    %c0_6 = arith.constant 0 : index
    %c0_7 = arith.constant 0 : index
    %8 = vector.load %arg5[%c0_6, %c0_7] : memref<128x256xf32, #tpu.memory_space<vmem>>, vector<128x256xf32>
    tpu.vector_store %arg5[%c0_6, %c0_7], %7 {strides = array<i32>} : memref<128x256xf32, #tpu.memory_space<vmem>>, vector<128x256xf32>,
    return
  }
  func.func @transform_0(%arg0: i32, %arg1: i32, %arg2: i32) -> (i32, i32) {
    %c0_i32 = arith.constant 0 : i32
    return %arg0, %arg2 : i32, i32
  }
  func.func @transform_1(%arg0: i32, %arg1: i32, %arg2: i32) -> (i32, i32) {
    %c0_i32 = arith.constant 0 : i32
    return %arg2, %arg1 : i32, i32
  }
  func.func @transform_2(%arg0: i32, %arg1: i32, %arg2: i32) -> (i32, i32) {
    %c0_i32 = arith.constant 0 : i32
    return %arg0, %arg1 : i32, i32
  }
}

module attributes {stable_mosaic.version = 11 : i64} {
  func.func @_bn_stats_kernel(%arg0: i32, %arg1: memref<128x256xf32, #tpu.memory_space<vmem>>, %arg2: memref<1x256xf32, #tpu.memory_space<vmem>>, %arg3: memref<1x256xf32, #tpu.memory_space<vmem>>) attributes {dimension_semantics = [#tpu.dimension_semantics<arbitrary>], iteration_bounds = array<i64: 1>, scalar_prefetch = 0 : i64, scratch_operands = 0 : i64, tpu.core_type = #tpu.core_type<tc>, window_params = [{transform_indices = @transform_0, window_bounds = array<i64: 128, 256>}, {pipeline_mode = #tpu.pipeline_mode<synchronous>, transform_indices = @transform_1, window_bounds = array<i64: 1, 256>}, {pipeline_mode = #tpu.pipeline_mode<synchronous>, transform_indices = @transform_2, window_bounds = array<i64: 1, 256>}]} {
    %c0_i32 = arith.constant 0 : i32
    %0 = arith.cmpi eq, %arg0, %c0_i32 : i32
    %1 = arith.extui %0 : i1 to i32
    %c0_i32_0 = arith.constant 0 : i32
    %2 = arith.cmpi ne, %1, %c0_i32_0 : i32
    scf.if %2 {
      %cst_11 = arith.constant 0.000000e+00 : f32
      %15 = vector.broadcast %cst_11 : f32 to vector<1x256xf32>
      %c0_12 = arith.constant 0 : index
      %c0_13 = arith.constant 0 : index
      %16 = vector.load %arg2[%c0_12, %c0_13] : memref<1x256xf32, #tpu.memory_space<vmem>>, vector<1x256xf32>
      tpu.vector_store %arg2[%c0_12, %c0_13], %15 {strides = array<i32>} : memref<1x256xf32, #tpu.memory_space<vmem>>, vector<1x256xf32>,
      %cst_14 = arith.constant 0.000000e+00 : f32
      %17 = vector.broadcast %cst_14 : f32 to vector<1x256xf32>
      %c0_15 = arith.constant 0 : index
      %c0_16 = arith.constant 0 : index
      %18 = vector.load %arg3[%c0_15, %c0_16] : memref<1x256xf32, #tpu.memory_space<vmem>>, vector<1x256xf32>
      tpu.vector_store %arg3[%c0_15, %c0_16], %17 {strides = array<i32>} : memref<1x256xf32, #tpu.memory_space<vmem>>, vector<1x256xf32>,
    } else {
    }
    %c0 = arith.constant 0 : index
    %c0_1 = arith.constant 0 : index
    %3 = vector.load %arg1[%c0, %c0_1] : memref<128x256xf32, #tpu.memory_space<vmem>>, vector<128x256xf32>
    %c0_2 = arith.constant 0 : index
    %c0_3 = arith.constant 0 : index
    %4 = vector.load %arg2[%c0_2, %c0_3] : memref<1x256xf32, #tpu.memory_space<vmem>>, vector<1x256xf32>
    %cst = arith.constant dense<0.000000e+00> : vector<256xf32>
    %5 = vector.multi_reduction <add>, %3, %cst [0] : vector<128x256xf32> to vector<256xf32>
    %6 = vector.shape_cast %5 : vector<256xf32> to vector<1x256xf32>
    %7 = arith.addf %4, %6 : vector<1x256xf32>
    %c0_4 = arith.constant 0 : index
    %c0_5 = arith.constant 0 : index
    %8 = vector.load %arg2[%c0_4, %c0_5] : memref<1x256xf32, #tpu.memory_space<vmem>>, vector<1x256xf32>
    tpu.vector_store %arg2[%c0_4, %c0_5], %7 {strides = array<i32>} : memref<1x256xf32, #tpu.memory_space<vmem>>, vector<1x256xf32>,
    %c0_6 = arith.constant 0 : index
    %c0_7 = arith.constant 0 : index
    %9 = vector.load %arg3[%c0_6, %c0_7] : memref<1x256xf32, #tpu.memory_space<vmem>>, vector<1x256xf32>
    %10 = arith.mulf %3, %3 : vector<128x256xf32>
    %cst_8 = arith.constant dense<0.000000e+00> : vector<256xf32>
    %11 = vector.multi_reduction <add>, %10, %cst_8 [0] : vector<128x256xf32> to vector<256xf32>
    %12 = vector.shape_cast %11 : vector<256xf32> to vector<1x256xf32>
    %13 = arith.addf %9, %12 : vector<1x256xf32>
    %c0_9 = arith.constant 0 : index
    %c0_10 = arith.constant 0 : index
    %14 = vector.load %arg3[%c0_9, %c0_10] : memref<1x256xf32, #tpu.memory_space<vmem>>, vector<1x256xf32>
    tpu.vector_store %arg3[%c0_9, %c0_10], %13 {strides = array<i32>} : memref<1x256xf32, #tpu.memory_space<vmem>>, vector<1x256xf32>,
    return
  }
  func.func @transform_0(%arg0: i32) -> (i32, i32) {
    %c0_i32 = arith.constant 0 : i32
    %c0_i32_0 = arith.constant 0 : i32
    return %arg0, %c0_i32 : i32, i32
  }
  func.func @transform_1(%arg0: i32) -> (i32, i32) {
    %c0_i32 = arith.constant 0 : i32
    %c0_i32_0 = arith.constant 0 : i32
    %c0_i32_1 = arith.constant 0 : i32
    return %c0_i32, %c0_i32_0 : i32, i32
  }
  func.func @transform_2(%arg0: i32) -> (i32, i32) {
    %c0_i32 = arith.constant 0 : i32
    %c0_i32_0 = arith.constant 0 : i32
    %c0_i32_1 = arith.constant 0 : i32
    return %c0_i32, %c0_i32_0 : i32, i32
  }
}

module attributes {stable_mosaic.version = 11 : i64} {
  func.func @_bn_apply_kernel(%arg0: i32, %arg1: memref<128x256xf32, #tpu.memory_space<vmem>>, %arg2: memref<1x256xf32, #tpu.memory_space<vmem>>, %arg3: memref<1x256xf32, #tpu.memory_space<vmem>>, %arg4: memref<128x256xf32, #tpu.memory_space<vmem>>) attributes {dimension_semantics = [#tpu.dimension_semantics<parallel>], iteration_bounds = array<i64: 1>, scalar_prefetch = 0 : i64, scratch_operands = 0 : i64, tpu.core_type = #tpu.core_type<tc>, window_params = [{transform_indices = @transform_0, window_bounds = array<i64: 128, 256>}, {pipeline_mode = #tpu.pipeline_mode<synchronous>, transform_indices = @transform_1, window_bounds = array<i64: 1, 256>}, {pipeline_mode = #tpu.pipeline_mode<synchronous>, transform_indices = @transform_2, window_bounds = array<i64: 1, 256>}, {transform_indices = @transform_3, window_bounds = array<i64: 128, 256>}]} {
    %c0 = arith.constant 0 : index
    %c0_0 = arith.constant 0 : index
    %0 = vector.load %arg1[%c0, %c0_0] : memref<128x256xf32, #tpu.memory_space<vmem>>, vector<128x256xf32>
    %c0_1 = arith.constant 0 : index
    %c0_2 = arith.constant 0 : index
    %1 = vector.load %arg2[%c0_1, %c0_2] : memref<1x256xf32, #tpu.memory_space<vmem>>, vector<1x256xf32>
    %2 = vector.broadcast %1 : vector<1x256xf32> to vector<128x256xf32>
    %3 = arith.mulf %0, %2 : vector<128x256xf32>
    %c0_3 = arith.constant 0 : index
    %c0_4 = arith.constant 0 : index
    %4 = vector.load %arg3[%c0_3, %c0_4] : memref<1x256xf32, #tpu.memory_space<vmem>>, vector<1x256xf32>
    %5 = vector.broadcast %4 : vector<1x256xf32> to vector<128x256xf32>
    %6 = arith.addf %3, %5 : vector<128x256xf32>
    %cst = arith.constant 0.000000e+00 : f32
    %7 = vector.broadcast %cst : f32 to vector<128x256xf32>
    %8 = arith.cmpf oge, %6, %7 : vector<128x256xf32>
    %cst_5 = arith.constant 2.000000e-01 : f32
    %9 = vector.broadcast %cst_5 : f32 to vector<128x256xf32>
    %10 = arith.mulf %9, %6 : vector<128x256xf32>
    %11 = arith.select %8, %6, %10 : vector<128x256xi1>, vector<128x256xf32>
    %c0_6 = arith.constant 0 : index
    %c0_7 = arith.constant 0 : index
    %12 = vector.load %arg4[%c0_6, %c0_7] : memref<128x256xf32, #tpu.memory_space<vmem>>, vector<128x256xf32>
    tpu.vector_store %arg4[%c0_6, %c0_7], %11 {strides = array<i32>} : memref<128x256xf32, #tpu.memory_space<vmem>>, vector<128x256xf32>,
    return
  }
  func.func @transform_0(%arg0: i32) -> (i32, i32) {
    %c0_i32 = arith.constant 0 : i32
    %c0_i32_0 = arith.constant 0 : i32
    return %arg0, %c0_i32 : i32, i32
  }
  func.func @transform_1(%arg0: i32) -> (i32, i32) {
    %c0_i32 = arith.constant 0 : i32
    %c0_i32_0 = arith.constant 0 : i32
    %c0_i32_1 = arith.constant 0 : i32
    return %c0_i32, %c0_i32_0 : i32, i32
  }
  func.func @transform_2(%arg0: i32) -> (i32, i32) {
    %c0_i32 = arith.constant 0 : i32
    %c0_i32_0 = arith.constant 0 : i32
    %c0_i32_1 = arith.constant 0 : i32
    return %c0_i32, %c0_i32_0 : i32, i32
  }
  func.func @transform_3(%arg0: i32) -> (i32, i32) {
    %c0_i32 = arith.constant 0 : i32
    %c0_i32_0 = arith.constant 0 : i32
    return %arg0, %c0_i32 : i32, i32
  }
}

module attributes {stable_mosaic.version = 11 : i64} {
  func.func @_matmul_fused_kernel(%arg0: i32, %arg1: i32, %arg2: i32, %arg3: memref<32x512xbf16, #tpu.memory_space<vmem>>, %arg4: memref<512x256xbf16, #tpu.memory_space<vmem>>, %arg5: memref<32x256xf32, #tpu.memory_space<vmem>>) attributes {dimension_semantics = [#tpu.dimension_semantics<parallel>, #tpu.dimension_semantics<parallel>, #tpu.dimension_semantics<arbitrary>], iteration_bounds = array<i64: 1, 2, 8>, scalar_prefetch = 0 : i64, scratch_operands = 0 : i64, tpu.core_type = #tpu.core_type<tc>, window_params = [{transform_indices = @transform_0, window_bounds = array<i64: 32, 512>}, {transform_indices = @transform_1, window_bounds = array<i64: 512, 256>}, {transform_indices = @transform_2, window_bounds = array<i64: 32, 256>}]} {
    %c0_i32 = arith.constant 0 : i32
    %0 = arith.cmpi eq, %arg2, %c0_i32 : i32
    %1 = arith.extui %0 : i1 to i32
    %c0_i32_0 = arith.constant 0 : i32
    %2 = arith.cmpi ne, %1, %c0_i32_0 : i32
    scf.if %2 {
      %cst_8 = arith.constant 0.000000e+00 : f32
      %9 = vector.broadcast %cst_8 : f32 to vector<32x256xf32>
      %c0_9 = arith.constant 0 : index
      %c0_10 = arith.constant 0 : index
      %10 = vector.load %arg5[%c0_9, %c0_10] : memref<32x256xf32, #tpu.memory_space<vmem>>, vector<32x256xf32>
      tpu.vector_store %arg5[%c0_9, %c0_10], %9 {strides = array<i32>} : memref<32x256xf32, #tpu.memory_space<vmem>>, vector<32x256xf32>,
    } else {
    }
    %c0 = arith.constant 0 : index
    %c0_1 = arith.constant 0 : index
    %3 = vector.load %arg5[%c0, %c0_1] : memref<32x256xf32, #tpu.memory_space<vmem>>, vector<32x256xf32>
    %c0_2 = arith.constant 0 : index
    %c0_3 = arith.constant 0 : index
    %4 = vector.load %arg3[%c0_2, %c0_3] : memref<32x512xbf16, #tpu.memory_space<vmem>>, vector<32x512xbf16>
    %c0_4 = arith.constant 0 : index
    %c0_5 = arith.constant 0 : index
    %5 = vector.load %arg4[%c0_4, %c0_5] : memref<512x256xbf16, #tpu.memory_space<vmem>>, vector<512x256xbf16>
    %cst = arith.constant dense<0.000000e+00> : vector<32x256xf32>
    %6 = tpu.matmul %4, %5, %cst {dimension_numbers = #tpu.dot_dimension_numbers<[1], [0], [0], [1], [0, 0, 1, 1], [], []>} : vector<32x512xbf16>, vector<512x256xbf16>, vector<32x256xf32> -> vector<32x256xf32>
    %7 = arith.addf %3, %6 : vector<32x256xf32>
    %c0_6 = arith.constant 0 : index
    %c0_7 = arith.constant 0 : index
    %8 = vector.load %arg5[%c0_6, %c0_7] : memref<32x256xf32, #tpu.memory_space<vmem>>, vector<32x256xf32>
    tpu.vector_store %arg5[%c0_6, %c0_7], %7 {strides = array<i32>} : memref<32x256xf32, #tpu.memory_space<vmem>>, vector<32x256xf32>,
    return
  }
  func.func @transform_0(%arg0: i32, %arg1: i32, %arg2: i32) -> (i32, i32) {
    %c0_i32 = arith.constant 0 : i32
    return %arg0, %arg2 : i32, i32
  }
  func.func @transform_1(%arg0: i32, %arg1: i32, %arg2: i32) -> (i32, i32) {
    %c0_i32 = arith.constant 0 : i32
    return %arg2, %arg1 : i32, i32
  }
  func.func @transform_2(%arg0: i32, %arg1: i32, %arg2: i32) -> (i32, i32) {
    %c0_i32 = arith.constant 0 : i32
    return %arg0, %arg1 : i32, i32
  }
}

module attributes {stable_mosaic.version = 11 : i64} {
  func.func @_bn_stats_kernel(%arg0: i32, %arg1: memref<32x512xf32, #tpu.memory_space<vmem>>, %arg2: memref<1x512xf32, #tpu.memory_space<vmem>>, %arg3: memref<1x512xf32, #tpu.memory_space<vmem>>) attributes {dimension_semantics = [#tpu.dimension_semantics<arbitrary>], iteration_bounds = array<i64: 1>, scalar_prefetch = 0 : i64, scratch_operands = 0 : i64, tpu.core_type = #tpu.core_type<tc>, window_params = [{transform_indices = @transform_0, window_bounds = array<i64: 32, 512>}, {pipeline_mode = #tpu.pipeline_mode<synchronous>, transform_indices = @transform_1, window_bounds = array<i64: 1, 512>}, {pipeline_mode = #tpu.pipeline_mode<synchronous>, transform_indices = @transform_2, window_bounds = array<i64: 1, 512>}]} {
    %c0_i32 = arith.constant 0 : i32
    %0 = arith.cmpi eq, %arg0, %c0_i32 : i32
    %1 = arith.extui %0 : i1 to i32
    %c0_i32_0 = arith.constant 0 : i32
    %2 = arith.cmpi ne, %1, %c0_i32_0 : i32
    scf.if %2 {
      %cst_11 = arith.constant 0.000000e+00 : f32
      %15 = vector.broadcast %cst_11 : f32 to vector<1x512xf32>
      %c0_12 = arith.constant 0 : index
      %c0_13 = arith.constant 0 : index
      %16 = vector.load %arg2[%c0_12, %c0_13] : memref<1x512xf32, #tpu.memory_space<vmem>>, vector<1x512xf32>
      tpu.vector_store %arg2[%c0_12, %c0_13], %15 {strides = array<i32>} : memref<1x512xf32, #tpu.memory_space<vmem>>, vector<1x512xf32>,
      %cst_14 = arith.constant 0.000000e+00 : f32
      %17 = vector.broadcast %cst_14 : f32 to vector<1x512xf32>
      %c0_15 = arith.constant 0 : index
      %c0_16 = arith.constant 0 : index
      %18 = vector.load %arg3[%c0_15, %c0_16] : memref<1x512xf32, #tpu.memory_space<vmem>>, vector<1x512xf32>
      tpu.vector_store %arg3[%c0_15, %c0_16], %17 {strides = array<i32>} : memref<1x512xf32, #tpu.memory_space<vmem>>, vector<1x512xf32>,
    } else {
    }
    %c0 = arith.constant 0 : index
    %c0_1 = arith.constant 0 : index
    %3 = vector.load %arg1[%c0, %c0_1] : memref<32x512xf32, #tpu.memory_space<vmem>>, vector<32x512xf32>
    %c0_2 = arith.constant 0 : index
    %c0_3 = arith.constant 0 : index
    %4 = vector.load %arg2[%c0_2, %c0_3] : memref<1x512xf32, #tpu.memory_space<vmem>>, vector<1x512xf32>
    %cst = arith.constant dense<0.000000e+00> : vector<512xf32>
    %5 = vector.multi_reduction <add>, %3, %cst [0] : vector<32x512xf32> to vector<512xf32>
    %6 = vector.shape_cast %5 : vector<512xf32> to vector<1x512xf32>
    %7 = arith.addf %4, %6 : vector<1x512xf32>
    %c0_4 = arith.constant 0 : index
    %c0_5 = arith.constant 0 : index
    %8 = vector.load %arg2[%c0_4, %c0_5] : memref<1x512xf32, #tpu.memory_space<vmem>>, vector<1x512xf32>
    tpu.vector_store %arg2[%c0_4, %c0_5], %7 {strides = array<i32>} : memref<1x512xf32, #tpu.memory_space<vmem>>, vector<1x512xf32>,
    %c0_6 = arith.constant 0 : index
    %c0_7 = arith.constant 0 : index
    %9 = vector.load %arg3[%c0_6, %c0_7] : memref<1x512xf32, #tpu.memory_space<vmem>>, vector<1x512xf32>
    %10 = arith.mulf %3, %3 : vector<32x512xf32>
    %cst_8 = arith.constant dense<0.000000e+00> : vector<512xf32>
    %11 = vector.multi_reduction <add>, %10, %cst_8 [0] : vector<32x512xf32> to vector<512xf32>
    %12 = vector.shape_cast %11 : vector<512xf32> to vector<1x512xf32>
    %13 = arith.addf %9, %12 : vector<1x512xf32>
    %c0_9 = arith.constant 0 : index
    %c0_10 = arith.constant 0 : index
    %14 = vector.load %arg3[%c0_9, %c0_10] : memref<1x512xf32, #tpu.memory_space<vmem>>, vector<1x512xf32>
    tpu.vector_store %arg3[%c0_9, %c0_10], %13 {strides = array<i32>} : memref<1x512xf32, #tpu.memory_space<vmem>>, vector<1x512xf32>,
    return
  }
  func.func @transform_0(%arg0: i32) -> (i32, i32) {
    %c0_i32 = arith.constant 0 : i32
    %c0_i32_0 = arith.constant 0 : i32
    return %arg0, %c0_i32 : i32, i32
  }
  func.func @transform_1(%arg0: i32) -> (i32, i32) {
    %c0_i32 = arith.constant 0 : i32
    %c0_i32_0 = arith.constant 0 : i32
    %c0_i32_1 = arith.constant 0 : i32
    return %c0_i32, %c0_i32_0 : i32, i32
  }
  func.func @transform_2(%arg0: i32) -> (i32, i32) {
    %c0_i32 = arith.constant 0 : i32
    %c0_i32_0 = arith.constant 0 : i32
    %c0_i32_1 = arith.constant 0 : i32
    return %c0_i32, %c0_i32_0 : i32, i32
  }
}

module attributes {stable_mosaic.version = 11 : i64} {
  func.func @_bn_apply_kernel(%arg0: i32, %arg1: memref<32x512xf32, #tpu.memory_space<vmem>>, %arg2: memref<1x512xf32, #tpu.memory_space<vmem>>, %arg3: memref<1x512xf32, #tpu.memory_space<vmem>>, %arg4: memref<32x512xf32, #tpu.memory_space<vmem>>) attributes {dimension_semantics = [#tpu.dimension_semantics<parallel>], iteration_bounds = array<i64: 1>, scalar_prefetch = 0 : i64, scratch_operands = 0 : i64, tpu.core_type = #tpu.core_type<tc>, window_params = [{transform_indices = @transform_0, window_bounds = array<i64: 32, 512>}, {pipeline_mode = #tpu.pipeline_mode<synchronous>, transform_indices = @transform_1, window_bounds = array<i64: 1, 512>}, {pipeline_mode = #tpu.pipeline_mode<synchronous>, transform_indices = @transform_2, window_bounds = array<i64: 1, 512>}, {transform_indices = @transform_3, window_bounds = array<i64: 32, 512>}]} {
    %c0 = arith.constant 0 : index
    %c0_0 = arith.constant 0 : index
    %0 = vector.load %arg1[%c0, %c0_0] : memref<32x512xf32, #tpu.memory_space<vmem>>, vector<32x512xf32>
    %c0_1 = arith.constant 0 : index
    %c0_2 = arith.constant 0 : index
    %1 = vector.load %arg2[%c0_1, %c0_2] : memref<1x512xf32, #tpu.memory_space<vmem>>, vector<1x512xf32>
    %2 = vector.broadcast %1 : vector<1x512xf32> to vector<32x512xf32>
    %3 = arith.mulf %0, %2 : vector<32x512xf32>
    %c0_3 = arith.constant 0 : index
    %c0_4 = arith.constant 0 : index
    %4 = vector.load %arg3[%c0_3, %c0_4] : memref<1x512xf32, #tpu.memory_space<vmem>>, vector<1x512xf32>
    %5 = vector.broadcast %4 : vector<1x512xf32> to vector<32x512xf32>
    %6 = arith.addf %3, %5 : vector<32x512xf32>
    %cst = arith.constant 0.000000e+00 : f32
    %7 = vector.broadcast %cst : f32 to vector<32x512xf32>
    %8 = arith.cmpf oge, %6, %7 : vector<32x512xf32>
    %cst_5 = arith.constant 2.000000e-01 : f32
    %9 = vector.broadcast %cst_5 : f32 to vector<32x512xf32>
    %10 = arith.mulf %9, %6 : vector<32x512xf32>
    %11 = arith.select %8, %6, %10 : vector<32x512xi1>, vector<32x512xf32>
    %c0_6 = arith.constant 0 : index
    %c0_7 = arith.constant 0 : index
    %12 = vector.load %arg4[%c0_6, %c0_7] : memref<32x512xf32, #tpu.memory_space<vmem>>, vector<32x512xf32>
    tpu.vector_store %arg4[%c0_6, %c0_7], %11 {strides = array<i32>} : memref<32x512xf32, #tpu.memory_space<vmem>>, vector<32x512xf32>,
    return
  }
  func.func @transform_0(%arg0: i32) -> (i32, i32) {
    %c0_i32 = arith.constant 0 : i32
    %c0_i32_0 = arith.constant 0 : i32
    return %arg0, %c0_i32 : i32, i32
  }
  func.func @transform_1(%arg0: i32) -> (i32, i32) {
    %c0_i32 = arith.constant 0 : i32
    %c0_i32_0 = arith.constant 0 : i32
    %c0_i32_1 = arith.constant 0 : i32
    return %c0_i32, %c0_i32_0 : i32, i32
  }
  func.func @transform_2(%arg0: i32) -> (i32, i32) {
    %c0_i32 = arith.constant 0 : i32
    %c0_i32_0 = arith.constant 0 : i32
    %c0_i32_1 = arith.constant 0 : i32
    return %c0_i32, %c0_i32_0 : i32, i32
  }
  func.func @transform_3(%arg0: i32) -> (i32, i32) {
    %c0_i32 = arith.constant 0 : i32
    %c0_i32_0 = arith.constant 0 : i32
    return %arg0, %c0_i32 : i32, i32
  }
}

module attributes {stable_mosaic.version = 11 : i64} {
  func.func @_matmul_fused_kernel(%arg0: i32, %arg1: i32, %arg2: i32, %arg3: memref<16x512xbf16, #tpu.memory_space<vmem>>, %arg4: memref<512x128xbf16, #tpu.memory_space<vmem>>, %arg5: memref<16x128xf32, #tpu.memory_space<vmem>>) attributes {dimension_semantics = [#tpu.dimension_semantics<parallel>, #tpu.dimension_semantics<parallel>, #tpu.dimension_semantics<arbitrary>], iteration_bounds = array<i64: 1, 1, 16>, scalar_prefetch = 0 : i64, scratch_operands = 0 : i64, tpu.core_type = #tpu.core_type<tc>, window_params = [{transform_indices = @transform_0, window_bounds = array<i64: 16, 512>}, {transform_indices = @transform_1, window_bounds = array<i64: 512, 128>}, {transform_indices = @transform_2, window_bounds = array<i64: 16, 128>}]} {
    %c0_i32 = arith.constant 0 : i32
    %0 = arith.cmpi eq, %arg2, %c0_i32 : i32
    %1 = arith.extui %0 : i1 to i32
    %c0_i32_0 = arith.constant 0 : i32
    %2 = arith.cmpi ne, %1, %c0_i32_0 : i32
    scf.if %2 {
      %cst_9 = arith.constant 0.000000e+00 : f32
      %12 = vector.broadcast %cst_9 : f32 to vector<16x128xf32>
      %c0_10 = arith.constant 0 : index
      %c0_11 = arith.constant 0 : index
      %13 = vector.load %arg5[%c0_10, %c0_11] : memref<16x128xf32, #tpu.memory_space<vmem>>, vector<16x128xf32>
      tpu.vector_store %arg5[%c0_10, %c0_11], %12 {strides = array<i32>} : memref<16x128xf32, #tpu.memory_space<vmem>>, vector<16x128xf32>,
    } else {
    }
    %c0 = arith.constant 0 : index
    %c0_1 = arith.constant 0 : index
    %3 = vector.load %arg5[%c0, %c0_1] : memref<16x128xf32, #tpu.memory_space<vmem>>, vector<16x128xf32>
    %c0_2 = arith.constant 0 : index
    %c0_3 = arith.constant 0 : index
    %4 = vector.load %arg3[%c0_2, %c0_3] : memref<16x512xbf16, #tpu.memory_space<vmem>>, vector<16x512xbf16>
    %c0_4 = arith.constant 0 : index
    %c0_5 = arith.constant 0 : index
    %5 = vector.load %arg4[%c0_4, %c0_5] : memref<512x128xbf16, #tpu.memory_space<vmem>>, vector<512x128xbf16>
    %cst = arith.constant dense<0.000000e+00> : vector<16x128xf32>
    %6 = tpu.matmul %4, %5, %cst {dimension_numbers = #tpu.dot_dimension_numbers<[1], [0], [0], [1], [0, 0, 1, 1], [], []>} : vector<16x512xbf16>, vector<512x128xbf16>, vector<16x128xf32> -> vector<16x128xf32>
    %7 = arith.addf %3, %6 : vector<16x128xf32>
    %c0_6 = arith.constant 0 : index
    %c0_7 = arith.constant 0 : index
    %8 = vector.load %arg5[%c0_6, %c0_7] : memref<16x128xf32, #tpu.memory_space<vmem>>, vector<16x128xf32>
    tpu.vector_store %arg5[%c0_6, %c0_7], %7 {strides = array<i32>} : memref<16x128xf32, #tpu.memory_space<vmem>>, vector<16x128xf32>,
    %c15_i32 = arith.constant 15 : i32
    %9 = arith.cmpi eq, %arg2, %c15_i32 : i32
    %10 = arith.extui %9 : i1 to i32
    %c0_i32_8 = arith.constant 0 : i32
    %11 = arith.cmpi ne, %10, %c0_i32_8 : i32
    scf.if %11 {
      %c0_9 = arith.constant 0 : index
      %c0_10 = arith.constant 0 : index
      %12 = vector.load %arg5[%c0_9, %c0_10] : memref<16x128xf32, #tpu.memory_space<vmem>>, vector<16x128xf32>
      %13 = arith.negf %12 : vector<16x128xf32>
      %14 = math.exp %13 : vector<16x128xf32>
      %cst_11 = arith.constant 1.000000e+00 : f32
      %15 = vector.broadcast %cst_11 : f32 to vector<16x128xf32>
      %16 = arith.addf %15, %14 : vector<16x128xf32>
      %17 = arith.divf %15, %16 : vector<16x128xf32>
      %c0_12 = arith.constant 0 : index
      %c0_13 = arith.constant 0 : index
      %18 = vector.load %arg5[%c0_12, %c0_13] : memref<16x128xf32, #tpu.memory_space<vmem>>, vector<16x128xf32>
      tpu.vector_store %arg5[%c0_12, %c0_13], %17 {strides = array<i32>} : memref<16x128xf32, #tpu.memory_space<vmem>>, vector<16x128xf32>,
    } else {
    }
    return
  }
  func.func @transform_0(%arg0: i32, %arg1: i32, %arg2: i32) -> (i32, i32) {
    %c0_i32 = arith.constant 0 : i32
    return %arg0, %arg2 : i32, i32
  }
  func.func @transform_1(%arg0: i32, %arg1: i32, %arg2: i32) -> (i32, i32) {
    %c0_i32 = arith.constant 0 : i32
    return %arg2, %arg1 : i32, i32
  }
  func.func @transform_2(%arg0: i32, %arg1: i32, %arg2: i32) -> (i32, i32) {
    %c0_i32 = arith.constant 0 : i32
    return %arg0, %arg1 : i32, i32
  }
}

</mosaic_0001>

<bundles_post_ra>
// kernel: discriminator_forward.11
= control target key start
LH: loop header
LB: loop body
LE: loop exit
PB: predicated region body
PF: predicated region fallthrough
CT: control target
= control target key end

     0   :  { %s1178_s9 = smov 0   ;;  %s1180_s10 = smov 0   ;;  %s1291_s0 = inlined_call_operand.vmem [shape: bf16[2048,128], index: 0, kind: input, shape index: {}]   ;;  %s1292_s1 = inlined_call_operand.vmem [shape: bf16[128,128], index: 1, kind: input, shape index: {}]   ;;  %s1293_s2 = inlined_call_operand.vmem [shape: f32[2048,128], index: 2, kind: output, shape index: {}]  }
   0x1   :  { %s1182_s11 = smov 0  }
   0x2 LB: > { %s31_s12 = sadd.s32 1, %s1157_s10  ;;  %p971_p0 = scmp.ge.s32.totalorder %s1161_s11, 1  ;;  %s1161_s11 = sphi %s1182_s11, %s12_s11   ;;  %s1157_s10 = sphi %s1180_s10, %s1295_s10   ;;  %s1153_s9 = sphi %s1178_s9, %s1294_s9  }
   0x3   : > { %p33_p1 = scmp.ge.s32.totalorder %s31_s12, 8  ;;  %p155_p2 = scmp.lt.s32.totalorder %s1161_s11, 9 }
   0x5   : > { %s1297_s12 = smov (%p33_p1, %s31_s12), 0  ;;  %p156_p3 = pnand %p971_p0, %p155_p2 }
   0x6   : > { %s972_s15 = sshll.u32 (!%p156_p3), %s1153_s9, 5 }
   0x7   : > { %159 = sbr.rel (%p156_p3) target bundleno = 273 (0x111), region = 28  ;;  %p192_p4 = scmp.lt.s32.totalorder (!%p156_p3), %s972_s15, 255 }
   0xc   : > { %v1115_v0 = vld [vmem:[%s1292_s1 + $0x38] sm:$0xff]   ;;  %v1116_v1 = vld [vmem:[%s1292_s1 + $0x30] sm:$0xff]   ;;  %s1299_s15 = smov (!%p192_p4, %s972_s15), 255  ;;  %v1117_v2 = vld [vmem:[%s1292_s1 + $0x28] sm:$0xff]  }
   0xd   : > { %1026 = vmatprep.subr.bf16.mxu0 %v1115_v0  ;;  %1074 = vmatprep.subr.bf16.mxu1 %v1115_v0  ;;  %s973_s20 = sshll.u32 %s1299_s15, 2  ;;  %v1118_v3 = vld [vmem:[%s1292_s1 + $0x20] sm:$0xff]   ;;  %v1119_v6 = vld [vmem:[%s1292_s1 + $0x18] sm:$0xff]   ;;  %v1120_v7 = vld [vmem:[%s1292_s1 + $0x10] sm:$0xff]   ;;  %s975_s6 = sshll.u32 %s1299_s15, 3 }
   0xe   : > { %1027 = vmatpush3.bf16.msra.mxu0 %v1115_v0  ;;  %1082 = vmatpush3.bf16.msra.mxu1 %v1115_v0  ;;  %s1211_s23 = scalar_lea.vmem %s1291_s0, %s973_s20  ;;  %v1121_v8 = vld [vmem:[%s1292_s1 + $0x8] sm:$0xff]   ;;  %v1122_v9 = vld [vmem:[%s1292_s1] sm:$0xff]   ;;  %s1248_s9 = scalar_lea.vmem %s1293_s2, %s975_s6 }
   0xf   : > { %1028 = vmatprep.subr.bf16.mxu0 %v1116_v1  ;;  %1075 = vmatprep.subr.bf16.mxu1 %v1116_v1  ;;  %v1123_v4 = vld [vmem:[%s1211_s23] sm:$0xff]   ;;  %v1125_v10 = vld [vmem:[%s1211_s23 + $0x8] sm:$0xff]   ;;  %v1127_v12 = vld [vmem:[%s1211_s23 + $0x10] sm:$0xff]  }
  0x10   : > { %v1124_v5 = vld [vmem:[%s1211_s23 + $0x40] sm:$0xff]   ;;  %1042 = vmatprep.mubr.bf16.mxu0 %v1123_v4  ;;  %v1126_v11 = vld [vmem:[%s1211_s23 + $0x48] sm:$0xff]   ;;  %v1128_v13 = vld [vmem:[%s1211_s23 + $0x50] sm:$0xff]  }
  0x11   : > { %1058 = vmatprep.mubr.bf16.mxu1 %v1124_v5  ;;  %v1129_v14 = vld [vmem:[%s1211_s23 + $0x18] sm:$0xff]   ;;  %v1131_v16 = vld [vmem:[%s1211_s23 + $0x20] sm:$0xff]   ;;  %v1133_v18 = vld [vmem:[%s1211_s23 + $0x28] sm:$0xff]  }
  0x12   : > { %1029 = vmatpush3.bf16.msra.mxu0 %v1116_v1  ;;  %1083 = vmatpush3.bf16.msra.mxu1 %v1116_v1  ;;  %v1130_v15 = vld [vmem:[%s1211_s23 + $0x58] sm:$0xff]   ;;  %v1132_v17 = vld [vmem:[%s1211_s23 + $0x60] sm:$0xff]   ;;  %v1134_v19 = vld [vmem:[%s1211_s23 + $0x68] sm:$0xff]  }
  0x13   : > { %1030 = vmatprep.subr.bf16.mxu0 %v1117_v2  ;;  %1076 = vmatprep.subr.bf16.mxu1 %v1117_v2  ;;  %v1135_v20 = vld [vmem:[%s1211_s23 + $0x30] sm:$0xff]   ;;  %v1137_v22 = vld [vmem:[%s1211_s23 + $0x38] sm:$0xff]  }
  0x14   : > { %v1136_v21 = vld [vmem:[%s1211_s23 + $0x70] sm:$0xff]   ;;  %v1138_v23 = vld [vmem:[%s1211_s23 + $0x78] sm:$0xff]  }
  0x16   : > { %1031 = vmatpush3.bf16.msra.mxu0 %v1117_v2  ;;  %1084 = vmatpush3.bf16.msra.mxu1 %v1117_v2 }
  0x17   : > { %1032 = vmatprep.subr.bf16.mxu0 %v1118_v3  ;;  %1077 = vmatprep.subr.bf16.mxu1 %v1118_v3 }
  0x1a   : > { %1033 = vmatpush3.bf16.msra.mxu0 %v1118_v3  ;;  %1085 = vmatpush3.bf16.msra.mxu1 %v1118_v3 }
  0x1b   : > { %1034 = vmatprep.subr.bf16.mxu0 %v1119_v6  ;;  %1078 = vmatprep.subr.bf16.mxu1 %v1119_v6 }
  0x1e   : > { %1035 = vmatpush3.bf16.msra.mxu0 %v1119_v6  ;;  %1086 = vmatpush3.bf16.msra.mxu1 %v1119_v6 }
  0x1f   : > { %1036 = vmatprep.subr.bf16.mxu0 %v1120_v7  ;;  %1079 = vmatprep.subr.bf16.mxu1 %v1120_v7 }
  0x22   : > { %1037 = vmatpush3.bf16.msra.mxu0 %v1120_v7  ;;  %1087 = vmatpush3.bf16.msra.mxu1 %v1120_v7 }
  0x23   : > { %1038 = vmatprep.subr.bf16.mxu0 %v1121_v8  ;;  %1080 = vmatprep.subr.bf16.mxu1 %v1121_v8 }
  0x26   : > { %1039 = vmatpush3.bf16.msra.mxu0 %v1121_v8  ;;  %1088 = vmatpush3.bf16.msra.mxu1 %v1121_v8 }
  0x27   : > { %1040 = vmatprep.subr.bf16.mxu0 %v1122_v9  ;;  %1081 = vmatprep.subr.bf16.mxu1 %v1122_v9 }
  0x2a   : > { %1041 = vmatpush3.bf16.msra.mxu0 %v1122_v9  ;;  %1089 = vmatpush3.bf16.msra.mxu1 %v1122_v9 }
  0x2d   : > { %1043 = vmatmul.mubr.bf16.vlgmr.msra.gmra.mxu0 %v1125_v10  ;;  %1059 = vmatmul.mubr.bf16.vlgmr.msra.gmra.mxu1 %v1126_v11 }
  0x2e   : > { %1046 = vmatprep.mubr.bf16.mxu0 %v1127_v12  ;;  %1062 = vmatprep.mubr.bf16.mxu1 %v1128_v13 }
  0x35   : > { %1047 = vmatmul.mubr.bf16.gmra.mxu0 %v1129_v14  ;;  %1063 = vmatmul.mubr.bf16.gmra.mxu1 %v1130_v15 }
  0x36   : > { %1050 = vmatprep.mubr.bf16.mxu0 %v1131_v16  ;;  %1066 = vmatprep.mubr.bf16.mxu1 %v1132_v17 }
  0x3d   : > { %1051 = vmatmul.mubr.bf16.gmra.mxu0 %v1133_v18  ;;  %1067 = vmatmul.mubr.bf16.gmra.mxu1 %v1134_v19 }
  0x3e   : > { %1054 = vmatprep.mubr.bf16.mxu0 %v1135_v20  ;;  %1070 = vmatprep.mubr.bf16.mxu1 %v1136_v21 }
  0x45   : > { %1055 = vmatmul.mubr.bf16.gmra.mxu0 %v1137_v22  ;;  %1071 = vmatmul.mubr.bf16.gmra.mxu1 %v1138_v23 }
  0xed   : > { %v1044_v24 = vpop.f32.mrf.mxu0  ;;  %v1060_v25 = vpop.f32.mrf.mxu1 }
  0xee   : > { %vm741_vm0 = vcmp.ge.f32.partialorder %v1044_v24, 0.0  ;;  %v773_v28 = vmul.f32 0.2, %v1044_v24  ;;  %vm757_vm1 = vcmp.ge.f32.partialorder %v1060_v25, 0.0  ;;  %v789_v29 = vmul.f32 0.2, %v1060_v25 }
  0xef   : > { %v513_v26 = vpop.f32.mrf.mxu0  ;;  %v577_v27 = vpop.f32.mrf.mxu1 }
  0xf0   : > { %v805_v32 = vsel %vm741_vm0, %v1044_v24, %v773_v28  ;;  %v821_v33 = vsel %vm757_vm1, %v1060_v25, %v789_v29  ;;  %vm739_vm2 = vcmp.ge.f32.partialorder %v513_v26, 0.0  ;;  %v771_v34 = vmul.f32 0.2, %v513_v26 }
  0xf1   : > { %v1045_v30 = vpop.f32.mrf.mxu0  ;;  %v1061_v31 = vpop.f32.mrf.mxu1  ;;  %837 = vst [vmem:[%s1248_s9 + $0x10] sm:$0xff] %v805_v32  ;;  %853 = vst [vmem:[%s1248_s9 + $0x90] sm:$0xff] %v821_v33  ;;  %vm755_vm3 = vcmp.ge.f32.partialorder %v577_v27, 0.0  ;;  %v787_v35 = vmul.f32 0.2, %v577_v27 }
  0xf2   : > { %vm742_vm4 = vcmp.ge.f32.partialorder %v1045_v30, 0.0  ;;  %v774_v38 = vmul.f32 0.2, %v1045_v30  ;;  %vm758_vm5 = vcmp.ge.f32.partialorder %v1061_v31, 0.0  ;;  %v790_v39 = vmul.f32 0.2, %v1061_v31 }
  0xf3   : > { %v516_v36 = vpop.f32.mrf.mxu0  ;;  %v580_v37 = vpop.f32.mrf.mxu1  ;;  %v803_v40 = vsel %vm739_vm2, %v513_v26, %v771_v34  ;;  %v819_v41 = vsel %vm755_vm3, %v577_v27, %v787_v35 }
  0xf4   : > { %835 = vst [vmem:[%s1248_s9] sm:$0xff] %v803_v40  ;;  %851 = vst [vmem:[%s1248_s9 + $0x80] sm:$0xff] %v819_v41  ;;  %v806_v44 = vsel %vm742_vm4, %v1045_v30, %v774_v38  ;;  %v822_v45 = vsel %vm758_vm5, %v1061_v31, %v790_v39  ;;  %vm740_vm6 = vcmp.ge.f32.partialorder %v516_v36, 0.0  ;;  %v772_v46 = vmul.f32 0.2, %v516_v36 }
  0xf5   : > { %v1048_v42 = vpop.f32.mrf.mxu0  ;;  %v1064_v43 = vpop.f32.mrf.mxu1  ;;  %838 = vst [vmem:[%s1248_s9 + $0x18] sm:$0xff] %v806_v44  ;;  %854 = vst [vmem:[%s1248_s9 + $0x98] sm:$0xff] %v822_v45  ;;  %vm756_vm7 = vcmp.ge.f32.partialorder %v580_v37, 0.0  ;;  %v788_v47 = vmul.f32 0.2, %v580_v37 }
  0xf6   : > { %vm745_vm8 = vcmp.ge.f32.partialorder %v1048_v42, 0.0  ;;  %v777_v50 = vmul.f32 0.2, %v1048_v42  ;;  %vm761_vm9 = vcmp.ge.f32.partialorder %v1064_v43, 0.0  ;;  %v793_v51 = vmul.f32 0.2, %v1064_v43 }
  0xf7   : > { %v529_v48 = vpop.f32.mrf.mxu0  ;;  %v593_v49 = vpop.f32.mrf.mxu1  ;;  %v804_v52 = vsel %vm740_vm6, %v516_v36, %v772_v46  ;;  %v820_v53 = vsel %vm756_vm7, %v580_v37, %v788_v47 }
  0xf8   : > { %836 = vst [vmem:[%s1248_s9 + $0x8] sm:$0xff] %v804_v52  ;;  %852 = vst [vmem:[%s1248_s9 + $0x88] sm:$0xff] %v820_v53  ;;  %v809_v56 = vsel %vm745_vm8, %v1048_v42, %v777_v50  ;;  %v825_v57 = vsel %vm761_vm9, %v1064_v43, %v793_v51  ;;  %vm743_vm10 = vcmp.ge.f32.partialorder %v529_v48, 0.0  ;;  %v775_v58 = vmul.f32 0.2, %v529_v48 }
  0xf9   : > { %v1049_v54 = vpop.f32.mrf.mxu0  ;;  %v1065_v55 = vpop.f32.mrf.mxu1  ;;  %841 = vst [vmem:[%s1248_s9 + $0x30] sm:$0xff] %v809_v56  ;;  %857 = vst [vmem:[%s1248_s9 + $0xb0] sm:$0xff] %v825_v57  ;;  %vm759_vm11 = vcmp.ge.f32.partialorder %v593_v49, 0.0  ;;  %v791_v59 = vmul.f32 0.2, %v593_v49 }
  0xfa   : > { %vm746_vm12 = vcmp.ge.f32.partialorder %v1049_v54, 0.0  ;;  %v778_v62 = vmul.f32 0.2, %v1049_v54  ;;  %vm762_vm13 = vcmp.ge.f32.partialorder %v1065_v55, 0.0  ;;  %v794_v63 = vmul.f32 0.2, %v1065_v55 }
  0xfb   : > { %v532_v60 = vpop.f32.mrf.mxu0  ;;  %v596_v61 = vpop.f32.mrf.mxu1  ;;  %v807_v0 = vsel %vm743_vm10, %v529_v48, %v775_v58  ;;  %v823_v1 = vsel %vm759_vm11, %v593_v49, %v791_v59 }
  0xfc   : > { %839 = vst [vmem:[%s1248_s9 + $0x20] sm:$0xff] %v807_v0  ;;  %855 = vst [vmem:[%s1248_s9 + $0xa0] sm:$0xff] %v823_v1  ;;  %v810_v4 = vsel %vm746_vm12, %v1049_v54, %v778_v62  ;;  %v826_v5 = vsel %vm762_vm13, %v1065_v55, %v794_v63  ;;  %vm744_vm14 = vcmp.ge.f32.partialorder %v532_v60, 0.0  ;;  %v776_v6 = vmul.f32 0.2, %v532_v60 }
  0xfd   : > { %v1052_v2 = vpop.f32.mrf.mxu0  ;;  %v1068_v3 = vpop.f32.mrf.mxu1  ;;  %842 = vst [vmem:[%s1248_s9 + $0x38] sm:$0xff] %v810_v4  ;;  %858 = vst [vmem:[%s1248_s9 + $0xb8] sm:$0xff] %v826_v5  ;;  %vm760_vm15 = vcmp.ge.f32.partialorder %v596_v61, 0.0  ;;  %v792_v7 = vmul.f32 0.2, %v596_v61 }
  0xfe   : > { %vm749_vm0 = vcmp.ge.f32.partialorder %v1052_v2, 0.0  ;;  %v781_v10 = vmul.f32 0.2, %v1052_v2  ;;  %vm765_vm1 = vcmp.ge.f32.partialorder %v1068_v3, 0.0  ;;  %v797_v11 = vmul.f32 0.2, %v1068_v3 }
  0xff   : > { %v545_v8 = vpop.f32.mrf.mxu0  ;;  %v609_v9 = vpop.f32.mrf.mxu1  ;;  %v808_v12 = vsel %vm744_vm14, %v532_v60, %v776_v6  ;;  %v824_v13 = vsel %vm760_vm15, %v596_v61, %v792_v7 }
 0x100   : > { %840 = vst [vmem:[%s1248_s9 + $0x28] sm:$0xff] %v808_v12  ;;  %856 = vst [vmem:[%s1248_s9 + $0xa8] sm:$0xff] %v824_v13  ;;  %v813_v16 = vsel %vm749_vm0, %v1052_v2, %v781_v10  ;;  %v829_v17 = vsel %vm765_vm1, %v1068_v3, %v797_v11  ;;  %vm747_vm2 = vcmp.ge.f32.partialorder %v545_v8, 0.0  ;;  %v779_v18 = vmul.f32 0.2, %v545_v8 }
 0x101   : > { %v1053_v14 = vpop.f32.mrf.mxu0  ;;  %v1069_v15 = vpop.f32.mrf.mxu1  ;;  %845 = vst [vmem:[%s1248_s9 + $0x50] sm:$0xff] %v813_v16  ;;  %861 = vst [vmem:[%s1248_s9 + $0xd0] sm:$0xff] %v829_v17  ;;  %vm763_vm3 = vcmp.ge.f32.partialorder %v609_v9, 0.0  ;;  %v795_v19 = vmul.f32 0.2, %v609_v9 }
 0x102   : > { %vm750_vm4 = vcmp.ge.f32.partialorder %v1053_v14, 0.0  ;;  %v782_v22 = vmul.f32 0.2, %v1053_v14  ;;  %vm766_vm5 = vcmp.ge.f32.partialorder %v1069_v15, 0.0  ;;  %v798_v23 = vmul.f32 0.2, %v1069_v15 }
 0x103   : > { %v548_v20 = vpop.f32.mrf.mxu0  ;;  %v612_v21 = vpop.f32.mrf.mxu1  ;;  %v811_v24 = vsel %vm747_vm2, %v545_v8, %v779_v18  ;;  %v827_v25 = vsel %vm763_vm3, %v609_v9, %v795_v19 }
 0x104   : > { %843 = vst [vmem:[%s1248_s9 + $0x40] sm:$0xff] %v811_v24  ;;  %859 = vst [vmem:[%s1248_s9 + $0xc0] sm:$0xff] %v827_v25  ;;  %v814_v28 = vsel %vm750_vm4, %v1053_v14, %v782_v22  ;;  %v830_v29 = vsel %vm766_vm5, %v1069_v15, %v798_v23  ;;  %vm748_vm6 = vcmp.ge.f32.partialorder %v548_v20, 0.0  ;;  %v780_v30 = vmul.f32 0.2, %v548_v20 }
 0x105   : > { %v1056_v26 = vpop.f32.mrf.mxu0  ;;  %v1072_v27 = vpop.f32.mrf.mxu1  ;;  %846 = vst [vmem:[%s1248_s9 + $0x58] sm:$0xff] %v814_v28  ;;  %862 = vst [vmem:[%s1248_s9 + $0xd8] sm:$0xff] %v830_v29  ;;  %vm764_vm7 = vcmp.ge.f32.partialorder %v612_v21, 0.0  ;;  %v796_v31 = vmul.f32 0.2, %v612_v21 }
 0x106   : > { %vm753_vm8 = vcmp.ge.f32.partialorder %v1056_v26, 0.0  ;;  %v785_v34 = vmul.f32 0.2, %v1056_v26  ;;  %vm769_vm9 = vcmp.ge.f32.partialorder %v1072_v27, 0.0  ;;  %v801_v35 = vmul.f32 0.2, %v1072_v27 }
 0x107   : > { %v561_v32 = vpop.f32.mrf.mxu0  ;;  %v625_v33 = vpop.f32.mrf.mxu1  ;;  %v812_v36 = vsel %vm748_vm6, %v548_v20, %v780_v30  ;;  %v828_v37 = vsel %vm764_vm7, %v612_v21, %v796_v31 }
 0x108   : > { %844 = vst [vmem:[%s1248_s9 + $0x48] sm:$0xff] %v812_v36  ;;  %860 = vst [vmem:[%s1248_s9 + $0xc8] sm:$0xff] %v828_v37  ;;  %v817_v40 = vsel %vm753_vm8, %v1056_v26, %v785_v34  ;;  %v833_v41 = vsel %vm769_vm9, %v1072_v27, %v801_v35  ;;  %vm751_vm10 = vcmp.ge.f32.partialorder %v561_v32, 0.0  ;;  %v783_v42 = vmul.f32 0.2, %v561_v32 }
 0x109   : > { %v1057_v38 = vpop.f32.mrf.mxu0  ;;  %v1073_v39 = vpop.f32.mrf.mxu1  ;;  %849 = vst [vmem:[%s1248_s9 + $0x70] sm:$0xff] %v817_v40  ;;  %865 = vst [vmem:[%s1248_s9 + $0xf0] sm:$0xff] %v833_v41  ;;  %vm767_vm11 = vcmp.ge.f32.partialorder %v625_v33, 0.0  ;;  %v799_v43 = vmul.f32 0.2, %v625_v33 }
 0x10a   : > { %vm754_vm12 = vcmp.ge.f32.partialorder %v1057_v38, 0.0  ;;  %v786_v46 = vmul.f32 0.2, %v1057_v38  ;;  %vm770_vm13 = vcmp.ge.f32.partialorder %v1073_v39, 0.0  ;;  %v802_v47 = vmul.f32 0.2, %v1073_v39 }
 0x10b   : > { %v564_v44 = vpop.f32.mrf.mxu0  ;;  %v628_v45 = vpop.f32.mrf.mxu1  ;;  %v815_v48 = vsel %vm751_vm10, %v561_v32, %v783_v42  ;;  %v831_v49 = vsel %vm767_vm11, %v625_v33, %v799_v43 }
 0x10c   : > { %847 = vst [vmem:[%s1248_s9 + $0x60] sm:$0xff] %v815_v48  ;;  %863 = vst [vmem:[%s1248_s9 + $0xe0] sm:$0xff] %v831_v49  ;;  %v818_v50 = vsel %vm754_vm12, %v1057_v38, %v786_v46  ;;  %v834_v51 = vsel %vm770_vm13, %v1073_v39, %v802_v47  ;;  %vm752_vm14 = vcmp.ge.f32.partialorder %v564_v44, 0.0  ;;  %v784_v52 = vmul.f32 0.2, %v564_v44 }
 0x10d   : > { %850 = vst [vmem:[%s1248_s9 + $0x78] sm:$0xff] %v818_v50  ;;  %866 = vst [vmem:[%s1248_s9 + $0xf8] sm:$0xff] %v834_v51  ;;  %vm768_vm15 = vcmp.ge.f32.partialorder %v628_v45, 0.0  ;;  %v800_v53 = vmul.f32 0.2, %v628_v45 }
 0x10e   : > { %v816_v54 = vsel %vm752_vm14, %v564_v44, %v784_v52 }
 0x10f   : > { %v832_v55 = vsel %vm768_vm15, %v628_v45, %v800_v53  ;;  %848 = vst [vmem:[%s1248_s9 + $0x68] sm:$0xff] %v816_v54 }
 0x110   : > { %864 = vst [vmem:[%s1248_s9 + $0xe8] sm:$0xff] %v832_v55 }
 0x111 PF: > { %s12_s11 = sadd.s32 1, %s1161_s11   ;;  %s1294_s9 = smov %s1157_s10 }
 0x112   : > { %p9_p5 = scmp.ge.s32.totalorder %s12_s11, 10   ;;  %s1295_s10 = smov %s1297_s12 }
 0x114   :  { %11 = sbr.rel (!%p9_p5) target bundleno = 2 (0x2), region = 69 }

// kernel: discriminator_forward.13
= control target key start
LH: loop header
LB: loop body
LE: loop exit
PB: predicated region body
PF: predicated region fallthrough
CT: control target
= control target key end

     0   :  { %v297_v0 = vmov 0.0   ;;  %s523_s0 = inlined_call_operand.vmem [shape: f32[512,128], index: 0, kind: input, shape index: {}]   ;;  %s524_s1 = inlined_call_operand.vmem [shape: f32[1,128], index: 1, kind: output, shape index: {0}]   ;;  %s525_s2 = inlined_call_operand.vmem [shape: f32[1,128], index: 2, kind: output, shape index: {1}]  }
   0x1   :  { %14 = vst [vmem:[%s524_s1] sm:$0x1] %v297_v0  ;;  %15 = vst [vmem:[%s525_s2] sm:$0x1] %v297_v0  ;;  %v16_v1 = vld [vmem:[%s523_s0] sm:$0xff]  ;;  %v17_v2 = vld [vmem:[%s523_s0 + $0x8] sm:$0xff] }
   0x2   :  { %v18_v3 = vld [vmem:[%s523_s0 + $0x10] sm:$0xff]  ;;  %v19_v4 = vld [vmem:[%s523_s0 + $0x18] sm:$0xff]  ;;  %v81_v5 = vadd.f32 %v17_v2, %v16_v1  ;;  %v153_v6 = vmul.f32 %v16_v1, %v16_v1  ;;  %v154_v7 = vmul.f32 %v17_v2, %v17_v2  ;;  %v20_v9 = vld [vmem:[%s523_s0 + $0x20] sm:$0xff] }
   0x3   :  { %v155_v8 = vmul.f32 %v18_v3, %v18_v3  ;;  %v156_v11 = vmul.f32 %v19_v4, %v19_v4  ;;  %v21_v13 = vld [vmem:[%s523_s0 + $0x28] sm:$0xff]  ;;  %v157_v15 = vmul.f32 %v20_v9, %v20_v9  ;;  %v22_v17 = vld [vmem:[%s523_s0 + $0x30] sm:$0xff]  ;;  %v23_v21 = vld [vmem:[%s523_s0 + $0x38] sm:$0xff] }
   0x4   :  { %v82_v10 = vadd.f32 %v81_v5, %v18_v3  ;;  %v217_v12 = vadd.f32 %v154_v7, %v153_v6  ;;  %v158_v19 = vmul.f32 %v21_v13, %v21_v13  ;;  %v159_v23 = vmul.f32 %v22_v17, %v22_v17  ;;  %v24_v25 = vld [vmem:[%s523_s0 + $0x40] sm:$0xff]  ;;  %v25_v29 = vld [vmem:[%s523_s0 + $0x48] sm:$0xff]  ;;  %v26_v33 = vld [vmem:[%s523_s0 + $0x50] sm:$0xff] }
   0x5   :  { %v160_v27 = vmul.f32 %v23_v21, %v23_v21  ;;  %v161_v31 = vmul.f32 %v24_v25, %v24_v25  ;;  %v162_v35 = vmul.f32 %v25_v29, %v25_v29  ;;  %v27_v37 = vld [vmem:[%s523_s0 + $0x58] sm:$0xff]  ;;  %v163_v39 = vmul.f32 %v26_v33, %v26_v33  ;;  %v28_v41 = vld [vmem:[%s523_s0 + $0x60] sm:$0xff]  ;;  %v29_v45 = vld [vmem:[%s523_s0 + $0x68] sm:$0xff] }
   0x6   :  { %v83_v14 = vadd.f32 %v82_v10, %v19_v4  ;;  %v218_v16 = vadd.f32 %v217_v12, %v155_v8  ;;  %v164_v43 = vmul.f32 %v27_v37, %v27_v37  ;;  %v165_v47 = vmul.f32 %v28_v41, %v28_v41  ;;  %v30_v49 = vld [vmem:[%s523_s0 + $0x70] sm:$0xff]  ;;  %v31_v53 = vld [vmem:[%s523_s0 + $0x78] sm:$0xff]  ;;  %v32_v57 = vld [vmem:[%s523_s0 + $0x80] sm:$0xff] }
   0x7   :  { %v166_v51 = vmul.f32 %v29_v45, %v29_v45  ;;  %v167_v55 = vmul.f32 %v30_v49, %v30_v49  ;;  %v168_v59 = vmul.f32 %v31_v53, %v31_v53  ;;  %v33_v61 = vld [vmem:[%s523_s0 + $0x88] sm:$0xff]  ;;  %v169_v63 = vmul.f32 %v32_v57, %v32_v57  ;;  %v34_v1 = vld [vmem:[%s523_s0 + $0x90] sm:$0xff]  ;;  %v35_v5 = vld [vmem:[%s523_s0 + $0x98] sm:$0xff] }
   0x8   :  { %v84_v18 = vadd.f32 %v83_v14, %v20_v9  ;;  %v219_v20 = vadd.f32 %v218_v16, %v156_v11  ;;  %v170_v3 = vmul.f32 %v33_v61, %v33_v61  ;;  %v171_v7 = vmul.f32 %v34_v1, %v34_v1  ;;  %v36_v9 = vld [vmem:[%s523_s0 + $0xa0] sm:$0xff] }
   0x9   :  { %v172_v11 = vmul.f32 %v35_v5, %v35_v5 }
   0xa   :  { %v85_v22 = vadd.f32 %v84_v18, %v21_v13  ;;  %v220_v24 = vadd.f32 %v219_v20, %v157_v15  ;;  %v37_v13 = vld [vmem:[%s523_s0 + $0xa8] sm:$0xff]  ;;  %v173_v15 = vmul.f32 %v36_v9, %v36_v9 }
   0xc   :  { %v86_v26 = vadd.f32 %v85_v22, %v22_v17  ;;  %v221_v28 = vadd.f32 %v220_v24, %v158_v19  ;;  %v38_v17 = vld [vmem:[%s523_s0 + $0xb0] sm:$0xff]  ;;  %v174_v19 = vmul.f32 %v37_v13, %v37_v13 }
   0xe   :  { %v87_v30 = vadd.f32 %v86_v26, %v23_v21  ;;  %v222_v32 = vadd.f32 %v221_v28, %v159_v23  ;;  %v39_v21 = vld [vmem:[%s523_s0 + $0xb8] sm:$0xff]  ;;  %v175_v23 = vmul.f32 %v38_v17, %v38_v17 }
  0x10   :  { %v88_v34 = vadd.f32 %v87_v30, %v24_v25  ;;  %v223_v36 = vadd.f32 %v222_v32, %v160_v27  ;;  %v40_v25 = vld [vmem:[%s523_s0 + $0xc0] sm:$0xff]  ;;  %v176_v27 = vmul.f32 %v39_v21, %v39_v21 }
  0x12   :  { %v89_v38 = vadd.f32 %v88_v34, %v25_v29  ;;  %v224_v40 = vadd.f32 %v223_v36, %v161_v31  ;;  %v41_v29 = vld [vmem:[%s523_s0 + $0xc8] sm:$0xff]  ;;  %v177_v31 = vmul.f32 %v40_v25, %v40_v25 }
  0x14   :  { %v90_v42 = vadd.f32 %v89_v38, %v26_v33  ;;  %v225_v44 = vadd.f32 %v224_v40, %v162_v35  ;;  %v42_v33 = vld [vmem:[%s523_s0 + $0xd0] sm:$0xff]  ;;  %v178_v35 = vmul.f32 %v41_v29, %v41_v29 }
  0x16   :  { %v91_v46 = vadd.f32 %v90_v42, %v27_v37  ;;  %v226_v48 = vadd.f32 %v225_v44, %v163_v39  ;;  %v43_v37 = vld [vmem:[%s523_s0 + $0xd8] sm:$0xff]  ;;  %v179_v39 = vmul.f32 %v42_v33, %v42_v33 }
  0x18   :  { %v92_v50 = vadd.f32 %v91_v46, %v28_v41  ;;  %v227_v52 = vadd.f32 %v226_v48, %v164_v43  ;;  %v44_v41 = vld [vmem:[%s523_s0 + $0xe0] sm:$0xff]  ;;  %v180_v43 = vmul.f32 %v43_v37, %v43_v37 }
  0x1a   :  { %v93_v54 = vadd.f32 %v92_v50, %v29_v45  ;;  %v228_v56 = vadd.f32 %v227_v52, %v165_v47  ;;  %v45_v45 = vld [vmem:[%s523_s0 + $0xe8] sm:$0xff]  ;;  %v181_v47 = vmul.f32 %v44_v41, %v44_v41 }
  0x1c   :  { %v94_v58 = vadd.f32 %v93_v54, %v30_v49  ;;  %v229_v60 = vadd.f32 %v228_v56, %v166_v51  ;;  %v46_v49 = vld [vmem:[%s523_s0 + $0xf0] sm:$0xff]  ;;  %v182_v51 = vmul.f32 %v45_v45, %v45_v45 }
  0x1e   :  { %v95_v62 = vadd.f32 %v94_v58, %v31_v53  ;;  %v230_v0 = vadd.f32 %v229_v60, %v167_v55  ;;  %v47_v53 = vld [vmem:[%s523_s0 + $0xf8] sm:$0xff]  ;;  %v183_v55 = vmul.f32 %v46_v49, %v46_v49 }
  0x20   :  { %v96_v2 = vadd.f32 %v95_v62, %v32_v57  ;;  %v231_v4 = vadd.f32 %v230_v0, %v168_v59  ;;  %v48_v57 = vld [vmem:[%s523_s0 + $0x100] sm:$0xff]  ;;  %v184_v59 = vmul.f32 %v47_v53, %v47_v53 }
  0x22   :  { %v97_v6 = vadd.f32 %v96_v2, %v33_v61  ;;  %v232_v8 = vadd.f32 %v231_v4, %v169_v63  ;;  %v49_v61 = vld [vmem:[%s523_s0 + $0x108] sm:$0xff]  ;;  %v185_v63 = vmul.f32 %v48_v57, %v48_v57 }
  0x24   :  { %v98_v10 = vadd.f32 %v97_v6, %v34_v1  ;;  %v233_v12 = vadd.f32 %v232_v8, %v170_v3  ;;  %v50_v1 = vld [vmem:[%s523_s0 + $0x110] sm:$0xff]  ;;  %v186_v3 = vmul.f32 %v49_v61, %v49_v61 }
  0x26   :  { %v99_v14 = vadd.f32 %v98_v10, %v35_v5  ;;  %v234_v16 = vadd.f32 %v233_v12, %v171_v7  ;;  %v51_v5 = vld [vmem:[%s523_s0 + $0x118] sm:$0xff]  ;;  %v187_v7 = vmul.f32 %v50_v1, %v50_v1 }
  0x28   :  { %v100_v18 = vadd.f32 %v99_v14, %v36_v9  ;;  %v235_v20 = vadd.f32 %v234_v16, %v172_v11  ;;  %v52_v9 = vld [vmem:[%s523_s0 + $0x120] sm:$0xff]  ;;  %v188_v11 = vmul.f32 %v51_v5, %v51_v5 }
  0x2a   :  { %v101_v22 = vadd.f32 %v100_v18, %v37_v13  ;;  %v236_v24 = vadd.f32 %v235_v20, %v173_v15  ;;  %v53_v13 = vld [vmem:[%s523_s0 + $0x128] sm:$0xff]  ;;  %v189_v15 = vmul.f32 %v52_v9, %v52_v9 }
  0x2c   :  { %v102_v26 = vadd.f32 %v101_v22, %v38_v17  ;;  %v237_v28 = vadd.f32 %v236_v24, %v174_v19  ;;  %v54_v17 = vld [vmem:[%s523_s0 + $0x130] sm:$0xff]  ;;  %v190_v19 = vmul.f32 %v53_v13, %v53_v13 }
  0x2e   :  { %v103_v30 = vadd.f32 %v102_v26, %v39_v21  ;;  %v238_v32 = vadd.f32 %v237_v28, %v175_v23  ;;  %v55_v21 = vld [vmem:[%s523_s0 + $0x138] sm:$0xff]  ;;  %v191_v23 = vmul.f32 %v54_v17, %v54_v17 }
  0x30   :  { %v104_v34 = vadd.f32 %v103_v30, %v40_v25  ;;  %v239_v36 = vadd.f32 %v238_v32, %v176_v27  ;;  %v56_v25 = vld [vmem:[%s523_s0 + $0x140] sm:$0xff]  ;;  %v192_v27 = vmul.f32 %v55_v21, %v55_v21 }
  0x32   :  { %v105_v38 = vadd.f32 %v104_v34, %v41_v29  ;;  %v240_v40 = vadd.f32 %v239_v36, %v177_v31  ;;  %v57_v29 = vld [vmem:[%s523_s0 + $0x148] sm:$0xff]  ;;  %v193_v31 = vmul.f32 %v56_v25, %v56_v25 }
  0x34   :  { %v106_v42 = vadd.f32 %v105_v38, %v42_v33  ;;  %v241_v44 = vadd.f32 %v240_v40, %v178_v35  ;;  %v58_v33 = vld [vmem:[%s523_s0 + $0x150] sm:$0xff]  ;;  %v194_v35 = vmul.f32 %v57_v29, %v57_v29 }
  0x36   :  { %v107_v46 = vadd.f32 %v106_v42, %v43_v37  ;;  %v242_v48 = vadd.f32 %v241_v44, %v179_v39  ;;  %v59_v37 = vld [vmem:[%s523_s0 + $0x158] sm:$0xff]  ;;  %v195_v39 = vmul.f32 %v58_v33, %v58_v33 }
  0x38   :  { %v108_v50 = vadd.f32 %v107_v46, %v44_v41  ;;  %v243_v52 = vadd.f32 %v242_v48, %v180_v43  ;;  %v60_v41 = vld [vmem:[%s523_s0 + $0x160] sm:$0xff]  ;;  %v196_v43 = vmul.f32 %v59_v37, %v59_v37 }
  0x3a   :  { %v109_v54 = vadd.f32 %v108_v50, %v45_v45  ;;  %v244_v56 = vadd.f32 %v243_v52, %v181_v47  ;;  %v61_v45 = vld [vmem:[%s523_s0 + $0x168] sm:$0xff]  ;;  %v197_v47 = vmul.f32 %v60_v41, %v60_v41 }
  0x3c   :  { %v110_v58 = vadd.f32 %v109_v54, %v46_v49  ;;  %v245_v60 = vadd.f32 %v244_v56, %v182_v51  ;;  %v62_v49 = vld [vmem:[%s523_s0 + $0x170] sm:$0xff]  ;;  %v198_v51 = vmul.f32 %v61_v45, %v61_v45 }
  0x3e   :  { %v111_v62 = vadd.f32 %v110_v58, %v47_v53  ;;  %v246_v0 = vadd.f32 %v245_v60, %v183_v55  ;;  %v63_v53 = vld [vmem:[%s523_s0 + $0x178] sm:$0xff]  ;;  %v199_v55 = vmul.f32 %v62_v49, %v62_v49 }
  0x40   :  { %v112_v2 = vadd.f32 %v111_v62, %v48_v57  ;;  %v247_v4 = vadd.f32 %v246_v0, %v184_v59  ;;  %v64_v57 = vld [vmem:[%s523_s0 + $0x180] sm:$0xff]  ;;  %v200_v59 = vmul.f32 %v63_v53, %v63_v53 }
  0x42   :  { %v113_v6 = vadd.f32 %v112_v2, %v49_v61  ;;  %v248_v8 = vadd.f32 %v247_v4, %v185_v63  ;;  %v65_v61 = vld [vmem:[%s523_s0 + $0x188] sm:$0xff]  ;;  %v201_v63 = vmul.f32 %v64_v57, %v64_v57 }
  0x44   :  { %v114_v10 = vadd.f32 %v113_v6, %v50_v1  ;;  %v249_v12 = vadd.f32 %v248_v8, %v186_v3  ;;  %v66_v1 = vld [vmem:[%s523_s0 + $0x190] sm:$0xff]  ;;  %v202_v3 = vmul.f32 %v65_v61, %v65_v61 }
  0x46   :  { %v115_v14 = vadd.f32 %v114_v10, %v51_v5  ;;  %v250_v16 = vadd.f32 %v249_v12, %v187_v7  ;;  %v67_v5 = vld [vmem:[%s523_s0 + $0x198] sm:$0xff]  ;;  %v203_v7 = vmul.f32 %v66_v1, %v66_v1 }
  0x48   :  { %v116_v18 = vadd.f32 %v115_v14, %v52_v9  ;;  %v251_v20 = vadd.f32 %v250_v16, %v188_v11  ;;  %v68_v9 = vld [vmem:[%s523_s0 + $0x1a0] sm:$0xff]  ;;  %v204_v11 = vmul.f32 %v67_v5, %v67_v5 }
  0x4a   :  { %v117_v22 = vadd.f32 %v116_v18, %v53_v13  ;;  %v252_v24 = vadd.f32 %v251_v20, %v189_v15  ;;  %v69_v13 = vld [vmem:[%s523_s0 + $0x1a8] sm:$0xff]  ;;  %v205_v15 = vmul.f32 %v68_v9, %v68_v9 }
  0x4c   :  { %v118_v26 = vadd.f32 %v117_v22, %v54_v17  ;;  %v253_v28 = vadd.f32 %v252_v24, %v190_v19  ;;  %v70_v17 = vld [vmem:[%s523_s0 + $0x1b0] sm:$0xff]  ;;  %v206_v19 = vmul.f32 %v69_v13, %v69_v13 }
  0x4e   :  { %v119_v30 = vadd.f32 %v118_v26, %v55_v21  ;;  %v254_v32 = vadd.f32 %v253_v28, %v191_v23  ;;  %v71_v21 = vld [vmem:[%s523_s0 + $0x1b8] sm:$0xff]  ;;  %v207_v23 = vmul.f32 %v70_v17, %v70_v17 }
  0x50   :  { %v120_v34 = vadd.f32 %v119_v30, %v56_v25  ;;  %v255_v36 = vadd.f32 %v254_v32, %v192_v27  ;;  %v72_v25 = vld [vmem:[%s523_s0 + $0x1c0] sm:$0xff]  ;;  %v208_v27 = vmul.f32 %v71_v21, %v71_v21 }
  0x52   :  { %v121_v38 = vadd.f32 %v120_v34, %v57_v29  ;;  %v256_v40 = vadd.f32 %v255_v36, %v193_v31  ;;  %v73_v29 = vld [vmem:[%s523_s0 + $0x1c8] sm:$0xff]  ;;  %v209_v31 = vmul.f32 %v72_v25, %v72_v25 }
  0x54   :  { %v122_v42 = vadd.f32 %v121_v38, %v58_v33  ;;  %v257_v44 = vadd.f32 %v256_v40, %v194_v35  ;;  %v74_v33 = vld [vmem:[%s523_s0 + $0x1d0] sm:$0xff]  ;;  %v210_v35 = vmul.f32 %v73_v29, %v73_v29 }
  0x56   :  { %v123_v46 = vadd.f32 %v122_v42, %v59_v37  ;;  %v258_v48 = vadd.f32 %v257_v44, %v195_v39  ;;  %v75_v37 = vld [vmem:[%s523_s0 + $0x1d8] sm:$0xff]  ;;  %v211_v39 = vmul.f32 %v74_v33, %v74_v33 }
  0x58   :  { %v124_v50 = vadd.f32 %v123_v46, %v60_v41  ;;  %v259_v52 = vadd.f32 %v258_v48, %v196_v43  ;;  %v76_v41 = vld [vmem:[%s523_s0 + $0x1e0] sm:$0xff]  ;;  %v212_v43 = vmul.f32 %v75_v37, %v75_v37 }
  0x5a   :  { %v125_v54 = vadd.f32 %v124_v50, %v61_v45  ;;  %v260_v56 = vadd.f32 %v259_v52, %v197_v47  ;;  %v77_v45 = vld [vmem:[%s523_s0 + $0x1e8] sm:$0xff]  ;;  %v213_v47 = vmul.f32 %v76_v41, %v76_v41 }
  0x5c   :  { %v126_v58 = vadd.f32 %v125_v54, %v62_v49  ;;  %v261_v60 = vadd.f32 %v260_v56, %v198_v51  ;;  %v78_v49 = vld [vmem:[%s523_s0 + $0x1f0] sm:$0xff]  ;;  %v214_v51 = vmul.f32 %v77_v45, %v77_v45 }
  0x5e   :  { %v127_v62 = vadd.f32 %v126_v58, %v63_v53  ;;  %v262_v0 = vadd.f32 %v261_v60, %v199_v55  ;;  %v79_v53 = vld [vmem:[%s523_s0 + $0x1f8] sm:$0xff]  ;;  %v215_v55 = vmul.f32 %v78_v49, %v78_v49 }
  0x5f   :  { %v216_v58 = vmul.f32 %v79_v53, %v79_v53 }
  0x60   :  { %v128_v2 = vadd.f32 %v127_v62, %v64_v57  ;;  %v263_v4 = vadd.f32 %v262_v0, %v200_v59 }
  0x62   :  { %v129_v6 = vadd.f32 %v128_v2, %v65_v61  ;;  %v264_v8 = vadd.f32 %v263_v4, %v201_v63 }
  0x64   :  { %v130_v10 = vadd.f32 %v129_v6, %v66_v1  ;;  %v265_v12 = vadd.f32 %v264_v8, %v202_v3 }
  0x66   :  { %v131_v14 = vadd.f32 %v130_v10, %v67_v5  ;;  %v266_v16 = vadd.f32 %v265_v12, %v203_v7  ;;  %v80_v7 = vld [vmem:[%s524_s1] sm:$0x1] }
  0x67   :  { %v152_v12 = vld [vmem:[%s525_s2] sm:$0x1] }
  0x68   :  { %v132_v18 = vadd.f32 %v131_v14, %v68_v9  ;;  %v267_v20 = vadd.f32 %v266_v16, %v204_v11 }
  0x6a   :  { %v133_v22 = vadd.f32 %v132_v18, %v69_v13  ;;  %v268_v24 = vadd.f32 %v267_v20, %v205_v15 }
  0x6c   :  { %v134_v26 = vadd.f32 %v133_v22, %v70_v17  ;;  %v269_v28 = vadd.f32 %v268_v24, %v206_v19 }
  0x6e   :  { %v135_v30 = vadd.f32 %v134_v26, %v71_v21  ;;  %v270_v32 = vadd.f32 %v269_v28, %v207_v23 }
  0x70   :  { %v136_v34 = vadd.f32 %v135_v30, %v72_v25  ;;  %v271_v36 = vadd.f32 %v270_v32, %v208_v27 }
  0x72   :  { %v137_v38 = vadd.f32 %v136_v34, %v73_v29  ;;  %v272_v40 = vadd.f32 %v271_v36, %v209_v31 }
  0x74   :  { %v138_v42 = vadd.f32 %v137_v38, %v74_v33  ;;  %v273_v44 = vadd.f32 %v272_v40, %v210_v35 }
  0x76   :  { %v139_v46 = vadd.f32 %v138_v42, %v75_v37  ;;  %v274_v48 = vadd.f32 %v273_v44, %v211_v39 }
  0x78   :  { %v140_v50 = vadd.f32 %v139_v46, %v76_v41  ;;  %v275_v52 = vadd.f32 %v274_v48, %v212_v43 }
  0x7a   :  { %v141_v54 = vadd.f32 %v140_v50, %v77_v45  ;;  %v276_v56 = vadd.f32 %v275_v52, %v213_v47 }
  0x7c   :  { %v142_v57 = vadd.f32 %v141_v54, %v78_v49  ;;  %v277_v59 = vadd.f32 %v276_v56, %v214_v51 }
  0x7e   :  { %v143_v60 = vadd.f32 %v142_v57, %v79_v53  ;;  %v278_v61 = vadd.f32 %v277_v59, %v215_v55 }
  0x80   :  { %v144_v62 = vrot.slane %v143_v60, 4  ;;  %v279_v63 = vadd.f32 %v278_v61, %v216_v58 }
  0x82   :  { %v145_v0 = vadd.f32 %v144_v62, %v143_v60  ;;  %v280_v1 = vrot.slane %v279_v63, 4 }
  0x84   :  { %v146_v2 = vrot.slane %v145_v0, 2  ;;  %v281_v3 = vadd.f32 %v280_v1, %v279_v63 }
  0x86   :  { %v147_v4 = vadd.f32 %v146_v2, %v145_v0  ;;  %v282_v5 = vrot.slane %v281_v3, 2 }
  0x88   :  { %v148_v6 = vrot.slane %v147_v4, 1  ;;  %v283_v8 = vadd.f32 %v282_v5, %v281_v3 }
  0x8a   :  { %v149_v9 = vadd.f32 %v148_v6, %v147_v4  ;;  %v284_v10 = vrot.slane %v283_v8, 1 }
  0x8c   :  { %v150_v11 = vadd.f32 %v149_v9, %v80_v7  ;;  %v285_v13 = vadd.f32 %v284_v10, %v283_v8 }
  0x8e   :  { %151 = vst [vmem:[%s524_s1] sm:$0x1] %v150_v11  ;;  %v286_v14 = vadd.f32 %v285_v13, %v152_v12 }
  0x90   :  { %287 = vst [vmem:[%s525_s2] sm:$0x1] %v286_v14 }

// kernel: discriminator_forward.12
= control target key start
LH: loop header
LB: loop body
LE: loop exit
PB: predicated region body
PF: predicated region fallthrough
CT: control target
= control target key end

     0   :  { %s2154_s9 = smov 0   ;;  %s2156_s10 = smov 0   ;;  %s2577_s0 = inlined_call_operand.vmem [shape: bf16[512,1024], index: 0, kind: input, shape index: {}]   ;;  %s2578_s1 = inlined_call_operand.vmem [shape: bf16[1024,128], index: 1, kind: input, shape index: {}]   ;;  %s2579_s2 = inlined_call_operand.vmem [shape: f32[512,128], index: 2, kind: output, shape index: {}]  }
   0x1   :  { %s2158_s11 = smov 0   ;;  %s2160_s12 = smov 0  }
   0x2   :  { %s2162_s13 = smov 0   ;;  %s2164_s14 = smov 0  }
   0x3   :  { %s2166_s15 = smov 0  }
   0x4 LB: > { %s24_s16 = sadd.s32 1, %s2128_s13  ;;  %s31_s17 = sadd.s32 1, %s2132_s14  ;;  %s2136_s15 = sphi %s2166_s15, %s12_s15   ;;  %s2132_s14 = sphi %s2164_s14, %s2585_s14   ;;  %s2128_s13 = sphi %s2162_s13, %s2584_s13   ;;  %s2124_s12 = sphi %s2160_s12, %s2583_s12   ;;  %s2120_s11 = sphi %s2158_s11, %s2582_s11   ;;  %s2116_s10 = sphi %s2156_s10, %s2581_s10   ;;  %s2112_s9 = sphi %s2154_s9, %s2580_s9  }
   0x5   : > { %p25_p0 = scmp.ge.s32.totalorder %s24_s16, 2  ;;  %p47_p1 = scmp.ne.s32.totalorder %s2116_s10, %s2112_s9 }
   0x6   : > { %p48_p2 = scmp.eq.s32.totalorder %s2136_s15, 0  ;;  %s40_s21 = sadd.s32 1, %s2116_s10 }
   0x7   : > { %s2587_s16 = smov (%p25_p0, %s24_s16), 0  ;;  %s2589_s17 = smov (!%p25_p0, %s31_s17), %s2132_s14 }
   0x8   : > { %p49_p3 = por %p48_p2, %p47_p1  ;;  %p33_p4 = scmp.ge.s32.totalorder %s2589_s17, 2 }
   0x9   : > { %s36_s18 = ssub.s32 %s2128_s13, %s2587_s16  ;;  %p1561_p6 = scmp.ge.s32.totalorder %s2136_s15, 4 }
   0xa   : > { %s2591_s17 = smov (%p33_p4, %s2589_s17), 0 }
   0xb   : > { %s35_s19 = ssub.s32 %s2132_s14, %s2591_s17  ;;  %129 = sbr.rel (%p1561_p6) target bundleno = 55 (0x37), region = 16 }
   0xc   : > { %s37_s20 = sor.u32 %s36_s18, %s35_s19 }
   0xd   : > { %p38_p5 = scmp.eq.s32.totalorder %s37_s20, 0 }
   0xf   : > { %s2205_s22 = scalar_select %p38_p5, %s2116_s10, %s40_s21  }
  0x10   : > { %132 = sbr.rel (!%p49_p3) target bundleno = 55 (0x37), region = 20  ;;  %s134_s23 = sand.u32 (%p49_p3), 1, %s2116_s10  }
  0x11   : > { %s1564_s24 = sshll.u32 (%p49_p3), %s2128_s13, 2  ;;  %s1562_s25 = sshll.u32 (%p49_p3), %s134_s23, 9 }
  0x12   : > { %s1672_s26 = sshll.u32 (%p49_p3), %s2132_s14, 8  ;;  %s2219_s4 = scalar_lea.vmem (%p49_p3), [#allocation2], %s1562_s25 }
  0x13   : > { %s140_s27 = sadd.s32 (%p49_p3), %s1672_s26, %s1564_s24 }
  0x14   : > { %s1566_s28 = sshll.u32 (%p49_p3), %s140_s27, 2 }
  0x15   : > { %s2214_s3 = scalar_lea.vmem %s2577_s0, %s1566_s28 }
  0x16   : > { %v155_v0 = vld [vmem:[%s2214_s3] sm:$0xff]  ;;  %v157_v1 = vld [vmem:[%s2214_s3 + $0x8] sm:$0xff] }
  0x17   : > { %v159_v2 = vld [vmem:[%s2214_s3 + $0x20] sm:$0xff]  ;;  %156 = vst [vmem:[%s2219_s4] sm:$0xff] %v155_v0  ;;  %158 = vst [vmem:[%s2219_s4 + $0x8] sm:$0xff] %v157_v1  ;;  %v161_v3 = vld [vmem:[%s2214_s3 + $0x28] sm:$0xff] }
  0x18   : > { %160 = vst [vmem:[%s2219_s4 + $0x10] sm:$0xff] %v159_v2  ;;  %v163_v4 = vld [vmem:[%s2214_s3 + $0x40] sm:$0xff]  ;;  %v165_v5 = vld [vmem:[%s2214_s3 + $0x48] sm:$0xff]  ;;  %162 = vst [vmem:[%s2219_s4 + $0x18] sm:$0xff] %v161_v3 }
  0x19   : > { %164 = vst [vmem:[%s2219_s4 + $0x20] sm:$0xff] %v163_v4  ;;  %166 = vst [vmem:[%s2219_s4 + $0x28] sm:$0xff] %v165_v5  ;;  %v167_v6 = vld [vmem:[%s2214_s3 + $0x60] sm:$0xff]  ;;  %v169_v7 = vld [vmem:[%s2214_s3 + $0x68] sm:$0xff] }
  0x1a   : > { %v171_v8 = vld [vmem:[%s2214_s3 + $0x80] sm:$0xff]  ;;  %168 = vst [vmem:[%s2219_s4 + $0x30] sm:$0xff] %v167_v6  ;;  %170 = vst [vmem:[%s2219_s4 + $0x38] sm:$0xff] %v169_v7  ;;  %v173_v9 = vld [vmem:[%s2214_s3 + $0x88] sm:$0xff] }
  0x1b   : > { %172 = vst [vmem:[%s2219_s4 + $0x40] sm:$0xff] %v171_v8  ;;  %v175_v10 = vld [vmem:[%s2214_s3 + $0xa0] sm:$0xff]  ;;  %v177_v11 = vld [vmem:[%s2214_s3 + $0xa8] sm:$0xff]  ;;  %174 = vst [vmem:[%s2219_s4 + $0x48] sm:$0xff] %v173_v9 }
  0x1c   : > { %176 = vst [vmem:[%s2219_s4 + $0x50] sm:$0xff] %v175_v10  ;;  %178 = vst [vmem:[%s2219_s4 + $0x58] sm:$0xff] %v177_v11  ;;  %v179_v12 = vld [vmem:[%s2214_s3 + $0xc0] sm:$0xff]  ;;  %v181_v13 = vld [vmem:[%s2214_s3 + $0xc8] sm:$0xff] }
  0x1d   : > { %v183_v14 = vld [vmem:[%s2214_s3 + $0xe0] sm:$0xff]  ;;  %180 = vst [vmem:[%s2219_s4 + $0x60] sm:$0xff] %v179_v12  ;;  %182 = vst [vmem:[%s2219_s4 + $0x68] sm:$0xff] %v181_v13  ;;  %v185_v15 = vld [vmem:[%s2214_s3 + $0xe8] sm:$0xff] }
  0x1e   : > { %184 = vst [vmem:[%s2219_s4 + $0x70] sm:$0xff] %v183_v14  ;;  %v187_v16 = vld [vmem:[%s2214_s3 + $0x100] sm:$0xff]  ;;  %v189_v17 = vld [vmem:[%s2214_s3 + $0x108] sm:$0xff]  ;;  %186 = vst [vmem:[%s2219_s4 + $0x78] sm:$0xff] %v185_v15 }
  0x1f   : > { %188 = vst [vmem:[%s2219_s4 + $0x80] sm:$0xff] %v187_v16  ;;  %190 = vst [vmem:[%s2219_s4 + $0x88] sm:$0xff] %v189_v17  ;;  %v191_v18 = vld [vmem:[%s2214_s3 + $0x120] sm:$0xff]  ;;  %v193_v19 = vld [vmem:[%s2214_s3 + $0x128] sm:$0xff] }
  0x20   : > { %v195_v20 = vld [vmem:[%s2214_s3 + $0x140] sm:$0xff]  ;;  %192 = vst [vmem:[%s2219_s4 + $0x90] sm:$0xff] %v191_v18  ;;  %194 = vst [vmem:[%s2219_s4 + $0x98] sm:$0xff] %v193_v19  ;;  %v197_v21 = vld [vmem:[%s2214_s3 + $0x148] sm:$0xff] }
  0x21   : > { %196 = vst [vmem:[%s2219_s4 + $0xa0] sm:$0xff] %v195_v20  ;;  %v199_v22 = vld [vmem:[%s2214_s3 + $0x160] sm:$0xff]  ;;  %v201_v23 = vld [vmem:[%s2214_s3 + $0x168] sm:$0xff]  ;;  %198 = vst [vmem:[%s2219_s4 + $0xa8] sm:$0xff] %v197_v21 }
  0x22   : > { %200 = vst [vmem:[%s2219_s4 + $0xb0] sm:$0xff] %v199_v22  ;;  %202 = vst [vmem:[%s2219_s4 + $0xb8] sm:$0xff] %v201_v23  ;;  %v203_v24 = vld [vmem:[%s2214_s3 + $0x180] sm:$0xff]  ;;  %v205_v25 = vld [vmem:[%s2214_s3 + $0x188] sm:$0xff] }
  0x23   : > { %v207_v26 = vld [vmem:[%s2214_s3 + $0x1a0] sm:$0xff]  ;;  %204 = vst [vmem:[%s2219_s4 + $0xc0] sm:$0xff] %v203_v24  ;;  %206 = vst [vmem:[%s2219_s4 + $0xc8] sm:$0xff] %v205_v25  ;;  %v209_v27 = vld [vmem:[%s2214_s3 + $0x1a8] sm:$0xff] }
  0x24   : > { %208 = vst [vmem:[%s2219_s4 + $0xd0] sm:$0xff] %v207_v26  ;;  %v211_v28 = vld [vmem:[%s2214_s3 + $0x1c0] sm:$0xff]  ;;  %v213_v29 = vld [vmem:[%s2214_s3 + $0x1c8] sm:$0xff]  ;;  %210 = vst [vmem:[%s2219_s4 + $0xd8] sm:$0xff] %v209_v27 }
  0x25   : > { %212 = vst [vmem:[%s2219_s4 + $0xe0] sm:$0xff] %v211_v28  ;;  %214 = vst [vmem:[%s2219_s4 + $0xe8] sm:$0xff] %v213_v29  ;;  %v215_v30 = vld [vmem:[%s2214_s3 + $0x1e0] sm:$0xff]  ;;  %v217_v31 = vld [vmem:[%s2214_s3 + $0x1e8] sm:$0xff] }
  0x26   : > { %v219_v32 = vld [vmem:[%s2214_s3 + $0x200] sm:$0xff]  ;;  %216 = vst [vmem:[%s2219_s4 + $0xf0] sm:$0xff] %v215_v30  ;;  %218 = vst [vmem:[%s2219_s4 + $0xf8] sm:$0xff] %v217_v31  ;;  %v221_v33 = vld [vmem:[%s2214_s3 + $0x208] sm:$0xff] }
  0x27   : > { %220 = vst [vmem:[%s2219_s4 + $0x100] sm:$0xff] %v219_v32  ;;  %v223_v34 = vld [vmem:[%s2214_s3 + $0x220] sm:$0xff]  ;;  %v225_v35 = vld [vmem:[%s2214_s3 + $0x228] sm:$0xff]  ;;  %222 = vst [vmem:[%s2219_s4 + $0x108] sm:$0xff] %v221_v33 }
  0x28   : > { %224 = vst [vmem:[%s2219_s4 + $0x110] sm:$0xff] %v223_v34  ;;  %226 = vst [vmem:[%s2219_s4 + $0x118] sm:$0xff] %v225_v35  ;;  %v227_v36 = vld [vmem:[%s2214_s3 + $0x240] sm:$0xff]  ;;  %v229_v37 = vld [vmem:[%s2214_s3 + $0x248] sm:$0xff] }
  0x29   : > { %v231_v38 = vld [vmem:[%s2214_s3 + $0x260] sm:$0xff]  ;;  %228 = vst [vmem:[%s2219_s4 + $0x120] sm:$0xff] %v227_v36  ;;  %230 = vst [vmem:[%s2219_s4 + $0x128] sm:$0xff] %v229_v37  ;;  %v233_v39 = vld [vmem:[%s2214_s3 + $0x268] sm:$0xff] }
  0x2a   : > { %232 = vst [vmem:[%s2219_s4 + $0x130] sm:$0xff] %v231_v38  ;;  %v235_v40 = vld [vmem:[%s2214_s3 + $0x280] sm:$0xff]  ;;  %v237_v41 = vld [vmem:[%s2214_s3 + $0x288] sm:$0xff]  ;;  %234 = vst [vmem:[%s2219_s4 + $0x138] sm:$0xff] %v233_v39 }
  0x2b   : > { %236 = vst [vmem:[%s2219_s4 + $0x140] sm:$0xff] %v235_v40  ;;  %238 = vst [vmem:[%s2219_s4 + $0x148] sm:$0xff] %v237_v41  ;;  %v239_v42 = vld [vmem:[%s2214_s3 + $0x2a0] sm:$0xff]  ;;  %v241_v43 = vld [vmem:[%s2214_s3 + $0x2a8] sm:$0xff] }
  0x2c   : > { %v243_v44 = vld [vmem:[%s2214_s3 + $0x2c0] sm:$0xff]  ;;  %240 = vst [vmem:[%s2219_s4 + $0x150] sm:$0xff] %v239_v42  ;;  %242 = vst [vmem:[%s2219_s4 + $0x158] sm:$0xff] %v241_v43  ;;  %v245_v45 = vld [vmem:[%s2214_s3 + $0x2c8] sm:$0xff] }
  0x2d   : > { %244 = vst [vmem:[%s2219_s4 + $0x160] sm:$0xff] %v243_v44  ;;  %v247_v46 = vld [vmem:[%s2214_s3 + $0x2e0] sm:$0xff]  ;;  %v249_v47 = vld [vmem:[%s2214_s3 + $0x2e8] sm:$0xff]  ;;  %246 = vst [vmem:[%s2219_s4 + $0x168] sm:$0xff] %v245_v45 }
  0x2e   : > { %248 = vst [vmem:[%s2219_s4 + $0x170] sm:$0xff] %v247_v46  ;;  %250 = vst [vmem:[%s2219_s4 + $0x178] sm:$0xff] %v249_v47  ;;  %v251_v48 = vld [vmem:[%s2214_s3 + $0x300] sm:$0xff]  ;;  %v253_v49 = vld [vmem:[%s2214_s3 + $0x308] sm:$0xff] }
  0x2f   : > { %v255_v50 = vld [vmem:[%s2214_s3 + $0x320] sm:$0xff]  ;;  %252 = vst [vmem:[%s2219_s4 + $0x180] sm:$0xff] %v251_v48  ;;  %254 = vst [vmem:[%s2219_s4 + $0x188] sm:$0xff] %v253_v49  ;;  %v257_v51 = vld [vmem:[%s2214_s3 + $0x328] sm:$0xff] }
  0x30   : > { %256 = vst [vmem:[%s2219_s4 + $0x190] sm:$0xff] %v255_v50  ;;  %v259_v52 = vld [vmem:[%s2214_s3 + $0x340] sm:$0xff]  ;;  %v261_v53 = vld [vmem:[%s2214_s3 + $0x348] sm:$0xff]  ;;  %258 = vst [vmem:[%s2219_s4 + $0x198] sm:$0xff] %v257_v51 }
  0x31   : > { %260 = vst [vmem:[%s2219_s4 + $0x1a0] sm:$0xff] %v259_v52  ;;  %262 = vst [vmem:[%s2219_s4 + $0x1a8] sm:$0xff] %v261_v53  ;;  %v263_v54 = vld [vmem:[%s2214_s3 + $0x360] sm:$0xff]  ;;  %v265_v55 = vld [vmem:[%s2214_s3 + $0x368] sm:$0xff] }
  0x32   : > { %v267_v56 = vld [vmem:[%s2214_s3 + $0x380] sm:$0xff]  ;;  %264 = vst [vmem:[%s2219_s4 + $0x1b0] sm:$0xff] %v263_v54  ;;  %266 = vst [vmem:[%s2219_s4 + $0x1b8] sm:$0xff] %v265_v55  ;;  %v269_v57 = vld [vmem:[%s2214_s3 + $0x388] sm:$0xff] }
  0x33   : > { %268 = vst [vmem:[%s2219_s4 + $0x1c0] sm:$0xff] %v267_v56  ;;  %v271_v58 = vld [vmem:[%s2214_s3 + $0x3a0] sm:$0xff]  ;;  %v273_v59 = vld [vmem:[%s2214_s3 + $0x3a8] sm:$0xff]  ;;  %270 = vst [vmem:[%s2219_s4 + $0x1c8] sm:$0xff] %v269_v57 }
  0x34   : > { %272 = vst [vmem:[%s2219_s4 + $0x1d0] sm:$0xff] %v271_v58  ;;  %274 = vst [vmem:[%s2219_s4 + $0x1d8] sm:$0xff] %v273_v59  ;;  %v275_v60 = vld [vmem:[%s2214_s3 + $0x3c0] sm:$0xff]  ;;  %v277_v61 = vld [vmem:[%s2214_s3 + $0x3c8] sm:$0xff] }
  0x35   : > { %v279_v62 = vld [vmem:[%s2214_s3 + $0x3e0] sm:$0xff]  ;;  %276 = vst [vmem:[%s2219_s4 + $0x1e0] sm:$0xff] %v275_v60  ;;  %278 = vst [vmem:[%s2219_s4 + $0x1e8] sm:$0xff] %v277_v61  ;;  %v281_v63 = vld [vmem:[%s2214_s3 + $0x3e8] sm:$0xff] }
  0x36   : > { %280 = vst [vmem:[%s2219_s4 + $0x1f0] sm:$0xff] %v279_v62  ;;  %282 = vst [vmem:[%s2219_s4 + $0x1f8] sm:$0xff] %v281_v63 }
  0x37 PF: > { %p1567_p7 = scmp.ge.s32.totalorder %s2136_s15, 1  ;;  %p299_p8 = scmp.lt.s32.totalorder %s2136_s15, 5 }
  0x39   : > { %p300_p9 = pnand %p1567_p7, %p299_p8 }
  0x3a   : > { %s306_s5 = sand.u32 (!%p300_p9), 1, %s2112_s9   ;;  %s1569_s6 = sshll.u32 (!%p300_p9), %s2120_s11, 6 }
  0x3b   : > { %303 = sbr.rel (%p300_p9) target bundleno = 450 (0x1c2), region = 47  ;;  %s1568_s7 = sshll.u32 (!%p300_p9), %s306_s5, 9 }
  0x3c   : > { %p341_p10 = scmp.lt.s32.totalorder (!%p300_p9), %s1569_s6, 127  ;;  %s1571_s8 = sshll.u32 (!%p300_p9), %s2124_s12, 5 }
  0x3d   : > { %p350_p11 = scmp.lt.s32.totalorder (!%p300_p9), %s1571_s8, 63  ;;  %s2361_s9 = scalar_lea.vmem (!%p300_p9), [#allocation2], %s1568_s7 }
  0x3e   : > { %p1573_p12 = scmp.ne.s32.totalorder (!%p300_p9), %s2120_s11, 0 }
  0x40   : > { %s2593_s6 = smov (!%p341_p10, %s1569_s6), 127  ;;  %s2595_s8 = smov (!%p350_p11, %s1571_s8), 63 }
  0x41   : > { %s1570_s18 = sshll.u32 %s2593_s6, 2  ;;  %s1572_s23 = sshll.u32 %s2595_s8, 3 }
  0x42   : > { %s2354_s21 = scalar_lea.vmem %s2578_s1, %s1570_s18  ;;  %s2359_s26 = scalar_lea.vmem %s2579_s2, %s1572_s23 }
  0x43   : > { %362 = sbr.rel (%p1573_p12) target bundleno = 89 (0x59), region = 55 }
  0x48   : > { %v2138_v0 = vmov 0.0  }
  0x49   : > { %363 = vst [vmem:[%s2359_s26] sm:$0xff] %v2138_v0  ;;  %364 = vst [vmem:[%s2359_s26 + $0x8] sm:$0xff] %v2138_v0 }
  0x4a   : > { %365 = vst [vmem:[%s2359_s26 + $0x10] sm:$0xff] %v2138_v0  ;;  %366 = vst [vmem:[%s2359_s26 + $0x18] sm:$0xff] %v2138_v0 }
  0x4b   : > { %367 = vst [vmem:[%s2359_s26 + $0x20] sm:$0xff] %v2138_v0  ;;  %368 = vst [vmem:[%s2359_s26 + $0x28] sm:$0xff] %v2138_v0 }
  0x4c   : > { %369 = vst [vmem:[%s2359_s26 + $0x30] sm:$0xff] %v2138_v0  ;;  %370 = vst [vmem:[%s2359_s26 + $0x38] sm:$0xff] %v2138_v0 }
  0x4d   : > { %371 = vst [vmem:[%s2359_s26 + $0x40] sm:$0xff] %v2138_v0  ;;  %372 = vst [vmem:[%s2359_s26 + $0x48] sm:$0xff] %v2138_v0 }
  0x4e   : > { %373 = vst [vmem:[%s2359_s26 + $0x50] sm:$0xff] %v2138_v0  ;;  %374 = vst [vmem:[%s2359_s26 + $0x58] sm:$0xff] %v2138_v0 }
  0x4f   : > { %375 = vst [vmem:[%s2359_s26 + $0x60] sm:$0xff] %v2138_v0  ;;  %376 = vst [vmem:[%s2359_s26 + $0x68] sm:$0xff] %v2138_v0 }
  0x50   : > { %377 = vst [vmem:[%s2359_s26 + $0x70] sm:$0xff] %v2138_v0  ;;  %378 = vst [vmem:[%s2359_s26 + $0x78] sm:$0xff] %v2138_v0 }
  0x51   : > { %379 = vst [vmem:[%s2359_s26 + $0x80] sm:$0xff] %v2138_v0  ;;  %380 = vst [vmem:[%s2359_s26 + $0x88] sm:$0xff] %v2138_v0 }
  0x52   : > { %381 = vst [vmem:[%s2359_s26 + $0x90] sm:$0xff] %v2138_v0  ;;  %382 = vst [vmem:[%s2359_s26 + $0x98] sm:$0xff] %v2138_v0 }
  0x53   : > { %383 = vst [vmem:[%s2359_s26 + $0xa0] sm:$0xff] %v2138_v0  ;;  %384 = vst [vmem:[%s2359_s26 + $0xa8] sm:$0xff] %v2138_v0 }
  0x54   : > { %385 = vst [vmem:[%s2359_s26 + $0xb0] sm:$0xff] %v2138_v0  ;;  %386 = vst [vmem:[%s2359_s26 + $0xb8] sm:$0xff] %v2138_v0 }
  0x55   : > { %387 = vst [vmem:[%s2359_s26 + $0xc0] sm:$0xff] %v2138_v0  ;;  %388 = vst [vmem:[%s2359_s26 + $0xc8] sm:$0xff] %v2138_v0 }
  0x56   : > { %389 = vst [vmem:[%s2359_s26 + $0xd0] sm:$0xff] %v2138_v0  ;;  %390 = vst [vmem:[%s2359_s26 + $0xd8] sm:$0xff] %v2138_v0 }
  0x57   : > { %391 = vst [vmem:[%s2359_s26 + $0xe0] sm:$0xff] %v2138_v0  ;;  %392 = vst [vmem:[%s2359_s26 + $0xe8] sm:$0xff] %v2138_v0 }
  0x58   : > { %393 = vst [vmem:[%s2359_s26 + $0xf0] sm:$0xff] %v2138_v0  ;;  %394 = vst [vmem:[%s2359_s26 + $0xf8] sm:$0xff] %v2138_v0 }
  0x59 PF: > { %v1954_v1 = vld [vmem:[%s2354_s21 + $0x78] sm:$0xff]   ;;  %v1958_v5 = vld [vmem:[%s2354_s21 + $0x70] sm:$0xff]   ;;  %v1962_v9 = vld [vmem:[%s2354_s21 + $0x68] sm:$0xff]  }
  0x5a   : > { %v1955_v2 = vld [vmem:[%s2354_s21 + $0xf8] sm:$0xff]   ;;  %1673 = vmatprep.subr.bf16.mxu0 %v1954_v1  ;;  %v1959_v6 = vld [vmem:[%s2354_s21 + $0xf0] sm:$0xff]   ;;  %v1963_v10 = vld [vmem:[%s2354_s21 + $0xe8] sm:$0xff]  }
  0x5b   : > { %v1956_v3 = vld [vmem:[%s2354_s21 + $0x38] sm:$0xff]   ;;  %1785 = vmatprep.subr.bf16.mxu1 %v1955_v2  ;;  %v1960_v7 = vld [vmem:[%s2354_s21 + $0x30] sm:$0xff]   ;;  %v1964_v11 = vld [vmem:[%s2354_s21 + $0x28] sm:$0xff]  }
  0x5c   : > { %v1957_v4 = vld [vmem:[%s2354_s21 + $0xb8] sm:$0xff]   ;;  %1674 = vmatpush3.bf16.msra.mxu0 %v1956_v3  ;;  %v1961_v8 = vld [vmem:[%s2354_s21 + $0xb0] sm:$0xff]   ;;  %v1965_v12 = vld [vmem:[%s2354_s21 + $0xa8] sm:$0xff]  }
  0x5d   : > { %1786 = vmatpush3.bf16.msra.mxu1 %v1957_v4  ;;  %1675 = vmatprep.subr.bf16.mxu0 %v1958_v5  ;;  %v1966_v13 = vld [vmem:[%s2354_s21 + $0x60] sm:$0xff]   ;;  %v1970_v17 = vld [vmem:[%s2354_s21 + $0x58] sm:$0xff]   ;;  %v1974_v21 = vld [vmem:[%s2354_s21 + $0x50] sm:$0xff]  }
  0x5e   : > { %1787 = vmatprep.subr.bf16.mxu1 %v1959_v6  ;;  %v1967_v14 = vld [vmem:[%s2354_s21 + $0xe0] sm:$0xff]   ;;  %v1971_v18 = vld [vmem:[%s2354_s21 + $0xd8] sm:$0xff]   ;;  %v1975_v22 = vld [vmem:[%s2354_s21 + $0xd0] sm:$0xff]  }
  0x5f   : > { %v1968_v15 = vld [vmem:[%s2354_s21 + $0x20] sm:$0xff]   ;;  %v1972_v19 = vld [vmem:[%s2354_s21 + $0x18] sm:$0xff]   ;;  %v1976_v23 = vld [vmem:[%s2354_s21 + $0x10] sm:$0xff]  }
  0x60   : > { %1676 = vmatpush3.bf16.msra.mxu0 %v1960_v7  ;;  %v1969_v16 = vld [vmem:[%s2354_s21 + $0xa0] sm:$0xff]   ;;  %v1973_v20 = vld [vmem:[%s2354_s21 + $0x98] sm:$0xff]   ;;  %v1977_v24 = vld [vmem:[%s2354_s21 + $0x90] sm:$0xff]  }
  0x61   : > { %1788 = vmatpush3.bf16.msra.mxu1 %v1961_v8  ;;  %1677 = vmatprep.subr.bf16.mxu0 %v1962_v9  ;;  %v1978_v25 = vld [vmem:[%s2354_s21 + $0x48] sm:$0xff]   ;;  %v1982_v29 = vld [vmem:[%s2354_s21 + $0x40] sm:$0xff]  }
  0x62   : > { %1789 = vmatprep.subr.bf16.mxu1 %v1963_v10  ;;  %v1979_v26 = vld [vmem:[%s2354_s21 + $0xc8] sm:$0xff]   ;;  %v1983_v30 = vld [vmem:[%s2354_s21 + $0xc0] sm:$0xff]  }
  0x63   : > { %v1980_v27 = vld [vmem:[%s2354_s21 + $0x8] sm:$0xff]   ;;  %v1984_v31 = vld [vmem:[%s2354_s21] sm:$0xff]  }
  0x64   : > { %1678 = vmatpush3.bf16.msra.mxu0 %v1964_v11  ;;  %v1981_v28 = vld [vmem:[%s2354_s21 + $0x88] sm:$0xff]   ;;  %v1985_v32 = vld [vmem:[%s2354_s21 + $0x80] sm:$0xff]  }
  0x65   : > { %1790 = vmatpush3.bf16.msra.mxu1 %v1965_v12  ;;  %1679 = vmatprep.subr.bf16.mxu0 %v1966_v13  ;;  %v1986_v33 = vld [vmem:[%s2361_s9] ss:$16 sps:$4 sm:$0xff]   ;;  %v1988_v34 = vld [vmem:[%s2361_s9 + $0x4] ss:$16 sps:$4 sm:$0xff]   ;;  %v1989_v35 = vld [vmem:[%s2361_s9 + $0x8] ss:$16 sps:$4 sm:$0xff]  }
  0x66   : > { %1791 = vmatprep.subr.bf16.mxu1 %v1967_v14  ;;  %v1991_v36 = vld [vmem:[%s2361_s9 + $0xc] ss:$16 sps:$4 sm:$0xff]   ;;  %1099 = vmatprep.mubr.bf16.mxu0 %v1988_v34  ;;  %v1992_v37 = vld [vmem:[%s2361_s9 + $0x24] ss:$16 sps:$4 sm:$0xff]   ;;  %v1996_v39 = vld [vmem:[%s2361_s9 + $0x20] ss:$16 sps:$4 sm:$0xff]  }
  0x67   : > { %1260 = vmatprep.mubr.bf16.mxu1 %v1991_v36  ;;  %v1994_v38 = vld [vmem:[%s2361_s9 + $0x2c] ss:$16 sps:$4 sm:$0xff]   ;;  %v1997_v40 = vld [vmem:[%s2361_s9 + $0x28] ss:$16 sps:$4 sm:$0xff]   ;;  %v1998_v41 = vld [vmem:[%s2361_s9 + $0x44] ss:$16 sps:$4 sm:$0xff]  }
  0x68   : > { %1680 = vmatpush3.bf16.msra.mxu0 %v1968_v15  ;;  %v2000_v42 = vld [vmem:[%s2361_s9 + $0x4c] ss:$16 sps:$4 sm:$0xff]   ;;  %v2002_v43 = vld [vmem:[%s2361_s9 + $0x40] ss:$16 sps:$4 sm:$0xff]   ;;  %v2003_v44 = vld [vmem:[%s2361_s9 + $0x48] ss:$16 sps:$4 sm:$0xff]  }
  0x69   : > { %1792 = vmatpush3.bf16.msra.mxu1 %v1969_v16  ;;  %1681 = vmatprep.subr.bf16.mxu0 %v1970_v17  ;;  %v2004_v45 = vld [vmem:[%s2361_s9 + $0x64] ss:$16 sps:$4 sm:$0xff]   ;;  %v2006_v46 = vld [vmem:[%s2361_s9 + $0x6c] ss:$16 sps:$4 sm:$0xff]   ;;  %v2008_v47 = vld [vmem:[%s2361_s9 + $0x60] ss:$16 sps:$4 sm:$0xff]  }
  0x6a   : > { %1793 = vmatprep.subr.bf16.mxu1 %v1971_v18  ;;  %v2009_v48 = vld [vmem:[%s2361_s9 + $0x68] ss:$16 sps:$4 sm:$0xff]   ;;  %v2010_v49 = vld [vmem:[%s2361_s9 + $0x84] ss:$16 sps:$4 sm:$0xff]   ;;  %v2012_v50 = vld [vmem:[%s2361_s9 + $0x8c] ss:$16 sps:$4 sm:$0xff]  }
  0x6b   : > { %v2014_v51 = vld [vmem:[%s2361_s9 + $0x80] ss:$16 sps:$4 sm:$0xff]   ;;  %v2015_v52 = vld [vmem:[%s2361_s9 + $0x88] ss:$16 sps:$4 sm:$0xff]   ;;  %v2016_v53 = vld [vmem:[%s2361_s9 + $0xa4] ss:$16 sps:$4 sm:$0xff]  }
  0x6c   : > { %1682 = vmatpush3.bf16.msra.mxu0 %v1972_v19  ;;  %v2018_v54 = vld [vmem:[%s2361_s9 + $0xac] ss:$16 sps:$4 sm:$0xff]   ;;  %v2020_v55 = vld [vmem:[%s2361_s9 + $0xa0] ss:$16 sps:$4 sm:$0xff]   ;;  %v2021_v56 = vld [vmem:[%s2361_s9 + $0xa8] ss:$16 sps:$4 sm:$0xff]  }
  0x6d   : > { %1794 = vmatpush3.bf16.msra.mxu1 %v1973_v20  ;;  %1683 = vmatprep.subr.bf16.mxu0 %v1974_v21  ;;  %v2022_v57 = vld [vmem:[%s2361_s9 + $0xc4] ss:$16 sps:$4 sm:$0xff]   ;;  %v2024_v58 = vld [vmem:[%s2361_s9 + $0xcc] ss:$16 sps:$4 sm:$0xff]   ;;  %v2026_v59 = vld [vmem:[%s2361_s9 + $0xc0] ss:$16 sps:$4 sm:$0xff]  }
  0x6e   : > { %1795 = vmatprep.subr.bf16.mxu1 %v1975_v22  ;;  %v2027_v60 = vld [vmem:[%s2361_s9 + $0xc8] ss:$16 sps:$4 sm:$0xff]   ;;  %v2028_v61 = vld [vmem:[%s2361_s9 + $0xe4] ss:$16 sps:$4 sm:$0xff]   ;;  %v2030_v62 = vld [vmem:[%s2361_s9 + $0xec] ss:$16 sps:$4 sm:$0xff]  }
  0x6f   : > { %v2032_v63 = vld [vmem:[%s2361_s9 + $0xe0] ss:$16 sps:$4 sm:$0xff]   ;;  %v2033_v0 = vld [vmem:[%s2361_s9 + $0xe8] ss:$16 sps:$4 sm:$0xff]   ;;  %v2034_v1 = vld [vmem:[%s2361_s9 + $0x104] ss:$16 sps:$4 sm:$0xff]  }
  0x70   : > { %1684 = vmatpush3.bf16.msra.mxu0 %v1976_v23  ;;  %v2036_v2 = vld [vmem:[%s2361_s9 + $0x10c] ss:$16 sps:$4 sm:$0xff]   ;;  %v2038_v3 = vld [vmem:[%s2361_s9 + $0x100] ss:$16 sps:$4 sm:$0xff]   ;;  %v2039_v4 = vld [vmem:[%s2361_s9 + $0x108] ss:$16 sps:$4 sm:$0xff]  }
  0x71   : > { %1796 = vmatpush3.bf16.msra.mxu1 %v1977_v24  ;;  %1685 = vmatprep.subr.bf16.mxu0 %v1978_v25  ;;  %v2040_v5 = vld [vmem:[%s2361_s9 + $0x124] ss:$16 sps:$4 sm:$0xff]   ;;  %v2042_v6 = vld [vmem:[%s2361_s9 + $0x12c] ss:$16 sps:$4 sm:$0xff]   ;;  %v2044_v7 = vld [vmem:[%s2361_s9 + $0x120] ss:$16 sps:$4 sm:$0xff]  }
  0x72   : > { %1797 = vmatprep.subr.bf16.mxu1 %v1979_v26  ;;  %v2045_v8 = vld [vmem:[%s2361_s9 + $0x128] ss:$16 sps:$4 sm:$0xff]   ;;  %v2046_v9 = vld [vmem:[%s2361_s9 + $0x144] ss:$16 sps:$4 sm:$0xff]   ;;  %v2048_v10 = vld [vmem:[%s2361_s9 + $0x14c] ss:$16 sps:$4 sm:$0xff]  }
  0x73   : > { %v2050_v11 = vld [vmem:[%s2361_s9 + $0x140] ss:$16 sps:$4 sm:$0xff]   ;;  %v2051_v12 = vld [vmem:[%s2361_s9 + $0x148] ss:$16 sps:$4 sm:$0xff]   ;;  %v2052_v13 = vld [vmem:[%s2361_s9 + $0x164] ss:$16 sps:$4 sm:$0xff]  }
  0x74   : > { %1686 = vmatpush3.bf16.msra.mxu0 %v1980_v27  ;;  %v2054_v14 = vld [vmem:[%s2361_s9 + $0x16c] ss:$16 sps:$4 sm:$0xff]   ;;  %v2056_v15 = vld [vmem:[%s2361_s9 + $0x160] ss:$16 sps:$4 sm:$0xff]   ;;  %v2057_v16 = vld [vmem:[%s2361_s9 + $0x168] ss:$16 sps:$4 sm:$0xff]  }
  0x75   : > { %1798 = vmatpush3.bf16.msra.mxu1 %v1981_v28  ;;  %1687 = vmatprep.subr.bf16.mxu0 %v1982_v29  ;;  %v2058_v17 = vld [vmem:[%s2361_s9 + $0x184] ss:$16 sps:$4 sm:$0xff]   ;;  %v2060_v18 = vld [vmem:[%s2361_s9 + $0x18c] ss:$16 sps:$4 sm:$0xff]   ;;  %v2062_v19 = vld [vmem:[%s2361_s9 + $0x180] ss:$16 sps:$4 sm:$0xff]  }
  0x76   : > { %1799 = vmatprep.subr.bf16.mxu1 %v1983_v30  ;;  %v2063_v20 = vld [vmem:[%s2361_s9 + $0x188] ss:$16 sps:$4 sm:$0xff]   ;;  %v2064_v21 = vld [vmem:[%s2361_s9 + $0x1a4] ss:$16 sps:$4 sm:$0xff]   ;;  %v2066_v22 = vld [vmem:[%s2361_s9 + $0x1ac] ss:$16 sps:$4 sm:$0xff]  }
  0x77   : > { %v2068_v23 = vld [vmem:[%s2361_s9 + $0x1a0] ss:$16 sps:$4 sm:$0xff]   ;;  %v2069_v24 = vld [vmem:[%s2361_s9 + $0x1a8] ss:$16 sps:$4 sm:$0xff]   ;;  %v2070_v25 = vld [vmem:[%s2361_s9 + $0x1c4] ss:$16 sps:$4 sm:$0xff]  }
  0x78   : > { %1688 = vmatpush3.bf16.msra.mxu0 %v1984_v31  ;;  %v2072_v26 = vld [vmem:[%s2361_s9 + $0x1cc] ss:$16 sps:$4 sm:$0xff]   ;;  %v2074_v27 = vld [vmem:[%s2361_s9 + $0x1c0] ss:$16 sps:$4 sm:$0xff]   ;;  %v2075_v28 = vld [vmem:[%s2361_s9 + $0x1c8] ss:$16 sps:$4 sm:$0xff]  }
  0x79   : > { %1800 = vmatpush3.bf16.msra.mxu1 %v1985_v32  ;;  %v2076_v29 = vld [vmem:[%s2361_s9 + $0x1e4] ss:$16 sps:$4 sm:$0xff]   ;;  %v2078_v30 = vld [vmem:[%s2361_s9 + $0x1ec] ss:$16 sps:$4 sm:$0xff]   ;;  %v2080_v31 = vld [vmem:[%s2361_s9 + $0x1e0] ss:$16 sps:$4 sm:$0xff]  }
  0x7a   : > { %v2081_v32 = vld [vmem:[%s2361_s9 + $0x1e8] ss:$16 sps:$4 sm:$0xff]  }
  0x7b   : > { %1100 = vmatmul.mubr.bf16.vlgmr.msra.gmra.mxu0 %v1986_v33 }
  0x7c   : > { %1261 = vmatmul.mubr.bf16.vlgmr.msra.gmra.mxu1 %v1989_v35  ;;  %1107 = vmatprep.mubr.bf16.mxu0 %v1992_v37 }
  0x7d   : > { %1268 = vmatprep.mubr.bf16.mxu1 %v1994_v38 }
  0x83   : > { %1108 = vmatmul.mubr.bf16.gmra.mxu0 %v1996_v39 }
  0x84   : > { %1269 = vmatmul.mubr.bf16.gmra.mxu1 %v1997_v40  ;;  %1115 = vmatprep.mubr.bf16.mxu0 %v1998_v41  ;;  %v395_v40 = vld [vmem:[%s2359_s26] sm:$0xff] }
  0x85   : > { %1276 = vmatprep.mubr.bf16.mxu1 %v2000_v42 }
  0x8b   : > { %1116 = vmatmul.mubr.bf16.gmra.mxu0 %v2002_v43 }
  0x8c   : > { %1277 = vmatmul.mubr.bf16.gmra.mxu1 %v2003_v44  ;;  %1123 = vmatprep.mubr.bf16.mxu0 %v2004_v45 }
  0x8d   : > { %1284 = vmatprep.mubr.bf16.mxu1 %v2006_v46 }
  0x93   : > { %1124 = vmatmul.mubr.bf16.gmra.mxu0 %v2008_v47 }
  0x94   : > { %1285 = vmatmul.mubr.bf16.gmra.mxu1 %v2009_v48  ;;  %1131 = vmatprep.mubr.bf16.mxu0 %v2010_v49  ;;  %v396_v49 = vld [vmem:[%s2359_s26 + $0x8] sm:$0xff] }
  0x95   : > { %1292 = vmatprep.mubr.bf16.mxu1 %v2012_v50 }
  0x9b   : > { %1132 = vmatmul.mubr.bf16.gmra.mxu0 %v2014_v51 }
  0x9c   : > { %1293 = vmatmul.mubr.bf16.gmra.mxu1 %v2015_v52  ;;  %1139 = vmatprep.mubr.bf16.mxu0 %v2016_v53 }
  0x9d   : > { %1300 = vmatprep.mubr.bf16.mxu1 %v2018_v54 }
  0xa3   : > { %1140 = vmatmul.mubr.bf16.gmra.mxu0 %v2020_v55 }
  0xa4   : > { %1301 = vmatmul.mubr.bf16.gmra.mxu1 %v2021_v56  ;;  %1147 = vmatprep.mubr.bf16.mxu0 %v2022_v57 }
  0xa5   : > { %1308 = vmatprep.mubr.bf16.mxu1 %v2024_v58  ;;  %v397_v58 = vld [vmem:[%s2359_s26 + $0x10] sm:$0xff] }
  0xab   : > { %1148 = vmatmul.mubr.bf16.gmra.mxu0 %v2026_v59 }
  0xac   : > { %1309 = vmatmul.mubr.bf16.gmra.mxu1 %v2027_v60  ;;  %1155 = vmatprep.mubr.bf16.mxu0 %v2028_v61 }
  0xad   : > { %1316 = vmatprep.mubr.bf16.mxu1 %v2030_v62 }
  0xb3   : > { %1156 = vmatmul.mubr.bf16.gmra.mxu0 %v2032_v63 }
  0xb4   : > { %1317 = vmatmul.mubr.bf16.gmra.mxu1 %v2033_v0  ;;  %1163 = vmatprep.mubr.bf16.mxu0 %v2034_v1 }
  0xb5   : > { %1324 = vmatprep.mubr.bf16.mxu1 %v2036_v2 }
  0xbb   : > { %1164 = vmatmul.mubr.bf16.gmra.mxu0 %v2038_v3  ;;  %v398_v3 = vld [vmem:[%s2359_s26 + $0x18] sm:$0xff] }
  0xbc   : > { %1325 = vmatmul.mubr.bf16.gmra.mxu1 %v2039_v4  ;;  %1171 = vmatprep.mubr.bf16.mxu0 %v2040_v5 }
  0xbd   : > { %1332 = vmatprep.mubr.bf16.mxu1 %v2042_v6 }
  0xc3   : > { %1172 = vmatmul.mubr.bf16.gmra.mxu0 %v2044_v7 }
  0xc4   : > { %1333 = vmatmul.mubr.bf16.gmra.mxu1 %v2045_v8  ;;  %1179 = vmatprep.mubr.bf16.mxu0 %v2046_v9 }
  0xc5   : > { %1340 = vmatprep.mubr.bf16.mxu1 %v2048_v10 }
  0xcb   : > { %1180 = vmatmul.mubr.bf16.gmra.mxu0 %v2050_v11 }
  0xcc   : > { %1341 = vmatmul.mubr.bf16.gmra.mxu1 %v2051_v12  ;;  %1187 = vmatprep.mubr.bf16.mxu0 %v2052_v13  ;;  %v399_v12 = vld [vmem:[%s2359_s26 + $0x20] sm:$0xff] }
  0xcd   : > { %1348 = vmatprep.mubr.bf16.mxu1 %v2054_v14 }
  0xd3   : > { %1188 = vmatmul.mubr.bf16.gmra.mxu0 %v2056_v15 }
  0xd4   : > { %1349 = vmatmul.mubr.bf16.gmra.mxu1 %v2057_v16  ;;  %1195 = vmatprep.mubr.bf16.mxu0 %v2058_v17 }
  0xd5   : > { %1356 = vmatprep.mubr.bf16.mxu1 %v2060_v18 }
  0xdb   : > { %1196 = vmatmul.mubr.bf16.gmra.mxu0 %v2062_v19 }
  0xdc   : > { %1357 = vmatmul.mubr.bf16.gmra.mxu1 %v2063_v20  ;;  %1203 = vmatprep.mubr.bf16.mxu0 %v2064_v21  ;;  %v400_v21 = vld [vmem:[%s2359_s26 + $0x28] sm:$0xff] }
  0xdd   : > { %1364 = vmatprep.mubr.bf16.mxu1 %v2066_v22 }
  0xe3   : > { %1204 = vmatmul.mubr.bf16.gmra.mxu0 %v2068_v23 }
  0xe4   : > { %1365 = vmatmul.mubr.bf16.gmra.mxu1 %v2069_v24  ;;  %1211 = vmatprep.mubr.bf16.mxu0 %v2070_v25 }
  0xe5   : > { %1372 = vmatprep.mubr.bf16.mxu1 %v2072_v26 }
  0xeb   : > { %1212 = vmatmul.mubr.bf16.gmra.mxu0 %v2074_v27 }
  0xec   : > { %1373 = vmatmul.mubr.bf16.gmra.mxu1 %v2075_v28  ;;  %1219 = vmatprep.mubr.bf16.mxu0 %v2076_v29 }
  0xed   : > { %1380 = vmatprep.mubr.bf16.mxu1 %v2078_v30  ;;  %v401_v30 = vld [vmem:[%s2359_s26 + $0x30] sm:$0xff] }
  0xf3   : > { %1220 = vmatmul.mubr.bf16.gmra.mxu0 %v2080_v31 }
  0xf4   : > { %1381 = vmatmul.mubr.bf16.gmra.mxu1 %v2081_v32 }
 0x13b   : > { %v1689_v33 = vpop.f32.mrf.mxu0 }
 0x13c   : > { %v1801_v34 = vpop.f32.mrf.mxu1 }
 0x13d   : > { %v1690_v35 = vpop.f32.mrf.mxu0 }
 0x13e   : > { %v1691_v36 = vadd.f32 %v1690_v35, %v1689_v33  ;;  %v1802_v37 = vpop.f32.mrf.mxu1 }
 0x13f   : > { %v1803_v38 = vadd.f32 %v1802_v37, %v1801_v34  ;;  %v1692_v39 = vpop.f32.mrf.mxu0 }
 0x140   : > { %v1804_v41 = vpop.f32.mrf.mxu1 }
 0x141   : > { %v1263_v42 = vadd.f32 %v1803_v38, %v1691_v36  ;;  %v1693_v43 = vpop.f32.mrf.mxu0 }
 0x142   : > { %v1694_v44 = vadd.f32 %v1693_v43, %v1692_v39  ;;  %v1805_v45 = vpop.f32.mrf.mxu1  ;;  %v402_v39 = vld [vmem:[%s2359_s26 + $0x38] sm:$0xff] }
 0x143   : > { %v1389_v46 = vadd.f32 %v1263_v42, %v395_v40  ;;  %v1806_v47 = vadd.f32 %v1805_v45, %v1804_v41  ;;  %v1695_v48 = vpop.f32.mrf.mxu0 }
 0x144   : > { %v1807_v50 = vpop.f32.mrf.mxu1 }
 0x145   : > { %1421 = vst [vmem:[%s2359_s26] sm:$0xff] %v1389_v46  ;;  %v1266_v51 = vadd.f32 %v1806_v47, %v1694_v44  ;;  %v1696_v52 = vpop.f32.mrf.mxu0 }
 0x146   : > { %v1697_v53 = vadd.f32 %v1696_v52, %v1695_v48  ;;  %v1808_v54 = vpop.f32.mrf.mxu1  ;;  %v403_v48 = vld [vmem:[%s2359_s26 + $0x40] sm:$0xff] }
 0x147   : > { %v1390_v55 = vadd.f32 %v1266_v51, %v396_v49  ;;  %v1809_v56 = vadd.f32 %v1808_v54, %v1807_v50  ;;  %v1698_v57 = vpop.f32.mrf.mxu0 }
 0x148   : > { %v1810_v59 = vpop.f32.mrf.mxu1 }
 0x149   : > { %1422 = vst [vmem:[%s2359_s26 + $0x8] sm:$0xff] %v1390_v55  ;;  %v1271_v60 = vadd.f32 %v1809_v56, %v1697_v53  ;;  %v1699_v61 = vpop.f32.mrf.mxu0 }
 0x14a   : > { %v1700_v62 = vadd.f32 %v1699_v61, %v1698_v57  ;;  %v1811_v63 = vpop.f32.mrf.mxu1  ;;  %v404_v57 = vld [vmem:[%s2359_s26 + $0x48] sm:$0xff] }
 0x14b   : > { %v1391_v0 = vadd.f32 %v1271_v60, %v397_v58  ;;  %v1812_v1 = vadd.f32 %v1811_v63, %v1810_v59  ;;  %v1701_v2 = vpop.f32.mrf.mxu0 }
 0x14c   : > { %v1813_v4 = vpop.f32.mrf.mxu1 }
 0x14d   : > { %1423 = vst [vmem:[%s2359_s26 + $0x10] sm:$0xff] %v1391_v0  ;;  %v1274_v5 = vadd.f32 %v1812_v1, %v1700_v62  ;;  %v1702_v6 = vpop.f32.mrf.mxu0 }
 0x14e   : > { %v1703_v7 = vadd.f32 %v1702_v6, %v1701_v2  ;;  %v1814_v8 = vpop.f32.mrf.mxu1  ;;  %v405_v2 = vld [vmem:[%s2359_s26 + $0x50] sm:$0xff] }
 0x14f   : > { %v1392_v9 = vadd.f32 %v1274_v5, %v398_v3  ;;  %v1815_v10 = vadd.f32 %v1814_v8, %v1813_v4  ;;  %v1704_v11 = vpop.f32.mrf.mxu0 }
 0x150   : > { %v1816_v13 = vpop.f32.mrf.mxu1 }
 0x151   : > { %1424 = vst [vmem:[%s2359_s26 + $0x18] sm:$0xff] %v1392_v9  ;;  %v1279_v14 = vadd.f32 %v1815_v10, %v1703_v7  ;;  %v1705_v15 = vpop.f32.mrf.mxu0 }
 0x152   : > { %v1706_v16 = vadd.f32 %v1705_v15, %v1704_v11  ;;  %v1817_v17 = vpop.f32.mrf.mxu1  ;;  %v406_v11 = vld [vmem:[%s2359_s26 + $0x58] sm:$0xff] }
 0x153   : > { %v1393_v18 = vadd.f32 %v1279_v14, %v399_v12  ;;  %v1818_v19 = vadd.f32 %v1817_v17, %v1816_v13  ;;  %v1707_v20 = vpop.f32.mrf.mxu0 }
 0x154   : > { %v1819_v22 = vpop.f32.mrf.mxu1 }
 0x155   : > { %1425 = vst [vmem:[%s2359_s26 + $0x20] sm:$0xff] %v1393_v18  ;;  %v1282_v23 = vadd.f32 %v1818_v19, %v1706_v16  ;;  %v1708_v24 = vpop.f32.mrf.mxu0 }
 0x156   : > { %v1709_v25 = vadd.f32 %v1708_v24, %v1707_v20  ;;  %v1820_v26 = vpop.f32.mrf.mxu1  ;;  %v407_v20 = vld [vmem:[%s2359_s26 + $0x60] sm:$0xff] }
 0x157   : > { %v1394_v27 = vadd.f32 %v1282_v23, %v400_v21  ;;  %v1821_v28 = vadd.f32 %v1820_v26, %v1819_v22  ;;  %v1710_v29 = vpop.f32.mrf.mxu0 }
 0x158   : > { %v1822_v31 = vpop.f32.mrf.mxu1 }
 0x159   : > { %1426 = vst [vmem:[%s2359_s26 + $0x28] sm:$0xff] %v1394_v27  ;;  %v1287_v32 = vadd.f32 %v1821_v28, %v1709_v25  ;;  %v1711_v33 = vpop.f32.mrf.mxu0 }
 0x15a   : > { %v1712_v34 = vadd.f32 %v1711_v33, %v1710_v29  ;;  %v1823_v35 = vpop.f32.mrf.mxu1  ;;  %v408_v29 = vld [vmem:[%s2359_s26 + $0x68] sm:$0xff] }
 0x15b   : > { %v1395_v36 = vadd.f32 %v1287_v32, %v401_v30  ;;  %v1824_v37 = vadd.f32 %v1823_v35, %v1822_v31  ;;  %v1713_v38 = vpop.f32.mrf.mxu0 }
 0x15c   : > { %v1825_v40 = vpop.f32.mrf.mxu1 }
 0x15d   : > { %1427 = vst [vmem:[%s2359_s26 + $0x30] sm:$0xff] %v1395_v36  ;;  %v1290_v41 = vadd.f32 %v1824_v37, %v1712_v34  ;;  %v1714_v42 = vpop.f32.mrf.mxu0 }
 0x15e   : > { %v1715_v43 = vadd.f32 %v1714_v42, %v1713_v38  ;;  %v1826_v44 = vpop.f32.mrf.mxu1  ;;  %v409_v38 = vld [vmem:[%s2359_s26 + $0x70] sm:$0xff] }
 0x15f   : > { %v1396_v45 = vadd.f32 %v1290_v41, %v402_v39  ;;  %v1827_v46 = vadd.f32 %v1826_v44, %v1825_v40  ;;  %v1716_v47 = vpop.f32.mrf.mxu0 }
 0x160   : > { %v1828_v49 = vpop.f32.mrf.mxu1 }
 0x161   : > { %1428 = vst [vmem:[%s2359_s26 + $0x38] sm:$0xff] %v1396_v45  ;;  %v1295_v50 = vadd.f32 %v1827_v46, %v1715_v43  ;;  %v1717_v51 = vpop.f32.mrf.mxu0 }
 0x162   : > { %v1718_v52 = vadd.f32 %v1717_v51, %v1716_v47  ;;  %v1829_v53 = vpop.f32.mrf.mxu1  ;;  %v410_v47 = vld [vmem:[%s2359_s26 + $0x78] sm:$0xff] }
 0x163   : > { %v1397_v54 = vadd.f32 %v1295_v50, %v403_v48  ;;  %v1830_v55 = vadd.f32 %v1829_v53, %v1828_v49  ;;  %v1719_v56 = vpop.f32.mrf.mxu0 }
 0x164   : > { %v1831_v58 = vpop.f32.mrf.mxu1 }
 0x165   : > { %1429 = vst [vmem:[%s2359_s26 + $0x40] sm:$0xff] %v1397_v54  ;;  %v1298_v59 = vadd.f32 %v1830_v55, %v1718_v52  ;;  %v1720_v60 = vpop.f32.mrf.mxu0 }
 0x166   : > { %v1721_v61 = vadd.f32 %v1720_v60, %v1719_v56  ;;  %v1832_v62 = vpop.f32.mrf.mxu1  ;;  %v411_v56 = vld [vmem:[%s2359_s26 + $0x80] sm:$0xff] }
 0x167   : > { %v1398_v63 = vadd.f32 %v1298_v59, %v404_v57  ;;  %v1833_v0 = vadd.f32 %v1832_v62, %v1831_v58  ;;  %v1722_v1 = vpop.f32.mrf.mxu0 }
 0x168   : > { %v1834_v3 = vpop.f32.mrf.mxu1 }
 0x169   : > { %1430 = vst [vmem:[%s2359_s26 + $0x48] sm:$0xff] %v1398_v63  ;;  %v1303_v4 = vadd.f32 %v1833_v0, %v1721_v61  ;;  %v1723_v5 = vpop.f32.mrf.mxu0 }
 0x16a   : > { %v1724_v6 = vadd.f32 %v1723_v5, %v1722_v1  ;;  %v1835_v7 = vpop.f32.mrf.mxu1  ;;  %v412_v1 = vld [vmem:[%s2359_s26 + $0x88] sm:$0xff] }
 0x16b   : > { %v1399_v8 = vadd.f32 %v1303_v4, %v405_v2  ;;  %v1836_v9 = vadd.f32 %v1835_v7, %v1834_v3  ;;  %v1725_v10 = vpop.f32.mrf.mxu0 }
 0x16c   : > { %v1837_v12 = vpop.f32.mrf.mxu1 }
 0x16d   : > { %1431 = vst [vmem:[%s2359_s26 + $0x50] sm:$0xff] %v1399_v8  ;;  %v1306_v13 = vadd.f32 %v1836_v9, %v1724_v6  ;;  %v1726_v14 = vpop.f32.mrf.mxu0 }
 0x16e   : > { %v1727_v15 = vadd.f32 %v1726_v14, %v1725_v10  ;;  %v1838_v16 = vpop.f32.mrf.mxu1  ;;  %v413_v10 = vld [vmem:[%s2359_s26 + $0x90] sm:$0xff] }
 0x16f   : > { %v1400_v17 = vadd.f32 %v1306_v13, %v406_v11  ;;  %v1839_v18 = vadd.f32 %v1838_v16, %v1837_v12  ;;  %v1728_v19 = vpop.f32.mrf.mxu0 }
 0x170   : > { %v1840_v21 = vpop.f32.mrf.mxu1 }
 0x171   : > { %1432 = vst [vmem:[%s2359_s26 + $0x58] sm:$0xff] %v1400_v17  ;;  %v1311_v22 = vadd.f32 %v1839_v18, %v1727_v15  ;;  %v1729_v23 = vpop.f32.mrf.mxu0 }
 0x172   : > { %v1730_v24 = vadd.f32 %v1729_v23, %v1728_v19  ;;  %v1841_v25 = vpop.f32.mrf.mxu1  ;;  %v414_v19 = vld [vmem:[%s2359_s26 + $0x98] sm:$0xff] }
 0x173   : > { %v1401_v26 = vadd.f32 %v1311_v22, %v407_v20  ;;  %v1842_v27 = vadd.f32 %v1841_v25, %v1840_v21  ;;  %v1731_v28 = vpop.f32.mrf.mxu0 }
 0x174   : > { %v1843_v30 = vpop.f32.mrf.mxu1 }
 0x175   : > { %1433 = vst [vmem:[%s2359_s26 + $0x60] sm:$0xff] %v1401_v26  ;;  %v1314_v31 = vadd.f32 %v1842_v27, %v1730_v24  ;;  %v1732_v32 = vpop.f32.mrf.mxu0 }
 0x176   : > { %v1733_v33 = vadd.f32 %v1732_v32, %v1731_v28  ;;  %v1844_v34 = vpop.f32.mrf.mxu1  ;;  %v415_v28 = vld [vmem:[%s2359_s26 + $0xa0] sm:$0xff] }
 0x177   : > { %v1402_v35 = vadd.f32 %v1314_v31, %v408_v29  ;;  %v1845_v36 = vadd.f32 %v1844_v34, %v1843_v30  ;;  %v1734_v37 = vpop.f32.mrf.mxu0 }
 0x178   : > { %v1846_v39 = vpop.f32.mrf.mxu1 }
 0x179   : > { %1434 = vst [vmem:[%s2359_s26 + $0x68] sm:$0xff] %v1402_v35  ;;  %v1319_v40 = vadd.f32 %v1845_v36, %v1733_v33  ;;  %v1735_v41 = vpop.f32.mrf.mxu0 }
 0x17a   : > { %v1736_v42 = vadd.f32 %v1735_v41, %v1734_v37  ;;  %v1847_v43 = vpop.f32.mrf.mxu1  ;;  %v416_v37 = vld [vmem:[%s2359_s26 + $0xa8] sm:$0xff] }
 0x17b   : > { %v1403_v44 = vadd.f32 %v1319_v40, %v409_v38  ;;  %v1848_v45 = vadd.f32 %v1847_v43, %v1846_v39  ;;  %v1737_v46 = vpop.f32.mrf.mxu0 }
 0x17c   : > { %v1849_v48 = vpop.f32.mrf.mxu1 }
 0x17d   : > { %1435 = vst [vmem:[%s2359_s26 + $0x70] sm:$0xff] %v1403_v44  ;;  %v1322_v49 = vadd.f32 %v1848_v45, %v1736_v42  ;;  %v1738_v50 = vpop.f32.mrf.mxu0 }
 0x17e   : > { %v1739_v51 = vadd.f32 %v1738_v50, %v1737_v46  ;;  %v1850_v52 = vpop.f32.mrf.mxu1  ;;  %v417_v46 = vld [vmem:[%s2359_s26 + $0xb0] sm:$0xff] }
 0x17f   : > { %v1404_v53 = vadd.f32 %v1322_v49, %v410_v47  ;;  %v1851_v54 = vadd.f32 %v1850_v52, %v1849_v48  ;;  %v1740_v55 = vpop.f32.mrf.mxu0 }
 0x180   : > { %v1852_v57 = vpop.f32.mrf.mxu1 }
 0x181   : > { %1436 = vst [vmem:[%s2359_s26 + $0x78] sm:$0xff] %v1404_v53  ;;  %v1327_v58 = vadd.f32 %v1851_v54, %v1739_v51  ;;  %v1741_v59 = vpop.f32.mrf.mxu0 }
 0x182   : > { %v1742_v60 = vadd.f32 %v1741_v59, %v1740_v55  ;;  %v1853_v61 = vpop.f32.mrf.mxu1  ;;  %v418_v55 = vld [vmem:[%s2359_s26 + $0xb8] sm:$0xff] }
 0x183   : > { %v1405_v62 = vadd.f32 %v1327_v58, %v411_v56  ;;  %v1854_v63 = vadd.f32 %v1853_v61, %v1852_v57  ;;  %v1743_v0 = vpop.f32.mrf.mxu0 }
 0x184   : > { %v1855_v2 = vpop.f32.mrf.mxu1 }
 0x185   : > { %1437 = vst [vmem:[%s2359_s26 + $0x80] sm:$0xff] %v1405_v62  ;;  %v1330_v3 = vadd.f32 %v1854_v63, %v1742_v60  ;;  %v1744_v4 = vpop.f32.mrf.mxu0 }
 0x186   : > { %v1745_v5 = vadd.f32 %v1744_v4, %v1743_v0  ;;  %v1856_v6 = vpop.f32.mrf.mxu1  ;;  %v419_v0 = vld [vmem:[%s2359_s26 + $0xc0] sm:$0xff] }
 0x187   : > { %v1406_v7 = vadd.f32 %v1330_v3, %v412_v1  ;;  %v1857_v8 = vadd.f32 %v1856_v6, %v1855_v2  ;;  %v1746_v9 = vpop.f32.mrf.mxu0 }
 0x188   : > { %v1858_v11 = vpop.f32.mrf.mxu1 }
 0x189   : > { %1438 = vst [vmem:[%s2359_s26 + $0x88] sm:$0xff] %v1406_v7  ;;  %v1335_v12 = vadd.f32 %v1857_v8, %v1745_v5  ;;  %v1747_v13 = vpop.f32.mrf.mxu0 }
 0x18a   : > { %v1748_v14 = vadd.f32 %v1747_v13, %v1746_v9  ;;  %v1859_v15 = vpop.f32.mrf.mxu1  ;;  %v420_v9 = vld [vmem:[%s2359_s26 + $0xc8] sm:$0xff] }
 0x18b   : > { %v1407_v16 = vadd.f32 %v1335_v12, %v413_v10  ;;  %v1860_v17 = vadd.f32 %v1859_v15, %v1858_v11  ;;  %v1749_v18 = vpop.f32.mrf.mxu0 }
 0x18c   : > { %v1861_v20 = vpop.f32.mrf.mxu1 }
 0x18d   : > { %1439 = vst [vmem:[%s2359_s26 + $0x90] sm:$0xff] %v1407_v16  ;;  %v1338_v21 = vadd.f32 %v1860_v17, %v1748_v14  ;;  %v1750_v22 = vpop.f32.mrf.mxu0 }
 0x18e   : > { %v1751_v23 = vadd.f32 %v1750_v22, %v1749_v18  ;;  %v1862_v24 = vpop.f32.mrf.mxu1  ;;  %v421_v18 = vld [vmem:[%s2359_s26 + $0xd0] sm:$0xff] }
 0x18f   : > { %v1408_v25 = vadd.f32 %v1338_v21, %v414_v19  ;;  %v1863_v26 = vadd.f32 %v1862_v24, %v1861_v20  ;;  %v1752_v27 = vpop.f32.mrf.mxu0 }
 0x190   : > { %v1864_v29 = vpop.f32.mrf.mxu1 }
 0x191   : > { %1440 = vst [vmem:[%s2359_s26 + $0x98] sm:$0xff] %v1408_v25  ;;  %v1343_v30 = vadd.f32 %v1863_v26, %v1751_v23  ;;  %v1753_v31 = vpop.f32.mrf.mxu0 }
 0x192   : > { %v1754_v32 = vadd.f32 %v1753_v31, %v1752_v27  ;;  %v1865_v33 = vpop.f32.mrf.mxu1  ;;  %v422_v27 = vld [vmem:[%s2359_s26 + $0xd8] sm:$0xff] }
 0x193   : > { %v1409_v34 = vadd.f32 %v1343_v30, %v415_v28  ;;  %v1866_v35 = vadd.f32 %v1865_v33, %v1864_v29  ;;  %v1755_v36 = vpop.f32.mrf.mxu0 }
 0x194   : > { %v1867_v38 = vpop.f32.mrf.mxu1 }
 0x195   : > { %1441 = vst [vmem:[%s2359_s26 + $0xa0] sm:$0xff] %v1409_v34  ;;  %v1346_v39 = vadd.f32 %v1866_v35, %v1754_v32  ;;  %v1756_v40 = vpop.f32.mrf.mxu0 }
 0x196   : > { %v1757_v41 = vadd.f32 %v1756_v40, %v1755_v36  ;;  %v1868_v42 = vpop.f32.mrf.mxu1  ;;  %v423_v36 = vld [vmem:[%s2359_s26 + $0xe0] sm:$0xff] }
 0x197   : > { %v1410_v43 = vadd.f32 %v1346_v39, %v416_v37  ;;  %v1869_v44 = vadd.f32 %v1868_v42, %v1867_v38  ;;  %v1758_v45 = vpop.f32.mrf.mxu0 }
 0x198   : > { %v1870_v47 = vpop.f32.mrf.mxu1 }
 0x199   : > { %1442 = vst [vmem:[%s2359_s26 + $0xa8] sm:$0xff] %v1410_v43  ;;  %v1351_v48 = vadd.f32 %v1869_v44, %v1757_v41  ;;  %v1759_v49 = vpop.f32.mrf.mxu0 }
 0x19a   : > { %v1760_v50 = vadd.f32 %v1759_v49, %v1758_v45  ;;  %v1871_v51 = vpop.f32.mrf.mxu1  ;;  %v424_v45 = vld [vmem:[%s2359_s26 + $0xe8] sm:$0xff] }
 0x19b   : > { %v1411_v52 = vadd.f32 %v1351_v48, %v417_v46  ;;  %v1872_v53 = vadd.f32 %v1871_v51, %v1870_v47  ;;  %v1761_v54 = vpop.f32.mrf.mxu0 }
 0x19c   : > { %v1873_v56 = vpop.f32.mrf.mxu1 }
 0x19d   : > { %1443 = vst [vmem:[%s2359_s26 + $0xb0] sm:$0xff] %v1411_v52  ;;  %v1354_v57 = vadd.f32 %v1872_v53, %v1760_v50  ;;  %v1762_v58 = vpop.f32.mrf.mxu0 }
 0x19e   : > { %v1763_v59 = vadd.f32 %v1762_v58, %v1761_v54  ;;  %v1874_v60 = vpop.f32.mrf.mxu1  ;;  %v425_v54 = vld [vmem:[%s2359_s26 + $0xf0] sm:$0xff] }
 0x19f   : > { %v1412_v61 = vadd.f32 %v1354_v57, %v418_v55  ;;  %v1875_v62 = vadd.f32 %v1874_v60, %v1873_v56  ;;  %v1764_v63 = vpop.f32.mrf.mxu0 }
 0x1a0   : > { %v1876_v1 = vpop.f32.mrf.mxu1 }
 0x1a1   : > { %1444 = vst [vmem:[%s2359_s26 + $0xb8] sm:$0xff] %v1412_v61  ;;  %v1359_v2 = vadd.f32 %v1875_v62, %v1763_v59  ;;  %v1765_v3 = vpop.f32.mrf.mxu0  ;;  %v426_v62 = vld [vmem:[%s2359_s26 + $0xf8] sm:$0xff] }
 0x1a2   : > { %v1766_v4 = vadd.f32 %v1765_v3, %v1764_v63  ;;  %v1877_v5 = vpop.f32.mrf.mxu1 }
 0x1a3   : > { %v1413_v6 = vadd.f32 %v1359_v2, %v419_v0  ;;  %v1878_v7 = vadd.f32 %v1877_v5, %v1876_v1  ;;  %v1767_v8 = vpop.f32.mrf.mxu0 }
 0x1a4   : > { %v1879_v10 = vpop.f32.mrf.mxu1 }
 0x1a5   : > { %1445 = vst [vmem:[%s2359_s26 + $0xc0] sm:$0xff] %v1413_v6  ;;  %v1362_v11 = vadd.f32 %v1878_v7, %v1766_v4  ;;  %v1768_v12 = vpop.f32.mrf.mxu0 }
 0x1a6   : > { %v1769_v13 = vadd.f32 %v1768_v12, %v1767_v8  ;;  %v1880_v14 = vpop.f32.mrf.mxu1 }
 0x1a7   : > { %v1414_v15 = vadd.f32 %v1362_v11, %v420_v9  ;;  %v1881_v16 = vadd.f32 %v1880_v14, %v1879_v10  ;;  %v1770_v17 = vpop.f32.mrf.mxu0 }
 0x1a8   : > { %v1882_v19 = vpop.f32.mrf.mxu1 }
 0x1a9   : > { %1446 = vst [vmem:[%s2359_s26 + $0xc8] sm:$0xff] %v1414_v15  ;;  %v1367_v20 = vadd.f32 %v1881_v16, %v1769_v13  ;;  %v1771_v21 = vpop.f32.mrf.mxu0 }
 0x1aa   : > { %v1772_v22 = vadd.f32 %v1771_v21, %v1770_v17  ;;  %v1883_v23 = vpop.f32.mrf.mxu1 }
 0x1ab   : > { %v1415_v24 = vadd.f32 %v1367_v20, %v421_v18  ;;  %v1884_v25 = vadd.f32 %v1883_v23, %v1882_v19  ;;  %v1773_v26 = vpop.f32.mrf.mxu0 }
 0x1ac   : > { %v1885_v28 = vpop.f32.mrf.mxu1 }
 0x1ad   : > { %1447 = vst [vmem:[%s2359_s26 + $0xd0] sm:$0xff] %v1415_v24  ;;  %v1370_v29 = vadd.f32 %v1884_v25, %v1772_v22  ;;  %v1774_v30 = vpop.f32.mrf.mxu0 }
 0x1ae   : > { %v1775_v31 = vadd.f32 %v1774_v30, %v1773_v26  ;;  %v1886_v32 = vpop.f32.mrf.mxu1 }
 0x1af   : > { %v1416_v33 = vadd.f32 %v1370_v29, %v422_v27  ;;  %v1887_v34 = vadd.f32 %v1886_v32, %v1885_v28  ;;  %v1776_v35 = vpop.f32.mrf.mxu0 }
 0x1b0   : > { %v1888_v37 = vpop.f32.mrf.mxu1 }
 0x1b1   : > { %1448 = vst [vmem:[%s2359_s26 + $0xd8] sm:$0xff] %v1416_v33  ;;  %v1375_v38 = vadd.f32 %v1887_v34, %v1775_v31  ;;  %v1777_v39 = vpop.f32.mrf.mxu0 }
 0x1b2   : > { %v1778_v40 = vadd.f32 %v1777_v39, %v1776_v35  ;;  %v1889_v41 = vpop.f32.mrf.mxu1 }
 0x1b3   : > { %v1417_v42 = vadd.f32 %v1375_v38, %v423_v36  ;;  %v1890_v43 = vadd.f32 %v1889_v41, %v1888_v37  ;;  %v1779_v44 = vpop.f32.mrf.mxu0 }
 0x1b4   : > { %v1891_v46 = vpop.f32.mrf.mxu1 }
 0x1b5   : > { %1449 = vst [vmem:[%s2359_s26 + $0xe0] sm:$0xff] %v1417_v42  ;;  %v1378_v47 = vadd.f32 %v1890_v43, %v1778_v40  ;;  %v1780_v48 = vpop.f32.mrf.mxu0 }
 0x1b6   : > { %v1781_v49 = vadd.f32 %v1780_v48, %v1779_v44  ;;  %v1892_v50 = vpop.f32.mrf.mxu1 }
 0x1b7   : > { %v1418_v51 = vadd.f32 %v1378_v47, %v424_v45  ;;  %v1893_v52 = vadd.f32 %v1892_v50, %v1891_v46  ;;  %v1782_v53 = vpop.f32.mrf.mxu0 }
 0x1b8   : > { %v1894_v55 = vpop.f32.mrf.mxu1 }
 0x1b9   : > { %1450 = vst [vmem:[%s2359_s26 + $0xe8] sm:$0xff] %v1418_v51  ;;  %v1383_v56 = vadd.f32 %v1893_v52, %v1781_v49  ;;  %v1783_v57 = vpop.f32.mrf.mxu0 }
 0x1ba   : > { %v1784_v58 = vadd.f32 %v1783_v57, %v1782_v53  ;;  %v1895_v59 = vpop.f32.mrf.mxu1 }
 0x1bb   : > { %v1419_v60 = vadd.f32 %v1383_v56, %v425_v54  ;;  %v1896_v61 = vadd.f32 %v1895_v59, %v1894_v55 }
 0x1bd   : > { %1451 = vst [vmem:[%s2359_s26 + $0xf0] sm:$0xff] %v1419_v60  ;;  %v1386_v63 = vadd.f32 %v1896_v61, %v1784_v58 }
 0x1bf   : > { %v1420_v0 = vadd.f32 %v1386_v63, %v426_v62 }
 0x1c1   : > { %1452 = vst [vmem:[%s2359_s26 + $0xf8] sm:$0xff] %v1420_v0 }
 0x1c2 PF: > { %s12_s15 = sadd.s32 1, %s2136_s15   ;;  %s2580_s9 = smov %s2116_s10 }
 0x1c3   : > { %p9_p13 = scmp.ge.s32.totalorder %s12_s15, 6   ;;  %s2581_s10 = smov %s2205_s22 }
 0x1c4   : > { %s2582_s11 = smov %s2128_s13  ;;  %s2583_s12 = smov %s2132_s14 }
 0x1c5   : > { %s2584_s13 = smov %s2587_s16  ;;  %s2585_s14 = smov %s2591_s17 }
 0x1c6   :  { %11 = sbr.rel (!%p9_p13) target bundleno = 4 (0x4), region = 93 }

// kernel: discriminator_forward.14
= control target key start
LH: loop header
LB: loop body
LE: loop exit
PB: predicated region body
PF: predicated region fallthrough
CT: control target
= control target key end

     0   :  { %s1030_s0 = inlined_call_operand.vmem [shape: f32[512,128], index: 0, kind: input, shape index: {}]   ;;  %s1031_s1 = inlined_call_operand.vmem [shape: f32[1,128], index: 1, kind: input, shape index: {}]   ;;  %s1032_s2 = inlined_call_operand.vmem [shape: f32[1,128], index: 2, kind: input, shape index: {}]   ;;  %s1033_s3 = inlined_call_operand.vmem [shape: f32[512,128], index: 3, kind: output, shape index: {}]  }
   0x1   :  { %v14_v0 = vld [vmem:[%s1030_s0] sm:$0xff]  ;;  %v15_v4 = vld [vmem:[%s1030_s0 + $0x8] sm:$0xff]  ;;  %v16_v5 = vld [vmem:[%s1030_s0 + $0x10] sm:$0xff] }
   0x2   :  { %v508_v1 = vld [vmem:[%s1031_s1] ss:$0 sm:$0xff]  ;;  %v17_v6 = vld [vmem:[%s1030_s0 + $0x18] sm:$0xff]  ;;  %v19_v11 = vld [vmem:[%s1030_s0 + $0x28] sm:$0xff] }
   0x3   :  { %v513_v2 = vld [vmem:[%s1032_s2] ss:$0 sm:$0xff]  ;;  %v85_v3 = vmul.f32 %v508_v1, %v14_v0  ;;  %v86_v7 = vmul.f32 %v508_v1, %v15_v4  ;;  %v87_v8 = vmul.f32 %v508_v1, %v16_v5  ;;  %v88_v9 = vmul.f32 %v508_v1, %v17_v6  ;;  %v20_v12 = vld [vmem:[%s1030_s0 + $0x30] sm:$0xff]  ;;  %v21_v17 = vld [vmem:[%s1030_s0 + $0x38] sm:$0xff] }
   0x4   :  { %v18_v10 = vld [vmem:[%s1030_s0 + $0x20] sm:$0xff]  ;;  %v90_v15 = vmul.f32 %v508_v1, %v19_v11  ;;  %v91_v16 = vmul.f32 %v508_v1, %v20_v12  ;;  %v92_v21 = vmul.f32 %v508_v1, %v21_v17  ;;  %v23_v30 = vld [vmem:[%s1030_s0 + $0x48] sm:$0xff]  ;;  %v24_v31 = vld [vmem:[%s1030_s0 + $0x50] sm:$0xff] }
   0x5   :  { %v156_v13 = vadd.f32 %v513_v2, %v85_v3  ;;  %v89_v14 = vmul.f32 %v508_v1, %v18_v10  ;;  %v157_v18 = vadd.f32 %v513_v2, %v86_v7  ;;  %v158_v19 = vadd.f32 %v513_v2, %v87_v8  ;;  %v22_v25 = vld [vmem:[%s1030_s0 + $0x40] sm:$0xff]  ;;  %v25_v43 = vld [vmem:[%s1030_s0 + $0x58] sm:$0xff]  ;;  %v27_v45 = vld [vmem:[%s1030_s0 + $0x68] sm:$0xff] }
   0x6   :  { %v159_v20 = vadd.f32 %v513_v2, %v88_v9  ;;  %v161_v24 = vadd.f32 %v513_v2, %v90_v15  ;;  %v162_v37 = vadd.f32 %v513_v2, %v91_v16  ;;  %v163_v38 = vadd.f32 %v513_v2, %v92_v21  ;;  %v26_v44 = vld [vmem:[%s1030_s0 + $0x60] sm:$0xff]  ;;  %v28_v56 = vld [vmem:[%s1030_s0 + $0x70] sm:$0xff]  ;;  %v29_v4 = vld [vmem:[%s1030_s0 + $0x78] sm:$0xff] }
   0x7   :  { %vm220_vm0 = vcmp.ge.f32.partialorder %v156_v13, 0.0  ;;  %v284_v22 = vmul.f32 0.2, %v156_v13  ;;  %v160_v23 = vadd.f32 %v513_v2, %v89_v14  ;;  %vm221_vm1 = vcmp.ge.f32.partialorder %v157_v18, 0.0  ;;  %v30_v5 = vld [vmem:[%s1030_s0 + $0x80] sm:$0xff]  ;;  %v31_v9 = vld [vmem:[%s1030_s0 + $0x88] sm:$0xff] }
   0x8   :  { %v285_v26 = vmul.f32 0.2, %v157_v18  ;;  %vm222_vm2 = vcmp.ge.f32.partialorder %v158_v19, 0.0  ;;  %v286_v27 = vmul.f32 0.2, %v158_v19  ;;  %vm223_vm3 = vcmp.ge.f32.partialorder %v159_v20, 0.0 }
   0x9   :  { %v348_v28 = vsel %vm220_vm0, %v156_v13, %v284_v22  ;;  %v287_v29 = vmul.f32 0.2, %v159_v20  ;;  %vm224_vm4 = vcmp.ge.f32.partialorder %v160_v23, 0.0  ;;  %v288_v34 = vmul.f32 0.2, %v160_v23  ;;  %v32_v10 = vld [vmem:[%s1030_s0 + $0x90] sm:$0xff] }
   0xa   :  { %412 = vst [vmem:[%s1033_s3] sm:$0xff] %v348_v28  ;;  %v349_v32 = vsel %vm221_vm1, %v157_v18, %v285_v26  ;;  %v350_v33 = vsel %vm222_vm2, %v158_v19, %v286_v27  ;;  %vm225_vm5 = vcmp.ge.f32.partialorder %v161_v24, 0.0  ;;  %v289_v36 = vmul.f32 0.2, %v161_v24  ;;  %v33_v17 = vld [vmem:[%s1030_s0 + $0x98] sm:$0xff]  ;;  %v34_v18 = vld [vmem:[%s1030_s0 + $0xa0] sm:$0xff] }
   0xb   :  { %413 = vst [vmem:[%s1033_s3 + $0x8] sm:$0xff] %v349_v32  ;;  %414 = vst [vmem:[%s1033_s3 + $0x10] sm:$0xff] %v350_v33  ;;  %v351_v35 = vsel %vm223_vm3, %v159_v20, %v287_v29  ;;  %v352_v39 = vsel %vm224_vm4, %v160_v23, %v288_v34  ;;  %v93_v40 = vmul.f32 %v508_v1, %v22_v25  ;;  %vm226_vm6 = vcmp.ge.f32.partialorder %v162_v37, 0.0  ;;  %v35_v32 = vld [vmem:[%s1030_s0 + $0xa8] sm:$0xff]  ;;  %v36_v33 = vld [vmem:[%s1030_s0 + $0xb0] sm:$0xff] }
   0xc   :  { %415 = vst [vmem:[%s1033_s3 + $0x18] sm:$0xff] %v351_v35  ;;  %v94_v41 = vmul.f32 %v508_v1, %v23_v30  ;;  %v95_v42 = vmul.f32 %v508_v1, %v24_v31  ;;  %416 = vst [vmem:[%s1033_s3 + $0x20] sm:$0xff] %v352_v39  ;;  %v353_v46 = vsel %vm225_vm5, %v161_v24, %v289_v36  ;;  %v290_v47 = vmul.f32 0.2, %v162_v37 }
   0xd   :  { %vm227_vm7 = vcmp.ge.f32.partialorder %v163_v38, 0.0  ;;  %417 = vst [vmem:[%s1033_s3 + $0x28] sm:$0xff] %v353_v46  ;;  %v291_v48 = vmul.f32 0.2, %v163_v38  ;;  %v164_v49 = vadd.f32 %v513_v2, %v93_v40  ;;  %v96_v53 = vmul.f32 %v508_v1, %v25_v43  ;;  %v37_v40 = vld [vmem:[%s1030_s0 + $0xb8] sm:$0xff]  ;;  %v39_v46 = vld [vmem:[%s1030_s0 + $0xc8] sm:$0xff] }
   0xe   :  { %v165_v50 = vadd.f32 %v513_v2, %v94_v41  ;;  %v166_v51 = vadd.f32 %v513_v2, %v95_v42  ;;  %v354_v52 = vsel %vm226_vm6, %v162_v37, %v290_v47  ;;  %v97_v54 = vmul.f32 %v508_v1, %v26_v44  ;;  %v40_v47 = vld [vmem:[%s1030_s0 + $0xd0] sm:$0xff] }
   0xf   :  { %v98_v55 = vmul.f32 %v508_v1, %v27_v45  ;;  %418 = vst [vmem:[%s1033_s3 + $0x30] sm:$0xff] %v354_v52  ;;  %v355_v57 = vsel %vm227_vm7, %v163_v38, %v291_v48  ;;  %vm228_vm8 = vcmp.ge.f32.partialorder %v164_v49, 0.0  ;;  %v292_v58 = vmul.f32 0.2, %v164_v49  ;;  %v38_v45 = vld [vmem:[%s1030_s0 + $0xc0] sm:$0xff] }
  0x10   :  { %vm229_vm9 = vcmp.ge.f32.partialorder %v165_v50, 0.0  ;;  %419 = vst [vmem:[%s1033_s3 + $0x38] sm:$0xff] %v355_v57  ;;  %v293_v59 = vmul.f32 0.2, %v165_v50  ;;  %vm230_vm10 = vcmp.ge.f32.partialorder %v166_v51, 0.0  ;;  %v167_v61 = vadd.f32 %v513_v2, %v96_v53 }
  0x11   :  { %v294_v60 = vmul.f32 0.2, %v166_v51  ;;  %v356_v62 = vsel %vm228_vm8, %v164_v49, %v292_v58  ;;  %v168_v63 = vadd.f32 %v513_v2, %v97_v54  ;;  %v169_v0 = vadd.f32 %v513_v2, %v98_v55  ;;  %v41_v58 = vld [vmem:[%s1030_s0 + $0xd8] sm:$0xff] }
  0x12   :  { %v99_v3 = vmul.f32 %v508_v1, %v28_v56  ;;  %420 = vst [vmem:[%s1033_s3 + $0x40] sm:$0xff] %v356_v62  ;;  %v357_v6 = vsel %vm229_vm9, %v165_v50, %v293_v59  ;;  %vm231_vm11 = vcmp.ge.f32.partialorder %v167_v61, 0.0  ;;  %v295_v8 = vmul.f32 0.2, %v167_v61  ;;  %v42_v59 = vld [vmem:[%s1030_s0 + $0xe0] sm:$0xff] }
  0x13   :  { %v358_v7 = vsel %vm230_vm10, %v166_v51, %v294_v60  ;;  %421 = vst [vmem:[%s1033_s3 + $0x48] sm:$0xff] %v357_v6  ;;  %vm232_vm12 = vcmp.ge.f32.partialorder %v168_v63, 0.0  ;;  %v296_v11 = vmul.f32 0.2, %v168_v63  ;;  %vm233_vm13 = vcmp.ge.f32.partialorder %v169_v0, 0.0 }
  0x14   :  { %422 = vst [vmem:[%s1033_s3 + $0x50] sm:$0xff] %v358_v7  ;;  %v297_v12 = vmul.f32 0.2, %v169_v0  ;;  %v359_v13 = vsel %vm231_vm11, %v167_v61, %v295_v8  ;;  %v170_v14 = vadd.f32 %v513_v2, %v99_v3  ;;  %v100_v15 = vmul.f32 %v508_v1, %v29_v4 }
  0x15   :  { %v101_v16 = vmul.f32 %v508_v1, %v30_v5  ;;  %423 = vst [vmem:[%s1033_s3 + $0x58] sm:$0xff] %v359_v13  ;;  %v360_v19 = vsel %vm232_vm12, %v168_v63, %v296_v11  ;;  %v102_v21 = vmul.f32 %v508_v1, %v31_v9  ;;  %v103_v22 = vmul.f32 %v508_v1, %v32_v10  ;;  %v43_v10 = vld [vmem:[%s1030_s0 + $0xe8] sm:$0xff]  ;;  %v44_v11 = vld [vmem:[%s1030_s0 + $0xf0] sm:$0xff] }
  0x16   :  { %v361_v20 = vsel %vm233_vm13, %v169_v0, %v297_v12  ;;  %424 = vst [vmem:[%s1033_s3 + $0x60] sm:$0xff] %v360_v19  ;;  %vm234_vm14 = vcmp.ge.f32.partialorder %v170_v14, 0.0  ;;  %v298_v23 = vmul.f32 0.2, %v170_v14  ;;  %v171_v24 = vadd.f32 %v513_v2, %v100_v15 }
  0x17   :  { %425 = vst [vmem:[%s1033_s3 + $0x68] sm:$0xff] %v361_v20  ;;  %v172_v25 = vadd.f32 %v513_v2, %v101_v16  ;;  %v173_v26 = vadd.f32 %v513_v2, %v102_v21  ;;  %v174_v27 = vadd.f32 %v513_v2, %v103_v22  ;;  %v104_v28 = vmul.f32 %v508_v1, %v33_v17 }
  0x18   :  { %v105_v29 = vmul.f32 %v508_v1, %v34_v18  ;;  %v362_v30 = vsel %vm234_vm14, %v170_v14, %v298_v23  ;;  %vm235_vm15 = vcmp.ge.f32.partialorder %v171_v24, 0.0  ;;  %v299_v31 = vmul.f32 0.2, %v171_v24  ;;  %v45_v18 = vld [vmem:[%s1030_s0 + $0xf8] sm:$0xff]  ;;  %v46_v23 = vld [vmem:[%s1030_s0 + $0x100] sm:$0xff] }
  0x19   :  { %vm236_vm0 = vcmp.ge.f32.partialorder %v172_v25, 0.0  ;;  %426 = vst [vmem:[%s1033_s3 + $0x70] sm:$0xff] %v362_v30  ;;  %v300_v34 = vmul.f32 0.2, %v172_v25  ;;  %vm237_vm1 = vcmp.ge.f32.partialorder %v173_v26, 0.0  ;;  %vm238_vm2 = vcmp.ge.f32.partialorder %v174_v27, 0.0 }
  0x1a   :  { %v301_v35 = vmul.f32 0.2, %v173_v26  ;;  %v363_v36 = vsel %vm235_vm15, %v171_v24, %v299_v31  ;;  %v302_v37 = vmul.f32 0.2, %v174_v27  ;;  %v175_v38 = vadd.f32 %v513_v2, %v104_v28  ;;  %v47_v24 = vld [vmem:[%s1030_s0 + $0x108] sm:$0xff] }
  0x1b   :  { %v176_v39 = vadd.f32 %v513_v2, %v105_v29  ;;  %427 = vst [vmem:[%s1033_s3 + $0x78] sm:$0xff] %v363_v36  ;;  %v364_v41 = vsel %vm236_vm0, %v172_v25, %v300_v34  ;;  %v106_v43 = vmul.f32 %v508_v1, %v35_v32  ;;  %v107_v44 = vmul.f32 %v508_v1, %v36_v33  ;;  %v48_v25 = vld [vmem:[%s1030_s0 + $0x110] sm:$0xff]  ;;  %v49_v36 = vld [vmem:[%s1030_s0 + $0x118] sm:$0xff] }
  0x1c   :  { %v365_v42 = vsel %vm237_vm1, %v173_v26, %v301_v35  ;;  %428 = vst [vmem:[%s1033_s3 + $0x80] sm:$0xff] %v364_v41  ;;  %v366_v48 = vsel %vm238_vm2, %v174_v27, %v302_v37  ;;  %vm239_vm3 = vcmp.ge.f32.partialorder %v175_v38, 0.0  ;;  %v303_v49 = vmul.f32 0.2, %v175_v38  ;;  %v50_v37 = vld [vmem:[%s1030_s0 + $0x120] sm:$0xff] }
  0x1d   :  { %429 = vst [vmem:[%s1033_s3 + $0x88] sm:$0xff] %v365_v42  ;;  %vm240_vm4 = vcmp.ge.f32.partialorder %v176_v39, 0.0  ;;  %430 = vst [vmem:[%s1033_s3 + $0x90] sm:$0xff] %v366_v48  ;;  %v304_v50 = vmul.f32 0.2, %v176_v39  ;;  %v177_v51 = vadd.f32 %v513_v2, %v106_v43  ;;  %v178_v52 = vadd.f32 %v513_v2, %v107_v44 }
  0x1e   :  { %v108_v53 = vmul.f32 %v508_v1, %v37_v40  ;;  %v367_v54 = vsel %vm239_vm3, %v175_v38, %v303_v49  ;;  %v109_v55 = vmul.f32 %v508_v1, %v38_v45  ;;  %v110_v56 = vmul.f32 %v508_v1, %v39_v46 }
  0x1f   :  { %v111_v57 = vmul.f32 %v508_v1, %v40_v47  ;;  %431 = vst [vmem:[%s1033_s3 + $0x98] sm:$0xff] %v367_v54  ;;  %v368_v60 = vsel %vm240_vm4, %v176_v39, %v304_v50  ;;  %vm241_vm5 = vcmp.ge.f32.partialorder %v177_v51, 0.0  ;;  %v305_v61 = vmul.f32 0.2, %v177_v51  ;;  %v51_v50 = vld [vmem:[%s1030_s0 + $0x128] sm:$0xff] }
  0x20   :  { %vm242_vm6 = vcmp.ge.f32.partialorder %v178_v52, 0.0  ;;  %432 = vst [vmem:[%s1033_s3 + $0xa0] sm:$0xff] %v368_v60  ;;  %v306_v62 = vmul.f32 0.2, %v178_v52  ;;  %v179_v63 = vadd.f32 %v513_v2, %v108_v53  ;;  %v180_v0 = vadd.f32 %v513_v2, %v109_v55 }
  0x21   :  { %v181_v3 = vadd.f32 %v513_v2, %v110_v56  ;;  %v369_v4 = vsel %vm241_vm5, %v177_v51, %v305_v61  ;;  %v182_v5 = vadd.f32 %v513_v2, %v111_v57  ;;  %v112_v6 = vmul.f32 %v508_v1, %v41_v58  ;;  %v52_v51 = vld [vmem:[%s1030_s0 + $0x130] sm:$0xff]  ;;  %v53_v58 = vld [vmem:[%s1030_s0 + $0x138] sm:$0xff] }
  0x22   :  { %v113_v7 = vmul.f32 %v508_v1, %v42_v59  ;;  %433 = vst [vmem:[%s1033_s3 + $0xa8] sm:$0xff] %v369_v4  ;;  %v370_v8 = vsel %vm242_vm6, %v178_v52, %v306_v62  ;;  %vm243_vm7 = vcmp.ge.f32.partialorder %v179_v63, 0.0  ;;  %v307_v9 = vmul.f32 0.2, %v179_v63 }
  0x23   :  { %vm244_vm8 = vcmp.ge.f32.partialorder %v180_v0, 0.0  ;;  %434 = vst [vmem:[%s1033_s3 + $0xb0] sm:$0xff] %v370_v8  ;;  %v308_v12 = vmul.f32 0.2, %v180_v0  ;;  %vm245_vm9 = vcmp.ge.f32.partialorder %v181_v3, 0.0  ;;  %vm246_vm10 = vcmp.ge.f32.partialorder %v182_v5, 0.0 }
  0x24   :  { %v309_v13 = vmul.f32 0.2, %v181_v3  ;;  %v371_v14 = vsel %vm243_vm7, %v179_v63, %v307_v9  ;;  %v310_v15 = vmul.f32 0.2, %v182_v5  ;;  %v183_v16 = vadd.f32 %v513_v2, %v112_v6  ;;  %v54_v63 = vld [vmem:[%s1030_s0 + $0x140] sm:$0xff] }
  0x25   :  { %v184_v17 = vadd.f32 %v513_v2, %v113_v7  ;;  %435 = vst [vmem:[%s1033_s3 + $0xb8] sm:$0xff] %v371_v14  ;;  %v372_v19 = vsel %vm244_vm8, %v180_v0, %v308_v12  ;;  %v114_v21 = vmul.f32 %v508_v1, %v43_v10  ;;  %v115_v22 = vmul.f32 %v508_v1, %v44_v11  ;;  %v55_v0 = vld [vmem:[%s1030_s0 + $0x148] sm:$0xff]  ;;  %v57_v14 = vld [vmem:[%s1030_s0 + $0x158] sm:$0xff] }
  0x26   :  { %v373_v20 = vsel %vm245_vm9, %v181_v3, %v309_v13  ;;  %436 = vst [vmem:[%s1033_s3 + $0xc0] sm:$0xff] %v372_v19  ;;  %v374_v26 = vsel %vm246_vm10, %v182_v5, %v310_v15  ;;  %vm247_vm11 = vcmp.ge.f32.partialorder %v183_v16, 0.0  ;;  %v311_v27 = vmul.f32 0.2, %v183_v16  ;;  %v56_v3 = vld [vmem:[%s1030_s0 + $0x150] sm:$0xff]  ;;  %v58_v15 = vld [vmem:[%s1030_s0 + $0x160] sm:$0xff] }
  0x27   :  { %437 = vst [vmem:[%s1033_s3 + $0xc8] sm:$0xff] %v373_v20  ;;  %vm248_vm12 = vcmp.ge.f32.partialorder %v184_v17, 0.0  ;;  %438 = vst [vmem:[%s1033_s3 + $0xd0] sm:$0xff] %v374_v26  ;;  %v312_v28 = vmul.f32 0.2, %v184_v17  ;;  %v185_v29 = vadd.f32 %v513_v2, %v114_v21  ;;  %v186_v30 = vadd.f32 %v513_v2, %v115_v22 }
  0x28   :  { %v116_v31 = vmul.f32 %v508_v1, %v45_v18  ;;  %v375_v32 = vsel %vm247_vm11, %v183_v16, %v311_v27  ;;  %v117_v33 = vmul.f32 %v508_v1, %v46_v23  ;;  %v118_v34 = vmul.f32 %v508_v1, %v47_v24 }
  0x29   :  { %v119_v35 = vmul.f32 %v508_v1, %v48_v25  ;;  %439 = vst [vmem:[%s1033_s3 + $0xd8] sm:$0xff] %v375_v32  ;;  %v376_v38 = vsel %vm248_vm12, %v184_v17, %v312_v28  ;;  %vm249_vm13 = vcmp.ge.f32.partialorder %v185_v29, 0.0  ;;  %v313_v39 = vmul.f32 0.2, %v185_v29  ;;  %v59_v28 = vld [vmem:[%s1030_s0 + $0x168] sm:$0xff] }
  0x2a   :  { %vm250_vm14 = vcmp.ge.f32.partialorder %v186_v30, 0.0  ;;  %440 = vst [vmem:[%s1033_s3 + $0xe0] sm:$0xff] %v376_v38  ;;  %v314_v40 = vmul.f32 0.2, %v186_v30  ;;  %v187_v41 = vadd.f32 %v513_v2, %v116_v31  ;;  %v188_v42 = vadd.f32 %v513_v2, %v117_v33 }
  0x2b   :  { %v189_v43 = vadd.f32 %v513_v2, %v118_v34  ;;  %v377_v44 = vsel %vm249_vm13, %v185_v29, %v313_v39  ;;  %v190_v45 = vadd.f32 %v513_v2, %v119_v35  ;;  %v120_v46 = vmul.f32 %v508_v1, %v49_v36  ;;  %v60_v29 = vld [vmem:[%s1030_s0 + $0x170] sm:$0xff]  ;;  %v61_v36 = vld [vmem:[%s1030_s0 + $0x178] sm:$0xff] }
  0x2c   :  { %v121_v47 = vmul.f32 %v508_v1, %v50_v37  ;;  %441 = vst [vmem:[%s1033_s3 + $0xe8] sm:$0xff] %v377_v44  ;;  %v378_v48 = vsel %vm250_vm14, %v186_v30, %v314_v40  ;;  %vm251_vm15 = vcmp.ge.f32.partialorder %v187_v41, 0.0  ;;  %v315_v49 = vmul.f32 0.2, %v187_v41 }
  0x2d   :  { %vm252_vm0 = vcmp.ge.f32.partialorder %v188_v42, 0.0  ;;  %442 = vst [vmem:[%s1033_s3 + $0xf0] sm:$0xff] %v378_v48  ;;  %v316_v52 = vmul.f32 0.2, %v188_v42  ;;  %vm253_vm1 = vcmp.ge.f32.partialorder %v189_v43, 0.0  ;;  %vm254_vm2 = vcmp.ge.f32.partialorder %v190_v45, 0.0 }
  0x2e   :  { %v317_v53 = vmul.f32 0.2, %v189_v43  ;;  %v379_v54 = vsel %vm251_vm15, %v187_v41, %v315_v49  ;;  %v318_v55 = vmul.f32 0.2, %v190_v45  ;;  %v191_v56 = vadd.f32 %v513_v2, %v120_v46  ;;  %v62_v41 = vld [vmem:[%s1030_s0 + $0x180] sm:$0xff] }
  0x2f   :  { %v192_v57 = vadd.f32 %v513_v2, %v121_v47  ;;  %443 = vst [vmem:[%s1033_s3 + $0xf8] sm:$0xff] %v379_v54  ;;  %v380_v59 = vsel %vm252_vm0, %v188_v42, %v316_v52  ;;  %v122_v61 = vmul.f32 %v508_v1, %v51_v50  ;;  %v123_v62 = vmul.f32 %v508_v1, %v52_v51  ;;  %v63_v42 = vld [vmem:[%s1030_s0 + $0x188] sm:$0xff]  ;;  %v65_v54 = vld [vmem:[%s1030_s0 + $0x198] sm:$0xff] }
  0x30   :  { %v381_v60 = vsel %vm253_vm1, %v189_v43, %v317_v53  ;;  %444 = vst [vmem:[%s1033_s3 + $0x100] sm:$0xff] %v380_v59  ;;  %v382_v4 = vsel %vm254_vm2, %v190_v45, %v318_v55  ;;  %vm255_vm3 = vcmp.ge.f32.partialorder %v191_v56, 0.0  ;;  %v319_v5 = vmul.f32 0.2, %v191_v56  ;;  %v64_v43 = vld [vmem:[%s1030_s0 + $0x190] sm:$0xff]  ;;  %v66_v55 = vld [vmem:[%s1030_s0 + $0x1a0] sm:$0xff] }
  0x31   :  { %445 = vst [vmem:[%s1033_s3 + $0x108] sm:$0xff] %v381_v60  ;;  %vm256_vm4 = vcmp.ge.f32.partialorder %v192_v57, 0.0  ;;  %446 = vst [vmem:[%s1033_s3 + $0x110] sm:$0xff] %v382_v4  ;;  %v320_v6 = vmul.f32 0.2, %v192_v57  ;;  %v193_v7 = vadd.f32 %v513_v2, %v122_v61  ;;  %v194_v8 = vadd.f32 %v513_v2, %v123_v62 }
  0x32   :  { %v124_v9 = vmul.f32 %v508_v1, %v53_v58  ;;  %v383_v10 = vsel %vm255_vm3, %v191_v56, %v319_v5  ;;  %v125_v11 = vmul.f32 %v508_v1, %v54_v63  ;;  %v126_v12 = vmul.f32 %v508_v1, %v55_v0 }
  0x33   :  { %v127_v13 = vmul.f32 %v508_v1, %v56_v3  ;;  %447 = vst [vmem:[%s1033_s3 + $0x118] sm:$0xff] %v383_v10  ;;  %v384_v16 = vsel %vm256_vm4, %v192_v57, %v320_v6  ;;  %vm257_vm5 = vcmp.ge.f32.partialorder %v193_v7, 0.0  ;;  %v321_v17 = vmul.f32 0.2, %v193_v7  ;;  %v67_v6 = vld [vmem:[%s1030_s0 + $0x1a8] sm:$0xff] }
  0x34   :  { %vm258_vm6 = vcmp.ge.f32.partialorder %v194_v8, 0.0  ;;  %448 = vst [vmem:[%s1033_s3 + $0x120] sm:$0xff] %v384_v16  ;;  %v322_v18 = vmul.f32 0.2, %v194_v8  ;;  %v195_v19 = vadd.f32 %v513_v2, %v124_v9  ;;  %v196_v20 = vadd.f32 %v513_v2, %v125_v11 }
  0x35   :  { %v197_v21 = vadd.f32 %v513_v2, %v126_v12  ;;  %v385_v22 = vsel %vm257_vm5, %v193_v7, %v321_v17  ;;  %v198_v23 = vadd.f32 %v513_v2, %v127_v13  ;;  %v128_v24 = vmul.f32 %v508_v1, %v57_v14  ;;  %v68_v7 = vld [vmem:[%s1030_s0 + $0x1b0] sm:$0xff]  ;;  %v69_v14 = vld [vmem:[%s1030_s0 + $0x1b8] sm:$0xff] }
  0x36   :  { %v129_v25 = vmul.f32 %v508_v1, %v58_v15  ;;  %449 = vst [vmem:[%s1033_s3 + $0x128] sm:$0xff] %v385_v22  ;;  %v386_v26 = vsel %vm258_vm6, %v194_v8, %v322_v18  ;;  %vm259_vm7 = vcmp.ge.f32.partialorder %v195_v19, 0.0  ;;  %v323_v27 = vmul.f32 0.2, %v195_v19 }
  0x37   :  { %vm260_vm8 = vcmp.ge.f32.partialorder %v196_v20, 0.0  ;;  %450 = vst [vmem:[%s1033_s3 + $0x130] sm:$0xff] %v386_v26  ;;  %v324_v30 = vmul.f32 0.2, %v196_v20  ;;  %vm261_vm9 = vcmp.ge.f32.partialorder %v197_v21, 0.0  ;;  %vm262_vm10 = vcmp.ge.f32.partialorder %v198_v23, 0.0 }
  0x38   :  { %v325_v31 = vmul.f32 0.2, %v197_v21  ;;  %v387_v32 = vsel %vm259_vm7, %v195_v19, %v323_v27  ;;  %v326_v33 = vmul.f32 0.2, %v198_v23  ;;  %v199_v34 = vadd.f32 %v513_v2, %v128_v24  ;;  %v70_v19 = vld [vmem:[%s1030_s0 + $0x1c0] sm:$0xff] }
  0x39   :  { %v200_v35 = vadd.f32 %v513_v2, %v129_v25  ;;  %451 = vst [vmem:[%s1033_s3 + $0x138] sm:$0xff] %v387_v32  ;;  %v388_v37 = vsel %vm260_vm8, %v196_v20, %v324_v30  ;;  %v130_v39 = vmul.f32 %v508_v1, %v59_v28  ;;  %v131_v40 = vmul.f32 %v508_v1, %v60_v29  ;;  %v71_v20 = vld [vmem:[%s1030_s0 + $0x1c8] sm:$0xff]  ;;  %v73_v32 = vld [vmem:[%s1030_s0 + $0x1d8] sm:$0xff] }
  0x3a   :  { %v389_v38 = vsel %vm261_vm9, %v197_v21, %v325_v31  ;;  %452 = vst [vmem:[%s1033_s3 + $0x140] sm:$0xff] %v388_v37  ;;  %v390_v44 = vsel %vm262_vm10, %v198_v23, %v326_v33  ;;  %vm263_vm11 = vcmp.ge.f32.partialorder %v199_v34, 0.0  ;;  %v327_v45 = vmul.f32 0.2, %v199_v34  ;;  %v72_v21 = vld [vmem:[%s1030_s0 + $0x1d0] sm:$0xff]  ;;  %v74_v33 = vld [vmem:[%s1030_s0 + $0x1e0] sm:$0xff] }
  0x3b   :  { %453 = vst [vmem:[%s1033_s3 + $0x148] sm:$0xff] %v389_v38  ;;  %vm264_vm12 = vcmp.ge.f32.partialorder %v200_v35, 0.0  ;;  %454 = vst [vmem:[%s1033_s3 + $0x150] sm:$0xff] %v390_v44  ;;  %v328_v46 = vmul.f32 0.2, %v200_v35  ;;  %v201_v47 = vadd.f32 %v513_v2, %v130_v39  ;;  %v202_v48 = vadd.f32 %v513_v2, %v131_v40 }
  0x3c   :  { %v132_v49 = vmul.f32 %v508_v1, %v61_v36  ;;  %v391_v50 = vsel %vm263_vm11, %v199_v34, %v327_v45  ;;  %v133_v51 = vmul.f32 %v508_v1, %v62_v41  ;;  %v134_v52 = vmul.f32 %v508_v1, %v63_v42 }
  0x3d   :  { %v135_v53 = vmul.f32 %v508_v1, %v64_v43  ;;  %455 = vst [vmem:[%s1033_s3 + $0x158] sm:$0xff] %v391_v50  ;;  %v392_v56 = vsel %vm264_vm12, %v200_v35, %v328_v46  ;;  %vm265_vm13 = vcmp.ge.f32.partialorder %v201_v47, 0.0  ;;  %v329_v57 = vmul.f32 0.2, %v201_v47  ;;  %v75_v46 = vld [vmem:[%s1030_s0 + $0x1e8] sm:$0xff] }
  0x3e   :  { %vm266_vm14 = vcmp.ge.f32.partialorder %v202_v48, 0.0  ;;  %456 = vst [vmem:[%s1033_s3 + $0x160] sm:$0xff] %v392_v56  ;;  %v330_v58 = vmul.f32 0.2, %v202_v48  ;;  %v203_v59 = vadd.f32 %v513_v2, %v132_v49  ;;  %v204_v60 = vadd.f32 %v513_v2, %v133_v51 }
  0x3f   :  { %v205_v61 = vadd.f32 %v513_v2, %v134_v52  ;;  %v393_v62 = vsel %vm265_vm13, %v201_v47, %v329_v57  ;;  %v206_v63 = vadd.f32 %v513_v2, %v135_v53  ;;  %v136_v0 = vmul.f32 %v508_v1, %v65_v54  ;;  %v76_v47 = vld [vmem:[%s1030_s0 + $0x1f0] sm:$0xff]  ;;  %v77_v54 = vld [vmem:[%s1030_s0 + $0x1f8] sm:$0xff] }
  0x40   :  { %v137_v3 = vmul.f32 %v508_v1, %v66_v55  ;;  %457 = vst [vmem:[%s1033_s3 + $0x168] sm:$0xff] %v393_v62  ;;  %v394_v4 = vsel %vm266_vm14, %v202_v48, %v330_v58  ;;  %vm267_vm15 = vcmp.ge.f32.partialorder %v203_v59, 0.0  ;;  %v331_v5 = vmul.f32 0.2, %v203_v59 }
  0x41   :  { %vm268_vm0 = vcmp.ge.f32.partialorder %v204_v60, 0.0  ;;  %458 = vst [vmem:[%s1033_s3 + $0x170] sm:$0xff] %v394_v4  ;;  %v332_v8 = vmul.f32 0.2, %v204_v60  ;;  %vm269_vm1 = vcmp.ge.f32.partialorder %v205_v61, 0.0  ;;  %vm270_vm2 = vcmp.ge.f32.partialorder %v206_v63, 0.0 }
  0x42   :  { %v333_v9 = vmul.f32 0.2, %v205_v61  ;;  %v395_v10 = vsel %vm267_vm15, %v203_v59, %v331_v5  ;;  %v334_v11 = vmul.f32 0.2, %v206_v63  ;;  %v207_v12 = vadd.f32 %v513_v2, %v136_v0 }
  0x43   :  { %v208_v13 = vadd.f32 %v513_v2, %v137_v3  ;;  %459 = vst [vmem:[%s1033_s3 + $0x178] sm:$0xff] %v395_v10  ;;  %v396_v15 = vsel %vm268_vm0, %v204_v60, %v332_v8  ;;  %v138_v17 = vmul.f32 %v508_v1, %v67_v6  ;;  %v139_v18 = vmul.f32 %v508_v1, %v68_v7 }
  0x44   :  { %v397_v16 = vsel %vm269_vm1, %v205_v61, %v333_v9  ;;  %460 = vst [vmem:[%s1033_s3 + $0x180] sm:$0xff] %v396_v15  ;;  %v398_v22 = vsel %vm270_vm2, %v206_v63, %v334_v11  ;;  %vm271_vm3 = vcmp.ge.f32.partialorder %v207_v12, 0.0  ;;  %v335_v23 = vmul.f32 0.2, %v207_v12 }
  0x45   :  { %461 = vst [vmem:[%s1033_s3 + $0x188] sm:$0xff] %v397_v16  ;;  %vm272_vm4 = vcmp.ge.f32.partialorder %v208_v13, 0.0  ;;  %462 = vst [vmem:[%s1033_s3 + $0x190] sm:$0xff] %v398_v22  ;;  %v336_v24 = vmul.f32 0.2, %v208_v13  ;;  %v209_v25 = vadd.f32 %v513_v2, %v138_v17  ;;  %v210_v26 = vadd.f32 %v513_v2, %v139_v18 }
  0x46   :  { %v140_v27 = vmul.f32 %v508_v1, %v69_v14  ;;  %v399_v28 = vsel %vm271_vm3, %v207_v12, %v335_v23  ;;  %v141_v29 = vmul.f32 %v508_v1, %v70_v19  ;;  %v142_v30 = vmul.f32 %v508_v1, %v71_v20 }
  0x47   :  { %v143_v31 = vmul.f32 %v508_v1, %v72_v21  ;;  %463 = vst [vmem:[%s1033_s3 + $0x198] sm:$0xff] %v399_v28  ;;  %v400_v34 = vsel %vm272_vm4, %v208_v13, %v336_v24  ;;  %vm273_vm5 = vcmp.ge.f32.partialorder %v209_v25, 0.0  ;;  %v337_v35 = vmul.f32 0.2, %v209_v25 }
  0x48   :  { %vm274_vm6 = vcmp.ge.f32.partialorder %v210_v26, 0.0  ;;  %464 = vst [vmem:[%s1033_s3 + $0x1a0] sm:$0xff] %v400_v34  ;;  %v338_v36 = vmul.f32 0.2, %v210_v26  ;;  %v211_v37 = vadd.f32 %v513_v2, %v140_v27  ;;  %v212_v38 = vadd.f32 %v513_v2, %v141_v29 }
  0x49   :  { %v213_v39 = vadd.f32 %v513_v2, %v142_v30  ;;  %v401_v40 = vsel %vm273_vm5, %v209_v25, %v337_v35  ;;  %v214_v41 = vadd.f32 %v513_v2, %v143_v31  ;;  %v144_v42 = vmul.f32 %v508_v1, %v73_v32 }
  0x4a   :  { %v145_v43 = vmul.f32 %v508_v1, %v74_v33  ;;  %465 = vst [vmem:[%s1033_s3 + $0x1a8] sm:$0xff] %v401_v40  ;;  %v402_v44 = vsel %vm274_vm6, %v210_v26, %v338_v36  ;;  %vm275_vm7 = vcmp.ge.f32.partialorder %v211_v37, 0.0  ;;  %v339_v45 = vmul.f32 0.2, %v211_v37 }
  0x4b   :  { %vm276_vm8 = vcmp.ge.f32.partialorder %v212_v38, 0.0  ;;  %466 = vst [vmem:[%s1033_s3 + $0x1b0] sm:$0xff] %v402_v44  ;;  %v340_v48 = vmul.f32 0.2, %v212_v38  ;;  %vm277_vm9 = vcmp.ge.f32.partialorder %v213_v39, 0.0  ;;  %vm278_vm10 = vcmp.ge.f32.partialorder %v214_v41, 0.0 }
  0x4c   :  { %v341_v49 = vmul.f32 0.2, %v213_v39  ;;  %v403_v50 = vsel %vm275_vm7, %v211_v37, %v339_v45  ;;  %v342_v51 = vmul.f32 0.2, %v214_v41  ;;  %v215_v52 = vadd.f32 %v513_v2, %v144_v42 }
  0x4d   :  { %v216_v53 = vadd.f32 %v513_v2, %v145_v43  ;;  %467 = vst [vmem:[%s1033_s3 + $0x1b8] sm:$0xff] %v403_v50  ;;  %v404_v55 = vsel %vm276_vm8, %v212_v38, %v340_v48  ;;  %v146_v57 = vmul.f32 %v508_v1, %v75_v46  ;;  %v147_v58 = vmul.f32 %v508_v1, %v76_v47 }
  0x4e   :  { %v405_v56 = vsel %vm277_vm9, %v213_v39, %v341_v49  ;;  %468 = vst [vmem:[%s1033_s3 + $0x1c0] sm:$0xff] %v404_v55  ;;  %v406_v59 = vsel %vm278_vm10, %v214_v41, %v342_v51  ;;  %vm279_vm11 = vcmp.ge.f32.partialorder %v215_v52, 0.0  ;;  %v343_v60 = vmul.f32 0.2, %v215_v52 }
  0x4f   :  { %469 = vst [vmem:[%s1033_s3 + $0x1c8] sm:$0xff] %v405_v56  ;;  %vm280_vm12 = vcmp.ge.f32.partialorder %v216_v53, 0.0  ;;  %470 = vst [vmem:[%s1033_s3 + $0x1d0] sm:$0xff] %v406_v59  ;;  %v344_v61 = vmul.f32 0.2, %v216_v53  ;;  %v217_v62 = vadd.f32 %v513_v2, %v146_v57  ;;  %v218_v63 = vadd.f32 %v513_v2, %v147_v58 }
  0x50   :  { %v148_v0 = vmul.f32 %v508_v1, %v77_v54  ;;  %v407_v3 = vsel %vm279_vm11, %v215_v52, %v343_v60 }
  0x51   :  { %471 = vst [vmem:[%s1033_s3 + $0x1d8] sm:$0xff] %v407_v3  ;;  %v408_v4 = vsel %vm280_vm12, %v216_v53, %v344_v61  ;;  %vm281_vm13 = vcmp.ge.f32.partialorder %v217_v62, 0.0  ;;  %v345_v5 = vmul.f32 0.2, %v217_v62  ;;  %vm282_vm14 = vcmp.ge.f32.partialorder %v218_v63, 0.0 }
  0x52   :  { %472 = vst [vmem:[%s1033_s3 + $0x1e0] sm:$0xff] %v408_v4  ;;  %v346_v6 = vmul.f32 0.2, %v218_v63  ;;  %v219_v7 = vadd.f32 %v513_v2, %v148_v0 }
  0x53   :  { %v409_v8 = vsel %vm281_vm13, %v217_v62, %v345_v5 }
  0x54   :  { %473 = vst [vmem:[%s1033_s3 + $0x1e8] sm:$0xff] %v409_v8  ;;  %v410_v1 = vsel %vm282_vm14, %v218_v63, %v346_v6  ;;  %vm283_vm15 = vcmp.ge.f32.partialorder %v219_v7, 0.0  ;;  %v347_v9 = vmul.f32 0.2, %v219_v7 }
  0x55   :  { %474 = vst [vmem:[%s1033_s3 + $0x1f0] sm:$0xff] %v410_v1 }
  0x56   :  { %v411_v10 = vsel %vm283_vm15, %v219_v7, %v347_v9 }
  0x57   :  { %475 = vst [vmem:[%s1033_s3 + $0x1f8] sm:$0xff] %v411_v10 }

// kernel: discriminator_forward.16
= control target key start
LH: loop header
LB: loop body
LE: loop exit
PB: predicated region body
PF: predicated region fallthrough
CT: control target
= control target key end

     0   :  { %v14_v0 = vlaneseq  ;;  %v224_v7 = vmov 0.0   ;;  %s369_s0 = inlined_call_operand.vmem [shape: f32[128,256], index: 0, kind: input, shape index: {}]   ;;  %s370_s1 = inlined_call_operand.vmem [shape: f32[1,256], index: 1, kind: output, shape index: {0}]   ;;  %s371_s2 = inlined_call_operand.vmem [shape: f32[1,256], index: 2, kind: output, shape index: {1}]  }
   0x1   :  { %v20_v1 = vld [vmem:[%s369_s0] sm:$0xff]  ;;  %v22_v2 = vld [vmem:[%s369_s0 + $0x10] sm:$0xff]  ;;  %v21_v4 = vld [vmem:[%s369_s0 + $0x8] sm:$0xff] }
   0x2   :  { %vm248_vm0 = vcmp.lt.s32.totalorder %v14_v0, 256  ;;  %v23_v5 = vld [vmem:[%s369_s0 + $0x18] sm:$0xff]  ;;  %v53_v6 = vadd.f32 %v22_v2, %v20_v1  ;;  %v24_v8 = vld [vmem:[%s369_s0 + $0x20] sm:$0xff]  ;;  %v25_v10 = vld [vmem:[%s369_s0 + $0x28] sm:$0xff]  ;;  %v120_v22 = vmul.f32 %v20_v1, %v20_v1  ;;  %v121_v25 = vmul.f32 %v21_v4, %v21_v4 }
   0x3   :  { %18 = vst.msk [vmem:[%s370_s1] sm:$0x3] %vm248_vm0, %v224_v7  ;;  %v74_v9 = vadd.f32 %v23_v5, %v21_v4  ;;  %19 = vst.msk [vmem:[%s371_s2] sm:$0x3] %vm248_vm0, %v224_v7  ;;  %v26_v12 = vld [vmem:[%s369_s0 + $0x30] sm:$0xff]  ;;  %v27_v14 = vld [vmem:[%s369_s0 + $0x38] sm:$0xff]  ;;  %v122_v26 = vmul.f32 %v22_v2, %v22_v2  ;;  %v123_v27 = vmul.f32 %v23_v5, %v23_v5 }
   0x4   :  { %v54_v11 = vadd.f32 %v53_v6, %v24_v8  ;;  %v28_v16 = vld [vmem:[%s369_s0 + $0x40] sm:$0xff]  ;;  %v29_v18 = vld [vmem:[%s369_s0 + $0x48] sm:$0xff]  ;;  %v30_v20 = vld [vmem:[%s369_s0 + $0x50] sm:$0xff]  ;;  %v124_v32 = vmul.f32 %v24_v8, %v24_v8  ;;  %v125_v33 = vmul.f32 %v25_v10, %v25_v10  ;;  %v126_v36 = vmul.f32 %v26_v12, %v26_v12 }
   0x5   :  { %v75_v13 = vadd.f32 %v74_v9, %v25_v10  ;;  %v31_v23 = vld [vmem:[%s369_s0 + $0x58] sm:$0xff]  ;;  %v32_v28 = vld [vmem:[%s369_s0 + $0x60] sm:$0xff]  ;;  %v33_v30 = vld [vmem:[%s369_s0 + $0x68] sm:$0xff]  ;;  %v127_v39 = vmul.f32 %v27_v14, %v27_v14  ;;  %v152_v40 = vadd.f32 %v122_v26, %v120_v22  ;;  %v173_v41 = vadd.f32 %v123_v27, %v121_v25 }
   0x6   :  { %v55_v15 = vadd.f32 %v54_v11, %v26_v12  ;;  %v34_v34 = vld [vmem:[%s369_s0 + $0x70] sm:$0xff]  ;;  %v35_v37 = vld [vmem:[%s369_s0 + $0x78] sm:$0xff]  ;;  %v36_v42 = vld [vmem:[%s369_s0 + $0x80] sm:$0xff]  ;;  %v128_v44 = vmul.f32 %v28_v16, %v28_v16  ;;  %v129_v47 = vmul.f32 %v29_v18, %v29_v18  ;;  %v130_v52 = vmul.f32 %v30_v20, %v30_v20 }
   0x7   :  { %v76_v17 = vadd.f32 %v75_v13, %v27_v14  ;;  %v37_v45 = vld [vmem:[%s369_s0 + $0x88] sm:$0xff]  ;;  %v153_v48 = vadd.f32 %v152_v40, %v124_v32  ;;  %v174_v49 = vadd.f32 %v173_v41, %v125_v33  ;;  %v38_v50 = vld [vmem:[%s369_s0 + $0x90] sm:$0xff]  ;;  %v39_v53 = vld [vmem:[%s369_s0 + $0x98] sm:$0xff]  ;;  %v131_v55 = vmul.f32 %v31_v23, %v31_v23 }
   0x8   :  { %v56_v19 = vadd.f32 %v55_v15, %v28_v16  ;;  %v40_v58 = vld [vmem:[%s369_s0 + $0xa0] sm:$0xff]  ;;  %v132_v60 = vmul.f32 %v32_v28, %v32_v28  ;;  %v41_v61 = vld [vmem:[%s369_s0 + $0xa8] sm:$0xff]  ;;  %v133_v63 = vmul.f32 %v33_v30, %v33_v30  ;;  %v42_v4 = vld [vmem:[%s369_s0 + $0xb0] sm:$0xff]  ;;  %v134_v6 = vmul.f32 %v34_v34, %v34_v34 }
   0x9   :  { %v77_v21 = vadd.f32 %v76_v17, %v29_v18  ;;  %v154_v56 = vadd.f32 %v153_v48, %v126_v36  ;;  %v175_v57 = vadd.f32 %v174_v49, %v127_v39  ;;  %v43_v7 = vld [vmem:[%s369_s0 + $0xb8] sm:$0xff]  ;;  %v135_v9 = vmul.f32 %v35_v37, %v35_v37  ;;  %v44_v12 = vld [vmem:[%s369_s0 + $0xc0] sm:$0xff]  ;;  %v45_v15 = vld [vmem:[%s369_s0 + $0xc8] sm:$0xff] }
   0xa   :  { %v57_v24 = vadd.f32 %v56_v19, %v30_v20  ;;  %v136_v14 = vmul.f32 %v36_v42, %v36_v42  ;;  %v137_v17 = vmul.f32 %v37_v45, %v37_v45  ;;  %v46_v20 = vld [vmem:[%s369_s0 + $0xd0] sm:$0xff]  ;;  %v138_v22 = vmul.f32 %v38_v50, %v38_v50  ;;  %v51_v39 = vld [vmem:[%s369_s0 + $0xf8] sm:$0xff] }
   0xb   :  { %v78_v29 = vadd.f32 %v77_v21, %v31_v23  ;;  %v155_v1 = vadd.f32 %v154_v56, %v128_v44  ;;  %v176_v2 = vadd.f32 %v175_v57, %v129_v47  ;;  %v47_v23 = vld [vmem:[%s369_s0 + $0xd8] sm:$0xff]  ;;  %v139_v25 = vmul.f32 %v39_v53, %v39_v53  ;;  %v50_v36 = vld [vmem:[%s369_s0 + $0xf0] sm:$0xff] }
   0xc   :  { %v58_v31 = vadd.f32 %v57_v24, %v32_v28  ;;  %v48_v28 = vld [vmem:[%s369_s0 + $0xe0] sm:$0xff]  ;;  %v141_v33 = vmul.f32 %v41_v61, %v41_v61  ;;  %v143_v41 = vmul.f32 %v43_v7, %v43_v7  ;;  %v145_v47 = vmul.f32 %v45_v15, %v45_v15 }
   0xd   :  { %v79_v35 = vadd.f32 %v78_v29, %v33_v30  ;;  %v156_v10 = vadd.f32 %v155_v1, %v130_v52  ;;  %v177_v11 = vadd.f32 %v176_v2, %v131_v55  ;;  %v140_v30 = vmul.f32 %v40_v58, %v40_v58 }
   0xe   :  { %v59_v38 = vadd.f32 %v58_v31, %v34_v34  ;;  %v49_v31 = vld [vmem:[%s369_s0 + $0xe8] sm:$0xff]  ;;  %v225_v57 = vmov 1966171168   ;;  %v150_v2 = vmul.f32 %v50_v36, %v50_v36 }
   0xf   :  { %v80_v43 = vadd.f32 %v79_v35, %v35_v37  ;;  %v157_v18 = vadd.f32 %v156_v10, %v132_v60  ;;  %v178_v19 = vadd.f32 %v177_v11, %v133_v63  ;;  %v102_v10 = vshrl.u32 %v14_v0, 7 }
  0x10   :  { %v60_v46 = vadd.f32 %v59_v38, %v36_v42  ;;  %v142_v38 = vmul.f32 %v42_v4, %v42_v4 }
  0x11   :  { %v81_v51 = vadd.f32 %v80_v43, %v37_v45  ;;  %v158_v26 = vadd.f32 %v157_v18, %v134_v6  ;;  %v179_v27 = vadd.f32 %v178_v19, %v135_v9  ;;  %v144_v45 = vmul.f32 %v44_v12, %v44_v12 }
  0x12   :  { %v61_v54 = vadd.f32 %v60_v46, %v38_v50 }
  0x13   :  { %v82_v59 = vadd.f32 %v81_v51, %v39_v53  ;;  %v159_v34 = vadd.f32 %v158_v26, %v136_v14  ;;  %v180_v35 = vadd.f32 %v179_v27, %v137_v17  ;;  %v146_v51 = vmul.f32 %v46_v20, %v46_v20  ;;  %v52_v26 = vld [vmem:[%s370_s1] sm:$0x3] }
  0x14   :  { %v62_v62 = vadd.f32 %v61_v54, %v40_v58  ;;  %v147_v53 = vmul.f32 %v47_v23, %v47_v23  ;;  %v99_v58 = vunpack.c.l.s4 %v225_v57 }
  0x15   :  { %v83_v5 = vadd.f32 %v82_v59, %v41_v61  ;;  %v160_v42 = vadd.f32 %v159_v34, %v138_v22  ;;  %v181_v43 = vadd.f32 %v180_v35, %v139_v25  ;;  %v148_v59 = vmul.f32 %v48_v28, %v48_v28 }
  0x16   :  { %v63_v8 = vadd.f32 %v62_v62, %v42_v4  ;;  %v149_v61 = vmul.f32 %v49_v31, %v49_v31  ;;  %v100_v9 = vunpack.c.0.s8 %v99_v58 }
  0x17   :  { %v84_v13 = vadd.f32 %v83_v5, %v43_v7  ;;  %v161_v48 = vadd.f32 %v160_v42, %v140_v30  ;;  %v182_v49 = vadd.f32 %v181_v43, %v141_v33  ;;  %v151_v5 = vmul.f32 %v51_v39, %v51_v39 }
  0x18   :  { %v64_v16 = vadd.f32 %v63_v8, %v44_v12  ;;  %v103_v19 = vsub.s32 %v100_v9, %v102_v10 }
  0x19   :  { %v85_v21 = vadd.f32 %v84_v13, %v45_v15  ;;  %v162_v54 = vadd.f32 %v161_v48, %v142_v38  ;;  %v183_v55 = vadd.f32 %v182_v49, %v143_v41  ;;  %v119_v38 = vld [vmem:[%s371_s2] sm:$0x3] }
  0x1a   :  { %v65_v24 = vadd.f32 %v64_v16, %v46_v20 }
  0x1b   :  { %v86_v29 = vadd.f32 %v85_v21, %v47_v23  ;;  %v163_v62 = vadd.f32 %v162_v54, %v144_v45  ;;  %v184_v63 = vadd.f32 %v183_v55, %v145_v47 }
  0x1c   :  { %v66_v32 = vadd.f32 %v65_v24, %v48_v28 }
  0x1d   :  { %v87_v37 = vadd.f32 %v86_v29, %v49_v31  ;;  %v164_v6 = vadd.f32 %v163_v62, %v146_v51  ;;  %v185_v7 = vadd.f32 %v184_v63, %v147_v53 }
  0x1e   :  { %v67_v40 = vadd.f32 %v66_v32, %v50_v36 }
  0x1f   :  { %v88_v44 = vadd.f32 %v87_v37, %v51_v39  ;;  %v165_v12 = vadd.f32 %v164_v6, %v148_v59  ;;  %v186_v13 = vadd.f32 %v185_v7, %v149_v61 }
  0x20   :  { %v68_v46 = vrot.slane %v67_v40, 4 }
  0x21   :  { %v89_v50 = vrot.slane %v88_v44, 4  ;;  %v166_v16 = vadd.f32 %v165_v12, %v150_v2  ;;  %v187_v17 = vadd.f32 %v186_v13, %v151_v5 }
  0x22   :  { %v69_v52 = vadd.f32 %v68_v46, %v67_v40 }
  0x23   :  { %v90_v56 = vadd.f32 %v89_v50, %v88_v44  ;;  %v167_v20 = vrot.slane %v166_v16, 4  ;;  %v188_v21 = vrot.slane %v187_v17, 4 }
  0x24   :  { %v70_v60 = vrot.slane %v69_v52, 2 }
  0x25   :  { %v91_v1 = vrot.slane %v90_v56, 2  ;;  %v168_v23 = vadd.f32 %v167_v20, %v166_v16  ;;  %v189_v24 = vadd.f32 %v188_v21, %v187_v17 }
  0x26   :  { %v71_v4 = vadd.f32 %v70_v60, %v69_v52 }
  0x27   :  { %v92_v8 = vadd.f32 %v91_v1, %v90_v56  ;;  %v169_v0 = vrot.slane %v168_v23, 2  ;;  %v190_v27 = vrot.slane %v189_v24, 2 }
  0x28   :  { %v72_v11 = vrot.slane %v71_v4, 1 }
  0x29   :  { %v93_v14 = vrot.slane %v92_v8, 1  ;;  %v170_v29 = vadd.f32 %v169_v0, %v168_v23  ;;  %v191_v30 = vadd.f32 %v190_v27, %v189_v24 }
  0x2a   :  { %v73_v15 = vadd.f32 %v72_v11, %v71_v4 }
  0x2b   :  { %v94_v18 = vadd.f32 %v93_v14, %v92_v8  ;;  %v171_v32 = vrot.slane %v170_v29, 1  ;;  %v192_v33 = vrot.slane %v191_v30, 1 }
  0x2d   :  { %v97_v22 = vcombine.low %v73_v15, %v94_v18  ;;  %v172_v34 = vadd.f32 %v171_v32, %v170_v29  ;;  %v193_v35 = vadd.f32 %v192_v33, %v191_v30 }
  0x2f   :  { %v104_v25 = vrot.slane %v97_v22, %v103_v19  ;;  %v196_v36 = vcombine.low %v172_v34, %v193_v35 }
  0x31   :  { %v111_v28 = vrot.slane %v104_v25, %v103_v19  ;;  %v203_v37 = vrot.slane %v196_v36, %v103_v19 }
  0x33   :  { %v113_v31 = vadd.f32 %v111_v28, %v52_v26  ;;  %v210_v39 = vrot.slane %v203_v37, %v103_v19 }
  0x35   :  { %118 = vst.msk [vmem:[%s370_s1] sm:$0x3] %vm248_vm0, %v113_v31  ;;  %v212_v40 = vadd.f32 %v210_v39, %v119_v38 }
  0x37   :  { %213 = vst.msk [vmem:[%s371_s2] sm:$0x3] %vm248_vm0, %v212_v40 }

// kernel: discriminator_forward.17
= control target key start
LH: loop header
LB: loop body
LE: loop exit
PB: predicated region body
PF: predicated region fallthrough
CT: control target
= control target key end

     0   :  { %v48_v0 = vlaneseq  ;;  %s556_s1 = inlined_call_operand.vmem [shape: f32[1,256], index: 1, kind: input, shape index: {}]   ;;  %s557_s2 = inlined_call_operand.vmem [shape: f32[1,256], index: 2, kind: input, shape index: {}]   ;;  %s558_s0 = inlined_call_operand.vmem [shape: f32[128,256], index: 0, kind: input, shape index: {}]   ;;  %s559_s3 = inlined_call_operand.vmem [shape: f32[128,256], index: 3, kind: output, shape index: {}]  }
   0x1   :  { %v46_v2 = vld [vmem:[%s556_s1] sm:$0x3]  ;;  %v15_v6 = vld [vmem:[%s558_s0 + $0x8] sm:$0xff]  ;;  %v16_v8 = vld [vmem:[%s558_s0 + $0x10] sm:$0xff] }
   0x2   :  { %v49_v1 = vshrl.u32 %v48_v0, 7  ;;  %v90_v3 = vld [vmem:[%s557_s2] sm:$0x3]  ;;  %v17_v9 = vld [vmem:[%s558_s0 + $0x18] sm:$0xff]  ;;  %v19_v15 = vld [vmem:[%s558_s0 + $0x28] sm:$0xff] }
   0x3   :  { %v14_v4 = vld [vmem:[%s558_s0] sm:$0xff]  ;;  %v20_v16 = vld [vmem:[%s558_s0 + $0x30] sm:$0xff]  ;;  %v21_v17 = vld [vmem:[%s558_s0 + $0x38] sm:$0xff] }
   0x4   :  { %v50_v5 = vsub.s32 0, %v49_v1  ;;  %v54_v7 = vsub.s32 1, %v49_v1  ;;  %v18_v10 = vld [vmem:[%s558_s0 + $0x20] sm:$0xff]  ;;  %v23_v42 = vld [vmem:[%s558_s0 + $0x48] sm:$0xff]  ;;  %v24_v46 = vld [vmem:[%s558_s0 + $0x50] sm:$0xff] }
   0x5   :  { %v22_v41 = vld [vmem:[%s558_s0 + $0x40] sm:$0xff]  ;;  %v25_v47 = vld [vmem:[%s558_s0 + $0x58] sm:$0xff]  ;;  %v27_v51 = vld [vmem:[%s558_s0 + $0x68] sm:$0xff] }
   0x6   :  { %v307_v11 = vrot.slane %v46_v2, %v50_v5  ;;  %v309_v12 = vrot.slane %v90_v3, %v50_v5  ;;  %v311_v13 = vrot.slane %v46_v2, %v54_v7  ;;  %v313_v14 = vrot.slane %v90_v3, %v54_v7  ;;  %v26_v48 = vld [vmem:[%s558_s0 + $0x60] sm:$0xff]  ;;  %v28_v56 = vld [vmem:[%s558_s0 + $0x70] sm:$0xff]  ;;  %v29_v5 = vld [vmem:[%s558_s0 + $0x78] sm:$0xff] }
   0x7   :  { %v31_v7 = vld [vmem:[%s558_s0 + $0x88] sm:$0xff] }
   0x8   :  { %v58_v18 = vmul.f32 %v307_v11, %v14_v4  ;;  %v59_v19 = vmul.f32 %v311_v13, %v15_v6  ;;  %v60_v20 = vmul.f32 %v307_v11, %v16_v8  ;;  %v61_v21 = vmul.f32 %v311_v13, %v17_v9  ;;  %v30_v6 = vld [vmem:[%s558_s0 + $0x80] sm:$0xff] }
   0x9   :  { %v62_v22 = vmul.f32 %v307_v11, %v18_v10  ;;  %v63_v23 = vmul.f32 %v311_v13, %v19_v15  ;;  %v64_v24 = vmul.f32 %v307_v11, %v20_v16  ;;  %v65_v25 = vmul.f32 %v311_v13, %v21_v17 }
   0xa   :  { %v102_v26 = vadd.f32 %v309_v12, %v58_v18  ;;  %v103_v27 = vadd.f32 %v313_v14, %v59_v19  ;;  %v104_v28 = vadd.f32 %v309_v12, %v60_v20  ;;  %v105_v29 = vadd.f32 %v313_v14, %v61_v21 }
   0xb   :  { %v106_v30 = vadd.f32 %v309_v12, %v62_v22  ;;  %v107_v31 = vadd.f32 %v313_v14, %v63_v23  ;;  %v108_v32 = vadd.f32 %v309_v12, %v64_v24  ;;  %v109_v33 = vadd.f32 %v313_v14, %v65_v25  ;;  %v32_v23 = vld [vmem:[%s558_s0 + $0x90] sm:$0xff] }
   0xc   :  { %vm134_vm0 = vcmp.ge.f32.partialorder %v102_v26, 0.0  ;;  %v166_v34 = vmul.f32 0.2, %v102_v26  ;;  %vm135_vm1 = vcmp.ge.f32.partialorder %v103_v27, 0.0  ;;  %v167_v35 = vmul.f32 0.2, %v103_v27 }
   0xd   :  { %vm136_vm2 = vcmp.ge.f32.partialorder %v104_v28, 0.0  ;;  %v168_v36 = vmul.f32 0.2, %v104_v28  ;;  %vm137_vm3 = vcmp.ge.f32.partialorder %v105_v29, 0.0  ;;  %v169_v37 = vmul.f32 0.2, %v105_v29 }
   0xe   :  { %v198_v38 = vsel %vm134_vm0, %v102_v26, %v166_v34  ;;  %v199_v39 = vsel %vm135_vm1, %v103_v27, %v167_v35  ;;  %vm138_vm4 = vcmp.ge.f32.partialorder %v106_v30, 0.0  ;;  %v170_v40 = vmul.f32 0.2, %v106_v30 }
   0xf   :  { %230 = vst [vmem:[%s559_s3] sm:$0xff] %v198_v38  ;;  %231 = vst [vmem:[%s559_s3 + $0x8] sm:$0xff] %v199_v39  ;;  %v200_v43 = vsel %vm136_vm2, %v104_v28, %v168_v36  ;;  %v201_v44 = vsel %vm137_vm3, %v105_v29, %v169_v37  ;;  %vm139_vm5 = vcmp.ge.f32.partialorder %v107_v31, 0.0  ;;  %v171_v45 = vmul.f32 0.2, %v107_v31  ;;  %v33_v28 = vld [vmem:[%s558_s0 + $0x98] sm:$0xff]  ;;  %v34_v29 = vld [vmem:[%s558_s0 + $0xa0] sm:$0xff] }
  0x10   :  { %232 = vst [vmem:[%s559_s3 + $0x10] sm:$0xff] %v200_v43  ;;  %233 = vst [vmem:[%s559_s3 + $0x18] sm:$0xff] %v201_v44  ;;  %v202_v49 = vsel %vm138_vm4, %v106_v30, %v170_v40  ;;  %vm140_vm6 = vcmp.ge.f32.partialorder %v108_v32, 0.0  ;;  %v172_v50 = vmul.f32 0.2, %v108_v32  ;;  %vm141_vm7 = vcmp.ge.f32.partialorder %v109_v33, 0.0 }
  0x11   :  { %234 = vst [vmem:[%s559_s3 + $0x20] sm:$0xff] %v202_v49  ;;  %v203_v52 = vsel %vm139_vm5, %v107_v31, %v171_v45  ;;  %v173_v53 = vmul.f32 0.2, %v109_v33  ;;  %v66_v54 = vmul.f32 %v307_v11, %v22_v41  ;;  %v67_v55 = vmul.f32 %v311_v13, %v23_v42  ;;  %v35_v40 = vld [vmem:[%s558_s0 + $0xa8] sm:$0xff] }
  0x12   :  { %235 = vst [vmem:[%s559_s3 + $0x28] sm:$0xff] %v203_v52  ;;  %v204_v57 = vsel %vm140_vm6, %v108_v32, %v172_v50  ;;  %v68_v58 = vmul.f32 %v307_v11, %v24_v46  ;;  %v69_v59 = vmul.f32 %v311_v13, %v25_v47  ;;  %v70_v60 = vmul.f32 %v307_v11, %v26_v48  ;;  %v36_v50 = vld [vmem:[%s558_s0 + $0xb0] sm:$0xff]  ;;  %v38_v52 = vld [vmem:[%s558_s0 + $0xc0] sm:$0xff] }
  0x13   :  { %236 = vst [vmem:[%s559_s3 + $0x30] sm:$0xff] %v204_v57  ;;  %v205_v61 = vsel %vm141_vm7, %v109_v33, %v173_v53  ;;  %v110_v62 = vadd.f32 %v309_v12, %v66_v54  ;;  %v111_v63 = vadd.f32 %v313_v14, %v67_v55  ;;  %v71_v0 = vmul.f32 %v311_v13, %v27_v51  ;;  %v37_v51 = vld [vmem:[%s558_s0 + $0xb8] sm:$0xff] }
  0x14   :  { %237 = vst [vmem:[%s559_s3 + $0x38] sm:$0xff] %v205_v61  ;;  %v112_v1 = vadd.f32 %v309_v12, %v68_v58  ;;  %v113_v2 = vadd.f32 %v313_v14, %v69_v59  ;;  %v114_v3 = vadd.f32 %v309_v12, %v70_v60  ;;  %v72_v4 = vmul.f32 %v307_v11, %v28_v56  ;;  %v39_v58 = vld [vmem:[%s558_s0 + $0xc8] sm:$0xff] }
  0x15   :  { %vm142_vm8 = vcmp.ge.f32.partialorder %v110_v62, 0.0  ;;  %v174_v8 = vmul.f32 0.2, %v110_v62  ;;  %vm143_vm9 = vcmp.ge.f32.partialorder %v111_v63, 0.0  ;;  %v175_v9 = vmul.f32 0.2, %v111_v63 }
  0x16   :  { %vm144_vm10 = vcmp.ge.f32.partialorder %v112_v1, 0.0  ;;  %v176_v10 = vmul.f32 0.2, %v112_v1  ;;  %vm145_vm11 = vcmp.ge.f32.partialorder %v113_v2, 0.0  ;;  %v177_v15 = vmul.f32 0.2, %v113_v2 }
  0x17   :  { %v206_v16 = vsel %vm142_vm8, %v110_v62, %v174_v8  ;;  %v207_v17 = vsel %vm143_vm9, %v111_v63, %v175_v9  ;;  %vm146_vm12 = vcmp.ge.f32.partialorder %v114_v3, 0.0  ;;  %v178_v18 = vmul.f32 0.2, %v114_v3  ;;  %v40_v63 = vld [vmem:[%s558_s0 + $0xd0] sm:$0xff] }
  0x18   :  { %238 = vst [vmem:[%s559_s3 + $0x40] sm:$0xff] %v206_v16  ;;  %239 = vst [vmem:[%s559_s3 + $0x48] sm:$0xff] %v207_v17  ;;  %v208_v19 = vsel %vm144_vm10, %v112_v1, %v176_v10  ;;  %v209_v20 = vsel %vm145_vm11, %v113_v2, %v177_v15  ;;  %v115_v21 = vadd.f32 %v313_v14, %v71_v0  ;;  %v41_v0 = vld [vmem:[%s558_s0 + $0xd8] sm:$0xff]  ;;  %v42_v1 = vld [vmem:[%s558_s0 + $0xe0] sm:$0xff] }
  0x19   :  { %v116_v22 = vadd.f32 %v309_v12, %v72_v4  ;;  %240 = vst [vmem:[%s559_s3 + $0x50] sm:$0xff] %v208_v19  ;;  %241 = vst [vmem:[%s559_s3 + $0x58] sm:$0xff] %v209_v20  ;;  %v210_v24 = vsel %vm146_vm12, %v114_v3, %v178_v18  ;;  %v73_v25 = vmul.f32 %v311_v13, %v29_v5 }
  0x1a   :  { %v74_v26 = vmul.f32 %v307_v11, %v30_v6  ;;  %v75_v27 = vmul.f32 %v311_v13, %v31_v7  ;;  %242 = vst [vmem:[%s559_s3 + $0x60] sm:$0xff] %v210_v24  ;;  %vm147_vm13 = vcmp.ge.f32.partialorder %v115_v21, 0.0  ;;  %v179_v30 = vmul.f32 0.2, %v115_v21 }
  0x1b   :  { %vm148_vm14 = vcmp.ge.f32.partialorder %v116_v22, 0.0  ;;  %v180_v31 = vmul.f32 0.2, %v116_v22  ;;  %v117_v32 = vadd.f32 %v313_v14, %v73_v25  ;;  %v76_v35 = vmul.f32 %v307_v11, %v32_v23 }
  0x1c   :  { %v118_v33 = vadd.f32 %v309_v12, %v74_v26  ;;  %v119_v34 = vadd.f32 %v313_v14, %v75_v27  ;;  %v211_v36 = vsel %vm147_vm13, %v115_v21, %v179_v30  ;;  %v77_v38 = vmul.f32 %v311_v13, %v33_v28  ;;  %v43_v26 = vld [vmem:[%s558_s0 + $0xe8] sm:$0xff]  ;;  %v44_v27 = vld [vmem:[%s558_s0 + $0xf0] sm:$0xff]  ;;  %v45_v30 = vld [vmem:[%s558_s0 + $0xf8] sm:$0xff] }
  0x1d   :  { %v212_v37 = vsel %vm148_vm14, %v116_v22, %v180_v31  ;;  %v78_v39 = vmul.f32 %v307_v11, %v34_v29  ;;  %243 = vst [vmem:[%s559_s3 + $0x68] sm:$0xff] %v211_v36  ;;  %vm149_vm15 = vcmp.ge.f32.partialorder %v117_v32, 0.0  ;;  %v181_v41 = vmul.f32 0.2, %v117_v32 }
  0x1e   :  { %244 = vst [vmem:[%s559_s3 + $0x70] sm:$0xff] %v212_v37  ;;  %vm150_vm0 = vcmp.ge.f32.partialorder %v118_v33, 0.0  ;;  %v182_v42 = vmul.f32 0.2, %v118_v33  ;;  %vm151_vm1 = vcmp.ge.f32.partialorder %v119_v34, 0.0  ;;  %v120_v44 = vadd.f32 %v309_v12, %v76_v35 }
  0x1f   :  { %v183_v43 = vmul.f32 0.2, %v119_v34  ;;  %v121_v45 = vadd.f32 %v313_v14, %v77_v38  ;;  %v213_v46 = vsel %vm149_vm15, %v117_v32, %v181_v41  ;;  %v122_v48 = vadd.f32 %v309_v12, %v78_v39 }
  0x20   :  { %v214_v47 = vsel %vm150_vm0, %v118_v33, %v182_v42  ;;  %v79_v49 = vmul.f32 %v311_v13, %v35_v40  ;;  %245 = vst [vmem:[%s559_s3 + $0x78] sm:$0xff] %v213_v46  ;;  %vm152_vm2 = vcmp.ge.f32.partialorder %v120_v44, 0.0  ;;  %v184_v54 = vmul.f32 0.2, %v120_v44 }
  0x21   :  { %246 = vst [vmem:[%s559_s3 + $0x80] sm:$0xff] %v214_v47  ;;  %v215_v53 = vsel %vm151_vm1, %v119_v34, %v183_v43  ;;  %vm153_vm3 = vcmp.ge.f32.partialorder %v121_v45, 0.0  ;;  %v185_v55 = vmul.f32 0.2, %v121_v45  ;;  %vm154_vm4 = vcmp.ge.f32.partialorder %v122_v48, 0.0 }
  0x22   :  { %247 = vst [vmem:[%s559_s3 + $0x88] sm:$0xff] %v215_v53  ;;  %v186_v56 = vmul.f32 0.2, %v122_v48  ;;  %v123_v57 = vadd.f32 %v313_v14, %v79_v49  ;;  %v216_v59 = vsel %vm152_vm2, %v120_v44, %v184_v54  ;;  %v80_v60 = vmul.f32 %v307_v11, %v36_v50 }
  0x23   :  { %v81_v61 = vmul.f32 %v311_v13, %v37_v51  ;;  %v82_v62 = vmul.f32 %v307_v11, %v38_v52  ;;  %248 = vst [vmem:[%s559_s3 + $0x90] sm:$0xff] %v216_v59  ;;  %v217_v2 = vsel %vm153_vm3, %v121_v45, %v185_v55  ;;  %v83_v8 = vmul.f32 %v311_v13, %v39_v58 }
  0x24   :  { %v218_v3 = vsel %vm154_vm4, %v122_v48, %v186_v56  ;;  %vm155_vm5 = vcmp.ge.f32.partialorder %v123_v57, 0.0  ;;  %v187_v4 = vmul.f32 0.2, %v123_v57  ;;  %249 = vst [vmem:[%s559_s3 + $0x98] sm:$0xff] %v217_v2  ;;  %v124_v5 = vadd.f32 %v309_v12, %v80_v60 }
  0x25   :  { %250 = vst [vmem:[%s559_s3 + $0xa0] sm:$0xff] %v218_v3  ;;  %v125_v6 = vadd.f32 %v313_v14, %v81_v61  ;;  %v126_v7 = vadd.f32 %v309_v12, %v82_v62  ;;  %v84_v10 = vmul.f32 %v307_v11, %v40_v63  ;;  %v85_v15 = vmul.f32 %v311_v13, %v41_v0 }
  0x26   :  { %v219_v9 = vsel %vm155_vm5, %v123_v57, %v187_v4  ;;  %v86_v16 = vmul.f32 %v307_v11, %v42_v1  ;;  %vm156_vm6 = vcmp.ge.f32.partialorder %v124_v5, 0.0  ;;  %v188_v17 = vmul.f32 0.2, %v124_v5 }
  0x27   :  { %251 = vst [vmem:[%s559_s3 + $0xa8] sm:$0xff] %v219_v9  ;;  %vm157_vm7 = vcmp.ge.f32.partialorder %v125_v6, 0.0  ;;  %v189_v18 = vmul.f32 0.2, %v125_v6  ;;  %vm158_vm8 = vcmp.ge.f32.partialorder %v126_v7, 0.0  ;;  %v127_v20 = vadd.f32 %v313_v14, %v83_v8 }
  0x28   :  { %v190_v19 = vmul.f32 0.2, %v126_v7  ;;  %v128_v21 = vadd.f32 %v309_v12, %v84_v10  ;;  %v220_v22 = vsel %vm156_vm6, %v124_v5, %v188_v17  ;;  %v129_v24 = vadd.f32 %v313_v14, %v85_v15 }
  0x29   :  { %v221_v23 = vsel %vm157_vm7, %v125_v6, %v189_v18  ;;  %v130_v25 = vadd.f32 %v309_v12, %v86_v16  ;;  %252 = vst [vmem:[%s559_s3 + $0xb0] sm:$0xff] %v220_v22  ;;  %vm159_vm9 = vcmp.ge.f32.partialorder %v127_v20, 0.0  ;;  %v191_v29 = vmul.f32 0.2, %v127_v20 }
  0x2a   :  { %253 = vst [vmem:[%s559_s3 + $0xb8] sm:$0xff] %v221_v23  ;;  %v222_v28 = vsel %vm158_vm8, %v126_v7, %v190_v19  ;;  %vm160_vm10 = vcmp.ge.f32.partialorder %v128_v21, 0.0  ;;  %v192_v31 = vmul.f32 0.2, %v128_v21  ;;  %vm161_vm11 = vcmp.ge.f32.partialorder %v129_v24, 0.0 }
  0x2b   :  { %254 = vst [vmem:[%s559_s3 + $0xc0] sm:$0xff] %v222_v28  ;;  %v193_v32 = vmul.f32 0.2, %v129_v24  ;;  %vm162_vm12 = vcmp.ge.f32.partialorder %v130_v25, 0.0  ;;  %v223_v33 = vsel %vm159_vm9, %v127_v20, %v191_v29  ;;  %v194_v34 = vmul.f32 0.2, %v130_v25 }
  0x2c   :  { %v87_v35 = vmul.f32 %v311_v13, %v43_v26  ;;  %v88_v36 = vmul.f32 %v307_v11, %v44_v27  ;;  %255 = vst [vmem:[%s559_s3 + $0xc8] sm:$0xff] %v223_v33  ;;  %v224_v37 = vsel %vm160_vm10, %v128_v21, %v192_v31  ;;  %v89_v39 = vmul.f32 %v311_v13, %v45_v30 }
  0x2d   :  { %v225_v38 = vsel %vm161_vm11, %v129_v24, %v193_v32  ;;  %256 = vst [vmem:[%s559_s3 + $0xd0] sm:$0xff] %v224_v37  ;;  %v226_v40 = vsel %vm162_vm12, %v130_v25, %v194_v34 }
  0x2e   :  { %257 = vst [vmem:[%s559_s3 + $0xd8] sm:$0xff] %v225_v38  ;;  %v131_v41 = vadd.f32 %v313_v14, %v87_v35  ;;  %v132_v11 = vadd.f32 %v309_v12, %v88_v36  ;;  %258 = vst [vmem:[%s559_s3 + $0xe0] sm:$0xff] %v226_v40  ;;  %v133_v42 = vadd.f32 %v313_v14, %v89_v39 }
  0x30   :  { %vm163_vm13 = vcmp.ge.f32.partialorder %v131_v41, 0.0  ;;  %v195_v13 = vmul.f32 0.2, %v131_v41  ;;  %vm164_vm14 = vcmp.ge.f32.partialorder %v132_v11, 0.0  ;;  %v196_v43 = vmul.f32 0.2, %v132_v11 }
  0x31   :  { %vm165_vm15 = vcmp.ge.f32.partialorder %v133_v42, 0.0  ;;  %v197_v44 = vmul.f32 0.2, %v133_v42 }
  0x32   :  { %v227_v45 = vsel %vm163_vm13, %v131_v41, %v195_v13  ;;  %v228_v46 = vsel %vm164_vm14, %v132_v11, %v196_v43 }
  0x33   :  { %259 = vst [vmem:[%s559_s3 + $0xe8] sm:$0xff] %v227_v45  ;;  %260 = vst [vmem:[%s559_s3 + $0xf0] sm:$0xff] %v228_v46  ;;  %v229_v12 = vsel %vm165_vm15, %v133_v42, %v197_v44 }
  0x34   :  { %261 = vst [vmem:[%s559_s3 + $0xf8] sm:$0xff] %v229_v12 }

// kernel: discriminator_forward.15
= control target key start
LH: loop header
LB: loop body
LE: loop exit
PB: predicated region body
PF: predicated region fallthrough
CT: control target
= control target key end

     0   :  { %s1707_s9 = smov 0   ;;  %s1709_s10 = smov 0   ;;  %s2229_s0 = inlined_call_operand.vmem [shape: bf16[128,2048], index: 0, kind: input, shape index: {}]   ;;  %s2230_s1 = inlined_call_operand.vmem [shape: bf16[2048,256], index: 1, kind: input, shape index: {}]   ;;  %s2231_s2 = inlined_call_operand.vmem [shape: f32[128,256], index: 2, kind: output, shape index: {}]  }
   0x1   :  { %s1711_s11 = smov 0   ;;  %s1713_s12 = smov 0  }
   0x2   :  { %s1715_s13 = smov 0  }
   0x3 LB: > { %s24_s14 = sadd.s32 1, %s1685_s12  ;;  %p47_p1 = scmp.ne.s32.totalorder %s1677_s10, %s1673_s9  ;;  %s1689_s13 = sphi %s1715_s13, %s12_s13   ;;  %s1685_s12 = sphi %s1713_s12, %s2235_s12   ;;  %s1681_s11 = sphi %s1711_s11, %s2234_s11   ;;  %s1677_s10 = sphi %s1709_s10, %s2233_s10   ;;  %s1673_s9 = sphi %s1707_s9, %s2232_s9  }
   0x4   : > { %p25_p0 = scmp.ge.s32.totalorder %s24_s14, 4  ;;  %p48_p2 = scmp.eq.s32.totalorder %s1689_s13, 0 }
   0x5   : > { %s40_s16 = sadd.s32 1, %s1677_s10  ;;  %p1354_p5 = scmp.ge.s32.totalorder %s1689_s13, 4 }
   0x6   : > { %s2237_s14 = smov (%p25_p0, %s24_s14), 0  ;;  %p49_p3 = por %p48_p2, %p47_p1 }
   0x7   : > { %s36_s15 = ssub.s32 %s1685_s12, %s2237_s14  ;;  %129 = sbr.rel (%p1354_p5) target bundleno = 32 (0x20), region = 16 }
   0x8   : > { %p38_p4 = scmp.eq.s32.totalorder %s36_s15, 0 }
   0xa   : > { %s1742_s17 = scalar_select %p38_p4, %s1677_s10, %s40_s16  }
   0xc   : > { %132 = sbr.rel (!%p49_p3) target bundleno = 32 (0x20), region = 20  ;;  %s134_s18 = sand.u32 (%p49_p3), 1, %s1677_s10  }
   0xd   : > { %s1464_s19 = sshll.u32 (%p49_p3), %s1685_s12, 4  ;;  %s1355_s20 = sshll.u32 (%p49_p3), %s134_s18, 8 }
   0xe   : > { %s1750_s23 = scalar_lea.vmem (%p49_p3), %s2229_s0, %s1464_s19  ;;  %s1755_s24 = scalar_lea.vmem (%p49_p3), [#allocation2], %s1355_s20 }
   0xf   : > { %v155_v0 = vld [vmem:[%s1750_s23] sm:$0xff] (%p49_p3)  ;;  %v157_v1 = vld [vmem:[%s1750_s23 + $0x8] sm:$0xff] (%p49_p3) }
  0x10   : > { %v159_v2 = vld [vmem:[%s1750_s23 + $0x40] sm:$0xff] (%p49_p3)  ;;  %156 = vst [vmem:[%s1755_s24] sm:$0xff] (%p49_p3), %v155_v0  ;;  %158 = vst [vmem:[%s1755_s24 + $0x8] sm:$0xff] (%p49_p3), %v157_v1  ;;  %v161_v3 = vld [vmem:[%s1750_s23 + $0x48] sm:$0xff] (%p49_p3) }
  0x11   : > { %160 = vst [vmem:[%s1755_s24 + $0x10] sm:$0xff] %v159_v2  ;;  %v163_v4 = vld [vmem:[%s1750_s23 + $0x80] sm:$0xff]  ;;  %v165_v5 = vld [vmem:[%s1750_s23 + $0x88] sm:$0xff]  ;;  %162 = vst [vmem:[%s1755_s24 + $0x18] sm:$0xff] %v161_v3 }
  0x12   : > { %164 = vst [vmem:[%s1755_s24 + $0x20] sm:$0xff] %v163_v4  ;;  %166 = vst [vmem:[%s1755_s24 + $0x28] sm:$0xff] %v165_v5  ;;  %v167_v6 = vld [vmem:[%s1750_s23 + $0xc0] sm:$0xff]  ;;  %v169_v7 = vld [vmem:[%s1750_s23 + $0xc8] sm:$0xff] }
  0x13   : > { %v171_v8 = vld [vmem:[%s1750_s23 + $0x100] sm:$0xff]  ;;  %168 = vst [vmem:[%s1755_s24 + $0x30] sm:$0xff] %v167_v6  ;;  %170 = vst [vmem:[%s1755_s24 + $0x38] sm:$0xff] %v169_v7  ;;  %v173_v9 = vld [vmem:[%s1750_s23 + $0x108] sm:$0xff] }
  0x14   : > { %172 = vst [vmem:[%s1755_s24 + $0x40] sm:$0xff] %v171_v8  ;;  %v175_v10 = vld [vmem:[%s1750_s23 + $0x140] sm:$0xff]  ;;  %v177_v11 = vld [vmem:[%s1750_s23 + $0x148] sm:$0xff]  ;;  %174 = vst [vmem:[%s1755_s24 + $0x48] sm:$0xff] %v173_v9 }
  0x15   : > { %176 = vst [vmem:[%s1755_s24 + $0x50] sm:$0xff] %v175_v10  ;;  %178 = vst [vmem:[%s1755_s24 + $0x58] sm:$0xff] %v177_v11  ;;  %v179_v12 = vld [vmem:[%s1750_s23 + $0x180] sm:$0xff]  ;;  %v181_v13 = vld [vmem:[%s1750_s23 + $0x188] sm:$0xff] }
  0x16   : > { %v183_v14 = vld [vmem:[%s1750_s23 + $0x1c0] sm:$0xff]  ;;  %180 = vst [vmem:[%s1755_s24 + $0x60] sm:$0xff] %v179_v12  ;;  %182 = vst [vmem:[%s1755_s24 + $0x68] sm:$0xff] %v181_v13  ;;  %v185_v15 = vld [vmem:[%s1750_s23 + $0x1c8] sm:$0xff] }
  0x17   : > { %184 = vst [vmem:[%s1755_s24 + $0x70] sm:$0xff] %v183_v14  ;;  %v187_v16 = vld [vmem:[%s1750_s23 + $0x200] sm:$0xff]  ;;  %v189_v17 = vld [vmem:[%s1750_s23 + $0x208] sm:$0xff]  ;;  %186 = vst [vmem:[%s1755_s24 + $0x78] sm:$0xff] %v185_v15 }
  0x18   : > { %188 = vst [vmem:[%s1755_s24 + $0x80] sm:$0xff] %v187_v16  ;;  %190 = vst [vmem:[%s1755_s24 + $0x88] sm:$0xff] %v189_v17  ;;  %v191_v18 = vld [vmem:[%s1750_s23 + $0x240] sm:$0xff]  ;;  %v193_v19 = vld [vmem:[%s1750_s23 + $0x248] sm:$0xff] }
  0x19   : > { %v195_v20 = vld [vmem:[%s1750_s23 + $0x280] sm:$0xff]  ;;  %192 = vst [vmem:[%s1755_s24 + $0x90] sm:$0xff] %v191_v18  ;;  %194 = vst [vmem:[%s1755_s24 + $0x98] sm:$0xff] %v193_v19  ;;  %v197_v21 = vld [vmem:[%s1750_s23 + $0x288] sm:$0xff] }
  0x1a   : > { %196 = vst [vmem:[%s1755_s24 + $0xa0] sm:$0xff] %v195_v20  ;;  %v199_v22 = vld [vmem:[%s1750_s23 + $0x2c0] sm:$0xff]  ;;  %v201_v23 = vld [vmem:[%s1750_s23 + $0x2c8] sm:$0xff]  ;;  %198 = vst [vmem:[%s1755_s24 + $0xa8] sm:$0xff] %v197_v21 }
  0x1b   : > { %200 = vst [vmem:[%s1755_s24 + $0xb0] sm:$0xff] %v199_v22  ;;  %202 = vst [vmem:[%s1755_s24 + $0xb8] sm:$0xff] %v201_v23  ;;  %v203_v24 = vld [vmem:[%s1750_s23 + $0x300] sm:$0xff]  ;;  %v205_v25 = vld [vmem:[%s1750_s23 + $0x308] sm:$0xff] }
  0x1c   : > { %v207_v26 = vld [vmem:[%s1750_s23 + $0x340] sm:$0xff]  ;;  %204 = vst [vmem:[%s1755_s24 + $0xc0] sm:$0xff] %v203_v24  ;;  %206 = vst [vmem:[%s1755_s24 + $0xc8] sm:$0xff] %v205_v25  ;;  %v209_v27 = vld [vmem:[%s1750_s23 + $0x348] sm:$0xff] }
  0x1d   : > { %208 = vst [vmem:[%s1755_s24 + $0xd0] sm:$0xff] %v207_v26  ;;  %v211_v28 = vld [vmem:[%s1750_s23 + $0x380] sm:$0xff]  ;;  %v213_v29 = vld [vmem:[%s1750_s23 + $0x388] sm:$0xff]  ;;  %210 = vst [vmem:[%s1755_s24 + $0xd8] sm:$0xff] %v209_v27 }
  0x1e   : > { %212 = vst [vmem:[%s1755_s24 + $0xe0] sm:$0xff] %v211_v28  ;;  %214 = vst [vmem:[%s1755_s24 + $0xe8] sm:$0xff] %v213_v29  ;;  %v215_v30 = vld [vmem:[%s1750_s23 + $0x3c0] sm:$0xff]  ;;  %v217_v31 = vld [vmem:[%s1750_s23 + $0x3c8] sm:$0xff] }
  0x1f   : > { %216 = vst [vmem:[%s1755_s24 + $0xf0] sm:$0xff] %v215_v30  ;;  %218 = vst [vmem:[%s1755_s24 + $0xf8] sm:$0xff] %v217_v31 }
  0x20 PF: > { %p1358_p6 = scmp.ge.s32.totalorder %s1689_s13, 1  ;;  %p238_p7 = scmp.lt.s32.totalorder %s1689_s13, 5 }
  0x22   : > { %p239_p8 = pnand %p1358_p6, %p238_p7 }
  0x23   : > { %s245_s25 = sand.u32 (!%p239_p8), 1, %s1673_s9   ;;  %s1360_s26 = sshll.u32 (!%p239_p8), %s1681_s11, 6 }
  0x24   : > { %242 = sbr.rel (%p239_p8) target bundleno = 389 (0x185), region = 47  ;;  %s1359_s27 = sshll.u32 (!%p239_p8), %s245_s25, 8 }
  0x25   : > { %p285_p9 = scmp.lt.s32.totalorder (!%p239_p8), %s1360_s26, 255  ;;  %s1827_s4 = scalar_lea.vmem (!%p239_p8), [#allocation2], %s1359_s27 }
  0x26   : > { %p1363_p10 = scmp.ne.s32.totalorder (!%p239_p8), %s1681_s11, 0 }
  0x29   : > { %s2239_s26 = smov (!%p285_p9, %s1360_s26), 255  ;;  %310 = sbr.rel (%p1363_p10) target bundleno = 63 (0x3f), region = 55 }
  0x2a   : > { %s1465_s28 = sshll.u32 %s2239_s26, 3 }
  0x2b   : > { %s1825_s3 = scalar_lea.vmem %s2230_s1, %s1465_s28 }
  0x2e   : > { %v1691_v32 = vmov 0.0  }
  0x2f   : > { %311 = vst [vmem:[%s2231_s2] sm:$0xff] %v1691_v32  ;;  %312 = vst [vmem:[%s2231_s2 + $0x8] sm:$0xff] %v1691_v32 }
  0x30   : > { %313 = vst [vmem:[%s2231_s2 + $0x10] sm:$0xff] %v1691_v32  ;;  %314 = vst [vmem:[%s2231_s2 + $0x18] sm:$0xff] %v1691_v32 }
  0x31   : > { %315 = vst [vmem:[%s2231_s2 + $0x20] sm:$0xff] %v1691_v32  ;;  %316 = vst [vmem:[%s2231_s2 + $0x28] sm:$0xff] %v1691_v32 }
  0x32   : > { %317 = vst [vmem:[%s2231_s2 + $0x30] sm:$0xff] %v1691_v32  ;;  %318 = vst [vmem:[%s2231_s2 + $0x38] sm:$0xff] %v1691_v32 }
  0x33   : > { %319 = vst [vmem:[%s2231_s2 + $0x40] sm:$0xff] %v1691_v32  ;;  %320 = vst [vmem:[%s2231_s2 + $0x48] sm:$0xff] %v1691_v32 }
  0x34   : > { %321 = vst [vmem:[%s2231_s2 + $0x50] sm:$0xff] %v1691_v32  ;;  %322 = vst [vmem:[%s2231_s2 + $0x58] sm:$0xff] %v1691_v32 }
  0x35   : > { %323 = vst [vmem:[%s2231_s2 + $0x60] sm:$0xff] %v1691_v32  ;;  %324 = vst [vmem:[%s2231_s2 + $0x68] sm:$0xff] %v1691_v32 }
  0x36   : > { %325 = vst [vmem:[%s2231_s2 + $0x70] sm:$0xff] %v1691_v32  ;;  %326 = vst [vmem:[%s2231_s2 + $0x78] sm:$0xff] %v1691_v32 }
  0x37   : > { %327 = vst [vmem:[%s2231_s2 + $0x80] sm:$0xff] %v1691_v32  ;;  %328 = vst [vmem:[%s2231_s2 + $0x88] sm:$0xff] %v1691_v32 }
  0x38   : > { %329 = vst [vmem:[%s2231_s2 + $0x90] sm:$0xff] %v1691_v32  ;;  %330 = vst [vmem:[%s2231_s2 + $0x98] sm:$0xff] %v1691_v32 }
  0x39   : > { %331 = vst [vmem:[%s2231_s2 + $0xa0] sm:$0xff] %v1691_v32  ;;  %332 = vst [vmem:[%s2231_s2 + $0xa8] sm:$0xff] %v1691_v32 }
  0x3a   : > { %333 = vst [vmem:[%s2231_s2 + $0xb0] sm:$0xff] %v1691_v32  ;;  %334 = vst [vmem:[%s2231_s2 + $0xb8] sm:$0xff] %v1691_v32 }
  0x3b   : > { %335 = vst [vmem:[%s2231_s2 + $0xc0] sm:$0xff] %v1691_v32  ;;  %336 = vst [vmem:[%s2231_s2 + $0xc8] sm:$0xff] %v1691_v32 }
  0x3c   : > { %337 = vst [vmem:[%s2231_s2 + $0xd0] sm:$0xff] %v1691_v32  ;;  %338 = vst [vmem:[%s2231_s2 + $0xd8] sm:$0xff] %v1691_v32 }
  0x3d   : > { %339 = vst [vmem:[%s2231_s2 + $0xe0] sm:$0xff] %v1691_v32  ;;  %340 = vst [vmem:[%s2231_s2 + $0xe8] sm:$0xff] %v1691_v32 }
  0x3e   : > { %341 = vst [vmem:[%s2231_s2 + $0xf0] sm:$0xff] %v1691_v32  ;;  %342 = vst [vmem:[%s2231_s2 + $0xf8] sm:$0xff] %v1691_v32 }
  0x3f PF: > { %v1507_v33 = vld [vmem:[%s1825_s3 + $0x74] ss:$8 sps:$4 sm:$0xff]   ;;  %v1511_v35 = vld [vmem:[%s1825_s3 + $0x70] ss:$8 sps:$4 sm:$0xff]   ;;  %v1513_v37 = vld [vmem:[%s1825_s3 + $0x64] ss:$8 sps:$4 sm:$0xff]  }
  0x40   : > { %v1509_v34 = vld [vmem:[%s1825_s3 + $0x174] ss:$8 sps:$4 sm:$0xff]   ;;  %951 = vmatprep.subr.bf16.mxu0 %v1507_v33  ;;  %v1512_v36 = vld [vmem:[%s1825_s3 + $0x170] ss:$8 sps:$4 sm:$0xff]   ;;  %v1515_v38 = vld [vmem:[%s1825_s3 + $0x164] ss:$8 sps:$4 sm:$0xff]  }
  0x41   : > { %1064 = vmatprep.subr.bf16.mxu1 %v1509_v34  ;;  %952 = vmatpush1.bf16.msra.mxu0 %v1511_v35  ;;  %v1517_v39 = vld [vmem:[%s1825_s3 + $0x60] ss:$8 sps:$4 sm:$0xff]   ;;  %v1519_v41 = vld [vmem:[%s1825_s3 + $0x54] ss:$8 sps:$4 sm:$0xff]   ;;  %v1523_v43 = vld [vmem:[%s1825_s3 + $0x50] ss:$8 sps:$4 sm:$0xff]  }
  0x42   : > { %1065 = vmatpush1.bf16.msra.mxu1 %v1512_v36  ;;  %953 = vmatprep.subr.bf16.mxu0 %v1513_v37  ;;  %v1518_v40 = vld [vmem:[%s1825_s3 + $0x160] ss:$8 sps:$4 sm:$0xff]   ;;  %v1521_v42 = vld [vmem:[%s1825_s3 + $0x154] ss:$8 sps:$4 sm:$0xff]   ;;  %v1524_v44 = vld [vmem:[%s1825_s3 + $0x150] ss:$8 sps:$4 sm:$0xff]  }
  0x43   : > { %1066 = vmatprep.subr.bf16.mxu1 %v1515_v38  ;;  %v1525_v45 = vld [vmem:[%s1825_s3 + $0x44] ss:$8 sps:$4 sm:$0xff]   ;;  %v1529_v47 = vld [vmem:[%s1825_s3 + $0x40] ss:$8 sps:$4 sm:$0xff]   ;;  %v1531_v49 = vld [vmem:[%s1825_s3 + $0x34] ss:$8 sps:$4 sm:$0xff]  }
  0x44   : > { %v1527_v46 = vld [vmem:[%s1825_s3 + $0x144] ss:$8 sps:$4 sm:$0xff]   ;;  %v1530_v48 = vld [vmem:[%s1825_s3 + $0x140] ss:$8 sps:$4 sm:$0xff]   ;;  %v1533_v50 = vld [vmem:[%s1825_s3 + $0x134] ss:$8 sps:$4 sm:$0xff]  }
  0x45   : > { %954 = vmatpush1.bf16.msra.mxu0 %v1517_v39  ;;  %v1535_v51 = vld [vmem:[%s1825_s3 + $0x30] ss:$8 sps:$4 sm:$0xff]   ;;  %v1537_v53 = vld [vmem:[%s1825_s3 + $0x24] ss:$8 sps:$4 sm:$0xff]   ;;  %v1541_v55 = vld [vmem:[%s1825_s3 + $0x20] ss:$8 sps:$4 sm:$0xff]  }
  0x46   : > { %1067 = vmatpush1.bf16.msra.mxu1 %v1518_v40  ;;  %955 = vmatprep.subr.bf16.mxu0 %v1519_v41  ;;  %v1536_v52 = vld [vmem:[%s1825_s3 + $0x130] ss:$8 sps:$4 sm:$0xff]   ;;  %v1539_v54 = vld [vmem:[%s1825_s3 + $0x124] ss:$8 sps:$4 sm:$0xff]   ;;  %v1542_v56 = vld [vmem:[%s1825_s3 + $0x120] ss:$8 sps:$4 sm:$0xff]  }
  0x47   : > { %1068 = vmatprep.subr.bf16.mxu1 %v1521_v42  ;;  %v1543_v57 = vld [vmem:[%s1825_s3 + $0x14] ss:$8 sps:$4 sm:$0xff]   ;;  %v1547_v59 = vld [vmem:[%s1825_s3 + $0x10] ss:$8 sps:$4 sm:$0xff]   ;;  %v1549_v61 = vld [vmem:[%s1825_s3 + $0x4] ss:$8 sps:$4 sm:$0xff]  }
  0x48   : > { %v1545_v58 = vld [vmem:[%s1825_s3 + $0x114] ss:$8 sps:$4 sm:$0xff]   ;;  %v1548_v60 = vld [vmem:[%s1825_s3 + $0x110] ss:$8 sps:$4 sm:$0xff]   ;;  %v1551_v62 = vld [vmem:[%s1825_s3 + $0x104] ss:$8 sps:$4 sm:$0xff]  }
  0x49   : > { %956 = vmatpush1.bf16.msra.mxu0 %v1523_v43  ;;  %v1553_v63 = vld [vmem:[%s1825_s3] ss:$8 sps:$4 sm:$0xff]   ;;  %v1555_v1 = vld [vmem:[%s1825_s3 + $0xf4] ss:$8 sps:$4 sm:$0xff]   ;;  %v1559_v3 = vld [vmem:[%s1825_s3 + $0xf0] ss:$8 sps:$4 sm:$0xff]  }
  0x4a   : > { %1069 = vmatpush1.bf16.msra.mxu1 %v1524_v44  ;;  %957 = vmatprep.subr.bf16.mxu0 %v1525_v45  ;;  %v1554_v0 = vld [vmem:[%s1825_s3 + $0x100] ss:$8 sps:$4 sm:$0xff]   ;;  %v1557_v2 = vld [vmem:[%s1825_s3 + $0x1f4] ss:$8 sps:$4 sm:$0xff]   ;;  %v1560_v4 = vld [vmem:[%s1825_s3 + $0x1f0] ss:$8 sps:$4 sm:$0xff]  }
  0x4b   : > { %1070 = vmatprep.subr.bf16.mxu1 %v1527_v46  ;;  %v1561_v5 = vld [vmem:[%s1825_s3 + $0xe4] ss:$8 sps:$4 sm:$0xff]   ;;  %v1565_v7 = vld [vmem:[%s1825_s3 + $0xe0] ss:$8 sps:$4 sm:$0xff]   ;;  %v1567_v9 = vld [vmem:[%s1825_s3 + $0xd4] ss:$8 sps:$4 sm:$0xff]  }
  0x4c   : > { %v1563_v6 = vld [vmem:[%s1825_s3 + $0x1e4] ss:$8 sps:$4 sm:$0xff]   ;;  %v1566_v8 = vld [vmem:[%s1825_s3 + $0x1e0] ss:$8 sps:$4 sm:$0xff]   ;;  %v1569_v10 = vld [vmem:[%s1825_s3 + $0x1d4] ss:$8 sps:$4 sm:$0xff]  }
  0x4d   : > { %958 = vmatpush1.bf16.msra.mxu0 %v1529_v47  ;;  %v1571_v11 = vld [vmem:[%s1825_s3 + $0xd0] ss:$8 sps:$4 sm:$0xff]   ;;  %v1573_v13 = vld [vmem:[%s1825_s3 + $0xc4] ss:$8 sps:$4 sm:$0xff]   ;;  %v1577_v15 = vld [vmem:[%s1825_s3 + $0xc0] ss:$8 sps:$4 sm:$0xff]  }
  0x4e   : > { %1071 = vmatpush1.bf16.msra.mxu1 %v1530_v48  ;;  %959 = vmatprep.subr.bf16.mxu0 %v1531_v49  ;;  %v1572_v12 = vld [vmem:[%s1825_s3 + $0x1d0] ss:$8 sps:$4 sm:$0xff]   ;;  %v1575_v14 = vld [vmem:[%s1825_s3 + $0x1c4] ss:$8 sps:$4 sm:$0xff]   ;;  %v1578_v16 = vld [vmem:[%s1825_s3 + $0x1c0] ss:$8 sps:$4 sm:$0xff]  }
  0x4f   : > { %1072 = vmatprep.subr.bf16.mxu1 %v1533_v50  ;;  %v1579_v17 = vld [vmem:[%s1825_s3 + $0xb4] ss:$8 sps:$4 sm:$0xff]   ;;  %v1583_v21 = vld [vmem:[%s1825_s3 + $0xb0] ss:$8 sps:$4 sm:$0xff]   ;;  %v1585_v23 = vld [vmem:[%s1825_s3 + $0xa4] ss:$8 sps:$4 sm:$0xff]  }
  0x50   : > { %v1605_v18 = vld [vmem:[%s1827_s4 + $0x4] ss:$16 sps:$4 sm:$0xff]   ;;  %v1608_v20 = vld [vmem:[%s1827_s4 + $0xc] ss:$16 sps:$4 sm:$0xff]   ;;  %v1584_v22 = vld [vmem:[%s1825_s3 + $0x1b0] ss:$8 sps:$4 sm:$0xff]  }
  0x51   : > { %960 = vmatpush1.bf16.msra.mxu0 %v1535_v51  ;;  %v1581_v19 = vld [vmem:[%s1825_s3 + $0x1b4] ss:$8 sps:$4 sm:$0xff]   ;;  %983 = vmatprep.mubr.bf16.mxu0 %v1605_v18  ;;  %v1587_v24 = vld [vmem:[%s1825_s3 + $0x1a4] ss:$8 sps:$4 sm:$0xff]   ;;  %v1589_v25 = vld [vmem:[%s1825_s3 + $0xa0] ss:$8 sps:$4 sm:$0xff]  }
  0x52   : > { %1073 = vmatpush1.bf16.msra.mxu1 %v1536_v52  ;;  %961 = vmatprep.subr.bf16.mxu0 %v1537_v53  ;;  %v1590_v26 = vld [vmem:[%s1825_s3 + $0x1a0] ss:$8 sps:$4 sm:$0xff]   ;;  %v1591_v27 = vld [vmem:[%s1825_s3 + $0x94] ss:$8 sps:$4 sm:$0xff]   ;;  %v1595_v29 = vld [vmem:[%s1825_s3 + $0x90] ss:$8 sps:$4 sm:$0xff]  }
  0x53   : > { %1074 = vmatprep.subr.bf16.mxu1 %v1539_v54  ;;  %1096 = vmatprep.mubr.bf16.mxu1 %v1608_v20  ;;  %v1593_v28 = vld [vmem:[%s1825_s3 + $0x194] ss:$8 sps:$4 sm:$0xff]   ;;  %v1596_v30 = vld [vmem:[%s1825_s3 + $0x190] ss:$8 sps:$4 sm:$0xff]   ;;  %v1597_v31 = vld [vmem:[%s1825_s3 + $0x84] ss:$8 sps:$4 sm:$0xff]  }
  0x54   : > { %v1599_v32 = vld [vmem:[%s1825_s3 + $0x184] ss:$8 sps:$4 sm:$0xff]   ;;  %v1601_v33 = vld [vmem:[%s1825_s3 + $0x80] ss:$8 sps:$4 sm:$0xff]  }
  0x55   : > { %962 = vmatpush1.bf16.msra.mxu0 %v1541_v55  ;;  %v1602_v34 = vld [vmem:[%s1825_s3 + $0x180] ss:$8 sps:$4 sm:$0xff]   ;;  %v1609_v37 = vld [vmem:[%s1827_s4 + $0x24] ss:$16 sps:$4 sm:$0xff]   ;;  %v1611_v38 = vld [vmem:[%s1827_s4 + $0x2c] ss:$16 sps:$4 sm:$0xff]  }
  0x56   : > { %1075 = vmatpush1.bf16.msra.mxu1 %v1542_v56  ;;  %963 = vmatprep.subr.bf16.mxu0 %v1543_v57  ;;  %v1603_v35 = vld [vmem:[%s1827_s4] ss:$16 sps:$4 sm:$0xff]   ;;  %v1606_v36 = vld [vmem:[%s1827_s4 + $0x8] ss:$16 sps:$4 sm:$0xff]   ;;  %v1615_v41 = vld [vmem:[%s1827_s4 + $0x44] ss:$16 sps:$4 sm:$0xff]  }
  0x57   : > { %1076 = vmatprep.subr.bf16.mxu1 %v1545_v58  ;;  %v1613_v39 = vld [vmem:[%s1827_s4 + $0x20] ss:$16 sps:$4 sm:$0xff]   ;;  %v1614_v40 = vld [vmem:[%s1827_s4 + $0x28] ss:$16 sps:$4 sm:$0xff]   ;;  %v1617_v42 = vld [vmem:[%s1827_s4 + $0x4c] ss:$16 sps:$4 sm:$0xff]  }
  0x58   : > { %v1619_v43 = vld [vmem:[%s1827_s4 + $0x40] ss:$16 sps:$4 sm:$0xff]   ;;  %v1620_v44 = vld [vmem:[%s1827_s4 + $0x48] ss:$16 sps:$4 sm:$0xff]   ;;  %v1621_v45 = vld [vmem:[%s1827_s4 + $0x64] ss:$16 sps:$4 sm:$0xff]  }
  0x59   : > { %964 = vmatpush1.bf16.msra.mxu0 %v1547_v59  ;;  %v1623_v46 = vld [vmem:[%s1827_s4 + $0x6c] ss:$16 sps:$4 sm:$0xff]   ;;  %v1625_v47 = vld [vmem:[%s1827_s4 + $0x60] ss:$16 sps:$4 sm:$0xff]   ;;  %v1626_v48 = vld [vmem:[%s1827_s4 + $0x68] ss:$16 sps:$4 sm:$0xff]  }
  0x5a   : > { %1077 = vmatpush1.bf16.msra.mxu1 %v1548_v60  ;;  %965 = vmatprep.subr.bf16.mxu0 %v1549_v61  ;;  %v1627_v49 = vld [vmem:[%s1827_s4 + $0x84] ss:$16 sps:$4 sm:$0xff]   ;;  %v1629_v50 = vld [vmem:[%s1827_s4 + $0x8c] ss:$16 sps:$4 sm:$0xff]   ;;  %v1631_v51 = vld [vmem:[%s1827_s4 + $0x80] ss:$16 sps:$4 sm:$0xff]  }
  0x5b   : > { %1078 = vmatprep.subr.bf16.mxu1 %v1551_v62  ;;  %v1632_v52 = vld [vmem:[%s1827_s4 + $0x88] ss:$16 sps:$4 sm:$0xff]   ;;  %v1633_v53 = vld [vmem:[%s1827_s4 + $0xa4] ss:$16 sps:$4 sm:$0xff]   ;;  %v1635_v54 = vld [vmem:[%s1827_s4 + $0xac] ss:$16 sps:$4 sm:$0xff]  }
  0x5c   : > { %v1637_v55 = vld [vmem:[%s1827_s4 + $0xa0] ss:$16 sps:$4 sm:$0xff]   ;;  %v1638_v56 = vld [vmem:[%s1827_s4 + $0xa8] ss:$16 sps:$4 sm:$0xff]   ;;  %v1639_v57 = vld [vmem:[%s1827_s4 + $0xc4] ss:$16 sps:$4 sm:$0xff]  }
  0x5d   : > { %966 = vmatpush1.bf16.msra.mxu0 %v1553_v63  ;;  %v1641_v58 = vld [vmem:[%s1827_s4 + $0xcc] ss:$16 sps:$4 sm:$0xff]   ;;  %v1643_v59 = vld [vmem:[%s1827_s4 + $0xc0] ss:$16 sps:$4 sm:$0xff]   ;;  %v1644_v60 = vld [vmem:[%s1827_s4 + $0xc8] ss:$16 sps:$4 sm:$0xff]  }
  0x5e   : > { %1079 = vmatpush1.bf16.msra.mxu1 %v1554_v0  ;;  %967 = vmatprep.subr.bf16.mxu0 %v1555_v1  ;;  %v1645_v61 = vld [vmem:[%s1827_s4 + $0xe4] ss:$16 sps:$4 sm:$0xff]   ;;  %v1647_v62 = vld [vmem:[%s1827_s4 + $0xec] ss:$16 sps:$4 sm:$0xff]   ;;  %v1649_v63 = vld [vmem:[%s1827_s4 + $0xe0] ss:$16 sps:$4 sm:$0xff]  }
  0x5f   : > { %1080 = vmatprep.subr.bf16.mxu1 %v1557_v2  ;;  %v1650_v0 = vld [vmem:[%s1827_s4 + $0xe8] ss:$16 sps:$4 sm:$0xff]   ;;  %v343_v2 = vld [vmem:[%s2231_s2] sm:$0xff] }
  0x61   : > { %968 = vmatpush2.bf16.msra.mxu0 %v1559_v3 }
  0x62   : > { %1081 = vmatpush2.bf16.msra.mxu1 %v1560_v4  ;;  %969 = vmatprep.subr.bf16.mxu0 %v1561_v5 }
  0x63   : > { %1082 = vmatprep.subr.bf16.mxu1 %v1563_v6  ;;  %v344_v6 = vld [vmem:[%s2231_s2 + $0x8] sm:$0xff] }
  0x65   : > { %970 = vmatpush2.bf16.msra.mxu0 %v1565_v7 }
  0x66   : > { %1083 = vmatpush2.bf16.msra.mxu1 %v1566_v8  ;;  %971 = vmatprep.subr.bf16.mxu0 %v1567_v9 }
  0x67   : > { %1084 = vmatprep.subr.bf16.mxu1 %v1569_v10 }
  0x69   : > { %972 = vmatpush2.bf16.msra.mxu0 %v1571_v11  ;;  %v345_v11 = vld [vmem:[%s2231_s2 + $0x10] sm:$0xff] }
  0x6a   : > { %1085 = vmatpush2.bf16.msra.mxu1 %v1572_v12  ;;  %973 = vmatprep.subr.bf16.mxu0 %v1573_v13 }
  0x6b   : > { %1086 = vmatprep.subr.bf16.mxu1 %v1575_v14 }
  0x6d   : > { %974 = vmatpush2.bf16.msra.mxu0 %v1577_v15 }
  0x6e   : > { %1087 = vmatpush2.bf16.msra.mxu1 %v1578_v16  ;;  %975 = vmatprep.subr.bf16.mxu0 %v1579_v17  ;;  %v346_v16 = vld [vmem:[%s2231_s2 + $0x18] sm:$0xff] }
  0x6f   : > { %1088 = vmatprep.subr.bf16.mxu1 %v1581_v19 }
  0x71   : > { %976 = vmatpush2.bf16.msra.mxu0 %v1583_v21  ;;  %v347_v21 = vld [vmem:[%s2231_s2 + $0x20] sm:$0xff] }
  0x72   : > { %1089 = vmatpush2.bf16.msra.mxu1 %v1584_v22  ;;  %977 = vmatprep.subr.bf16.mxu0 %v1585_v23 }
  0x73   : > { %1090 = vmatprep.subr.bf16.mxu1 %v1587_v24 }
  0x75   : > { %978 = vmatpush2.bf16.msra.mxu0 %v1589_v25 }
  0x76   : > { %1091 = vmatpush2.bf16.msra.mxu1 %v1590_v26  ;;  %979 = vmatprep.subr.bf16.mxu0 %v1591_v27  ;;  %v348_v26 = vld [vmem:[%s2231_s2 + $0x28] sm:$0xff] }
  0x77   : > { %1092 = vmatprep.subr.bf16.mxu1 %v1593_v28 }
  0x79   : > { %980 = vmatpush2.bf16.msra.mxu0 %v1595_v29 }
  0x7a   : > { %1093 = vmatpush2.bf16.msra.mxu1 %v1596_v30  ;;  %981 = vmatprep.subr.bf16.mxu0 %v1597_v31  ;;  %v349_v31 = vld [vmem:[%s2231_s2 + $0x30] sm:$0xff] }
  0x7b   : > { %1094 = vmatprep.subr.bf16.mxu1 %v1599_v32 }
  0x7d   : > { %982 = vmatpush2.bf16.msra.mxu0 %v1601_v33 }
  0x7e   : > { %1095 = vmatpush2.bf16.msra.mxu1 %v1602_v34 }
  0x80   : > { %984 = vmatmul.mubr.bf16.vlgmr.msra.gmra.mxu0 %v1603_v35 }
  0x81   : > { %1097 = vmatmul.mubr.bf16.vlgmr.msra.gmra.mxu1 %v1606_v36  ;;  %993 = vmatprep.mubr.bf16.mxu0 %v1609_v37  ;;  %v350_v36 = vld [vmem:[%s2231_s2 + $0x38] sm:$0xff] }
  0x82   : > { %1106 = vmatprep.mubr.bf16.mxu1 %v1611_v38 }
  0x88   : > { %994 = vmatmul.mubr.bf16.gmra.mxu0 %v1613_v39 }
  0x89   : > { %1107 = vmatmul.mubr.bf16.gmra.mxu1 %v1614_v40  ;;  %1003 = vmatprep.mubr.bf16.mxu0 %v1615_v41  ;;  %v351_v41 = vld [vmem:[%s2231_s2 + $0x40] sm:$0xff] }
  0x8a   : > { %1116 = vmatprep.mubr.bf16.mxu1 %v1617_v42 }
  0x90   : > { %1004 = vmatmul.mubr.bf16.gmra.mxu0 %v1619_v43 }
  0x91   : > { %1117 = vmatmul.mubr.bf16.gmra.mxu1 %v1620_v44  ;;  %1013 = vmatprep.mubr.bf16.mxu0 %v1621_v45 }
  0x92   : > { %1126 = vmatprep.mubr.bf16.mxu1 %v1623_v46  ;;  %v352_v46 = vld [vmem:[%s2231_s2 + $0x48] sm:$0xff] }
  0x98   : > { %1014 = vmatmul.mubr.bf16.gmra.mxu0 %v1625_v47 }
  0x99   : > { %1127 = vmatmul.mubr.bf16.gmra.mxu1 %v1626_v48  ;;  %1023 = vmatprep.mubr.bf16.mxu0 %v1627_v49 }
  0x9a   : > { %1136 = vmatprep.mubr.bf16.mxu1 %v1629_v50 }
  0xa0   : > { %1024 = vmatmul.mubr.bf16.gmra.mxu0 %v1631_v51  ;;  %v353_v51 = vld [vmem:[%s2231_s2 + $0x50] sm:$0xff] }
  0xa1   : > { %1137 = vmatmul.mubr.bf16.gmra.mxu1 %v1632_v52  ;;  %1033 = vmatprep.mubr.bf16.mxu0 %v1633_v53 }
  0xa2   : > { %1146 = vmatprep.mubr.bf16.mxu1 %v1635_v54 }
  0xa8   : > { %1034 = vmatmul.mubr.bf16.gmra.mxu0 %v1637_v55 }
  0xa9   : > { %1147 = vmatmul.mubr.bf16.gmra.mxu1 %v1638_v56  ;;  %1043 = vmatprep.mubr.bf16.mxu0 %v1639_v57  ;;  %v354_v56 = vld [vmem:[%s2231_s2 + $0x58] sm:$0xff] }
  0xaa   : > { %1156 = vmatprep.mubr.bf16.mxu1 %v1641_v58 }
  0xb0   : > { %1044 = vmatmul.mubr.bf16.gmra.mxu0 %v1643_v59 }
  0xb1   : > { %1157 = vmatmul.mubr.bf16.gmra.mxu1 %v1644_v60  ;;  %1053 = vmatprep.mubr.bf16.mxu0 %v1645_v61  ;;  %v355_v61 = vld [vmem:[%s2231_s2 + $0x60] sm:$0xff] }
  0xb2   : > { %1166 = vmatprep.mubr.bf16.mxu1 %v1647_v62 }
  0xb8   : > { %1054 = vmatmul.mubr.bf16.gmra.mxu0 %v1649_v63 }
  0xb9   : > { %1167 = vmatmul.mubr.bf16.gmra.mxu1 %v1650_v0 }
 0x140   : > { %v985_v1 = vpop.f32.mrf.mxu0 }
 0x141   : > { %v1098_v3 = vpop.f32.mrf.mxu1 }
 0x142   : > { %v1099_v4 = vadd.f32 %v1098_v3, %v985_v1  ;;  %v987_v5 = vpop.f32.mrf.mxu0 }
 0x143   : > { %v1100_v7 = vpop.f32.mrf.mxu1 }
 0x144   : > { %v1177_v8 = vadd.f32 %v1099_v4, %v343_v2  ;;  %v1101_v9 = vadd.f32 %v1100_v7, %v987_v5  ;;  %v989_v10 = vpop.f32.mrf.mxu0  ;;  %v356_v2 = vld [vmem:[%s2231_s2 + $0x68] sm:$0xff]  ;;  %v357_v7 = vld [vmem:[%s2231_s2 + $0x70] sm:$0xff] }
 0x145   : > { %v1102_v12 = vpop.f32.mrf.mxu1 }
 0x146   : > { %1209 = vst [vmem:[%s2231_s2] sm:$0xff] %v1177_v8  ;;  %v1178_v13 = vadd.f32 %v1101_v9, %v344_v6  ;;  %v1103_v14 = vadd.f32 %v1102_v12, %v989_v10  ;;  %v991_v15 = vpop.f32.mrf.mxu0  ;;  %v358_v12 = vld [vmem:[%s2231_s2 + $0x78] sm:$0xff] }
 0x147   : > { %v1104_v17 = vpop.f32.mrf.mxu1 }
 0x148   : > { %1210 = vst [vmem:[%s2231_s2 + $0x8] sm:$0xff] %v1178_v13  ;;  %v1179_v18 = vadd.f32 %v1103_v14, %v345_v11  ;;  %v1105_v19 = vadd.f32 %v1104_v17, %v991_v15  ;;  %v995_v20 = vpop.f32.mrf.mxu0  ;;  %v359_v17 = vld [vmem:[%s2231_s2 + $0x80] sm:$0xff] }
 0x149   : > { %v1108_v22 = vpop.f32.mrf.mxu1 }
 0x14a   : > { %1211 = vst [vmem:[%s2231_s2 + $0x10] sm:$0xff] %v1179_v18  ;;  %v1180_v23 = vadd.f32 %v1105_v19, %v346_v16  ;;  %v1109_v24 = vadd.f32 %v1108_v22, %v995_v20  ;;  %v997_v25 = vpop.f32.mrf.mxu0  ;;  %v360_v22 = vld [vmem:[%s2231_s2 + $0x88] sm:$0xff] }
 0x14b   : > { %v1110_v27 = vpop.f32.mrf.mxu1 }
 0x14c   : > { %1212 = vst [vmem:[%s2231_s2 + $0x18] sm:$0xff] %v1180_v23  ;;  %v1181_v28 = vadd.f32 %v1109_v24, %v347_v21  ;;  %v1111_v29 = vadd.f32 %v1110_v27, %v997_v25  ;;  %v999_v30 = vpop.f32.mrf.mxu0  ;;  %v361_v27 = vld [vmem:[%s2231_s2 + $0x90] sm:$0xff] }
 0x14d   : > { %v1112_v32 = vpop.f32.mrf.mxu1 }
 0x14e   : > { %1213 = vst [vmem:[%s2231_s2 + $0x20] sm:$0xff] %v1181_v28  ;;  %v1182_v33 = vadd.f32 %v1111_v29, %v348_v26  ;;  %v1113_v34 = vadd.f32 %v1112_v32, %v999_v30  ;;  %v1001_v35 = vpop.f32.mrf.mxu0  ;;  %v362_v32 = vld [vmem:[%s2231_s2 + $0x98] sm:$0xff] }
 0x14f   : > { %v1114_v37 = vpop.f32.mrf.mxu1 }
 0x150   : > { %1214 = vst [vmem:[%s2231_s2 + $0x28] sm:$0xff] %v1182_v33  ;;  %v1183_v38 = vadd.f32 %v1113_v34, %v349_v31  ;;  %v1115_v39 = vadd.f32 %v1114_v37, %v1001_v35  ;;  %v1005_v40 = vpop.f32.mrf.mxu0  ;;  %v363_v37 = vld [vmem:[%s2231_s2 + $0xa0] sm:$0xff] }
 0x151   : > { %v1118_v42 = vpop.f32.mrf.mxu1 }
 0x152   : > { %1215 = vst [vmem:[%s2231_s2 + $0x30] sm:$0xff] %v1183_v38  ;;  %v1184_v43 = vadd.f32 %v1115_v39, %v350_v36  ;;  %v1119_v44 = vadd.f32 %v1118_v42, %v1005_v40  ;;  %v1007_v45 = vpop.f32.mrf.mxu0  ;;  %v364_v42 = vld [vmem:[%s2231_s2 + $0xa8] sm:$0xff] }
 0x153   : > { %v1120_v47 = vpop.f32.mrf.mxu1 }
 0x154   : > { %1216 = vst [vmem:[%s2231_s2 + $0x38] sm:$0xff] %v1184_v43  ;;  %v1185_v48 = vadd.f32 %v1119_v44, %v351_v41  ;;  %v1121_v49 = vadd.f32 %v1120_v47, %v1007_v45  ;;  %v1009_v50 = vpop.f32.mrf.mxu0  ;;  %v365_v47 = vld [vmem:[%s2231_s2 + $0xb0] sm:$0xff] }
 0x155   : > { %v1122_v52 = vpop.f32.mrf.mxu1 }
 0x156   : > { %1217 = vst [vmem:[%s2231_s2 + $0x40] sm:$0xff] %v1185_v48  ;;  %v1186_v53 = vadd.f32 %v1121_v49, %v352_v46  ;;  %v1123_v54 = vadd.f32 %v1122_v52, %v1009_v50  ;;  %v1011_v55 = vpop.f32.mrf.mxu0  ;;  %v366_v52 = vld [vmem:[%s2231_s2 + $0xb8] sm:$0xff] }
 0x157   : > { %v1124_v57 = vpop.f32.mrf.mxu1 }
 0x158   : > { %1218 = vst [vmem:[%s2231_s2 + $0x48] sm:$0xff] %v1186_v53  ;;  %v1187_v58 = vadd.f32 %v1123_v54, %v353_v51  ;;  %v1125_v59 = vadd.f32 %v1124_v57, %v1011_v55  ;;  %v1015_v60 = vpop.f32.mrf.mxu0  ;;  %v367_v57 = vld [vmem:[%s2231_s2 + $0xc0] sm:$0xff] }
 0x159   : > { %v1128_v62 = vpop.f32.mrf.mxu1 }
 0x15a   : > { %1219 = vst [vmem:[%s2231_s2 + $0x50] sm:$0xff] %v1187_v58  ;;  %v1188_v63 = vadd.f32 %v1125_v59, %v354_v56  ;;  %v1129_v0 = vadd.f32 %v1128_v62, %v1015_v60  ;;  %v1017_v1 = vpop.f32.mrf.mxu0  ;;  %v368_v62 = vld [vmem:[%s2231_s2 + $0xc8] sm:$0xff] }
 0x15b   : > { %v1130_v3 = vpop.f32.mrf.mxu1 }
 0x15c   : > { %1220 = vst [vmem:[%s2231_s2 + $0x58] sm:$0xff] %v1188_v63  ;;  %v1189_v4 = vadd.f32 %v1129_v0, %v355_v61  ;;  %v1131_v5 = vadd.f32 %v1130_v3, %v1017_v1  ;;  %v1019_v6 = vpop.f32.mrf.mxu0  ;;  %v369_v3 = vld [vmem:[%s2231_s2 + $0xd0] sm:$0xff] }
 0x15d   : > { %v1132_v8 = vpop.f32.mrf.mxu1 }
 0x15e   : > { %1221 = vst [vmem:[%s2231_s2 + $0x60] sm:$0xff] %v1189_v4  ;;  %v1190_v9 = vadd.f32 %v1131_v5, %v356_v2  ;;  %v1133_v10 = vadd.f32 %v1132_v8, %v1019_v6  ;;  %v1021_v11 = vpop.f32.mrf.mxu0  ;;  %v370_v8 = vld [vmem:[%s2231_s2 + $0xd8] sm:$0xff] }
 0x15f   : > { %v1134_v13 = vpop.f32.mrf.mxu1 }
 0x160   : > { %1222 = vst [vmem:[%s2231_s2 + $0x68] sm:$0xff] %v1190_v9  ;;  %v1191_v14 = vadd.f32 %v1133_v10, %v357_v7  ;;  %v1135_v15 = vadd.f32 %v1134_v13, %v1021_v11  ;;  %v1025_v16 = vpop.f32.mrf.mxu0  ;;  %v371_v13 = vld [vmem:[%s2231_s2 + $0xe0] sm:$0xff] }
 0x161   : > { %v1138_v18 = vpop.f32.mrf.mxu1 }
 0x162   : > { %1223 = vst [vmem:[%s2231_s2 + $0x70] sm:$0xff] %v1191_v14  ;;  %v1192_v19 = vadd.f32 %v1135_v15, %v358_v12  ;;  %v1139_v20 = vadd.f32 %v1138_v18, %v1025_v16  ;;  %v1027_v21 = vpop.f32.mrf.mxu0  ;;  %v372_v18 = vld [vmem:[%s2231_s2 + $0xe8] sm:$0xff] }
 0x163   : > { %v1140_v23 = vpop.f32.mrf.mxu1 }
 0x164   : > { %1224 = vst [vmem:[%s2231_s2 + $0x78] sm:$0xff] %v1192_v19  ;;  %v1193_v24 = vadd.f32 %v1139_v20, %v359_v17  ;;  %v1141_v25 = vadd.f32 %v1140_v23, %v1027_v21  ;;  %v1029_v26 = vpop.f32.mrf.mxu0  ;;  %v373_v23 = vld [vmem:[%s2231_s2 + $0xf0] sm:$0xff] }
 0x165   : > { %v1142_v28 = vpop.f32.mrf.mxu1 }
 0x166   : > { %1225 = vst [vmem:[%s2231_s2 + $0x80] sm:$0xff] %v1193_v24  ;;  %v1194_v29 = vadd.f32 %v1141_v25, %v360_v22  ;;  %v1143_v30 = vadd.f32 %v1142_v28, %v1029_v26  ;;  %v1031_v31 = vpop.f32.mrf.mxu0  ;;  %v374_v28 = vld [vmem:[%s2231_s2 + $0xf8] sm:$0xff] }
 0x167   : > { %v1144_v33 = vpop.f32.mrf.mxu1 }
 0x168   : > { %1226 = vst [vmem:[%s2231_s2 + $0x88] sm:$0xff] %v1194_v29  ;;  %v1195_v34 = vadd.f32 %v1143_v30, %v361_v27  ;;  %v1145_v35 = vadd.f32 %v1144_v33, %v1031_v31  ;;  %v1035_v36 = vpop.f32.mrf.mxu0 }
 0x169   : > { %v1148_v38 = vpop.f32.mrf.mxu1 }
 0x16a   : > { %1227 = vst [vmem:[%s2231_s2 + $0x90] sm:$0xff] %v1195_v34  ;;  %v1196_v39 = vadd.f32 %v1145_v35, %v362_v32  ;;  %v1149_v40 = vadd.f32 %v1148_v38, %v1035_v36  ;;  %v1037_v41 = vpop.f32.mrf.mxu0 }
 0x16b   : > { %v1150_v43 = vpop.f32.mrf.mxu1 }
 0x16c   : > { %1228 = vst [vmem:[%s2231_s2 + $0x98] sm:$0xff] %v1196_v39  ;;  %v1197_v44 = vadd.f32 %v1149_v40, %v363_v37  ;;  %v1151_v45 = vadd.f32 %v1150_v43, %v1037_v41  ;;  %v1039_v46 = vpop.f32.mrf.mxu0 }
 0x16d   : > { %v1152_v48 = vpop.f32.mrf.mxu1 }
 0x16e   : > { %1229 = vst [vmem:[%s2231_s2 + $0xa0] sm:$0xff] %v1197_v44  ;;  %v1198_v49 = vadd.f32 %v1151_v45, %v364_v42  ;;  %v1153_v50 = vadd.f32 %v1152_v48, %v1039_v46  ;;  %v1041_v51 = vpop.f32.mrf.mxu0 }
 0x16f   : > { %v1154_v53 = vpop.f32.mrf.mxu1 }
 0x170   : > { %1230 = vst [vmem:[%s2231_s2 + $0xa8] sm:$0xff] %v1198_v49  ;;  %v1199_v54 = vadd.f32 %v1153_v50, %v365_v47  ;;  %v1155_v55 = vadd.f32 %v1154_v53, %v1041_v51  ;;  %v1045_v56 = vpop.f32.mrf.mxu0 }
 0x171   : > { %v1158_v58 = vpop.f32.mrf.mxu1 }
 0x172   : > { %1231 = vst [vmem:[%s2231_s2 + $0xb0] sm:$0xff] %v1199_v54  ;;  %v1200_v59 = vadd.f32 %v1155_v55, %v366_v52  ;;  %v1159_v60 = vadd.f32 %v1158_v58, %v1045_v56  ;;  %v1047_v61 = vpop.f32.mrf.mxu0 }
 0x173   : > { %v1160_v63 = vpop.f32.mrf.mxu1 }
 0x174   : > { %1232 = vst [vmem:[%s2231_s2 + $0xb8] sm:$0xff] %v1200_v59  ;;  %v1201_v0 = vadd.f32 %v1159_v60, %v367_v57  ;;  %v1161_v1 = vadd.f32 %v1160_v63, %v1047_v61  ;;  %v1049_v2 = vpop.f32.mrf.mxu0 }
 0x175   : > { %v1162_v4 = vpop.f32.mrf.mxu1 }
 0x176   : > { %1233 = vst [vmem:[%s2231_s2 + $0xc0] sm:$0xff] %v1201_v0  ;;  %v1202_v5 = vadd.f32 %v1161_v1, %v368_v62  ;;  %v1163_v6 = vadd.f32 %v1162_v4, %v1049_v2  ;;  %v1051_v7 = vpop.f32.mrf.mxu0 }
 0x177   : > { %v1164_v9 = vpop.f32.mrf.mxu1 }
 0x178   : > { %1234 = vst [vmem:[%s2231_s2 + $0xc8] sm:$0xff] %v1202_v5  ;;  %v1203_v10 = vadd.f32 %v1163_v6, %v369_v3  ;;  %v1165_v11 = vadd.f32 %v1164_v9, %v1051_v7  ;;  %v1055_v12 = vpop.f32.mrf.mxu0 }
 0x179   : > { %v1168_v14 = vpop.f32.mrf.mxu1 }
 0x17a   : > { %1235 = vst [vmem:[%s2231_s2 + $0xd0] sm:$0xff] %v1203_v10  ;;  %v1204_v15 = vadd.f32 %v1165_v11, %v370_v8  ;;  %v1169_v16 = vadd.f32 %v1168_v14, %v1055_v12  ;;  %v1057_v17 = vpop.f32.mrf.mxu0 }
 0x17b   : > { %v1170_v19 = vpop.f32.mrf.mxu1 }
 0x17c   : > { %1236 = vst [vmem:[%s2231_s2 + $0xd8] sm:$0xff] %v1204_v15  ;;  %v1205_v20 = vadd.f32 %v1169_v16, %v371_v13  ;;  %v1171_v21 = vadd.f32 %v1170_v19, %v1057_v17  ;;  %v1059_v22 = vpop.f32.mrf.mxu0 }
 0x17d   : > { %v1172_v24 = vpop.f32.mrf.mxu1 }
 0x17e   : > { %1237 = vst [vmem:[%s2231_s2 + $0xe0] sm:$0xff] %v1205_v20  ;;  %v1206_v25 = vadd.f32 %v1171_v21, %v372_v18  ;;  %v1173_v26 = vadd.f32 %v1172_v24, %v1059_v22  ;;  %v1061_v27 = vpop.f32.mrf.mxu0 }
 0x17f   : > { %v1174_v29 = vpop.f32.mrf.mxu1 }
 0x180   : > { %1238 = vst [vmem:[%s2231_s2 + $0xe8] sm:$0xff] %v1206_v25  ;;  %v1207_v30 = vadd.f32 %v1173_v26, %v373_v23  ;;  %v1175_v31 = vadd.f32 %v1174_v29, %v1061_v27 }
 0x182   : > { %1239 = vst [vmem:[%s2231_s2 + $0xf0] sm:$0xff] %v1207_v30  ;;  %v1208_v32 = vadd.f32 %v1175_v31, %v374_v28 }
 0x184   : > { %1240 = vst [vmem:[%s2231_s2 + $0xf8] sm:$0xff] %v1208_v32 }
 0x185 PF: > { %s12_s13 = sadd.s32 1, %s1689_s13   ;;  %s2232_s9 = smov %s1677_s10 }
 0x186   : > { %p9_p11 = scmp.ge.s32.totalorder %s12_s13, 6   ;;  %s2233_s10 = smov %s1742_s17 }
 0x187   : > { %s2234_s11 = smov %s1685_s12  ;;  %s2235_s12 = smov %s2237_s14 }
 0x188   :  { %11 = sbr.rel (!%p9_p11) target bundleno = 3 (0x3), region = 93 }

// kernel: discriminator_forward.19
= control target key start
LH: loop header
LB: loop body
LE: loop exit
PB: predicated region body
PF: predicated region fallthrough
CT: control target
= control target key end

     0   :  { %v14_v0 = vlaneseq  ;;  %v202_v4 = vmov 1966171168   ;;  %v203_v13 = vmov 0.0   ;;  %s305_s0 = inlined_call_operand.vmem [shape: f32[32,512], index: 0, kind: input, shape index: {}]   ;;  %s306_s1 = inlined_call_operand.vmem [shape: f32[1,512], index: 1, kind: output, shape index: {0}]   ;;  %s307_s2 = inlined_call_operand.vmem [shape: f32[1,512], index: 2, kind: output, shape index: {1}]  }
   0x1   :  { %v20_v1 = vld [vmem:[%s305_s0] sm:$0xff]  ;;  %v21_v2 = vld [vmem:[%s305_s0 + $0x8] sm:$0xff]  ;;  %v22_v3 = vld [vmem:[%s305_s0 + $0x10] sm:$0xff]  ;;  %v80_v5 = vunpack.c.l.s4 %v202_v4 }
   0x2   :  { %vm228_vm0 = vcmp.lt.s32.totalorder %v14_v0, 512  ;;  %v23_v7 = vld [vmem:[%s305_s0 + $0x18] sm:$0xff]  ;;  %v24_v8 = vld [vmem:[%s305_s0 + $0x20] sm:$0xff]  ;;  %v25_v9 = vld [vmem:[%s305_s0 + $0x28] sm:$0xff]  ;;  %v83_v10 = vshrl.u32 %v14_v0, 7  ;;  %v109_v11 = vmul.f32 %v20_v1, %v20_v1  ;;  %v110_v12 = vmul.f32 %v21_v2, %v21_v2 }
   0x3   :  { %18 = vst.msk [vmem:[%s306_s1] sm:$0xf] %vm228_vm0, %v203_v13  ;;  %v26_v14 = vld [vmem:[%s305_s0 + $0x30] sm:$0xff]  ;;  %v27_v15 = vld [vmem:[%s305_s0 + $0x38] sm:$0xff]  ;;  %v37_v16 = vadd.f32 %v24_v8, %v20_v1  ;;  %v46_v17 = vadd.f32 %v25_v9, %v21_v2  ;;  %v81_v18 = vunpack.c.0.s8 %v80_v5  ;;  %19 = vst.msk [vmem:[%s307_s2] sm:$0xf] %vm228_vm0, %v203_v13  ;;  %v111_v19 = vmul.f32 %v22_v3, %v22_v3 }
   0x4   :  { %v28_v20 = vld [vmem:[%s305_s0 + $0x40] sm:$0xff]  ;;  %v29_v21 = vld [vmem:[%s305_s0 + $0x48] sm:$0xff]  ;;  %v55_v22 = vadd.f32 %v26_v14, %v22_v3  ;;  %v64_v23 = vadd.f32 %v27_v15, %v23_v7  ;;  %v112_v24 = vmul.f32 %v23_v7, %v23_v7  ;;  %v113_v25 = vmul.f32 %v24_v8, %v24_v8  ;;  %v30_v26 = vld [vmem:[%s305_s0 + $0x50] sm:$0xff] }
   0x5   :  { %v31_v27 = vld [vmem:[%s305_s0 + $0x58] sm:$0xff]  ;;  %v38_v28 = vadd.f32 %v37_v16, %v28_v20  ;;  %v47_v29 = vadd.f32 %v46_v17, %v29_v21  ;;  %v269_v30 = vsub.s32 %v81_v18, %v83_v10  ;;  %v114_v31 = vmul.f32 %v25_v9, %v25_v9  ;;  %v32_v32 = vld [vmem:[%s305_s0 + $0x60] sm:$0xff]  ;;  %v33_v33 = vld [vmem:[%s305_s0 + $0x68] sm:$0xff] }
   0x6   :  { %v56_v34 = vadd.f32 %v55_v22, %v30_v26  ;;  %v65_v35 = vadd.f32 %v64_v23, %v31_v27  ;;  %v115_v36 = vmul.f32 %v26_v14, %v26_v14  ;;  %v116_v37 = vmul.f32 %v27_v15, %v27_v15  ;;  %v34_v38 = vld [vmem:[%s305_s0 + $0x70] sm:$0xff]  ;;  %v35_v39 = vld [vmem:[%s305_s0 + $0x78] sm:$0xff] }
   0x7   :  { %v39_v40 = vadd.f32 %v38_v28, %v32_v32  ;;  %v48_v41 = vadd.f32 %v47_v29, %v33_v33  ;;  %v117_v42 = vmul.f32 %v28_v20, %v28_v20  ;;  %v118_v43 = vmul.f32 %v29_v21, %v29_v21 }
   0x8   :  { %v57_v44 = vadd.f32 %v56_v34, %v34_v38  ;;  %v66_v45 = vadd.f32 %v65_v35, %v35_v39  ;;  %v119_v46 = vmul.f32 %v30_v26, %v30_v26  ;;  %v120_v47 = vmul.f32 %v31_v27, %v31_v27 }
   0x9   :  { %v40_v48 = vrot.slane %v39_v40, 4  ;;  %v49_v49 = vrot.slane %v48_v41, 4  ;;  %v121_v50 = vmul.f32 %v32_v32, %v32_v32  ;;  %v122_v51 = vmul.f32 %v33_v33, %v33_v33 }
   0xa   :  { %v58_v52 = vrot.slane %v57_v44, 4  ;;  %v67_v53 = vrot.slane %v66_v45, 4  ;;  %v123_v54 = vmul.f32 %v34_v38, %v34_v38  ;;  %v124_v55 = vmul.f32 %v35_v39, %v35_v39 }
   0xb   :  { %v41_v56 = vadd.f32 %v40_v48, %v39_v40  ;;  %v50_v57 = vadd.f32 %v49_v49, %v48_v41  ;;  %v125_v58 = vadd.f32 %v113_v25, %v109_v11  ;;  %v134_v59 = vadd.f32 %v114_v31, %v110_v12 }
   0xc   :  { %v59_v60 = vadd.f32 %v58_v52, %v57_v44  ;;  %v68_v61 = vadd.f32 %v67_v53, %v66_v45  ;;  %v143_v62 = vadd.f32 %v115_v36, %v111_v19  ;;  %v152_v63 = vadd.f32 %v116_v37, %v112_v24 }
   0xd   :  { %v42_v0 = vrot.slane %v41_v56, 2  ;;  %v51_v1 = vrot.slane %v50_v57, 2  ;;  %v126_v2 = vadd.f32 %v125_v58, %v117_v42  ;;  %v135_v3 = vadd.f32 %v134_v59, %v118_v43 }
   0xe   :  { %v60_v4 = vrot.slane %v59_v60, 2  ;;  %v69_v5 = vrot.slane %v68_v61, 2  ;;  %v144_v7 = vadd.f32 %v143_v62, %v119_v46  ;;  %v153_v8 = vadd.f32 %v152_v63, %v120_v47  ;;  %v108_v63 = vld [vmem:[%s307_s2] sm:$0xf] }
   0xf   :  { %v43_v9 = vadd.f32 %v42_v0, %v41_v56  ;;  %v52_v10 = vadd.f32 %v51_v1, %v50_v57  ;;  %v127_v13 = vadd.f32 %v126_v2, %v121_v50  ;;  %v136_v14 = vadd.f32 %v135_v3, %v122_v51  ;;  %v36_v51 = vld [vmem:[%s306_s1] sm:$0xf] }
  0x10   :  { %v61_v15 = vadd.f32 %v60_v4, %v59_v60  ;;  %v70_v16 = vadd.f32 %v69_v5, %v68_v61  ;;  %v145_v11 = vadd.f32 %v144_v7, %v123_v54  ;;  %v154_v12 = vadd.f32 %v153_v8, %v124_v55 }
  0x11   :  { %v44_v17 = vrot.slane %v43_v9, 1  ;;  %v53_v18 = vrot.slane %v52_v10, 1  ;;  %v128_v19 = vrot.slane %v127_v13, 4  ;;  %v137_v20 = vrot.slane %v136_v14, 4 }
  0x12   :  { %v62_v21 = vrot.slane %v61_v15, 1  ;;  %v71_v22 = vrot.slane %v70_v16, 1  ;;  %v146_v23 = vrot.slane %v145_v11, 4  ;;  %v155_v24 = vrot.slane %v154_v12, 4 }
  0x13   :  { %v45_v25 = vadd.f32 %v44_v17, %v43_v9  ;;  %v54_v26 = vadd.f32 %v53_v18, %v52_v10  ;;  %v129_v27 = vadd.f32 %v128_v19, %v127_v13  ;;  %v138_v28 = vadd.f32 %v137_v20, %v136_v14 }
  0x14   :  { %v63_v29 = vadd.f32 %v62_v21, %v61_v15  ;;  %v72_v31 = vadd.f32 %v71_v22, %v70_v16  ;;  %v147_v32 = vadd.f32 %v146_v23, %v145_v11  ;;  %v156_v33 = vadd.f32 %v155_v24, %v154_v12 }
  0x15   :  { %v77_v34 = vcombine.low %v45_v25, %v54_v26  ;;  %v130_v35 = vrot.slane %v129_v27, 2  ;;  %v139_v36 = vrot.slane %v138_v28, 2 }
  0x16   :  { %v78_v37 = vcombine.low %v63_v29, %v72_v31  ;;  %v148_v38 = vrot.slane %v147_v32, 2  ;;  %v157_v39 = vrot.slane %v156_v33, 2 }
  0x17   :  { %v85_v40 = vrot.slane %v77_v34, %v269_v30  ;;  %v131_v41 = vadd.f32 %v130_v35, %v129_v27  ;;  %v140_v42 = vadd.f32 %v139_v36, %v138_v28 }
  0x18   :  { %v92_v43 = vrot.slane %v78_v37, %v269_v30  ;;  %v149_v44 = vadd.f32 %v148_v38, %v147_v32  ;;  %v158_v45 = vadd.f32 %v157_v39, %v156_v33 }
  0x19   :  { %v132_v46 = vrot.slane %v131_v41, 1  ;;  %v141_v47 = vrot.slane %v140_v42, 1 }
  0x1a   :  { %v93_v48 = vcombine.low %v85_v40, %v92_v43  ;;  %v150_v49 = vrot.slane %v149_v44, 1  ;;  %v159_v50 = vrot.slane %v158_v45, 1 }
  0x1b   :  { %v133_v52 = vadd.f32 %v132_v46, %v131_v41  ;;  %v142_v53 = vadd.f32 %v141_v47, %v140_v42 }
  0x1c   :  { %v100_v54 = vrot.slane %v93_v48, %v269_v30  ;;  %v151_v55 = vadd.f32 %v150_v49, %v149_v44  ;;  %v160_v56 = vadd.f32 %v159_v50, %v158_v45 }
  0x1d   :  { %v165_v57 = vcombine.low %v133_v52, %v142_v53 }
  0x1e   :  { %v102_v58 = vadd.f32 %v100_v54, %v36_v51  ;;  %v166_v59 = vcombine.low %v151_v55, %v160_v56 }
  0x1f   :  { %v173_v60 = vrot.slane %v165_v57, %v269_v30 }
  0x20   :  { %107 = vst.msk [vmem:[%s306_s1] sm:$0xf] %vm228_vm0, %v102_v58  ;;  %v180_v61 = vrot.slane %v166_v59, %v269_v30 }
  0x22   :  { %v181_v62 = vcombine.low %v173_v60, %v180_v61 }
  0x24   :  { %v188_v0 = vrot.slane %v181_v62, %v269_v30 }
  0x26   :  { %v190_v1 = vadd.f32 %v188_v0, %v108_v63 }
  0x28   :  { %191 = vst.msk [vmem:[%s307_s2] sm:$0xf] %vm228_vm0, %v190_v1 }

// kernel: discriminator_forward.18
= control target key start
LH: loop header
LB: loop body
LE: loop exit
PB: predicated region body
PF: predicated region fallthrough
CT: control target
= control target key end

     0   :  { %s2032_s0 = inlined_call_operand.vmem [shape: bf16[32,4096], index: 0, kind: input, shape index: {}]   ;;  %s2033_s1 = inlined_call_operand.vmem [shape: bf16[4096,512], index: 1, kind: input, shape index: {}]   ;;  %s2034_s2 = inlined_call_operand.vmem [shape: f32[32,512], index: 2, kind: output, shape index: {}]  }
   0x1   :  { %2035 = sst [smem:[#allocation5_spill]] %s2032_s0 }
   0x2   :  { %s1631_s9 = smov 0   ;;  %s1633_s10 = smov 0  }
   0x3   :  { %s1635_s11 = smov 0   ;;  %s1637_s12 = smov 0  }
   0x4   :  { %s1639_s13 = smov 0   ;;  %s1641_s14 = smov 0  }
   0x5   :  { %s1643_s15 = smov 0   ;;  %s1645_s16 = smov 0  }
   0x6   :  { %s1647_s17 = smov 0   ;;  %s1649_s18 = smov 0  }
   0x7   :  { %s1651_s19 = smov 0  }
   0x8 LB: > { %s1233_s20 = sadd.s32 4294967295, %s1613_s19   ;;  %s24_s21 = sadd.s32 1, %s1605_s17  ;;  %s1613_s19 = sphi %s1651_s19, %s12_s19   ;;  %s1609_s18 = sphi %s1649_s18, %s2049_s18   ;;  %s1605_s17 = sphi %s1647_s17, %s2048_s17   ;;  %s1601_s16 = sphi %s1645_s16, %s2047_s16   ;;  %s1597_s15 = sphi %s1643_s15, %s2046_s15   ;;  %s1593_s14 = sphi %s1641_s14, %s2045_s14   ;;  %s1589_s13 = sphi %s1639_s13, %s2044_s13   ;;  %s1585_s12 = sphi %s1637_s12, %s2043_s12   ;;  %s1581_s11 = sphi %s1635_s11, %s2042_s11   ;;  %s1577_s10 = sphi %s1633_s10, %s2041_s10   ;;  %s1573_s9 = sphi %s1631_s9, %s2040_s9  }
   0x9   : > { %p25_p0 = scmp.ge.s32.totalorder %s24_s21, 8  ;;  %s27_s22 = sadd.s32 1, %s1609_s18 }
   0xa   : > { %s40_s23 = sadd.s32 1, %s1593_s14  ;;  %p47_p1 = scmp.ne.s32.totalorder %s1593_s14, %s1589_s13 }
   0xb   : > { %s2051_s21 = smov (%p25_p0, %s24_s21), 0  ;;  %s2053_s22 = smov (!%p25_p0, %s27_s22), %s1609_s18 }
   0xc   : > { %s36_s24 = ssub.s32 %s1605_s17, %s2051_s21  ;;  %p48_p2 = scmp.eq.s32.totalorder %s1613_s19, 0 }
   0xd   : > { %p29_p3 = scmp.ge.s32.totalorder %s2053_s22, 2  ;;  %p38_p4 = scmp.eq.s32.totalorder %s36_s24, 0 }
   0xe   : > { %p1698_p5 = por %p48_p2, %p47_p1  ;;  %s68_s26 = sadd.s32 1, %s1585_s12 }
   0xf   : > { %s2055_s22 = smov (%p29_p3, %s2053_s22), 0  ;;  %p75_p6 = scmp.ne.s32.totalorder %s1585_s12, %s1581_s11 }
  0x10   : > { %s1706_s27 = scalar_select %p38_p4, %s1593_s14, %s40_s23  }
  0x11   : > { %s64_s28 = ssub.s32 %s1609_s18, %s2055_s22  ;;  %p1712_p9 = por %p75_p6, %p48_p2 }
  0x12   : > { %s65_s29 = sor.u32 %s64_s28, %s36_s24  ;;  %p94_p7 = scmp.eq.s32.totalorder %s64_s28, 0 }
  0x13   : > { %p66_p8 = scmp.eq.s32.totalorder %s65_s29, 0  ;;  %s96_s3 = sadd.s32 1, %s1577_s10 }
  0x14   : > { %p106_p10 = scmp.ne.s32.totalorder %s1577_s10, %s1573_s9  ;;  %p107_p11 = scmp.eq.s32.totalorder %s1233_s20, 15 }
  0x15   : > { %s1720_s4 = scalar_select %p66_p8, %s1585_s12, %s68_s26  }
  0x16   : > { %s1723_s5 = scalar_select %p94_p7, %s1577_s10, %s96_s3  }
  0x17   : > { %p1725_p12 = por %p107_p11, %p106_p10  ;;  %p1236_p13 = scmp.ge.s32.totalorder %s1613_s19, 16 }
  0x19   : > { %129 = sbr.rel (%p1236_p13) target bundleno = 83 (0x53), region = 16 }
  0x1e   : > { %132 = sbr.rel (!%p1698_p5) target bundleno = 44 (0x2c), region = 20  ;;  %s134_s7 = sand.u32 (%p1698_p5), 1, %s1593_s14  }
  0x1f   : > { %s1327_s8 = sshll.u32 (%p1698_p5), %s1605_s17, 4  ;;  %s1237_s23 = sshll.u32 (%p1698_p5), %s134_s7, 6 }
  0x20   : > { %s2039_s0 = sld [smem:[#allocation5_spill]] (%p1698_p5)  ;;  %s136_s20 = scalar_lea.vmem (%p1698_p5), [#allocation2], %s1237_s23 }
  0x26   : > { %s142_s28 = scalar_lea.vmem %s2039_s0, %s1327_s8 }
  0x27   : > { %v155_v0 = vld [vmem:[%s142_s28] sm:$0xff]  ;;  %v157_v1 = vld [vmem:[%s142_s28 + $0x8] sm:$0xff] }
  0x28   : > { %v159_v2 = vld [vmem:[%s142_s28 + $0x80] sm:$0xff]  ;;  %156 = vst [vmem:[%s136_s20] sm:$0xff] %v155_v0  ;;  %158 = vst [vmem:[%s136_s20 + $0x8] sm:$0xff] %v157_v1  ;;  %v161_v3 = vld [vmem:[%s142_s28 + $0x88] sm:$0xff] }
  0x29   : > { %160 = vst [vmem:[%s136_s20 + $0x10] sm:$0xff] %v159_v2  ;;  %v163_v4 = vld [vmem:[%s142_s28 + $0x100] sm:$0xff]  ;;  %v165_v5 = vld [vmem:[%s142_s28 + $0x108] sm:$0xff]  ;;  %162 = vst [vmem:[%s136_s20 + $0x18] sm:$0xff] %v161_v3 }
  0x2a   : > { %164 = vst [vmem:[%s136_s20 + $0x20] sm:$0xff] %v163_v4  ;;  %166 = vst [vmem:[%s136_s20 + $0x28] sm:$0xff] %v165_v5  ;;  %v167_v6 = vld [vmem:[%s142_s28 + $0x180] sm:$0xff]  ;;  %v169_v7 = vld [vmem:[%s142_s28 + $0x188] sm:$0xff] }
  0x2b   : > { %168 = vst [vmem:[%s136_s20 + $0x30] sm:$0xff] %v167_v6  ;;  %170 = vst [vmem:[%s136_s20 + $0x38] sm:$0xff] %v169_v7 }
  0x2c PF: > { %176 = sbr.rel (!%p1712_p9) target bundleno = 83 (0x53), region = 43  ;;  %s178_s25 = sand.u32 (%p1712_p9), 1, %s1585_s12  }
  0x2d   : > { %s1242_s29 = sshll.u32 (%p1712_p9), %s1609_s18, 1  ;;  %s1240_s3 = sshll.u32 (%p1712_p9), %s178_s25, 9 }
  0x2e   : > { %s1328_s7 = sshll.u32 (%p1712_p9), %s1605_s17, 8  ;;  %s1750_s30 = scalar_lea.vmem (%p1712_p9), [#allocation3], %s1240_s3 }
  0x2f   : > { %s184_s8 = sadd.s32 (%p1712_p9), %s1328_s7, %s1242_s29 }
  0x30   : > { %s1244_s23 = sshll.u32 (%p1712_p9), %s184_s8, 2 }
  0x31   : > { %s1745_s0 = scalar_lea.vmem %s2033_s1, %s1244_s23 }
  0x32   : > { %v341_v8 = vld [vmem:[%s1745_s0] sm:$0xff]  ;;  %v343_v9 = vld [vmem:[%s1745_s0 + $0x10] sm:$0xff] }
  0x33   : > { %v345_v10 = vld [vmem:[%s1745_s0 + $0x20] sm:$0xff]  ;;  %342 = vst [vmem:[%s1750_s30] sm:$0xff] %v341_v8  ;;  %344 = vst [vmem:[%s1750_s30 + $0x8] sm:$0xff] %v343_v9  ;;  %v347_v11 = vld [vmem:[%s1745_s0 + $0x30] sm:$0xff] }
  0x34   : > { %346 = vst [vmem:[%s1750_s30 + $0x10] sm:$0xff] %v345_v10  ;;  %v349_v12 = vld [vmem:[%s1745_s0 + $0x40] sm:$0xff]  ;;  %v351_v13 = vld [vmem:[%s1745_s0 + $0x50] sm:$0xff]  ;;  %348 = vst [vmem:[%s1750_s30 + $0x18] sm:$0xff] %v347_v11 }
  0x35   : > { %350 = vst [vmem:[%s1750_s30 + $0x20] sm:$0xff] %v349_v12  ;;  %352 = vst [vmem:[%s1750_s30 + $0x28] sm:$0xff] %v351_v13  ;;  %v353_v14 = vld [vmem:[%s1745_s0 + $0x60] sm:$0xff]  ;;  %v355_v15 = vld [vmem:[%s1745_s0 + $0x70] sm:$0xff] }
  0x36   : > { %v357_v16 = vld [vmem:[%s1745_s0 + $0x80] sm:$0xff]  ;;  %354 = vst [vmem:[%s1750_s30 + $0x30] sm:$0xff] %v353_v14  ;;  %356 = vst [vmem:[%s1750_s30 + $0x38] sm:$0xff] %v355_v15  ;;  %v359_v17 = vld [vmem:[%s1745_s0 + $0x90] sm:$0xff] }
  0x37   : > { %358 = vst [vmem:[%s1750_s30 + $0x40] sm:$0xff] %v357_v16  ;;  %v361_v18 = vld [vmem:[%s1745_s0 + $0xa0] sm:$0xff]  ;;  %v363_v19 = vld [vmem:[%s1745_s0 + $0xb0] sm:$0xff]  ;;  %360 = vst [vmem:[%s1750_s30 + $0x48] sm:$0xff] %v359_v17 }
  0x38   : > { %362 = vst [vmem:[%s1750_s30 + $0x50] sm:$0xff] %v361_v18  ;;  %364 = vst [vmem:[%s1750_s30 + $0x58] sm:$0xff] %v363_v19  ;;  %v365_v20 = vld [vmem:[%s1745_s0 + $0xc0] sm:$0xff]  ;;  %v367_v21 = vld [vmem:[%s1745_s0 + $0xd0] sm:$0xff] }
  0x39   : > { %v369_v22 = vld [vmem:[%s1745_s0 + $0xe0] sm:$0xff]  ;;  %366 = vst [vmem:[%s1750_s30 + $0x60] sm:$0xff] %v365_v20  ;;  %368 = vst [vmem:[%s1750_s30 + $0x68] sm:$0xff] %v367_v21  ;;  %v371_v23 = vld [vmem:[%s1745_s0 + $0xf0] sm:$0xff] }
  0x3a   : > { %370 = vst [vmem:[%s1750_s30 + $0x70] sm:$0xff] %v369_v22  ;;  %v373_v24 = vld [vmem:[%s1745_s0 + $0x100] sm:$0xff]  ;;  %v375_v25 = vld [vmem:[%s1745_s0 + $0x110] sm:$0xff]  ;;  %372 = vst [vmem:[%s1750_s30 + $0x78] sm:$0xff] %v371_v23 }
  0x3b   : > { %374 = vst [vmem:[%s1750_s30 + $0x80] sm:$0xff] %v373_v24  ;;  %376 = vst [vmem:[%s1750_s30 + $0x88] sm:$0xff] %v375_v25  ;;  %v377_v26 = vld [vmem:[%s1745_s0 + $0x120] sm:$0xff]  ;;  %v379_v27 = vld [vmem:[%s1745_s0 + $0x130] sm:$0xff] }
  0x3c   : > { %v381_v28 = vld [vmem:[%s1745_s0 + $0x140] sm:$0xff]  ;;  %378 = vst [vmem:[%s1750_s30 + $0x90] sm:$0xff] %v377_v26  ;;  %380 = vst [vmem:[%s1750_s30 + $0x98] sm:$0xff] %v379_v27  ;;  %v383_v29 = vld [vmem:[%s1745_s0 + $0x150] sm:$0xff] }
  0x3d   : > { %382 = vst [vmem:[%s1750_s30 + $0xa0] sm:$0xff] %v381_v28  ;;  %v385_v30 = vld [vmem:[%s1745_s0 + $0x160] sm:$0xff]  ;;  %v387_v31 = vld [vmem:[%s1745_s0 + $0x170] sm:$0xff]  ;;  %384 = vst [vmem:[%s1750_s30 + $0xa8] sm:$0xff] %v383_v29 }
  0x3e   : > { %386 = vst [vmem:[%s1750_s30 + $0xb0] sm:$0xff] %v385_v30  ;;  %388 = vst [vmem:[%s1750_s30 + $0xb8] sm:$0xff] %v387_v31  ;;  %v389_v32 = vld [vmem:[%s1745_s0 + $0x180] sm:$0xff]  ;;  %v391_v33 = vld [vmem:[%s1745_s0 + $0x190] sm:$0xff] }
  0x3f   : > { %v393_v34 = vld [vmem:[%s1745_s0 + $0x1a0] sm:$0xff]  ;;  %390 = vst [vmem:[%s1750_s30 + $0xc0] sm:$0xff] %v389_v32  ;;  %392 = vst [vmem:[%s1750_s30 + $0xc8] sm:$0xff] %v391_v33  ;;  %v395_v35 = vld [vmem:[%s1745_s0 + $0x1b0] sm:$0xff] }
  0x40   : > { %394 = vst [vmem:[%s1750_s30 + $0xd0] sm:$0xff] %v393_v34  ;;  %v397_v36 = vld [vmem:[%s1745_s0 + $0x1c0] sm:$0xff]  ;;  %v399_v37 = vld [vmem:[%s1745_s0 + $0x1d0] sm:$0xff]  ;;  %396 = vst [vmem:[%s1750_s30 + $0xd8] sm:$0xff] %v395_v35 }
  0x41   : > { %398 = vst [vmem:[%s1750_s30 + $0xe0] sm:$0xff] %v397_v36  ;;  %400 = vst [vmem:[%s1750_s30 + $0xe8] sm:$0xff] %v399_v37  ;;  %v401_v38 = vld [vmem:[%s1745_s0 + $0x1e0] sm:$0xff]  ;;  %v403_v39 = vld [vmem:[%s1745_s0 + $0x1f0] sm:$0xff] }
  0x42   : > { %v405_v40 = vld [vmem:[%s1745_s0 + $0x200] sm:$0xff]  ;;  %402 = vst [vmem:[%s1750_s30 + $0xf0] sm:$0xff] %v401_v38  ;;  %404 = vst [vmem:[%s1750_s30 + $0xf8] sm:$0xff] %v403_v39  ;;  %v407_v41 = vld [vmem:[%s1745_s0 + $0x210] sm:$0xff] }
  0x43   : > { %406 = vst [vmem:[%s1750_s30 + $0x100] sm:$0xff] %v405_v40  ;;  %v409_v42 = vld [vmem:[%s1745_s0 + $0x220] sm:$0xff]  ;;  %v411_v43 = vld [vmem:[%s1745_s0 + $0x230] sm:$0xff]  ;;  %408 = vst [vmem:[%s1750_s30 + $0x108] sm:$0xff] %v407_v41 }
  0x44   : > { %410 = vst [vmem:[%s1750_s30 + $0x110] sm:$0xff] %v409_v42  ;;  %412 = vst [vmem:[%s1750_s30 + $0x118] sm:$0xff] %v411_v43  ;;  %v413_v44 = vld [vmem:[%s1745_s0 + $0x240] sm:$0xff]  ;;  %v415_v45 = vld [vmem:[%s1745_s0 + $0x250] sm:$0xff] }
  0x45   : > { %v417_v46 = vld [vmem:[%s1745_s0 + $0x260] sm:$0xff]  ;;  %414 = vst [vmem:[%s1750_s30 + $0x120] sm:$0xff] %v413_v44  ;;  %416 = vst [vmem:[%s1750_s30 + $0x128] sm:$0xff] %v415_v45  ;;  %v419_v47 = vld [vmem:[%s1745_s0 + $0x270] sm:$0xff] }
  0x46   : > { %418 = vst [vmem:[%s1750_s30 + $0x130] sm:$0xff] %v417_v46  ;;  %v421_v48 = vld [vmem:[%s1745_s0 + $0x280] sm:$0xff]  ;;  %v423_v49 = vld [vmem:[%s1745_s0 + $0x290] sm:$0xff]  ;;  %420 = vst [vmem:[%s1750_s30 + $0x138] sm:$0xff] %v419_v47 }
  0x47   : > { %422 = vst [vmem:[%s1750_s30 + $0x140] sm:$0xff] %v421_v48  ;;  %424 = vst [vmem:[%s1750_s30 + $0x148] sm:$0xff] %v423_v49  ;;  %v425_v50 = vld [vmem:[%s1745_s0 + $0x2a0] sm:$0xff]  ;;  %v427_v51 = vld [vmem:[%s1745_s0 + $0x2b0] sm:$0xff] }
  0x48   : > { %v429_v52 = vld [vmem:[%s1745_s0 + $0x2c0] sm:$0xff]  ;;  %426 = vst [vmem:[%s1750_s30 + $0x150] sm:$0xff] %v425_v50  ;;  %428 = vst [vmem:[%s1750_s30 + $0x158] sm:$0xff] %v427_v51  ;;  %v431_v53 = vld [vmem:[%s1745_s0 + $0x2d0] sm:$0xff] }
  0x49   : > { %430 = vst [vmem:[%s1750_s30 + $0x160] sm:$0xff] %v429_v52  ;;  %v433_v54 = vld [vmem:[%s1745_s0 + $0x2e0] sm:$0xff]  ;;  %v435_v55 = vld [vmem:[%s1745_s0 + $0x2f0] sm:$0xff]  ;;  %432 = vst [vmem:[%s1750_s30 + $0x168] sm:$0xff] %v431_v53 }
  0x4a   : > { %434 = vst [vmem:[%s1750_s30 + $0x170] sm:$0xff] %v433_v54  ;;  %436 = vst [vmem:[%s1750_s30 + $0x178] sm:$0xff] %v435_v55  ;;  %v437_v56 = vld [vmem:[%s1745_s0 + $0x300] sm:$0xff]  ;;  %v439_v57 = vld [vmem:[%s1745_s0 + $0x310] sm:$0xff] }
  0x4b   : > { %v441_v58 = vld [vmem:[%s1745_s0 + $0x320] sm:$0xff]  ;;  %438 = vst [vmem:[%s1750_s30 + $0x180] sm:$0xff] %v437_v56  ;;  %440 = vst [vmem:[%s1750_s30 + $0x188] sm:$0xff] %v439_v57  ;;  %v443_v59 = vld [vmem:[%s1745_s0 + $0x330] sm:$0xff] }
  0x4c   : > { %442 = vst [vmem:[%s1750_s30 + $0x190] sm:$0xff] %v441_v58  ;;  %v445_v60 = vld [vmem:[%s1745_s0 + $0x340] sm:$0xff]  ;;  %v447_v61 = vld [vmem:[%s1745_s0 + $0x350] sm:$0xff]  ;;  %444 = vst [vmem:[%s1750_s30 + $0x198] sm:$0xff] %v443_v59 }
  0x4d   : > { %446 = vst [vmem:[%s1750_s30 + $0x1a0] sm:$0xff] %v445_v60  ;;  %448 = vst [vmem:[%s1750_s30 + $0x1a8] sm:$0xff] %v447_v61  ;;  %v449_v62 = vld [vmem:[%s1745_s0 + $0x360] sm:$0xff]  ;;  %v451_v63 = vld [vmem:[%s1745_s0 + $0x370] sm:$0xff] }
  0x4e   : > { %v453_v0 = vld [vmem:[%s1745_s0 + $0x380] sm:$0xff]  ;;  %450 = vst [vmem:[%s1750_s30 + $0x1b0] sm:$0xff] %v449_v62  ;;  %452 = vst [vmem:[%s1750_s30 + $0x1b8] sm:$0xff] %v451_v63  ;;  %v455_v1 = vld [vmem:[%s1745_s0 + $0x390] sm:$0xff] }
  0x4f   : > { %454 = vst [vmem:[%s1750_s30 + $0x1c0] sm:$0xff] %v453_v0  ;;  %v457_v2 = vld [vmem:[%s1745_s0 + $0x3a0] sm:$0xff]  ;;  %v459_v3 = vld [vmem:[%s1745_s0 + $0x3b0] sm:$0xff]  ;;  %456 = vst [vmem:[%s1750_s30 + $0x1c8] sm:$0xff] %v455_v1 }
  0x50   : > { %458 = vst [vmem:[%s1750_s30 + $0x1d0] sm:$0xff] %v457_v2  ;;  %460 = vst [vmem:[%s1750_s30 + $0x1d8] sm:$0xff] %v459_v3  ;;  %v461_v4 = vld [vmem:[%s1745_s0 + $0x3c0] sm:$0xff]  ;;  %v463_v5 = vld [vmem:[%s1745_s0 + $0x3d0] sm:$0xff] }
  0x51   : > { %v465_v6 = vld [vmem:[%s1745_s0 + $0x3e0] sm:$0xff]  ;;  %462 = vst [vmem:[%s1750_s30 + $0x1e0] sm:$0xff] %v461_v4  ;;  %464 = vst [vmem:[%s1750_s30 + $0x1e8] sm:$0xff] %v463_v5  ;;  %v467_v7 = vld [vmem:[%s1745_s0 + $0x3f0] sm:$0xff] }
  0x52   : > { %466 = vst [vmem:[%s1750_s30 + $0x1f0] sm:$0xff] %v465_v6  ;;  %468 = vst [vmem:[%s1750_s30 + $0x1f8] sm:$0xff] %v467_v7 }
  0x53 PF: > { %p1245_p0 = scmp.ge.s32.totalorder %s1613_s19, 1  ;;  %p473_p1 = scmp.lt.s32.totalorder %s1613_s19, 17 }
  0x55   : > { %p474_p2 = pnand %p1245_p0, %p473_p1 }
  0x56   : > { %s480_s28 = sand.u32 (!%p474_p2), 1, %s1589_s13   ;;  %s487_s20 = sand.u32 (!%p474_p2), 1, %s1581_s11  }
  0x57   : > { %477 = sbr.rel (%p474_p2) target bundleno = 389 (0x185), region = 81  ;;  %s1246_s25 = sshll.u32 (!%p474_p2), %s480_s28, 6 }
  0x58   : > { %s1247_s29 = sshll.u32 (!%p474_p2), %s487_s20, 9  ;;  %s508_s3 = sand.u32 (!%p474_p2), 1, %s1573_s9  }
  0x59   : > { %s1248_s7 = sshll.u32 (!%p474_p2), %s508_s3, 6  ;;  %s1882_s8 = scalar_lea.vmem (!%p474_p2), [#allocation2], %s1246_s25 }
  0x5a   : > { %s1884_s0 = scalar_lea.vmem (!%p474_p2), [#allocation3], %s1247_s29  ;;  %s1886_s23 = scalar_lea.vmem (!%p474_p2), [#allocation4], %s1248_s7 }
  0x5b   : > { %p1249_p3 = scmp.ne.s32.totalorder (!%p474_p2), %s1597_s15, 0 }
  0x5d   : > { %520 = sbr.rel (%p1249_p3) target bundleno = 103 (0x67), region = 93 }
  0x62   : > { %v1615_v8 = vmov 0.0  }
  0x63   : > { %521 = vst [vmem:[%s1886_s23] sm:$0xff] %v1615_v8  ;;  %522 = vst [vmem:[%s1886_s23 + $0x8] sm:$0xff] %v1615_v8 }
  0x64   : > { %523 = vst [vmem:[%s1886_s23 + $0x10] sm:$0xff] %v1615_v8  ;;  %524 = vst [vmem:[%s1886_s23 + $0x18] sm:$0xff] %v1615_v8 }
  0x65   : > { %525 = vst [vmem:[%s1886_s23 + $0x20] sm:$0xff] %v1615_v8  ;;  %526 = vst [vmem:[%s1886_s23 + $0x28] sm:$0xff] %v1615_v8 }
  0x66   : > { %527 = vst [vmem:[%s1886_s23 + $0x30] sm:$0xff] %v1615_v8  ;;  %528 = vst [vmem:[%s1886_s23 + $0x38] sm:$0xff] %v1615_v8 }
  0x67 PF: > { %v1419_v9 = vld [vmem:[%s1884_s0 + $0x74] ss:$8 sps:$4 sm:$0xff]   ;;  %v1423_v11 = vld [vmem:[%s1884_s0 + $0x70] ss:$8 sps:$4 sm:$0xff]   ;;  %v1425_v13 = vld [vmem:[%s1884_s0 + $0x64] ss:$8 sps:$4 sm:$0xff]  }
  0x68   : > { %v1421_v10 = vld [vmem:[%s1884_s0 + $0x174] ss:$8 sps:$4 sm:$0xff]   ;;  %969 = vmatprep.subr.bf16.mxu0 %v1419_v9  ;;  %v1424_v12 = vld [vmem:[%s1884_s0 + $0x170] ss:$8 sps:$4 sm:$0xff]   ;;  %v1427_v14 = vld [vmem:[%s1884_s0 + $0x164] ss:$8 sps:$4 sm:$0xff]  }
  0x69   : > { %1022 = vmatprep.subr.bf16.mxu1 %v1421_v10  ;;  %970 = vmatpush1.bf16.msra.mxu0 %v1423_v11  ;;  %v1429_v15 = vld [vmem:[%s1884_s0 + $0x60] ss:$8 sps:$4 sm:$0xff]   ;;  %v1431_v17 = vld [vmem:[%s1884_s0 + $0x54] ss:$8 sps:$4 sm:$0xff]   ;;  %v1435_v19 = vld [vmem:[%s1884_s0 + $0x50] ss:$8 sps:$4 sm:$0xff]  }
  0x6a   : > { %1023 = vmatpush1.bf16.msra.mxu1 %v1424_v12  ;;  %971 = vmatprep.subr.bf16.mxu0 %v1425_v13  ;;  %v1430_v16 = vld [vmem:[%s1884_s0 + $0x160] ss:$8 sps:$4 sm:$0xff]   ;;  %v1433_v18 = vld [vmem:[%s1884_s0 + $0x154] ss:$8 sps:$4 sm:$0xff]   ;;  %v1436_v20 = vld [vmem:[%s1884_s0 + $0x150] ss:$8 sps:$4 sm:$0xff]  }
  0x6b   : > { %1024 = vmatprep.subr.bf16.mxu1 %v1427_v14  ;;  %v1437_v21 = vld [vmem:[%s1884_s0 + $0x44] ss:$8 sps:$4 sm:$0xff]   ;;  %v1441_v23 = vld [vmem:[%s1884_s0 + $0x40] ss:$8 sps:$4 sm:$0xff]   ;;  %v1443_v25 = vld [vmem:[%s1884_s0 + $0x34] ss:$8 sps:$4 sm:$0xff]  }
  0x6c   : > { %v1439_v22 = vld [vmem:[%s1884_s0 + $0x144] ss:$8 sps:$4 sm:$0xff]   ;;  %v1442_v24 = vld [vmem:[%s1884_s0 + $0x140] ss:$8 sps:$4 sm:$0xff]   ;;  %v1445_v26 = vld [vmem:[%s1884_s0 + $0x134] ss:$8 sps:$4 sm:$0xff]  }
  0x6d   : > { %972 = vmatpush1.bf16.msra.mxu0 %v1429_v15  ;;  %v1447_v27 = vld [vmem:[%s1884_s0 + $0x30] ss:$8 sps:$4 sm:$0xff]   ;;  %v1449_v29 = vld [vmem:[%s1884_s0 + $0x24] ss:$8 sps:$4 sm:$0xff]   ;;  %v1453_v31 = vld [vmem:[%s1884_s0 + $0x20] ss:$8 sps:$4 sm:$0xff]  }
  0x6e   : > { %1025 = vmatpush1.bf16.msra.mxu1 %v1430_v16  ;;  %973 = vmatprep.subr.bf16.mxu0 %v1431_v17  ;;  %v1448_v28 = vld [vmem:[%s1884_s0 + $0x130] ss:$8 sps:$4 sm:$0xff]   ;;  %v1451_v30 = vld [vmem:[%s1884_s0 + $0x124] ss:$8 sps:$4 sm:$0xff]   ;;  %v1454_v32 = vld [vmem:[%s1884_s0 + $0x120] ss:$8 sps:$4 sm:$0xff]  }
  0x6f   : > { %1026 = vmatprep.subr.bf16.mxu1 %v1433_v18  ;;  %v1455_v33 = vld [vmem:[%s1884_s0 + $0x14] ss:$8 sps:$4 sm:$0xff]   ;;  %v1459_v35 = vld [vmem:[%s1884_s0 + $0x10] ss:$8 sps:$4 sm:$0xff]   ;;  %v1461_v37 = vld [vmem:[%s1884_s0 + $0x4] ss:$8 sps:$4 sm:$0xff]  }
  0x70   : > { %v1457_v34 = vld [vmem:[%s1884_s0 + $0x114] ss:$8 sps:$4 sm:$0xff]   ;;  %v1460_v36 = vld [vmem:[%s1884_s0 + $0x110] ss:$8 sps:$4 sm:$0xff]   ;;  %v1463_v38 = vld [vmem:[%s1884_s0 + $0x104] ss:$8 sps:$4 sm:$0xff]  }
  0x71   : > { %974 = vmatpush1.bf16.msra.mxu0 %v1435_v19  ;;  %v1465_v39 = vld [vmem:[%s1884_s0] ss:$8 sps:$4 sm:$0xff]   ;;  %v1467_v41 = vld [vmem:[%s1884_s0 + $0xf4] ss:$8 sps:$4 sm:$0xff]   ;;  %v1471_v43 = vld [vmem:[%s1884_s0 + $0xf0] ss:$8 sps:$4 sm:$0xff]  }
  0x72   : > { %1027 = vmatpush1.bf16.msra.mxu1 %v1436_v20  ;;  %975 = vmatprep.subr.bf16.mxu0 %v1437_v21  ;;  %v1466_v40 = vld [vmem:[%s1884_s0 + $0x100] ss:$8 sps:$4 sm:$0xff]   ;;  %v1469_v42 = vld [vmem:[%s1884_s0 + $0x1f4] ss:$8 sps:$4 sm:$0xff]   ;;  %v1472_v44 = vld [vmem:[%s1884_s0 + $0x1f0] ss:$8 sps:$4 sm:$0xff]  }
  0x73   : > { %1028 = vmatprep.subr.bf16.mxu1 %v1439_v22  ;;  %v1473_v45 = vld [vmem:[%s1884_s0 + $0xe4] ss:$8 sps:$4 sm:$0xff]   ;;  %v1477_v47 = vld [vmem:[%s1884_s0 + $0xe0] ss:$8 sps:$4 sm:$0xff]   ;;  %v1479_v49 = vld [vmem:[%s1884_s0 + $0xd4] ss:$8 sps:$4 sm:$0xff]  }
  0x74   : > { %v1475_v46 = vld [vmem:[%s1884_s0 + $0x1e4] ss:$8 sps:$4 sm:$0xff]   ;;  %v1478_v48 = vld [vmem:[%s1884_s0 + $0x1e0] ss:$8 sps:$4 sm:$0xff]   ;;  %v1481_v50 = vld [vmem:[%s1884_s0 + $0x1d4] ss:$8 sps:$4 sm:$0xff]  }
  0x75   : > { %976 = vmatpush1.bf16.msra.mxu0 %v1441_v23  ;;  %v1483_v51 = vld [vmem:[%s1884_s0 + $0xd0] ss:$8 sps:$4 sm:$0xff]   ;;  %v1485_v53 = vld [vmem:[%s1884_s0 + $0xc4] ss:$8 sps:$4 sm:$0xff]   ;;  %v1489_v55 = vld [vmem:[%s1884_s0 + $0xc0] ss:$8 sps:$4 sm:$0xff]  }
  0x76   : > { %1029 = vmatpush1.bf16.msra.mxu1 %v1442_v24  ;;  %977 = vmatprep.subr.bf16.mxu0 %v1443_v25  ;;  %v1484_v52 = vld [vmem:[%s1884_s0 + $0x1d0] ss:$8 sps:$4 sm:$0xff]   ;;  %v1487_v54 = vld [vmem:[%s1884_s0 + $0x1c4] ss:$8 sps:$4 sm:$0xff]   ;;  %v1490_v56 = vld [vmem:[%s1884_s0 + $0x1c0] ss:$8 sps:$4 sm:$0xff]  }
  0x77   : > { %1030 = vmatprep.subr.bf16.mxu1 %v1445_v26  ;;  %v1491_v57 = vld [vmem:[%s1884_s0 + $0xb4] ss:$8 sps:$4 sm:$0xff]   ;;  %v1495_v61 = vld [vmem:[%s1884_s0 + $0xb0] ss:$8 sps:$4 sm:$0xff]   ;;  %v1497_v63 = vld [vmem:[%s1884_s0 + $0xa4] ss:$8 sps:$4 sm:$0xff]  }
  0x78   : > { %v1517_v58 = vld [vmem:[%s1882_s8 + $0x4] ss:$16 sps:$4 sm:$0xff]   ;;  %v1520_v60 = vld [vmem:[%s1882_s8 + $0xc] ss:$16 sps:$4 sm:$0xff]   ;;  %v1496_v62 = vld [vmem:[%s1884_s0 + $0x1b0] ss:$8 sps:$4 sm:$0xff]  }
  0x79   : > { %978 = vmatpush1.bf16.msra.mxu0 %v1447_v27  ;;  %v1493_v59 = vld [vmem:[%s1884_s0 + $0x1b4] ss:$8 sps:$4 sm:$0xff]   ;;  %1001 = vmatprep.mubr.bf16.mxu0 %v1517_v58  ;;  %v1499_v0 = vld [vmem:[%s1884_s0 + $0x1a4] ss:$8 sps:$4 sm:$0xff]   ;;  %v1501_v1 = vld [vmem:[%s1884_s0 + $0xa0] ss:$8 sps:$4 sm:$0xff]  }
  0x7a   : > { %1031 = vmatpush1.bf16.msra.mxu1 %v1448_v28  ;;  %979 = vmatprep.subr.bf16.mxu0 %v1449_v29  ;;  %v1502_v2 = vld [vmem:[%s1884_s0 + $0x1a0] ss:$8 sps:$4 sm:$0xff]   ;;  %v1503_v3 = vld [vmem:[%s1884_s0 + $0x94] ss:$8 sps:$4 sm:$0xff]   ;;  %v1507_v5 = vld [vmem:[%s1884_s0 + $0x90] ss:$8 sps:$4 sm:$0xff]  }
  0x7b   : > { %1032 = vmatprep.subr.bf16.mxu1 %v1451_v30  ;;  %1054 = vmatprep.mubr.bf16.mxu1 %v1520_v60  ;;  %v1505_v4 = vld [vmem:[%s1884_s0 + $0x194] ss:$8 sps:$4 sm:$0xff]   ;;  %v1508_v6 = vld [vmem:[%s1884_s0 + $0x190] ss:$8 sps:$4 sm:$0xff]   ;;  %v1509_v7 = vld [vmem:[%s1884_s0 + $0x84] ss:$8 sps:$4 sm:$0xff]  }
  0x7c   : > { %v1511_v8 = vld [vmem:[%s1884_s0 + $0x184] ss:$8 sps:$4 sm:$0xff]   ;;  %v1513_v9 = vld [vmem:[%s1884_s0 + $0x80] ss:$8 sps:$4 sm:$0xff]   ;;  %v531_v27 = vld [vmem:[%s1886_s23 + $0x10] sm:$0xff]  ;;  %s1329_s9 = sshll.u32 (%p1725_p12), %s1601_s16, 4 }
  0x7d   : > { %980 = vmatpush1.bf16.msra.mxu0 %v1453_v31  ;;  %v1514_v10 = vld [vmem:[%s1884_s0 + $0x180] ss:$8 sps:$4 sm:$0xff]   ;;  %v1521_v13 = vld [vmem:[%s1882_s8 + $0x24] ss:$16 sps:$4 sm:$0xff]   ;;  %v1523_v14 = vld [vmem:[%s1882_s8 + $0x2c] ss:$16 sps:$4 sm:$0xff]   ;;  %s1103_s15 = scalar_lea.vmem (%p1725_p12), %s2034_s2, %s1329_s9 }
  0x7e   : > { %1033 = vmatpush1.bf16.msra.mxu1 %v1454_v32  ;;  %981 = vmatprep.subr.bf16.mxu0 %v1455_v33  ;;  %v1515_v11 = vld [vmem:[%s1882_s8] ss:$16 sps:$4 sm:$0xff]   ;;  %v1518_v12 = vld [vmem:[%s1882_s8 + $0x8] ss:$16 sps:$4 sm:$0xff]  }
  0x7f   : > { %1034 = vmatprep.subr.bf16.mxu1 %v1457_v34  ;;  %v1525_v15 = vld [vmem:[%s1882_s8 + $0x20] ss:$16 sps:$4 sm:$0xff]   ;;  %v1526_v16 = vld [vmem:[%s1882_s8 + $0x28] ss:$16 sps:$4 sm:$0xff]  }
  0x80   : > { %v529_v18 = vld [vmem:[%s1886_s23] sm:$0xff]  ;;  %v530_v22 = vld [vmem:[%s1886_s23 + $0x8] sm:$0xff]  ;;  %v532_v32 = vld [vmem:[%s1886_s23 + $0x18] sm:$0xff] }
  0x81   : > { %982 = vmatpush1.bf16.msra.mxu0 %v1459_v35 }
  0x82   : > { %1035 = vmatpush1.bf16.msra.mxu1 %v1460_v36  ;;  %983 = vmatprep.subr.bf16.mxu0 %v1461_v37  ;;  %v533_v37 = vld [vmem:[%s1886_s23 + $0x20] sm:$0xff] }
  0x83   : > { %1036 = vmatprep.subr.bf16.mxu1 %v1463_v38 }
  0x85   : > { %984 = vmatpush1.bf16.msra.mxu0 %v1465_v39 }
  0x86   : > { %1037 = vmatpush1.bf16.msra.mxu1 %v1466_v40  ;;  %985 = vmatprep.subr.bf16.mxu0 %v1467_v41 }
  0x87   : > { %1038 = vmatprep.subr.bf16.mxu1 %v1469_v42  ;;  %v534_v42 = vld [vmem:[%s1886_s23 + $0x28] sm:$0xff] }
  0x89   : > { %986 = vmatpush2.bf16.msra.mxu0 %v1471_v43 }
  0x8a   : > { %1039 = vmatpush2.bf16.msra.mxu1 %v1472_v44  ;;  %987 = vmatprep.subr.bf16.mxu0 %v1473_v45 }
  0x8b   : > { %1040 = vmatprep.subr.bf16.mxu1 %v1475_v46 }
  0x8d   : > { %988 = vmatpush2.bf16.msra.mxu0 %v1477_v47  ;;  %v535_v47 = vld [vmem:[%s1886_s23 + $0x30] sm:$0xff] }
  0x8e   : > { %1041 = vmatpush2.bf16.msra.mxu1 %v1478_v48  ;;  %989 = vmatprep.subr.bf16.mxu0 %v1479_v49 }
  0x8f   : > { %1042 = vmatprep.subr.bf16.mxu1 %v1481_v50 }
  0x91   : > { %990 = vmatpush2.bf16.msra.mxu0 %v1483_v51 }
  0x92   : > { %1043 = vmatpush2.bf16.msra.mxu1 %v1484_v52  ;;  %991 = vmatprep.subr.bf16.mxu0 %v1485_v53  ;;  %v536_v52 = vld [vmem:[%s1886_s23 + $0x38] sm:$0xff] }
  0x93   : > { %1044 = vmatprep.subr.bf16.mxu1 %v1487_v54 }
  0x95   : > { %992 = vmatpush2.bf16.msra.mxu0 %v1489_v55 }
  0x96   : > { %1045 = vmatpush2.bf16.msra.mxu1 %v1490_v56  ;;  %993 = vmatprep.subr.bf16.mxu0 %v1491_v57 }
  0x97   : > { %1046 = vmatprep.subr.bf16.mxu1 %v1493_v59 }
  0x99   : > { %994 = vmatpush2.bf16.msra.mxu0 %v1495_v61 }
  0x9a   : > { %1047 = vmatpush2.bf16.msra.mxu1 %v1496_v62  ;;  %995 = vmatprep.subr.bf16.mxu0 %v1497_v63 }
  0x9b   : > { %1048 = vmatprep.subr.bf16.mxu1 %v1499_v0 }
  0x9d   : > { %996 = vmatpush2.bf16.msra.mxu0 %v1501_v1 }
  0x9e   : > { %1049 = vmatpush2.bf16.msra.mxu1 %v1502_v2  ;;  %997 = vmatprep.subr.bf16.mxu0 %v1503_v3 }
  0x9f   : > { %1050 = vmatprep.subr.bf16.mxu1 %v1505_v4 }
  0xa1   : > { %998 = vmatpush2.bf16.msra.mxu0 %v1507_v5 }
  0xa2   : > { %1051 = vmatpush2.bf16.msra.mxu1 %v1508_v6  ;;  %999 = vmatprep.subr.bf16.mxu0 %v1509_v7 }
  0xa3   : > { %1052 = vmatprep.subr.bf16.mxu1 %v1511_v8 }
  0xa5   : > { %1000 = vmatpush2.bf16.msra.mxu0 %v1513_v9 }
  0xa6   : > { %1053 = vmatpush2.bf16.msra.mxu1 %v1514_v10 }
  0xa8   : > { %1002 = vmatmul.mubr.bf16.vlgmr.msra.gmra.mxu0 %v1515_v11 }
  0xa9   : > { %1055 = vmatmul.mubr.bf16.vlgmr.msra.gmra.mxu1 %v1518_v12  ;;  %1011 = vmatprep.mubr.bf16.mxu0 %v1521_v13 }
  0xaa   : > { %1064 = vmatprep.mubr.bf16.mxu1 %v1523_v14 }
  0xb0   : > { %1012 = vmatmul.mubr.bf16.gmra.mxu0 %v1525_v15 }
  0xb1   : > { %1065 = vmatmul.mubr.bf16.gmra.mxu1 %v1526_v16 }
 0x168   : > { %v1003_v17 = vpop.f32.mrf.mxu0 }
 0x169   : > { %v1056_v19 = vpop.f32.mrf.mxu1 }
 0x16a   : > { %v1057_v20 = vadd.f32 %v1056_v19, %v1003_v17  ;;  %v1005_v21 = vpop.f32.mrf.mxu0 }
 0x16b   : > { %v1058_v23 = vpop.f32.mrf.mxu1 }
 0x16c   : > { %v1075_v24 = vadd.f32 %v1057_v20, %v529_v18  ;;  %v1059_v25 = vadd.f32 %v1058_v23, %v1005_v21  ;;  %v1007_v26 = vpop.f32.mrf.mxu0 }
 0x16d   : > { %v1060_v28 = vpop.f32.mrf.mxu1 }
 0x16e   : > { %1083 = vst [vmem:[%s1886_s23] sm:$0xff] %v1075_v24  ;;  %v1076_v29 = vadd.f32 %v1059_v25, %v530_v22  ;;  %v1061_v30 = vadd.f32 %v1060_v28, %v1007_v26  ;;  %v1009_v31 = vpop.f32.mrf.mxu0 }
 0x16f   : > { %v1062_v33 = vpop.f32.mrf.mxu1 }
 0x170   : > { %1084 = vst [vmem:[%s1886_s23 + $0x8] sm:$0xff] %v1076_v29  ;;  %v1077_v34 = vadd.f32 %v1061_v30, %v531_v27  ;;  %v1063_v35 = vadd.f32 %v1062_v33, %v1009_v31  ;;  %v1013_v36 = vpop.f32.mrf.mxu0 }
 0x171   : > { %v1066_v38 = vpop.f32.mrf.mxu1 }
 0x172   : > { %1085 = vst [vmem:[%s1886_s23 + $0x10] sm:$0xff] %v1077_v34  ;;  %v1078_v39 = vadd.f32 %v1063_v35, %v532_v32  ;;  %v1067_v40 = vadd.f32 %v1066_v38, %v1013_v36  ;;  %v1015_v41 = vpop.f32.mrf.mxu0 }
 0x173   : > { %v1068_v43 = vpop.f32.mrf.mxu1 }
 0x174   : > { %1086 = vst [vmem:[%s1886_s23 + $0x18] sm:$0xff] %v1078_v39  ;;  %v1079_v44 = vadd.f32 %v1067_v40, %v533_v37  ;;  %v1069_v45 = vadd.f32 %v1068_v43, %v1015_v41  ;;  %v1017_v46 = vpop.f32.mrf.mxu0 }
 0x175   : > { %v1070_v48 = vpop.f32.mrf.mxu1  ;;  %v1116_v57 = vld [vmem:[%s1886_s23] sm:$0xff] (%p1725_p12) }
 0x176   : > { %1087 = vst [vmem:[%s1886_s23 + $0x20] sm:$0xff] %v1079_v44  ;;  %v1080_v49 = vadd.f32 %v1069_v45, %v534_v42  ;;  %v1071_v50 = vadd.f32 %v1070_v48, %v1017_v46  ;;  %v1019_v51 = vpop.f32.mrf.mxu0  ;;  %1117 = vst [vmem:[%s1103_s15] sm:$0xff] (%p1725_p12), %v1116_v57 }
 0x177   : > { %v1072_v53 = vpop.f32.mrf.mxu1  ;;  %v1118_v58 = vld [vmem:[%s1886_s23 + $0x8] sm:$0xff] (%p1725_p12) }
 0x178   : > { %1088 = vst [vmem:[%s1886_s23 + $0x28] sm:$0xff] %v1080_v49  ;;  %v1081_v54 = vadd.f32 %v1071_v50, %v535_v47  ;;  %v1073_v55 = vadd.f32 %v1072_v53, %v1019_v51  ;;  %1097 = sbr.rel (!%p1725_p12) target bundleno = 389 (0x185), region = 97  ;;  %1119 = vst [vmem:[%s1103_s15 + $0x8] sm:$0xff] (%p1725_p12), %v1118_v58 }
 0x179   : > { %v1120_v59 = vld [vmem:[%s1886_s23 + $0x10] sm:$0xff] (%p1725_p12) }
 0x17a   : > { %1089 = vst [vmem:[%s1886_s23 + $0x30] sm:$0xff] %v1081_v54  ;;  %v1082_v56 = vadd.f32 %v1073_v55, %v536_v52  ;;  %1121 = vst [vmem:[%s1103_s15 + $0x20] sm:$0xff] (%p1725_p12), %v1120_v59 }
 0x17b   : > { %v1122_v60 = vld [vmem:[%s1886_s23 + $0x18] sm:$0xff] (%p1725_p12) }
 0x17c   : > { %1090 = vst [vmem:[%s1886_s23 + $0x38] sm:$0xff] %v1082_v56  ;;  %1123 = vst [vmem:[%s1103_s15 + $0x28] sm:$0xff] (%p1725_p12), %v1122_v60 }
 0x17d   : > { %v1124_v61 = vld [vmem:[%s1886_s23 + $0x20] sm:$0xff] }
 0x17e   : > { %1125 = vst [vmem:[%s1103_s15 + $0x40] sm:$0xff] %v1124_v61 }
 0x17f   : > { %v1126_v62 = vld [vmem:[%s1886_s23 + $0x28] sm:$0xff] }
 0x180   : > { %1127 = vst [vmem:[%s1103_s15 + $0x48] sm:$0xff] %v1126_v62 }
 0x181   : > { %v1128_v63 = vld [vmem:[%s1886_s23 + $0x30] sm:$0xff] }
 0x182   : > { %1129 = vst [vmem:[%s1103_s15 + $0x60] sm:$0xff] %v1128_v63 }
 0x183   : > { %v1130_v0 = vld [vmem:[%s1886_s23 + $0x38] sm:$0xff] }
 0x184   : > { %1131 = vst [vmem:[%s1103_s15 + $0x68] sm:$0xff] %v1130_v0 }
 0x185 PF: > { %s12_s19 = sadd.s32 1, %s1613_s19   ;;  %s2040_s9 = smov %s1577_s10 }
 0x186   : > { %p9_p4 = scmp.ge.s32.totalorder %s12_s19, 18   ;;  %s2041_s10 = smov %s1723_s5 }
 0x187   : > { %s2042_s11 = smov %s1585_s12  ;;  %s2043_s12 = smov %s1720_s4 }
 0x188   : > { %s2044_s13 = smov %s1593_s14  ;;  %s2045_s14 = smov %s1706_s27 }
 0x189   : > { %s2046_s15 = smov %s1605_s17  ;;  %s2047_s16 = smov %s1609_s18 }
 0x18a   : > { %s2048_s17 = smov %s2051_s21  ;;  %s2049_s18 = smov %s2055_s22 }
 0x18b   :  { %11 = sbr.rel (!%p9_p4) target bundleno = 8 (0x8), region = 159 }

// kernel: discriminator_forward.20
= control target key start
LH: loop header
LB: loop body
LE: loop exit
PB: predicated region body
PF: predicated region fallthrough
CT: control target
= control target key end

     0   :  { %v32_v0 = vlaneseq  ;;  %s344_s1 = inlined_call_operand.vmem [shape: f32[1,512], index: 1, kind: input, shape index: {}]   ;;  %s345_s2 = inlined_call_operand.vmem [shape: f32[1,512], index: 2, kind: input, shape index: {}]   ;;  %s346_s0 = inlined_call_operand.vmem [shape: f32[32,512], index: 0, kind: input, shape index: {}]   ;;  %s347_s3 = inlined_call_operand.vmem [shape: f32[32,512], index: 3, kind: output, shape index: {}]  }
   0x1   :  { %v30_v2 = vld [vmem:[%s344_s1] sm:$0xf]  ;;  %v15_v6 = vld [vmem:[%s346_s0 + $0x8] sm:$0xff]  ;;  %v16_v10 = vld [vmem:[%s346_s0 + $0x10] sm:$0xff] }
   0x2   :  { %v33_v1 = vshrl.u32 %v32_v0, 7  ;;  %v68_v3 = vld [vmem:[%s345_s2] sm:$0xf]  ;;  %v19_v12 = vld [vmem:[%s346_s0 + $0x28] sm:$0xff]  ;;  %v17_v17 = vld [vmem:[%s346_s0 + $0x18] sm:$0xff] }
   0x3   :  { %v14_v4 = vld [vmem:[%s346_s0] sm:$0xff]  ;;  %v20_v18 = vld [vmem:[%s346_s0 + $0x30] sm:$0xff]  ;;  %v21_v19 = vld [vmem:[%s346_s0 + $0x38] sm:$0xff] }
   0x4   :  { %v34_v5 = vsub.s32 0, %v33_v1  ;;  %v38_v7 = vsub.s32 1, %v33_v1  ;;  %v42_v8 = vsub.s32 2, %v33_v1  ;;  %v46_v9 = vsub.s32 3, %v33_v1  ;;  %v18_v11 = vld [vmem:[%s346_s0 + $0x20] sm:$0xff]  ;;  %v23_v48 = vld [vmem:[%s346_s0 + $0x48] sm:$0xff] }
   0x5   :  { %v22_v47 = vld [vmem:[%s346_s0 + $0x40] sm:$0xff]  ;;  %v24_v52 = vld [vmem:[%s346_s0 + $0x50] sm:$0xff]  ;;  %v25_v53 = vld [vmem:[%s346_s0 + $0x58] sm:$0xff] }
   0x6   :  { %v215_v13 = vrot.slane %v30_v2, %v34_v5  ;;  %v217_v14 = vrot.slane %v68_v3, %v34_v5  ;;  %v219_v15 = vrot.slane %v30_v2, %v38_v7  ;;  %v221_v16 = vrot.slane %v68_v3, %v38_v7  ;;  %v26_v54 = vld [vmem:[%s346_s0 + $0x60] sm:$0xff]  ;;  %v27_v57 = vld [vmem:[%s346_s0 + $0x68] sm:$0xff]  ;;  %v28_v62 = vld [vmem:[%s346_s0 + $0x70] sm:$0xff] }
   0x7   :  { %v232_v20 = vrot.slane %v30_v2, %v42_v8  ;;  %v234_v21 = vrot.slane %v68_v3, %v42_v8  ;;  %v236_v22 = vrot.slane %v30_v2, %v46_v9  ;;  %v238_v23 = vrot.slane %v68_v3, %v46_v9 }
   0x8   :  { %v52_v24 = vmul.f32 %v215_v13, %v14_v4  ;;  %v53_v25 = vmul.f32 %v219_v15, %v15_v6  ;;  %v56_v26 = vmul.f32 %v215_v13, %v18_v11  ;;  %v57_v27 = vmul.f32 %v219_v15, %v19_v12  ;;  %v29_v11 = vld [vmem:[%s346_s0 + $0x78] sm:$0xff] }
   0x9   :  { %v54_v28 = vmul.f32 %v232_v20, %v16_v10  ;;  %v55_v29 = vmul.f32 %v236_v22, %v17_v17  ;;  %v58_v30 = vmul.f32 %v232_v20, %v20_v18  ;;  %v59_v31 = vmul.f32 %v236_v22, %v21_v19 }
   0xa   :  { %v90_v32 = vadd.f32 %v217_v14, %v52_v24  ;;  %v91_v33 = vadd.f32 %v221_v16, %v53_v25  ;;  %v94_v34 = vadd.f32 %v217_v14, %v56_v26  ;;  %v95_v35 = vadd.f32 %v221_v16, %v57_v27 }
   0xb   :  { %v92_v36 = vadd.f32 %v234_v21, %v54_v28  ;;  %v93_v37 = vadd.f32 %v238_v23, %v55_v29  ;;  %v96_v38 = vadd.f32 %v234_v21, %v58_v30  ;;  %v97_v39 = vadd.f32 %v238_v23, %v59_v31 }
   0xc   :  { %vm106_vm0 = vcmp.ge.f32.partialorder %v90_v32, 0.0  ;;  %v122_v40 = vmul.f32 0.2, %v90_v32  ;;  %vm107_vm1 = vcmp.ge.f32.partialorder %v91_v33, 0.0  ;;  %v123_v41 = vmul.f32 0.2, %v91_v33 }
   0xd   :  { %vm108_vm2 = vcmp.ge.f32.partialorder %v92_v36, 0.0  ;;  %v124_v42 = vmul.f32 0.2, %v92_v36  ;;  %vm109_vm3 = vcmp.ge.f32.partialorder %v93_v37, 0.0  ;;  %v125_v43 = vmul.f32 0.2, %v93_v37 }
   0xe   :  { %v138_v44 = vsel %vm106_vm0, %v90_v32, %v122_v40  ;;  %v139_v45 = vsel %vm107_vm1, %v91_v33, %v123_v41  ;;  %vm110_vm4 = vcmp.ge.f32.partialorder %v94_v34, 0.0  ;;  %v126_v46 = vmul.f32 0.2, %v94_v34 }
   0xf   :  { %154 = vst [vmem:[%s347_s3] sm:$0xff] %v138_v44  ;;  %155 = vst [vmem:[%s347_s3 + $0x8] sm:$0xff] %v139_v45  ;;  %v140_v49 = vsel %vm108_vm2, %v92_v36, %v124_v42  ;;  %v141_v50 = vsel %vm109_vm3, %v93_v37, %v125_v43  ;;  %vm111_vm5 = vcmp.ge.f32.partialorder %v95_v35, 0.0  ;;  %v127_v51 = vmul.f32 0.2, %v95_v35 }
  0x10   :  { %156 = vst [vmem:[%s347_s3 + $0x10] sm:$0xff] %v140_v49  ;;  %157 = vst [vmem:[%s347_s3 + $0x18] sm:$0xff] %v141_v50  ;;  %v142_v55 = vsel %vm110_vm4, %v94_v34, %v126_v46  ;;  %vm112_vm6 = vcmp.ge.f32.partialorder %v96_v38, 0.0  ;;  %v128_v56 = vmul.f32 0.2, %v96_v38  ;;  %vm113_vm7 = vcmp.ge.f32.partialorder %v97_v39, 0.0 }
  0x11   :  { %158 = vst [vmem:[%s347_s3 + $0x20] sm:$0xff] %v142_v55  ;;  %v143_v58 = vsel %vm111_vm5, %v95_v35, %v127_v51  ;;  %v129_v59 = vmul.f32 0.2, %v97_v39  ;;  %v60_v60 = vmul.f32 %v215_v13, %v22_v47  ;;  %v61_v61 = vmul.f32 %v219_v15, %v23_v48 }
  0x12   :  { %159 = vst [vmem:[%s347_s3 + $0x28] sm:$0xff] %v143_v58  ;;  %v144_v63 = vsel %vm112_vm6, %v96_v38, %v128_v56  ;;  %v62_v0 = vmul.f32 %v232_v20, %v24_v52  ;;  %v63_v1 = vmul.f32 %v236_v22, %v25_v53  ;;  %v64_v2 = vmul.f32 %v215_v13, %v26_v54 }
  0x13   :  { %160 = vst [vmem:[%s347_s3 + $0x30] sm:$0xff] %v144_v63  ;;  %v145_v3 = vsel %vm113_vm7, %v97_v39, %v129_v59  ;;  %v98_v4 = vadd.f32 %v217_v14, %v60_v60  ;;  %v99_v5 = vadd.f32 %v221_v16, %v61_v61  ;;  %v65_v6 = vmul.f32 %v219_v15, %v27_v57 }
  0x14   :  { %161 = vst [vmem:[%s347_s3 + $0x38] sm:$0xff] %v145_v3  ;;  %v100_v7 = vadd.f32 %v234_v21, %v62_v0  ;;  %v101_v8 = vadd.f32 %v238_v23, %v63_v1  ;;  %v102_v9 = vadd.f32 %v217_v14, %v64_v2  ;;  %v66_v10 = vmul.f32 %v232_v20, %v28_v62 }
  0x15   :  { %vm114_vm8 = vcmp.ge.f32.partialorder %v98_v4, 0.0  ;;  %v130_v12 = vmul.f32 0.2, %v98_v4  ;;  %vm115_vm9 = vcmp.ge.f32.partialorder %v99_v5, 0.0  ;;  %v131_v13 = vmul.f32 0.2, %v99_v5 }
  0x16   :  { %vm116_vm10 = vcmp.ge.f32.partialorder %v100_v7, 0.0  ;;  %v132_v15 = vmul.f32 0.2, %v100_v7  ;;  %vm117_vm11 = vcmp.ge.f32.partialorder %v101_v8, 0.0  ;;  %v133_v17 = vmul.f32 0.2, %v101_v8 }
  0x17   :  { %v146_v18 = vsel %vm114_vm8, %v98_v4, %v130_v12  ;;  %v147_v19 = vsel %vm115_vm9, %v99_v5, %v131_v13  ;;  %vm118_vm12 = vcmp.ge.f32.partialorder %v102_v9, 0.0  ;;  %v134_v24 = vmul.f32 0.2, %v102_v9 }
  0x18   :  { %162 = vst [vmem:[%s347_s3 + $0x40] sm:$0xff] %v146_v18  ;;  %163 = vst [vmem:[%s347_s3 + $0x48] sm:$0xff] %v147_v19  ;;  %v148_v14 = vsel %vm116_vm10, %v100_v7, %v132_v15  ;;  %v149_v20 = vsel %vm117_vm11, %v101_v8, %v133_v17  ;;  %v103_v25 = vadd.f32 %v221_v16, %v65_v6 }
  0x19   :  { %v104_v26 = vadd.f32 %v234_v21, %v66_v10  ;;  %164 = vst [vmem:[%s347_s3 + $0x50] sm:$0xff] %v148_v14  ;;  %165 = vst [vmem:[%s347_s3 + $0x58] sm:$0xff] %v149_v20  ;;  %v150_v27 = vsel %vm118_vm12, %v102_v9, %v134_v24  ;;  %v67_v28 = vmul.f32 %v236_v22, %v29_v11 }
  0x1a   :  { %166 = vst [vmem:[%s347_s3 + $0x60] sm:$0xff] %v150_v27  ;;  %vm119_vm13 = vcmp.ge.f32.partialorder %v103_v25, 0.0  ;;  %v135_v29 = vmul.f32 0.2, %v103_v25 }
  0x1b   :  { %vm120_vm14 = vcmp.ge.f32.partialorder %v104_v26, 0.0  ;;  %v136_v16 = vmul.f32 0.2, %v104_v26  ;;  %v105_v21 = vadd.f32 %v238_v23, %v67_v28 }
  0x1c   :  { %v151_v30 = vsel %vm119_vm13, %v103_v25, %v135_v29 }
  0x1d   :  { %v152_v31 = vsel %vm120_vm14, %v104_v26, %v136_v16  ;;  %167 = vst [vmem:[%s347_s3 + $0x68] sm:$0xff] %v151_v30  ;;  %vm121_vm15 = vcmp.ge.f32.partialorder %v105_v21, 0.0  ;;  %v137_v22 = vmul.f32 0.2, %v105_v21 }
  0x1e   :  { %168 = vst [vmem:[%s347_s3 + $0x70] sm:$0xff] %v152_v31 }
  0x1f   :  { %v153_v32 = vsel %vm121_vm15, %v105_v21, %v137_v22 }
  0x20   :  { %169 = vst [vmem:[%s347_s3 + $0x78] sm:$0xff] %v153_v32 }

// kernel: discriminator_forward.21
= control target key start
LH: loop header
LB: loop body
LE: loop exit
PB: predicated region body
PF: predicated region fallthrough
CT: control target
= control target key end

     0   :  { %s974_s9 = smov 0   ;;  %s976_s10 = smov 0   ;;  %s1111_s0 = inlined_call_operand.vmem [shape: bf16[16,8192], index: 0, kind: input, shape index: {}]   ;;  %s1112_s1 = inlined_call_operand.vmem [shape: bf16[8192,128], index: 1, kind: input, shape index: {}]   ;;  %s1113_s2 = inlined_call_operand.vmem [shape: f32[16,128], index: 2, kind: output, shape index: {}]  }
   0x1   :  { %s978_s11 = smov 0   ;;  %s980_s12 = smov 0  }
   0x2   :  { %s982_s13 = smov 0  }
   0x3 LB: > { %s24_s14 = sadd.s32 1, %s952_s12  ;;  %p47_p1 = scmp.ne.s32.totalorder %s944_s10, %s940_s9  ;;  %s956_s13 = sphi %s982_s13, %s12_s13   ;;  %s952_s12 = sphi %s980_s12, %s1117_s12   ;;  %s948_s11 = sphi %s978_s11, %s1116_s11   ;;  %s944_s10 = sphi %s976_s10, %s1115_s10   ;;  %s940_s9 = sphi %s974_s9, %s1114_s9  }
   0x4   : > { %p25_p0 = scmp.ge.s32.totalorder %s24_s14, 16  ;;  %p48_p2 = scmp.eq.s32.totalorder %s956_s13, 0 }
   0x5   : > { %s40_s16 = sadd.s32 1, %s944_s10  ;;  %p734_p5 = scmp.ge.s32.totalorder %s956_s13, 16 }
   0x6   : > { %s1119_s14 = smov (%p25_p0, %s24_s14), 0  ;;  %p49_p3 = por %p48_p2, %p47_p1 }
   0x7   : > { %s36_s15 = ssub.s32 %s952_s12, %s1119_s14  ;;  %129 = sbr.rel (%p734_p5) target bundleno = 18 (0x12), region = 16 }
   0x8   : > { %p38_p4 = scmp.eq.s32.totalorder %s36_s15, 0 }
   0xa   : > { %s1009_s17 = scalar_select %p38_p4, %s944_s10, %s40_s16  }
   0xc   : > { %132 = sbr.rel (!%p49_p3) target bundleno = 18 (0x12), region = 20  ;;  %s134_s18 = sand.u32 (%p49_p3), 1, %s944_s10  }
   0xd   : > { %s786_s19 = sshll.u32 (%p49_p3), %s952_s12, 4  ;;  %s735_s20 = sshll.u32 (%p49_p3), %s134_s18, 5 }
   0xe   : > { %s142_s23 = scalar_lea.vmem (%p49_p3), %s1111_s0, %s786_s19  ;;  %s136_s24 = scalar_lea.vmem (%p49_p3), [#allocation2], %s735_s20 }
   0xf   : > { %v155_v0 = vld [vmem:[%s142_s23] sm:$0xff] (%p49_p3)  ;;  %v157_v1 = vld [vmem:[%s142_s23 + $0x8] sm:$0xff] (%p49_p3) }
  0x10   : > { %v159_v2 = vld [vmem:[%s142_s23 + $0x100] sm:$0xff] (%p49_p3)  ;;  %156 = vst [vmem:[%s136_s24] sm:$0xff] (%p49_p3), %v155_v0  ;;  %158 = vst [vmem:[%s136_s24 + $0x8] sm:$0xff] (%p49_p3), %v157_v1  ;;  %v161_v3 = vld [vmem:[%s142_s23 + $0x108] sm:$0xff] (%p49_p3) }
  0x11   : > { %160 = vst [vmem:[%s136_s24 + $0x10] sm:$0xff] %v159_v2  ;;  %162 = vst [vmem:[%s136_s24 + $0x18] sm:$0xff] %v161_v3 }
  0x12 PF: > { %p738_p6 = scmp.ge.s32.totalorder %s956_s13, 1  ;;  %p179_p7 = scmp.lt.s32.totalorder %s956_s13, 17 }
  0x14   : > { %p180_p8 = pnand %p738_p6, %p179_p7 }
  0x15   : > { %s186_s25 = sand.u32 (!%p180_p8), 1, %s940_s9   ;;  %s740_s26 = sshll.u32 (!%p180_p8), %s948_s11, 6 }
  0x16   : > { %183 = sbr.rel (%p180_p8) target bundleno = 315 (0x13b), region = 47  ;;  %s739_s27 = sshll.u32 (!%p180_p8), %s186_s25, 5 }
  0x17   : > { %p221_p9 = scmp.lt.s32.totalorder (!%p180_p8), %s740_s26, 1023  ;;  %s1026_s4 = scalar_lea.vmem (!%p180_p8), [#allocation2], %s739_s27 }
  0x18   : > { %p742_p10 = scmp.ne.s32.totalorder (!%p180_p8), %s948_s11, 0 }
  0x1b   : > { %s1121_s26 = smov (!%p221_p9, %s740_s26), 1023  ;;  %242 = sbr.rel (%p742_p10) target bundleno = 34 (0x22), region = 55 }
  0x1c   : > { %s741_s28 = sshll.u32 %s1121_s26, 2 }
  0x1d   : > { %s1024_s3 = scalar_lea.vmem %s1112_s1, %s741_s28 }
  0x20   : > { %v958_v4 = vmov 0.0  }
  0x21   : > { %243 = vst [vmem:[%s1113_s2] sm:$0xff] %v958_v4  ;;  %244 = vst [vmem:[%s1113_s2 + $0x8] sm:$0xff] %v958_v4 }
  0x22 PF: > { %v872_v5 = vld [vmem:[%s1024_s3 + $0x78] sm:$0xff]   ;;  %v876_v9 = vld [vmem:[%s1024_s3 + $0x70] sm:$0xff]   ;;  %v880_v13 = vld [vmem:[%s1024_s3 + $0x68] sm:$0xff]   ;;  %p779_p11 = scmp.ne.s32.totalorder %s948_s11, 15 }
  0x23   : > { %v873_v6 = vld [vmem:[%s1024_s3 + $0xf8] sm:$0xff]   ;;  %787 = vmatprep.subr.bf16.mxu0 %v872_v5  ;;  %v877_v10 = vld [vmem:[%s1024_s3 + $0xf0] sm:$0xff]   ;;  %v881_v14 = vld [vmem:[%s1024_s3 + $0xe8] sm:$0xff]  }
  0x24   : > { %v874_v7 = vld [vmem:[%s1024_s3 + $0x38] sm:$0xff]   ;;  %809 = vmatprep.subr.bf16.mxu1 %v873_v6  ;;  %v878_v11 = vld [vmem:[%s1024_s3 + $0x30] sm:$0xff]   ;;  %v882_v15 = vld [vmem:[%s1024_s3 + $0x28] sm:$0xff]  }
  0x25   : > { %v875_v8 = vld [vmem:[%s1024_s3 + $0xb8] sm:$0xff]   ;;  %788 = vmatpush3.bf16.msra.mxu0 %v874_v7  ;;  %v879_v12 = vld [vmem:[%s1024_s3 + $0xb0] sm:$0xff]   ;;  %v883_v16 = vld [vmem:[%s1024_s3 + $0xa8] sm:$0xff]  }
  0x26   : > { %810 = vmatpush3.bf16.msra.mxu1 %v875_v8  ;;  %789 = vmatprep.subr.bf16.mxu0 %v876_v9  ;;  %v884_v17 = vld [vmem:[%s1024_s3 + $0x60] sm:$0xff]   ;;  %v888_v21 = vld [vmem:[%s1024_s3 + $0x58] sm:$0xff]   ;;  %v892_v25 = vld [vmem:[%s1024_s3 + $0x50] sm:$0xff]  }
  0x27   : > { %811 = vmatprep.subr.bf16.mxu1 %v877_v10  ;;  %v885_v18 = vld [vmem:[%s1024_s3 + $0xe0] sm:$0xff]   ;;  %v889_v22 = vld [vmem:[%s1024_s3 + $0xd8] sm:$0xff]   ;;  %v893_v26 = vld [vmem:[%s1024_s3 + $0xd0] sm:$0xff]  }
  0x28   : > { %v886_v19 = vld [vmem:[%s1024_s3 + $0x20] sm:$0xff]   ;;  %v890_v23 = vld [vmem:[%s1024_s3 + $0x18] sm:$0xff]   ;;  %v894_v27 = vld [vmem:[%s1024_s3 + $0x10] sm:$0xff]  }
  0x29   : > { %790 = vmatpush3.bf16.msra.mxu0 %v878_v11  ;;  %v887_v20 = vld [vmem:[%s1024_s3 + $0xa0] sm:$0xff]   ;;  %v891_v24 = vld [vmem:[%s1024_s3 + $0x98] sm:$0xff]   ;;  %v895_v28 = vld [vmem:[%s1024_s3 + $0x90] sm:$0xff]  }
  0x2a   : > { %812 = vmatpush3.bf16.msra.mxu1 %v879_v12  ;;  %791 = vmatprep.subr.bf16.mxu0 %v880_v13  ;;  %v896_v29 = vld [vmem:[%s1024_s3 + $0x48] sm:$0xff]   ;;  %v900_v33 = vld [vmem:[%s1024_s3 + $0x40] sm:$0xff]  }
  0x2b   : > { %813 = vmatprep.subr.bf16.mxu1 %v881_v14  ;;  %v897_v30 = vld [vmem:[%s1024_s3 + $0xc8] sm:$0xff]   ;;  %v901_v34 = vld [vmem:[%s1024_s3 + $0xc0] sm:$0xff]  }
  0x2c   : > { %v898_v31 = vld [vmem:[%s1024_s3 + $0x8] sm:$0xff]   ;;  %v902_v35 = vld [vmem:[%s1024_s3] sm:$0xff]  }
  0x2d   : > { %792 = vmatpush3.bf16.msra.mxu0 %v882_v15  ;;  %v899_v32 = vld [vmem:[%s1024_s3 + $0x88] sm:$0xff]   ;;  %v903_v36 = vld [vmem:[%s1024_s3 + $0x80] sm:$0xff]  }
  0x2e   : > { %814 = vmatpush3.bf16.msra.mxu1 %v883_v16  ;;  %793 = vmatprep.subr.bf16.mxu0 %v884_v17  ;;  %v904_v37 = vld [vmem:[%s1026_s4] ss:$16 sps:$4 sm:$0xff]   ;;  %v906_v38 = vld [vmem:[%s1026_s4 + $0x4] ss:$16 sps:$4 sm:$0xff]   ;;  %v907_v39 = vld [vmem:[%s1026_s4 + $0x8] ss:$16 sps:$4 sm:$0xff]  }
  0x2f   : > { %815 = vmatprep.subr.bf16.mxu1 %v885_v18  ;;  %v909_v40 = vld [vmem:[%s1026_s4 + $0xc] ss:$16 sps:$4 sm:$0xff]   ;;  %559 = vmatprep.mubr.bf16.mxu0 %v906_v38  ;;  %v245_v48 = vld [vmem:[%s1113_s2] sm:$0xff] }
  0x30   : > { %600 = vmatprep.mubr.bf16.mxu1 %v909_v40  ;;  %v246_v56 = vld [vmem:[%s1113_s2 + $0x8] sm:$0xff] }
  0x31   : > { %794 = vmatpush3.bf16.msra.mxu0 %v886_v19 }
  0x32   : > { %816 = vmatpush3.bf16.msra.mxu1 %v887_v20  ;;  %795 = vmatprep.subr.bf16.mxu0 %v888_v21 }
  0x33   : > { %817 = vmatprep.subr.bf16.mxu1 %v889_v22 }
  0x35   : > { %796 = vmatpush3.bf16.msra.mxu0 %v890_v23 }
  0x36   : > { %818 = vmatpush3.bf16.msra.mxu1 %v891_v24  ;;  %797 = vmatprep.subr.bf16.mxu0 %v892_v25 }
  0x37   : > { %819 = vmatprep.subr.bf16.mxu1 %v893_v26 }
  0x39   : > { %798 = vmatpush3.bf16.msra.mxu0 %v894_v27 }
  0x3a   : > { %820 = vmatpush3.bf16.msra.mxu1 %v895_v28  ;;  %799 = vmatprep.subr.bf16.mxu0 %v896_v29 }
  0x3b   : > { %821 = vmatprep.subr.bf16.mxu1 %v897_v30 }
  0x3d   : > { %800 = vmatpush3.bf16.msra.mxu0 %v898_v31 }
  0x3e   : > { %822 = vmatpush3.bf16.msra.mxu1 %v899_v32  ;;  %801 = vmatprep.subr.bf16.mxu0 %v900_v33 }
  0x3f   : > { %823 = vmatprep.subr.bf16.mxu1 %v901_v34 }
  0x41   : > { %802 = vmatpush3.bf16.msra.mxu0 %v902_v35 }
  0x42   : > { %824 = vmatpush3.bf16.msra.mxu1 %v903_v36 }
  0x44   : > { %560 = vmatmul.mubr.bf16.vlgmr.msra.gmra.mxu0 %v904_v37 }
  0x45   : > { %601 = vmatmul.mubr.bf16.vlgmr.msra.gmra.mxu1 %v907_v39 }
 0x104   : > { %v803_v41 = vpop.f32.mrf.mxu0 }
 0x105   : > { %v825_v42 = vpop.f32.mrf.mxu1 }
 0x106   : > { %v804_v43 = vpop.f32.mrf.mxu0 }
 0x107   : > { %v805_v44 = vadd.f32 %v804_v43, %v803_v41  ;;  %v826_v45 = vpop.f32.mrf.mxu1 }
 0x108   : > { %v827_v46 = vadd.f32 %v826_v45, %v825_v42  ;;  %v806_v47 = vpop.f32.mrf.mxu0 }
 0x109   : > { %v828_v49 = vpop.f32.mrf.mxu1 }
 0x10a   : > { %v603_v50 = vadd.f32 %v827_v46, %v805_v44  ;;  %v807_v51 = vpop.f32.mrf.mxu0 }
 0x10b   : > { %v808_v52 = vadd.f32 %v807_v51, %v806_v47  ;;  %v829_v53 = vpop.f32.mrf.mxu1 }
 0x10c   : > { %v609_v54 = vadd.f32 %v603_v50, %v245_v48  ;;  %v830_v55 = vadd.f32 %v829_v53, %v828_v49 }
 0x10e   : > { %611 = vst [vmem:[%s1113_s2] sm:$0xff] %v609_v54  ;;  %v606_v57 = vadd.f32 %v830_v55, %v808_v52  ;;  %616 = sbr.rel (%p779_p11) target bundleno = 315 (0x13b), region = 59 }
 0x110   : > { %v610_v58 = vadd.f32 %v606_v57, %v246_v56 }
 0x112   : > { %612 = vst [vmem:[%s1113_s2 + $0x8] sm:$0xff] %v610_v58 }
 0x115   : > { %v617_v59 = vld [vmem:[%s1113_s2] sm:$0xff] }
 0x116   : > { %v780_v61 = vmul.f32 -1.442695, %v617_v59 }
 0x118   : > { %910 = vpow2.f32 %v780_v61 }
 0x119   : > { %v618_v60 = vld [vmem:[%s1113_s2 + $0x8] sm:$0xff] }
 0x11a   : > { %v781_v62 = vmul.f32 -1.442695, %v618_v60 }
 0x11c   : > { %912 = vpow2.f32 %v781_v62 }
 0x125   : > { %v911_v63 = vpop.eup %910 }
 0x126   : > { %v625_v1 = vadd.f32 1.0, %v911_v63 }
 0x128   : > { %914 = vrcp.f32 %v625_v1 }
 0x129   : > { %v913_v0 = vpop.eup %912 }
 0x12a   : > { %v626_v2 = vadd.f32 1.0, %v913_v0 }
 0x12c   : > { %916 = vrcp.f32 %v626_v2 }
 0x135   : > { %v915_v3 = vpop.eup %914 }
 0x136   : > { %631 = vst [vmem:[%s1113_s2] sm:$0xff] %v915_v3 }
 0x139   : > { %v917_v4 = vpop.eup %916 }
 0x13a   : > { %632 = vst [vmem:[%s1113_s2 + $0x8] sm:$0xff] %v917_v4 }
 0x13b PF: > { %s12_s13 = sadd.s32 1, %s956_s13   ;;  %s1114_s9 = smov %s944_s10 }
 0x13c   : > { %p9_p12 = scmp.ge.s32.totalorder %s12_s13, 18   ;;  %s1115_s10 = smov %s1009_s17 }
 0x13d   : > { %s1116_s11 = smov %s952_s12  ;;  %s1117_s12 = smov %s1119_s14 }
 0x13e   :  { %11 = sbr.rel (!%p9_p12) target bundleno = 3 (0x3), region = 97 }

</bundles_post_ra>
